<compile_context>
chip_gen: v5e
topology: v5e:2x2
jax: 0.10.0
libtpu: 0.0.40
codegen_flags: <defaults>
</compile_context>

<pallas_src>
import functools

import jax
import jax.numpy as jnp
from jax.experimental import pallas as pl
from jax.experimental.pallas import tpu as pltpu


def _mlp_kernel(x_ref, w1_ref, b1_ref, w2_ref, b2_ref, o_ref):
    # x_ref:  (tm, C)   tile of tokens (native dtype)
    # w1_ref: (C, H)    fc1 weight (pre-transposed), single-buffered
    # b1_ref: (1, H)    fc1 bias
    # w2_ref: (H, Co)   fc2 weight (pre-transposed), single-buffered
    # b2_ref: (1, Co)   fc2 bias
    # o_ref:  (tm, Co)

    # fc1 on the MXU in the native input dtype, f32 accumulation.
    h = jnp.dot(x_ref[...], w1_ref[...], preferred_element_type=jnp.float32)
    h = h + b1_ref[...].astype(jnp.float32)

    # Exact (erf-based) GELU in f32, matching torch.nn.GELU default.
    h = 0.5 * h * (1.0 + jax.lax.erf(h * 0.7071067811865476))

    # dropout(p=0.0) == identity (eval semantics)

    # fc2: cast the f32 activation back to the weight dtype for the MXU.
    y = jnp.dot(h.astype(w2_ref.dtype), w2_ref[...],
                preferred_element_type=jnp.float32)
    y = y + b2_ref[...].astype(jnp.float32)

    o_ref[...] = y.astype(o_ref.dtype)


def _round_up(x, m):
    return (x + m - 1) // m * m


@functools.partial(jax.jit, static_argnames=("tm",))
def mlp_pallas(x, w1, b1, w2, b2, *, tm=512):
    """x: [B, N, C];  w1: [C, H];  b1: [H];  w2: [H, Co];  b2: [Co]."""
    B, N, C = x.shape
    H = w1.shape[1]
    Co = w2.shape[1]
    M = B * N

    # Padding-minimizing row tiling: pick how many grid steps the requested
    # tile implies, then shrink the tile so each step carries (almost) the
    # same number of real rows.  Worst-case padding < 8 rows per step.
    tm_req = max(8, _round_up(tm, 8))
    g = max(1, pl.cdiv(M, tm_req))
    tm_eff = _round_up(pl.cdiv(M, g), 8)
    Mp = tm_eff * g

    x2 = x.reshape(M, C)
    if Mp != M:
        x2 = jnp.pad(x2, ((0, Mp - M), (0, 0)))

    b1_2 = b1.reshape(1, H)
    b2_2 = b2.reshape(1, Co)

    x_bpe = jnp.dtype(x.dtype).itemsize
    w_bpe = jnp.dtype(w1.dtype).itemsize

    # VMEM budget: single-buffered weights/biases + double-buffered x/out
    # tiles + the f32 hidden intermediate; 2x headroom, capped at 64 MiB.
    need = ((C * H + H + H * Co + Co) * w_bpe
            + 2 * (tm_eff * C + tm_eff * Co) * x_bpe
            + tm_eff * H * 4)
    vmem_limit = int(min(64 * 1024 * 1024, max(32 * 1024 * 1024, 2 * need)))

    cost = pl.CostEstimate(
        flops=2 * Mp * (C * H + H * Co),
        transcendentals=Mp * H,
        bytes_accessed=(Mp * C + Mp * Co) * x_bpe
                       + (C * H + H + H * Co + Co) * w_bpe,
    )

    out = pl.pallas_call(
        _mlp_kernel,
        out_shape=jax.ShapeDtypeStruct((Mp, Co), x.dtype),
        grid_spec=pltpu.PrefetchScalarGridSpec(
            num_scalar_prefetch=0,
            grid=(g,),
            in_specs=[
                pl.BlockSpec((tm_eff, C), lambda i: (i, 0)),           # x tile
                pl.BlockSpec((C, H), lambda i: (0, 0),
                             pipeline_mode=pl.Buffered(1)),             # w1
                pl.BlockSpec((1, H), lambda i: (0, 0),
                             pipeline_mode=pl.Buffered(1)),             # b1
                pl.BlockSpec((H, Co), lambda i: (0, 0),
                             pipeline_mode=pl.Buffered(1)),             # w2
                pl.BlockSpec((1, Co), lambda i: (0, 0),
                             pipeline_mode=pl.Buffered(1)),             # b2
            ],
            out_specs=pl.BlockSpec((tm_eff, Co), lambda i: (i, 0)),
        ),
        compiler_params=pltpu.CompilerParams(
            dimension_semantics=("parallel",),
            vmem_limit_bytes=vmem_limit,
        ),
        cost_estimate=cost,
    )(x2, w1, b1_2, w2, b2_2)

    if Mp != M:
        out = out[:M]
    return out.reshape(B, N, Co)


def mlp_reference(x, w1, b1, w2, b2):
    h = jnp.einsum("bnc,ch->bnh", x, w1,
                   precision=jax.lax.Precision.HIGHEST) + b1
    h = 0.5 * h * (1.0 + jax.lax.erf(h * 0.7071067811865476))
    return jnp.einsum("bnh,ho->bno", h, w2,
                      precision=jax.lax.Precision.HIGHEST) + b2


if __name__ == "__main__":
    # Small Swin-3D-ish shapes: C=128 channels (lane-dense), hidden=4*C,
    # out=C, B=2 windows x N=196 tokens.  M=392 is NOT a multiple of the row
    # tile, exercising the padding / remainder path with a 2-step grid
    # (tm=256 -> g=2, tm_eff=200, only 8 padded rows total).
    B, N = 2, 196
    C_IN, C_HID, C_OUT = 128, 512, 128

    key = jax.random.PRNGKey(0)
    kx, k1, kb1, k2, kb2 = jax.random.split(key, 5)

    x = jax.random.normal(kx, (B, N, C_IN), dtype=jnp.float32)
    # nn.Linear-equivalent parameters, pre-transposed to [in, out].
    w1 = jax.random.normal(k1, (C_IN, C_HID), dtype=jnp.float32) * 0.02
    b1 = jax.random.normal(kb1, (C_HID,), dtype=jnp.float32) * 0.02
    w2 = jax.random.normal(k2, (C_HID, C_OUT), dtype=jnp.float32) * 0.02
    b2 = jax.random.normal(kb2, (C_OUT,), dtype=jnp.float32) * 0.02

    y = mlp_pallas(x, w1, b1, w2, b2, tm=256)
    y = jax.block_until_ready(y)

    y_ref = mlp_reference(x, w1, b1, w2, b2)
    assert y.shape == (B, N, C_OUT)
    assert jnp.allclose(y, y_ref, atol=2e-4, rtol=2e-4), (
        float(jnp.max(jnp.abs(y - y_ref))))

    print("KERNEL_OK")
</pallas_src>

<mosaic_0001>
module attributes {stable_mosaic.version = 11 : i64} {
  func.func @_mlp_kernel(%arg0: i32, %arg1: memref<200x128xf32, #tpu.memory_space<vmem>>, %arg2: memref<128x512xf32, #tpu.memory_space<vmem>>, %arg3: memref<1x512xf32, #tpu.memory_space<vmem>>, %arg4: memref<512x128xf32, #tpu.memory_space<vmem>>, %arg5: memref<1x128xf32, #tpu.memory_space<vmem>>, %arg6: memref<200x128xf32, #tpu.memory_space<vmem>>) attributes {dimension_semantics = [#tpu.dimension_semantics<parallel>], iteration_bounds = array<i64: 2>, scalar_prefetch = 0 : i64, scratch_operands = 0 : i64, tpu.core_type = #tpu.core_type<tc>, window_params = [{transform_indices = @transform_0, window_bounds = array<i64: 200, 128>}, {pipeline_mode = #tpu.pipeline_mode<synchronous>, transform_indices = @transform_1, window_bounds = array<i64: 128, 512>}, {pipeline_mode = #tpu.pipeline_mode<synchronous>, transform_indices = @transform_2, window_bounds = array<i64: 1, 512>}, {pipeline_mode = #tpu.pipeline_mode<synchronous>, transform_indices = @transform_3, window_bounds = array<i64: 512, 128>}, {pipeline_mode = #tpu.pipeline_mode<synchronous>, transform_indices = @transform_4, window_bounds = array<i64: 1, 128>}, {transform_indices = @transform_5, window_bounds = array<i64: 200, 128>}]} {
    %c0 = arith.constant 0 : index
    %c0_0 = arith.constant 0 : index
    %0 = vector.load %arg1[%c0, %c0_0] : memref<200x128xf32, #tpu.memory_space<vmem>>, vector<200x128xf32>
    %c0_1 = arith.constant 0 : index
    %c0_2 = arith.constant 0 : index
    %1 = vector.load %arg2[%c0_1, %c0_2] : memref<128x512xf32, #tpu.memory_space<vmem>>, vector<128x512xf32>
    %cst = arith.constant dense<0.000000e+00> : vector<200x512xf32>
    %2 = tpu.matmul %0, %1, %cst {dimension_numbers = #tpu.dot_dimension_numbers<[1], [0], [0], [1], [0, 0, 1, 1], [], []>} : vector<200x128xf32>, vector<128x512xf32>, vector<200x512xf32> -> vector<200x512xf32>
    %c0_3 = arith.constant 0 : index
    %c0_4 = arith.constant 0 : index
    %3 = vector.load %arg3[%c0_3, %c0_4] : memref<1x512xf32, #tpu.memory_space<vmem>>, vector<1x512xf32>
    %4 = vector.broadcast %3 : vector<1x512xf32> to vector<200x512xf32>
    %5 = arith.addf %2, %4 : vector<200x512xf32>
    %cst_5 = arith.constant 5.000000e-01 : f32
    %6 = vector.broadcast %cst_5 : f32 to vector<200x512xf32>
    %7 = arith.mulf %6, %5 : vector<200x512xf32>
    %cst_6 = arith.constant 0.707106769 : f32
    %8 = vector.broadcast %cst_6 : f32 to vector<200x512xf32>
    %9 = arith.mulf %5, %8 : vector<200x512xf32>
    %10 = math.erf %9 : vector<200x512xf32>
    %cst_7 = arith.constant 1.000000e+00 : f32
    %11 = vector.broadcast %cst_7 : f32 to vector<200x512xf32>
    %12 = arith.addf %11, %10 : vector<200x512xf32>
    %13 = arith.mulf %7, %12 : vector<200x512xf32>
    %c0_8 = arith.constant 0 : index
    %c0_9 = arith.constant 0 : index
    %14 = vector.load %arg4[%c0_8, %c0_9] : memref<512x128xf32, #tpu.memory_space<vmem>>, vector<512x128xf32>
    %cst_10 = arith.constant dense<0.000000e+00> : vector<200x128xf32>
    %15 = tpu.matmul %13, %14, %cst_10 {dimension_numbers = #tpu.dot_dimension_numbers<[1], [0], [0], [1], [0, 0, 1, 1], [], []>} : vector<200x512xf32>, vector<512x128xf32>, vector<200x128xf32> -> vector<200x128xf32>
    %c0_11 = arith.constant 0 : index
    %c0_12 = arith.constant 0 : index
    %16 = vector.load %arg5[%c0_11, %c0_12] : memref<1x128xf32, #tpu.memory_space<vmem>>, vector<1x128xf32>
    %17 = vector.broadcast %16 : vector<1x128xf32> to vector<200x128xf32>
    %18 = arith.addf %15, %17 : vector<200x128xf32>
    %c0_13 = arith.constant 0 : index
    %c0_14 = arith.constant 0 : index
    %19 = vector.load %arg6[%c0_13, %c0_14] : memref<200x128xf32, #tpu.memory_space<vmem>>, vector<200x128xf32>
    tpu.vector_store %arg6[%c0_13, %c0_14], %18 {strides = array<i32>} : memref<200x128xf32, #tpu.memory_space<vmem>>, vector<200x128xf32>,
    return
  }
  func.func @transform_0(%arg0: i32) -> (i32, i32) {
    %c0_i32 = arith.constant 0 : i32
    %c0_i32_0 = arith.constant 0 : i32
    return %arg0, %c0_i32 : i32, i32
  }
  func.func @transform_1(%arg0: i32) -> (i32, i32) {
    %c0_i32 = arith.constant 0 : i32
    %c0_i32_0 = arith.constant 0 : i32
    %c0_i32_1 = arith.constant 0 : i32
    return %c0_i32, %c0_i32_0 : i32, i32
  }
  func.func @transform_2(%arg0: i32) -> (i32, i32) {
    %c0_i32 = arith.constant 0 : i32
    %c0_i32_0 = arith.constant 0 : i32
    %c0_i32_1 = arith.constant 0 : i32
    return %c0_i32, %c0_i32_0 : i32, i32
  }
  func.func @transform_3(%arg0: i32) -> (i32, i32) {
    %c0_i32 = arith.constant 0 : i32
    %c0_i32_0 = arith.constant 0 : i32
    %c0_i32_1 = arith.constant 0 : i32
    return %c0_i32, %c0_i32_0 : i32, i32
  }
  func.func @transform_4(%arg0: i32) -> (i32, i32) {
    %c0_i32 = arith.constant 0 : i32
    %c0_i32_0 = arith.constant 0 : i32
    %c0_i32_1 = arith.constant 0 : i32
    return %c0_i32, %c0_i32_0 : i32, i32
  }
  func.func @transform_5(%arg0: i32) -> (i32, i32) {
    %c0_i32 = arith.constant 0 : i32
    %c0_i32_0 = arith.constant 0 : i32
    return %arg0, %c0_i32 : i32, i32
  }
}

</mosaic_0001>

<bundles_post_ra>
// kernel: mlp_pallas.1
= control target key start
LH: loop header
LB: loop body
LE: loop exit
PB: predicated region body
PF: predicated region fallthrough
CT: control target
= control target key end

     0   :  { %s5970_s18 = smov 0   ;;  %s10471_s0 = inlined_call_operand.vmem [shape: f32[400,128], index: 0, kind: input, shape index: {}]   ;;  %s10472_s1 = inlined_call_operand.vmem [shape: f32[128,512], index: 1, kind: input, shape index: {}]   ;;  %s10473_s2 = inlined_call_operand.vmem [shape: f32[1,512], index: 2, kind: input, shape index: {}]   ;;  %s10474_s3 = inlined_call_operand.vmem [shape: f32[512,128], index: 3, kind: input, shape index: {}]   ;;  %s10475_s4 = inlined_call_operand.vmem [shape: f32[1,128], index: 4, kind: input, shape index: {}]   ;;  %s10476_s5 = inlined_call_operand.vmem [shape: f32[400,128], index: 5, kind: output, shape index: {}]  }
   0x1 LB: > { %s5612_s19 = sadd.s32 4294967295, %s5938_s18   ;;  %p5616_p0 = scmp.ge.s32.totalorder %s5938_s18, 1  ;;  %s5938_s18 = sphi %s5970_s18, %s15_s18  }
   0x2   : > { %p188_p1 = scmp.lt.s32.totalorder %s5938_s18, 3 }
   0x4   : > { %p189_p2 = pnand %p5616_p0, %p188_p1 }
   0x6   : > { %192 = sbr.rel (%p189_p2) target bundleno = 1407 (0x57f), region = 40 }
   0xb   : > { %v313_v0 = vld [vmem:[%s10472_s1 + $0x1e0] sm:$0xff]  ;;  %v314_v1 = vld [vmem:[%s10472_s1 + $0x1e8] sm:$0xff]  ;;  %v315_v2 = vld [vmem:[%s10472_s1 + $0x1f0] sm:$0xff]  ;;  %s6070_s9 = smul.u32 25, %s5612_s19 }
   0xc   : > { %327 = vmatpush.msra.mxu0 %v313_v0  ;;  %419 = vmatpush.msra.mxu1 %v314_v1  ;;  %v316_v3 = vld [vmem:[%s10472_s1 + $0x1f8] sm:$0xff]  ;;  %v309_v4 = vld [vmem:[%s10472_s1 + $0x1c0] sm:$0xff]  ;;  %v310_v5 = vld [vmem:[%s10472_s1 + $0x1c8] sm:$0xff] }
   0xd   : > { %511 = vmatpush.msra.mxu2 %v315_v2  ;;  %603 = vmatpush.msra.mxu3 %v316_v3  ;;  %v311_v6 = vld [vmem:[%s10472_s1 + $0x1d0] sm:$0xff]  ;;  %v312_v7 = vld [vmem:[%s10472_s1 + $0x1d8] sm:$0xff]  ;;  %v305_v8 = vld [vmem:[%s10472_s1 + $0x1a0] sm:$0xff]  ;;  %p217_p3 = scmp.lt.s32.totalorder %s6070_s9, 49 }
   0xe   : > { %328 = vmatpush.msra.mxu0 %v309_v4  ;;  %420 = vmatpush.msra.mxu1 %v310_v5  ;;  %v306_v9 = vld [vmem:[%s10472_s1 + $0x1a8] sm:$0xff]  ;;  %v307_v10 = vld [vmem:[%s10472_s1 + $0x1b0] sm:$0xff]  ;;  %v308_v11 = vld [vmem:[%s10472_s1 + $0x1b8] sm:$0xff] }
   0xf   : > { %512 = vmatpush.msra.mxu2 %v311_v6  ;;  %604 = vmatpush.msra.mxu3 %v312_v7  ;;  %v301_v12 = vld [vmem:[%s10472_s1 + $0x180] sm:$0xff]  ;;  %v302_v13 = vld [vmem:[%s10472_s1 + $0x188] sm:$0xff]  ;;  %v303_v14 = vld [vmem:[%s10472_s1 + $0x190] sm:$0xff]  ;;  %s11220_s9 = smov (!%p217_p3, %s6070_s9), 49 }
  0x10   : > { %329 = vmatpush.msra.mxu0 %v305_v8  ;;  %421 = vmatpush.msra.mxu1 %v306_v9  ;;  %v304_v15 = vld [vmem:[%s10472_s1 + $0x198] sm:$0xff]  ;;  %v297_v16 = vld [vmem:[%s10472_s1 + $0x160] sm:$0xff]  ;;  %v298_v17 = vld [vmem:[%s10472_s1 + $0x168] sm:$0xff]  ;;  %s5617_s12 = sshll.u32 %s11220_s9, 3 }
  0x11   : > { %513 = vmatpush.msra.mxu2 %v307_v10  ;;  %605 = vmatpush.msra.mxu3 %v308_v11  ;;  %v299_v18 = vld [vmem:[%s10472_s1 + $0x170] sm:$0xff]  ;;  %v300_v19 = vld [vmem:[%s10472_s1 + $0x178] sm:$0xff]  ;;  %v293_v20 = vld [vmem:[%s10472_s1 + $0x140] sm:$0xff]  ;;  %s6174_s28 = scalar_lea.vmem %s10471_s0, %s5617_s12  ;;  %s9681_s22 = scalar_lea.vmem %s10476_s5, %s5617_s12 }
  0x12   : > { %330 = vmatpush.msra.mxu0 %v301_v12  ;;  %422 = vmatpush.msra.mxu1 %v302_v13  ;;  %v294_v21 = vld [vmem:[%s10472_s1 + $0x148] sm:$0xff]  ;;  %v295_v22 = vld [vmem:[%s10472_s1 + $0x150] sm:$0xff]  ;;  %v296_v23 = vld [vmem:[%s10472_s1 + $0x158] sm:$0xff] }
  0x13   : > { %514 = vmatpush.msra.mxu2 %v303_v14  ;;  %606 = vmatpush.msra.mxu3 %v304_v15  ;;  %v289_v24 = vld [vmem:[%s10472_s1 + $0x120] sm:$0xff]  ;;  %v290_v25 = vld [vmem:[%s10472_s1 + $0x128] sm:$0xff]  ;;  %v291_v26 = vld [vmem:[%s10472_s1 + $0x130] sm:$0xff] }
  0x14   : > { %331 = vmatpush.msra.mxu0 %v297_v16  ;;  %423 = vmatpush.msra.mxu1 %v298_v17  ;;  %v292_v27 = vld [vmem:[%s10472_s1 + $0x138] sm:$0xff]  ;;  %v285_v28 = vld [vmem:[%s10472_s1 + $0x100] sm:$0xff]  ;;  %v286_v29 = vld [vmem:[%s10472_s1 + $0x108] sm:$0xff] }
  0x15   : > { %515 = vmatpush.msra.mxu2 %v299_v18  ;;  %607 = vmatpush.msra.mxu3 %v300_v19  ;;  %v287_v30 = vld [vmem:[%s10472_s1 + $0x110] sm:$0xff]  ;;  %v288_v31 = vld [vmem:[%s10472_s1 + $0x118] sm:$0xff]  ;;  %v281_v32 = vld [vmem:[%s10472_s1 + $0xe0] sm:$0xff] }
  0x16   : > { %332 = vmatpush.msra.mxu0 %v293_v20  ;;  %424 = vmatpush.msra.mxu1 %v294_v21  ;;  %v282_v33 = vld [vmem:[%s10472_s1 + $0xe8] sm:$0xff]  ;;  %v283_v34 = vld [vmem:[%s10472_s1 + $0xf0] sm:$0xff]  ;;  %v284_v35 = vld [vmem:[%s10472_s1 + $0xf8] sm:$0xff] }
  0x17   : > { %516 = vmatpush.msra.mxu2 %v295_v22  ;;  %608 = vmatpush.msra.mxu3 %v296_v23  ;;  %v277_v36 = vld [vmem:[%s10472_s1 + $0xc0] sm:$0xff]  ;;  %v278_v37 = vld [vmem:[%s10472_s1 + $0xc8] sm:$0xff]  ;;  %v279_v38 = vld [vmem:[%s10472_s1 + $0xd0] sm:$0xff] }
  0x18   : > { %333 = vmatpush.msra.mxu0 %v289_v24  ;;  %425 = vmatpush.msra.mxu1 %v290_v25  ;;  %v280_v39 = vld [vmem:[%s10472_s1 + $0xd8] sm:$0xff]  ;;  %v273_v40 = vld [vmem:[%s10472_s1 + $0xa0] sm:$0xff]  ;;  %v274_v41 = vld [vmem:[%s10472_s1 + $0xa8] sm:$0xff] }
  0x19   : > { %517 = vmatpush.msra.mxu2 %v291_v26  ;;  %609 = vmatpush.msra.mxu3 %v292_v27  ;;  %v275_v42 = vld [vmem:[%s10472_s1 + $0xb0] sm:$0xff]  ;;  %v276_v43 = vld [vmem:[%s10472_s1 + $0xb8] sm:$0xff]  ;;  %v269_v44 = vld [vmem:[%s10472_s1 + $0x80] sm:$0xff] }
  0x1a   : > { %334 = vmatpush.msra.mxu0 %v285_v28  ;;  %426 = vmatpush.msra.mxu1 %v286_v29  ;;  %v270_v45 = vld [vmem:[%s10472_s1 + $0x88] sm:$0xff]  ;;  %v271_v46 = vld [vmem:[%s10472_s1 + $0x90] sm:$0xff]  ;;  %v272_v47 = vld [vmem:[%s10472_s1 + $0x98] sm:$0xff] }
  0x1b   : > { %518 = vmatpush.msra.mxu2 %v287_v30  ;;  %610 = vmatpush.msra.mxu3 %v288_v31  ;;  %v265_v48 = vld [vmem:[%s10472_s1 + $0x60] sm:$0xff]  ;;  %v266_v49 = vld [vmem:[%s10472_s1 + $0x68] sm:$0xff]  ;;  %v267_v50 = vld [vmem:[%s10472_s1 + $0x70] sm:$0xff] }
  0x1c   : > { %335 = vmatpush.msra.mxu0 %v281_v32  ;;  %427 = vmatpush.msra.mxu1 %v282_v33  ;;  %v268_v51 = vld [vmem:[%s10472_s1 + $0x78] sm:$0xff]  ;;  %v261_v52 = vld [vmem:[%s10472_s1 + $0x40] sm:$0xff]  ;;  %v262_v53 = vld [vmem:[%s10472_s1 + $0x48] sm:$0xff] }
  0x1d   : > { %519 = vmatpush.msra.mxu2 %v283_v34  ;;  %611 = vmatpush.msra.mxu3 %v284_v35  ;;  %v263_v54 = vld [vmem:[%s10472_s1 + $0x50] sm:$0xff]  ;;  %v264_v55 = vld [vmem:[%s10472_s1 + $0x58] sm:$0xff]  ;;  %v257_v56 = vld [vmem:[%s10472_s1 + $0x20] sm:$0xff] }
  0x1e   : > { %336 = vmatpush.msra.mxu0 %v277_v36  ;;  %428 = vmatpush.msra.mxu1 %v278_v37  ;;  %v258_v57 = vld [vmem:[%s10472_s1 + $0x28] sm:$0xff]  ;;  %v259_v58 = vld [vmem:[%s10472_s1 + $0x30] sm:$0xff]  ;;  %v260_v59 = vld [vmem:[%s10472_s1 + $0x38] sm:$0xff] }
  0x1f   : > { %520 = vmatpush.msra.mxu2 %v279_v38  ;;  %612 = vmatpush.msra.mxu3 %v280_v39  ;;  %v253_v60 = vld [vmem:[%s10472_s1] sm:$0xff]  ;;  %v254_v61 = vld [vmem:[%s10472_s1 + $0x8] sm:$0xff]  ;;  %v255_v62 = vld [vmem:[%s10472_s1 + $0x10] sm:$0xff] }
  0x20   : > { %337 = vmatpush.msra.mxu0 %v273_v40  ;;  %429 = vmatpush.msra.mxu1 %v274_v41  ;;  %v256_v63 = vld [vmem:[%s10472_s1 + $0x18] sm:$0xff]  ;;  %v228_v0 = vld [vmem:[%s6174_s28] sm:$0xff]  ;;  %v5141_v5 = vld [vmem:[%s10474_s3 + $0x170] sm:$0xff] }
  0x21   : > { %521 = vmatpush.msra.mxu2 %v275_v42  ;;  %613 = vmatpush.msra.mxu3 %v276_v43  ;;  %v5142_v1 = vld [vmem:[%s10474_s3 + $0x178] sm:$0xff]  ;;  %v5109_v6 = vld [vmem:[%s10474_s3 + $0x70] sm:$0xff]  ;;  %v5140_v9 = vld [vmem:[%s10474_s3 + $0x168] sm:$0xff] }
  0x22   : > { %338 = vmatpush.msra.mxu0 %v269_v44  ;;  %430 = vmatpush.msra.mxu1 %v270_v45  ;;  %v5110_v2 = vld [vmem:[%s10474_s3 + $0x78] sm:$0xff]  ;;  %v5157_v7 = vld [vmem:[%s10474_s3 + $0x1f0] sm:$0xff]  ;;  %v5108_v10 = vld [vmem:[%s10474_s3 + $0x68] sm:$0xff] }
  0x23   : > { %522 = vmatpush.msra.mxu2 %v271_v46  ;;  %614 = vmatpush.msra.mxu3 %v272_v47  ;;  %v5158_v3 = vld [vmem:[%s10474_s3 + $0x1f8] sm:$0xff]  ;;  %v5125_v8 = vld [vmem:[%s10474_s3 + $0xf0] sm:$0xff]  ;;  %v5156_v11 = vld [vmem:[%s10474_s3 + $0x1e8] sm:$0xff] }
  0x24   : > { %339 = vmatpush.msra.mxu0 %v265_v48  ;;  %431 = vmatpush.msra.mxu1 %v266_v49  ;;  %v5126_v4 = vld [vmem:[%s10474_s3 + $0xf8] sm:$0xff]  ;;  %v5124_v12 = vld [vmem:[%s10474_s3 + $0xe8] sm:$0xff]  ;;  %v5139_v14 = vld [vmem:[%s10474_s3 + $0x160] sm:$0xff] }
  0x25   : > { %523 = vmatpush.msra.mxu2 %v267_v50  ;;  %615 = vmatpush.msra.mxu3 %v268_v51  ;;  %v229_v13 = vld [vmem:[%s6174_s28 + $0x8] sm:$0xff]  ;;  %v5107_v15 = vld [vmem:[%s10474_s3 + $0x60] sm:$0xff]  ;;  %v230_v18 = vld [vmem:[%s6174_s28 + $0x10] sm:$0xff] }
  0x26   : > { %340 = vmatpush.msra.mxu0 %v261_v52  ;;  %432 = vmatpush.msra.mxu1 %v262_v53  ;;  %v5155_v16 = vld [vmem:[%s10474_s3 + $0x1e0] sm:$0xff]  ;;  %v5138_v19 = vld [vmem:[%s10474_s3 + $0x158] sm:$0xff]  ;;  %v5137_v24 = vld [vmem:[%s10474_s3 + $0x150] sm:$0xff] }
  0x27   : > { %524 = vmatpush.msra.mxu2 %v263_v54  ;;  %616 = vmatpush.msra.mxu3 %v264_v55  ;;  %v5123_v17 = vld [vmem:[%s10474_s3 + $0xe0] sm:$0xff]  ;;  %v5106_v20 = vld [vmem:[%s10474_s3 + $0x58] sm:$0xff]  ;;  %v5105_v26 = vld [vmem:[%s10474_s3 + $0x50] sm:$0xff] }
  0x28   : > { %341 = vmatpush.msra.mxu0 %v257_v56  ;;  %433 = vmatpush.msra.mxu1 %v258_v57  ;;  %v5154_v21 = vld [vmem:[%s10474_s3 + $0x1d8] sm:$0xff]  ;;  %v232_v25 = vld [vmem:[%s6174_s28 + $0x20] sm:$0xff]  ;;  %v5153_v27 = vld [vmem:[%s10474_s3 + $0x1d0] sm:$0xff] }
  0x29   : > { %525 = vmatpush.msra.mxu2 %v259_v58  ;;  %617 = vmatpush.msra.mxu3 %v260_v59  ;;  %v5122_v22 = vld [vmem:[%s10474_s3 + $0xd8] sm:$0xff]  ;;  %v5121_v28 = vld [vmem:[%s10474_s3 + $0xd0] sm:$0xff]  ;;  %v233_v29 = vld [vmem:[%s6174_s28 + $0x28] sm:$0xff] }
  0x2a   : > { %342 = vmatpush.msra.mxu0 %v253_v60  ;;  %434 = vmatpush.msra.mxu1 %v254_v61  ;;  %v231_v23 = vld [vmem:[%s6174_s28 + $0x18] sm:$0xff]  ;;  %v5136_v30 = vld [vmem:[%s10474_s3 + $0x148] sm:$0xff]  ;;  %v234_v34 = vld [vmem:[%s6174_s28 + $0x30] sm:$0xff] }
  0x2b   : > { %526 = vmatpush.msra.mxu2 %v255_v62  ;;  %618 = vmatpush.msra.mxu3 %v256_v63  ;;  %v5104_v31 = vld [vmem:[%s10474_s3 + $0x48] sm:$0xff]  ;;  %v235_v35 = vld [vmem:[%s6174_s28 + $0x38] sm:$0xff]  ;;  %v5135_v36 = vld [vmem:[%s10474_s3 + $0x140] sm:$0xff] }
  0x2c   : > { %343 = vmatmul.f32.vlgmr.msra.gmra.mxu0 %v228_v0  ;;  %435 = vmatmul.f32.vlgmr.msra.gmra.mxu1 %v228_v0  ;;  %v5152_v32 = vld [vmem:[%s10474_s3 + $0x1c8] sm:$0xff]  ;;  %v5103_v37 = vld [vmem:[%s10474_s3 + $0x40] sm:$0xff]  ;;  %v5134_v41 = vld [vmem:[%s10474_s3 + $0x138] sm:$0xff] }
  0x2d   : > { %527 = vmatmul.f32.vlgmr.msra.gmra.mxu2 %v228_v0  ;;  %619 = vmatmul.f32.vlgmr.msra.gmra.mxu3 %v228_v0  ;;  %v5120_v33 = vld [vmem:[%s10474_s3 + $0xc8] sm:$0xff]  ;;  %v5151_v38 = vld [vmem:[%s10474_s3 + $0x1c0] sm:$0xff]  ;;  %v5102_v42 = vld [vmem:[%s10474_s3 + $0x38] sm:$0xff] }
  0x2e   : > { %5347 = vmatpush.msrb.mxu2 %v5142_v1  ;;  %5163 = vmatpush.msrb.mxu0 %v5110_v2  ;;  %v5119_v39 = vld [vmem:[%s10474_s3 + $0xc0] sm:$0xff]  ;;  %v5150_v43 = vld [vmem:[%s10474_s3 + $0x1b8] sm:$0xff]  ;;  %v237_v44 = vld [vmem:[%s6174_s28 + $0x48] sm:$0xff] }
  0x2f   : > { %5439 = vmatpush.msrb.mxu3 %v5158_v3  ;;  %5255 = vmatpush.msrb.mxu1 %v5126_v4  ;;  %v236_v40 = vld [vmem:[%s6174_s28 + $0x40] sm:$0xff]  ;;  %v5118_v45 = vld [vmem:[%s10474_s3 + $0xb8] sm:$0xff]  ;;  %v238_v46 = vld [vmem:[%s6174_s28 + $0x50] sm:$0xff] }
  0x30   : > { %5348 = vmatpush.msrb.mxu2 %v5141_v5  ;;  %5164 = vmatpush.msrb.mxu0 %v5109_v6  ;;  %v5133_v47 = vld [vmem:[%s10474_s3 + $0x130] sm:$0xff]  ;;  %v239_v51 = vld [vmem:[%s6174_s28 + $0x58] sm:$0xff]  ;;  %v240_v52 = vld [vmem:[%s6174_s28 + $0x60] sm:$0xff] }
  0x31   : > { %5440 = vmatpush.msrb.mxu3 %v5157_v7  ;;  %5256 = vmatpush.msrb.mxu1 %v5125_v8  ;;  %v5101_v48 = vld [vmem:[%s10474_s3 + $0x30] sm:$0xff]  ;;  %v241_v53 = vld [vmem:[%s6174_s28 + $0x68] sm:$0xff]  ;;  %v243_v55 = vld [vmem:[%s6174_s28 + $0x78] sm:$0xff] }
  0x32   : > { %5349 = vmatpush.msrb.mxu2 %v5140_v9  ;;  %5165 = vmatpush.msrb.mxu0 %v5108_v10  ;;  %v5149_v49 = vld [vmem:[%s10474_s3 + $0x1b0] sm:$0xff]  ;;  %v317_v56 = vld [vmem:[%s10473_s2] sm:$0xf] }
  0x33   : > { %5441 = vmatpush.msrb.mxu3 %v5156_v11  ;;  %5257 = vmatpush.msrb.mxu1 %v5124_v12  ;;  %v5117_v50 = vld [vmem:[%s10474_s3 + $0xb0] sm:$0xff]  ;;  %v6327_v57 = vperm.slane %v317_v56, 0  ;;  %v6329_v58 = vperm.slane %v317_v56, 1  ;;  %v244_v61 = vld [vmem:[%s6174_s28 + $0x80] sm:$0xff]  ;;  %v6344_v2 = vperm.slane %v317_v56, 2  ;;  %v6346_v3 = vperm.slane %v317_v56, 3 }
  0x34   : > { %346 = vmatmul.f32.gmra.mxu0 %v229_v13  ;;  %438 = vmatmul.f32.gmra.mxu1 %v229_v13  ;;  %v242_v54 = vld [vmem:[%s6174_s28 + $0x70] sm:$0xff]  ;;  %v245_v12 = vld [vmem:[%s6174_s28 + $0x88] sm:$0xff] }
  0x35   : > { %530 = vmatmul.f32.gmra.mxu2 %v229_v13  ;;  %622 = vmatmul.f32.gmra.mxu3 %v229_v13  ;;  %v246_v56 = vld [vmem:[%s6174_s28 + $0x90] sm:$0xff] }
  0x36   : > { %5350 = vmatpush.msrb.mxu2 %v5139_v14  ;;  %5166 = vmatpush.msrb.mxu0 %v5107_v15 }
  0x37   : > { %5442 = vmatpush.msrb.mxu3 %v5155_v16  ;;  %5258 = vmatpush.msrb.mxu1 %v5123_v17 }
  0x38   : > { %5351 = vmatpush.msrb.mxu2 %v5138_v19  ;;  %5167 = vmatpush.msrb.mxu0 %v5106_v20 }
  0x39   : > { %5443 = vmatpush.msrb.mxu3 %v5154_v21  ;;  %5259 = vmatpush.msrb.mxu1 %v5122_v22 }
  0x3a   : > { %5352 = vmatpush.msrb.mxu2 %v5137_v24  ;;  %5168 = vmatpush.msrb.mxu0 %v5105_v26 }
  0x3b   : > { %5444 = vmatpush.msrb.mxu3 %v5153_v27  ;;  %5260 = vmatpush.msrb.mxu1 %v5121_v28 }
  0x3c   : > { %349 = vmatmul.f32.gmra.mxu0 %v230_v18  ;;  %441 = vmatmul.f32.gmra.mxu1 %v230_v18 }
  0x3d   : > { %533 = vmatmul.f32.gmra.mxu2 %v230_v18  ;;  %625 = vmatmul.f32.gmra.mxu3 %v230_v18 }
  0x3e   : > { %5353 = vmatpush.msrb.mxu2 %v5136_v30  ;;  %5169 = vmatpush.msrb.mxu0 %v5104_v31 }
  0x3f   : > { %5445 = vmatpush.msrb.mxu3 %v5152_v32  ;;  %5261 = vmatpush.msrb.mxu1 %v5120_v33 }
  0x40   : > { %5354 = vmatpush.msrb.mxu2 %v5135_v36  ;;  %5170 = vmatpush.msrb.mxu0 %v5103_v37 }
  0x41   : > { %5446 = vmatpush.msrb.mxu3 %v5151_v38  ;;  %5262 = vmatpush.msrb.mxu1 %v5119_v39  ;;  %v5132_v39 = vld [vmem:[%s10474_s3 + $0x128] sm:$0xff] }
  0x42   : > { %5355 = vmatpush.msrb.mxu2 %v5134_v41  ;;  %5171 = vmatpush.msrb.mxu0 %v5102_v42  ;;  %v5148_v41 = vld [vmem:[%s10474_s3 + $0x1a8] sm:$0xff] }
  0x43   : > { %5447 = vmatpush.msrb.mxu3 %v5150_v43  ;;  %5263 = vmatpush.msrb.mxu1 %v5118_v45 }
  0x44   : > { %352 = vmatmul.f32.gmra.mxu0 %v231_v23  ;;  %444 = vmatmul.f32.gmra.mxu1 %v231_v23 }
  0x45   : > { %536 = vmatmul.f32.gmra.mxu2 %v231_v23  ;;  %628 = vmatmul.f32.gmra.mxu3 %v231_v23 }
  0x46   : > { %5356 = vmatpush.msrb.mxu2 %v5133_v47  ;;  %5172 = vmatpush.msrb.mxu0 %v5101_v48 }
  0x47   : > { %5448 = vmatpush.msrb.mxu3 %v5149_v49  ;;  %5264 = vmatpush.msrb.mxu1 %v5117_v50 }
  0x48   : > { %5357 = vmatpush.msrb.mxu2 %v5132_v39 }
  0x49   : > { %5449 = vmatpush.msrb.mxu3 %v5148_v41 }
  0x4c   : > { %355 = vmatmul.f32.gmra.mxu0 %v232_v25  ;;  %447 = vmatmul.f32.gmra.mxu1 %v232_v25 }
  0x4d   : > { %539 = vmatmul.f32.gmra.mxu2 %v232_v25  ;;  %631 = vmatmul.f32.gmra.mxu3 %v232_v25 }
  0x54   : > { %358 = vmatmul.f32.gmra.mxu0 %v233_v29  ;;  %450 = vmatmul.f32.gmra.mxu1 %v233_v29 }
  0x55   : > { %542 = vmatmul.f32.gmra.mxu2 %v233_v29  ;;  %634 = vmatmul.f32.gmra.mxu3 %v233_v29 }
  0x5c   : > { %361 = vmatmul.f32.gmra.mxu0 %v234_v34  ;;  %453 = vmatmul.f32.gmra.mxu1 %v234_v34 }
  0x5d   : > { %545 = vmatmul.f32.gmra.mxu2 %v234_v34  ;;  %637 = vmatmul.f32.gmra.mxu3 %v234_v34 }
  0x64   : > { %364 = vmatmul.f32.gmra.mxu0 %v235_v35  ;;  %456 = vmatmul.f32.gmra.mxu1 %v235_v35 }
  0x65   : > { %548 = vmatmul.f32.gmra.mxu2 %v235_v35  ;;  %640 = vmatmul.f32.gmra.mxu3 %v235_v35 }
  0x6c   : > { %367 = vmatmul.f32.gmra.mxu0 %v236_v40  ;;  %459 = vmatmul.f32.gmra.mxu1 %v236_v40 }
  0x6d   : > { %551 = vmatmul.f32.gmra.mxu2 %v236_v40  ;;  %643 = vmatmul.f32.gmra.mxu3 %v236_v40  ;;  %v5100_v40 = vld [vmem:[%s10474_s3 + $0x28] sm:$0xff] }
  0x6e   : > { %5173 = vmatpush.msrb.mxu0 %v5100_v40 }
  0x74   : > { %370 = vmatmul.f32.gmra.mxu0 %v237_v44  ;;  %462 = vmatmul.f32.gmra.mxu1 %v237_v44 }
  0x75   : > { %554 = vmatmul.f32.gmra.mxu2 %v237_v44  ;;  %646 = vmatmul.f32.gmra.mxu3 %v237_v44  ;;  %v5116_v44 = vld [vmem:[%s10474_s3 + $0xa8] sm:$0xff] }
  0x76   : > { %5265 = vmatpush.msrb.mxu1 %v5116_v44 }
  0x7c   : > { %373 = vmatmul.f32.gmra.mxu0 %v238_v46  ;;  %465 = vmatmul.f32.gmra.mxu1 %v238_v46 }
  0x7d   : > { %557 = vmatmul.f32.gmra.mxu2 %v238_v46  ;;  %649 = vmatmul.f32.gmra.mxu3 %v238_v46 }
  0x84   : > { %376 = vmatmul.f32.gmra.mxu0 %v239_v51  ;;  %468 = vmatmul.f32.gmra.mxu1 %v239_v51 }
  0x85   : > { %560 = vmatmul.f32.gmra.mxu2 %v239_v51  ;;  %652 = vmatmul.f32.gmra.mxu3 %v239_v51 }
  0x8c   : > { %379 = vmatmul.f32.gmra.mxu0 %v240_v52  ;;  %471 = vmatmul.f32.gmra.mxu1 %v240_v52 }
  0x8d   : > { %563 = vmatmul.f32.gmra.mxu2 %v240_v52  ;;  %655 = vmatmul.f32.gmra.mxu3 %v240_v52 }
  0x94   : > { %382 = vmatmul.f32.gmra.mxu0 %v241_v53  ;;  %474 = vmatmul.f32.gmra.mxu1 %v241_v53 }
  0x95   : > { %566 = vmatmul.f32.gmra.mxu2 %v241_v53  ;;  %658 = vmatmul.f32.gmra.mxu3 %v241_v53 }
  0x9c   : > { %385 = vmatmul.f32.gmra.mxu0 %v242_v54  ;;  %477 = vmatmul.f32.gmra.mxu1 %v242_v54 }
  0x9d   : > { %569 = vmatmul.f32.gmra.mxu2 %v242_v54  ;;  %661 = vmatmul.f32.gmra.mxu3 %v242_v54 }
  0xa4   : > { %388 = vmatmul.f32.gmra.mxu0 %v243_v55  ;;  %480 = vmatmul.f32.gmra.mxu1 %v243_v55 }
  0xa5   : > { %572 = vmatmul.f32.gmra.mxu2 %v243_v55  ;;  %664 = vmatmul.f32.gmra.mxu3 %v243_v55 }
  0xa9   : > { %v344_v59 = vpop.f32.mrf.mxu0  ;;  %v436_v60 = vpop.f32.mrf.mxu1 }
  0xaa   : > { %v6333_v62 = vadd.f32 %v344_v59, %v6327_v57  ;;  %v6336_v63 = vadd.f32 %v436_v60, %v6329_v58 }
  0xac   : > { %v6339_v0 = vmul.f32 0.70710677, %v6333_v62  ;;  %v6342_v1 = vmul.f32 0.70710677, %v6336_v63  ;;  %391 = vmatmul.f32.gmra.mxu0 %v244_v61  ;;  %483 = vmatmul.f32.gmra.mxu1 %v244_v61 }
  0xad   : > { %575 = vmatmul.f32.gmra.mxu2 %v244_v61  ;;  %667 = vmatmul.f32.gmra.mxu3 %v244_v61 }
  0xae   : > { %v895_v4 = vmul.f32 %v6339_v0, %v6339_v0  ;;  %v935_v5 = vmul.f32 %v6342_v1, %v6342_v1 }
  0xb0   : > { %v6352_v6 = vmin.f32 %v895_v4, 16.0  ;;  %v6354_v7 = vmin.f32 %v935_v5, 16.0  ;;  %v528_v8 = vpop.f32.mrf.mxu2  ;;  %v620_v9 = vpop.f32.mrf.mxu3 }
  0xb1   : > { %v6357_v10 = vadd.f32 %v528_v8, %v6344_v2  ;;  %v6360_v11 = vadd.f32 %v620_v9, %v6346_v3  ;;  %v347_v61 = vpop.f32.mrf.mxu0 }
  0xb2   : > { %v908_v13 = vmul.f32 3.8918573e-05, %v6352_v6  ;;  %v948_v14 = vmul.f32 3.8918573e-05, %v6354_v7  ;;  %v897_v24 = vmul.f32 2.1237322e-06, %v6352_v6 }
  0xb3   : > { %v6366_v15 = vmul.f32 0.70710677, %v6357_v10  ;;  %v6371_v19 = vmul.f32 0.70710677, %v6360_v11  ;;  %v937_v26 = vmul.f32 2.1237322e-06, %v6354_v7 }
  0xb4   : > { %v909_v16 = vadd.f32 0.001143296, %v908_v13  ;;  %394 = vmatmul.f32.gmra.mxu0 %v245_v12  ;;  %486 = vmatmul.f32.gmra.mxu1 %v245_v12  ;;  %v949_v17 = vadd.f32 0.001143296, %v948_v14  ;;  %v898_v33 = vadd.f32 0.00028619796, %v897_v24  ;;  %v348_v14 = vadd.f32 %v347_v61, %v6327_v57 }
  0xb5   : > { %v975_v18 = vmul.f32 %v6366_v15, %v6366_v15  ;;  %578 = vmatmul.f32.gmra.mxu2 %v245_v12  ;;  %670 = vmatmul.f32.gmra.mxu3 %v245_v12  ;;  %v1015_v23 = vmul.f32 %v6371_v19, %v6371_v19  ;;  %v938_v35 = vadd.f32 0.00028619796, %v937_v26 }
  0xb6   : > { %v910_v20 = vmul.f32 %v909_v16, %v6352_v6  ;;  %v950_v21 = vmul.f32 %v949_v17, %v6354_v7  ;;  %v899_v47 = vmul.f32 %v898_v33, %v6352_v6  ;;  %v6422_v24 = vmul.f32 0.70710677, %v348_v14 }
  0xb7   : > { %v6375_v22 = vmin.f32 %v975_v18, 16.0  ;;  %v6384_v32 = vmin.f32 %v1015_v23, 16.0  ;;  %v939_v49 = vmul.f32 %v938_v35, %v6354_v7 }
  0xb8   : > { %v911_v25 = vadd.f32 0.014752088, %v910_v20  ;;  %v951_v27 = vadd.f32 0.014752088, %v950_v21  ;;  %v900_v59 = vadd.f32 0.0036580483, %v899_v47 }
  0xb9   : > { %v988_v28 = vmul.f32 3.8918573e-05, %v6375_v22  ;;  %v977_v42 = vmul.f32 2.1237322e-06, %v6375_v22  ;;  %v1028_v46 = vmul.f32 3.8918573e-05, %v6384_v32 }
  0xba   : > { %v912_v29 = vmul.f32 %v911_v25, %v6352_v6  ;;  %v952_v30 = vmul.f32 %v951_v27, %v6354_v7  ;;  %v940_v5 = vadd.f32 0.0036580483, %v939_v49  ;;  %v1017_v12 = vmul.f32 2.1237322e-06, %v6384_v32  ;;  %v247_v47 = vld [vmem:[%s6174_s28 + $0x98] sm:$0xff] }
  0xbb   : > { %v989_v31 = vadd.f32 0.001143296, %v988_v28  ;;  %v978_v53 = vadd.f32 0.00028619796, %v977_v42  ;;  %v1029_v55 = vadd.f32 0.001143296, %v1028_v46  ;;  %v901_v16 = vmul.f32 %v900_v59, %v6352_v6  ;;  %v439_v28 = vpop.f32.mrf.mxu1  ;;  %v531_v46 = vpop.f32.mrf.mxu2 }
  0xbc   : > { %v913_v34 = vadd.f32 0.112945676, %v912_v29  ;;  %v953_v36 = vadd.f32 0.112945676, %v952_v30  ;;  %397 = vmatmul.f32.gmra.mxu0 %v246_v56  ;;  %489 = vmatmul.f32.gmra.mxu1 %v246_v56  ;;  %v941_v18 = vmul.f32 %v940_v5, %v6354_v7  ;;  %v1018_v21 = vadd.f32 0.00028619796, %v1017_v12 }
  0xbd   : > { %v990_v37 = vmul.f32 %v989_v31, %v6375_v22  ;;  %581 = vmatmul.f32.gmra.mxu2 %v246_v56  ;;  %673 = vmatmul.f32.gmra.mxu3 %v246_v56  ;;  %v979_v8 = vmul.f32 %v978_v53, %v6375_v22  ;;  %v1030_v13 = vmul.f32 %v1029_v55, %v6384_v32  ;;  %v902_v25 = vadd.f32 0.05243302, %v901_v16  ;;  %v5099_v12 = vld [vmem:[%s10474_s3 + $0x20] sm:$0xff] }
  0xbe   : > { %v914_v38 = vmul.f32 %v913_v34, %v6352_v6  ;;  %v954_v43 = vmul.f32 %v953_v36, %v6354_v7  ;;  %v942_v27 = vadd.f32 0.05243302, %v941_v18  ;;  %v1019_v31 = vmul.f32 %v1018_v21, %v6384_v32  ;;  %5174 = vmatpush.msrb.mxu0 %v5099_v12 }
  0xbf   : > { %v991_v45 = vadd.f32 0.014752088, %v990_v37  ;;  %v980_v20 = vadd.f32 0.0036580483, %v979_v8  ;;  %v1031_v23 = vadd.f32 0.014752088, %v1030_v13  ;;  %v1055_v34 = vmul.f32 %v6422_v24, %v6422_v24  ;;  %v623_v8 = vpop.f32.mrf.mxu3 }
  0xc0   : > { %v915_v48 = vadd.f32 0.4994258, %v914_v38  ;;  %v955_v50 = vadd.f32 0.4994258, %v954_v43  ;;  %v903_v35 = vmul.f32 %v902_v25, %v6352_v6  ;;  %v440_v37 = vadd.f32 %v439_v28, %v6329_v58  ;;  %v5131_v38 = vld [vmem:[%s10474_s3 + $0x120] sm:$0xff] }
  0xc1   : > { %v992_v51 = vmul.f32 %v991_v45, %v6375_v22  ;;  %v981_v29 = vmul.f32 %v980_v20, %v6375_v22  ;;  %v1032_v33 = vmul.f32 %v1031_v23, %v6384_v32  ;;  %v943_v40 = vmul.f32 %v942_v27, %v6354_v7  ;;  %5358 = vmatpush.msrb.mxu2 %v5131_v38 }
  0xc2   : > { %v916_v52 = vmul.f32 %v915_v48, %v6352_v6  ;;  %v956_v54 = vmul.f32 %v955_v50, %v6354_v7  ;;  %v1020_v43 = vadd.f32 0.0036580483, %v1019_v31  ;;  %v6442_v45 = vmin.f32 %v1055_v34, 16.0 }
  0xc3   : > { %v993_v60 = vadd.f32 0.112945676, %v992_v51  ;;  %v982_v42 = vadd.f32 0.05243302, %v981_v29  ;;  %v1033_v44 = vadd.f32 0.112945676, %v1032_v33  ;;  %v532_v59 = vadd.f32 %v531_v46, %v6344_v2 }
  0xc4   : > { %v6409_v4 = vadd.f32 1.0, %v916_v52  ;;  %v6412_v9 = vadd.f32 1.0, %v956_v54  ;;  %10637 = vst [vmem:[#allocation2_spill] sm:$0xff] %v6442_v45  ;;  %v904_v48 = vadd.f32 0.18741608, %v903_v35  ;;  %400 = vmatmul.f32.gmra.mxu0 %v247_v47  ;;  %492 = vmatmul.f32.gmra.mxu1 %v247_v47  ;;  %v6452_v52 = vmul.f32 0.5, %v6333_v62 }
  0xc5   : > { %v994_v17 = vmul.f32 %v993_v60, %v6375_v22  ;;  %v6449_v51 = vmul.f32 0.70710677, %v440_v37  ;;  %v944_v53 = vadd.f32 0.18741608, %v943_v40  ;;  %584 = vmatmul.f32.gmra.mxu2 %v247_v47  ;;  %676 = vmatmul.f32.gmra.mxu3 %v247_v47  ;;  %v6455_v55 = vmul.f32 0.5, %v6336_v63  ;;  %v5147_v63 = vld [vmem:[%s10474_s3 + $0x1a0] sm:$0xff] }
  0xc6   : > { %5730 = vrcp.f32 %v6409_v4  ;;  %v983_v56 = vmul.f32 %v982_v42, %v6375_v22  ;;  %v6460_v60 = vmul.f32 0.5, %v6357_v10  ;;  %v1021_v61 = vmul.f32 %v1020_v43, %v6384_v32  ;;  %5450 = vmatpush.msrb.mxu3 %v5147_v63  ;;  %v5115_v43 = vld [vmem:[%s10474_s3 + $0xa0] sm:$0xff] }
  0xc7   : > { %5732 = vrcp.f32 %v6412_v9  ;;  %v995_v26 = vadd.f32 0.4994258, %v994_v17  ;;  %v1034_v5 = vmul.f32 %v1033_v44, %v6384_v32  ;;  %v1057_v62 = vmul.f32 2.1237322e-06, %v6442_v45  ;;  %v350_v17 = vpop.f32.mrf.mxu0  ;;  %5266 = vmatpush.msrb.mxu1 %v5115_v43 }
  0xc8   : > { %v905_v13 = vmul.f32 %v904_v48, %v6352_v6  ;;  %v1095_v10 = vmul.f32 %v6449_v51, %v6449_v51  ;;  %v945_v18 = vmul.f32 %v944_v53, %v6354_v7  ;;  %v6477_v20 = vmul.f32 0.5, %v6360_v11 }
  0xc9   : > { %v996_v36 = vmul.f32 %v995_v26, %v6375_v22  ;;  %v6479_v21 = vmul.f32 0.5, %v348_v14  ;;  %v6481_v23 = vmul.f32 0.5, %v440_v37  ;;  %v984_v25 = vadd.f32 0.18741608, %v983_v56 }
  0xca   : > { %v6484_v26 = vmul.f32 0.5, %v532_v59  ;;  %v6487_v27 = vadd.f32 %v623_v8, %v6346_v3  ;;  %v1022_v28 = vadd.f32 0.05243302, %v1021_v61  ;;  %v1035_v29 = vadd.f32 0.4994258, %v1034_v5 }
  0xcb   : > { %v6447_v50 = vadd.f32 1.0, %v996_v36  ;;  %10638 = vst [vmem:[#allocation3_spill] sm:$0xff] %v6479_v21  ;;  %v1058_v31 = vadd.f32 0.00028619796, %v1057_v62  ;;  %v6490_v7 = vadd.f32 %v350_v17, %v6327_v57  ;;  %v906_v11 = vadd.f32 1.1283791, %v905_v13 }
  0xcc   : > { %v6425_v30 = vpop.eup %5730  ;;  %10639 = vst [vmem:[#allocation4_spill] sm:$0xff] %v6481_v23  ;;  %v6493_v33 = vmin.f32 %v1095_v10, 16.0  ;;  %v6495_v34 = vmul.f32 0.70710677, %v532_v59  ;;  %vm923_vm0 = vweird.f32 %v6409_v4  ;;  %v927_v35 = vand.u32 2147483647, %v6409_v4  ;;  %v534_v10 = vpop.f32.mrf.mxu2 }
  0xcd   : > { %v6437_v39 = vpop.eup %5732  ;;  %v919_v41 = vmul.f32 %v6425_v30, %v6409_v4  ;;  %5734 = vrcp.f32 %v6447_v50  ;;  %10640 = vst [vmem:[#allocation5_spill] sm:$0xff] %v6484_v26  ;;  %v929_v36 = vand.u32 2147483648, %v6409_v4  ;;  %v946_v37 = vadd.f32 1.1283791, %v945_v18 }
  0xce   : > { %v959_v49 = vmul.f32 %v6437_v39, %v6412_v9  ;;  %10641 = vst [vmem:[#allocation6_spill] sm:$0xff] %v6493_v33  ;;  %vm924_vm1 = vweird.f32 %v6425_v30  ;;  %v969_v42 = vand.u32 2147483648, %v6412_v9  ;;  %v985_v44 = vmul.f32 %v984_v25, %v6375_v22  ;;  %v248_v25 = vld [vmem:[%s6174_s28 + $0xa0] sm:$0xff] }
  0xcf   : > { %v920_v54 = vsub.f32 1.0, %v919_v41  ;;  %v967_v41 = vand.u32 2147483647, %v6412_v9  ;;  %v1023_v46 = vmul.f32 %v1022_v28, %v6384_v32  ;;  %v1036_v47 = vmul.f32 %v1035_v29, %v6384_v32  ;;  %vm6523_vm3 = vmor %vm923_vm0, %vm924_vm1  ;;  %403 = vmatmul.f32.gmra.mxu0 %v248_v25  ;;  %495 = vmatmul.f32.gmra.mxu1 %v248_v25  ;;  %v353_v4 = vpop.f32.mrf.mxu0 }
  0xd0   : > { %v960_v16 = vsub.f32 1.0, %v959_v49  ;;  %v1059_v48 = vmul.f32 %v1058_v31, %v6442_v45  ;;  %v442_v49 = vpop.f32.mrf.mxu1  ;;  %vm964_vm2 = vweird.f32 %v6437_v39  ;;  %v1135_v56 = vmul.f32 %v6495_v34, %v6495_v34  ;;  %587 = vmatmul.f32.gmra.mxu2 %v248_v25  ;;  %679 = vmatmul.f32.gmra.mxu3 %v248_v25 }
  0xd1   : > { %v921_v6 = vmul.f32 %v6425_v30, %v920_v54  ;;  %v1097_v54 = vmul.f32 2.1237322e-06, %v6493_v33  ;;  %v907_v59 = vmul.f32 %v906_v11, %v6339_v0  ;;  %vm6527_vm4 = vcmp.eq.f32.partialorder %v927_v35, 8.507059e+37 }
  0xd2   : > { %v961_v14 = vmul.f32 %v6437_v39, %v960_v16  ;;  %vm963_vm5 = vweird.f32 %v6412_v9  ;;  %v930_v62 = vor.u32 1.1754944e-38, %v929_v36  ;;  %vm6537_vm6 = vcmp.eq.f32.partialorder %v967_v41, 8.507059e+37 }
  0xd3   : > { %v6500_v38 = vpop.eup %5734  ;;  %v922_v40 = vadd.f32 %v6425_v30, %v921_v6  ;;  %v6542_v8 = vadd.f32 %v442_v49, %v6329_v58  ;;  %vm6544_vm7 = vmor %vm963_vm5, %vm964_vm2  ;;  %v970_v9 = vor.u32 1.1754944e-38, %v969_v42  ;;  %v1024_v63 = vadd.f32 0.18741608, %v1023_v46 }
  0xd4   : > { %v962_v53 = vadd.f32 %v6437_v39, %v961_v14  ;;  %v999_v5 = vmul.f32 %v6500_v38, %v6447_v50  ;;  %v6548_v13 = vadd.f32 1.0, %v1036_v47  ;;  %v1060_v16 = vadd.f32 0.0036580483, %v1059_v48 }
  0xd5   : > { %v926_v0 = vsel %vm6523_vm3, %v6425_v30, %v922_v40  ;;  %v986_v17 = vadd.f32 1.1283791, %v985_v44  ;;  %v1098_v18 = vadd.f32 0.00028619796, %v1097_v54  ;;  %v6553_v6 = vmin.f32 %v1135_v56, 16.0  ;;  %v626_v56 = vpop.f32.mrf.mxu3 }
  0xd6   : > { %v966_v30 = vsel %vm6544_vm7, %v6437_v39, %v962_v53  ;;  %v931_v28 = vsel %vm6527_vm4, %v930_v62, %v926_v0  ;;  %v1000_v29 = vsub.f32 1.0, %v999_v5  ;;  %v6559_v31 = vmul.f32 0.70710677, %v6487_v27 }
  0xd7   : > { %10650 = vst [vmem:[#allocation7_spill] sm:$0xff] %v6553_v6  ;;  %v6562_v11 = vmul.f32 0.70710677, %v6490_v7  ;;  %v1007_v14 = vand.u32 2147483647, %v6447_v50  ;;  %v1009_v39 = vand.u32 2147483648, %v6447_v50  ;;  %v6570_v36 = vadd.f32 %v534_v10, %v6344_v2 }
  0xd8   : > { %v6567_v35 = vmul.f32 0.70710677, %v6542_v8  ;;  %v971_v40 = vsel %vm6537_vm6, %v970_v9, %v966_v30  ;;  %v1025_v41 = vmul.f32 %v1024_v63, %v6384_v32  ;;  %5736 = vrcp.f32 %v6548_v13 }
  0xd9   : > { %v1061_v42 = vmul.f32 %v1060_v16, %v6442_v45  ;;  %v932_v43 = vmul.f32 %v931_v28, %v907_v59  ;;  %v947_v44 = vmul.f32 %v946_v37, %v6342_v1  ;;  %v1099_v46 = vmul.f32 %v1098_v18, %v6493_v33  ;;  %v5130_v28 = vld [vmem:[%s10474_s3 + $0x118] sm:$0xff] }
  0xda   : > { %v1137_v47 = vmul.f32 2.1237322e-06, %v6553_v6  ;;  %v6581_v48 = vmul.f32 %v986_v17, %v6366_v15  ;;  %v1001_v49 = vmul.f32 %v6500_v38, %v1000_v29  ;;  %v1175_v53 = vmul.f32 %v6559_v31, %v6559_v31  ;;  %5359 = vmatpush.msrb.mxu2 %v5130_v28 }
  0xdb   : > { %v1215_v32 = vmul.f32 %v6562_v11, %v6562_v11  ;;  %v972_v54 = vmul.f32 %v971_v40, %v947_v44  ;;  %vm1003_vm8 = vweird.f32 %v6447_v50  ;;  %v1255_v1 = vmul.f32 %v6567_v35, %v6567_v35 }
  0xdc   : > { %v6592_v37 = vmul.f32 0.70710677, %v6570_v36  ;;  %vm6594_vm9 = vcmp.eq.f32.partialorder %v1007_v14, 8.507059e+37  ;;  %v1010_v59 = vor.u32 1.1754944e-38, %v1009_v39  ;;  %v1026_v22 = vadd.f32 1.1283791, %v1025_v41 }
  0xdd   : > { %v1062_v61 = vadd.f32 0.05243302, %v1061_v42  ;;  %v5619_v5 = vclamps-f32 %v932_v43, 1.0  ;;  %vm1004_vm10 = vweird.f32 %v6500_v38  ;;  %v1100_v0 = vadd.f32 0.0036580483, %v1099_v46  ;;  %v5146_v41 = vld [vmem:[%s10474_s3 + $0x198] sm:$0xff] }
  0xde   : > { %v1138_v62 = vadd.f32 0.00028619796, %v1137_v47  ;;  %v6599_v12 = vpop.eup %5736  ;;  %v1002_v9 = vadd.f32 %v6500_v38, %v1001_v49  ;;  %v6602_v63 = vmin.f32 %v1175_v53, 16.0  ;;  %v6604_v16 = vmin.f32 %v1215_v32, 16.0  ;;  %v5114_v42 = vld [vmem:[%s10474_s3 + $0x98] sm:$0xff]  ;;  %vm6638_vm11 = vmor %vm1003_vm8, %vm1004_vm10  ;;  %v445_v53 = vpop.f32.mrf.mxu1  ;;  %5451 = vmatpush.msrb.mxu3 %v5146_v41 }
  0xdf   : > { %v6607_v10 = vadd.f32 %v626_v56, %v6346_v3  ;;  %v5620_v30 = vclamps-f32 %v972_v54, 1.0  ;;  %v6610_v17 = vmul.f32 0.5, %v6487_v27  ;;  %v6612_v18 = vmin.f32 %v1255_v1, 16.0  ;;  %v5098_v27 = vld [vmem:[%s10474_s3 + $0x18] sm:$0xff]  ;;  %5267 = vmatpush.msrb.mxu1 %v5114_v42 }
  0xe0   : > { %10653 = vst [vmem:[#allocation8_spill] sm:$0xff] %v6604_v16  ;;  %v1295_v25 = vmul.f32 %v6592_v37, %v6592_v37  ;;  %v1047_v29 = vand.u32 2147483647, %v6548_v13  ;;  %v1049_v14 = vand.u32 2147483648, %v6548_v13  ;;  %v1063_v39 = vmul.f32 %v1062_v61, %v6442_v45  ;;  %5175 = vmatpush.msrb.mxu0 %v5098_v27  ;;  %v537_v27 = vpop.f32.mrf.mxu2 }
  0xe1   : > { %10654 = vst [vmem:[#allocation9_spill] sm:$0xff] %v6610_v17  ;;  %v6623_v40 = vadd.f32 %v353_v4, %v6327_v57  ;;  %v4895_v43 = vadd.f32 1.0, %v5619_v5  ;;  %v1039_v46 = vmul.f32 %v6599_v12, %v6548_v13  ;;  %v1101_v47 = vmul.f32 %v1100_v0, %v6493_v33 }
  0xe2   : > { %10655 = vst [vmem:[#allocation10_spill] sm:$0xff] %v6612_v18  ;;  %v1139_v49 = vmul.f32 %v1138_v62, %v6553_v6  ;;  %v1006_v32 = vsel %vm6638_vm11, %v6500_v38, %v1002_v9  ;;  %v1177_v50 = vmul.f32 2.1237322e-06, %v6602_v63  ;;  %v1217_v54 = vmul.f32 2.1237322e-06, %v6604_v16  ;;  %v249_v62 = vld [vmem:[%s6174_s28 + $0xa8] sm:$0xff] }
  0xe3   : > { %v6652_v1 = vmul.f32 0.70710677, %v6607_v10  ;;  %v4896_v56 = vadd.f32 1.0, %v5620_v30  ;;  %v6655_v61 = vmul.f32 %v1026_v22, %v6371_v19  ;;  %v1257_v5 = vmul.f32 2.1237322e-06, %v6612_v18  ;;  %406 = vmatmul.f32.gmra.mxu0 %v249_v62  ;;  %498 = vmatmul.f32.gmra.mxu1 %v249_v62 }
  0xe4   : > { %v6658_v0 = vmin.f32 %v1295_v25, 16.0  ;;  %v6661_v4 = vor.u32 1.1754944e-38, %v1049_v14  ;;  %v1064_v38 = vadd.f32 0.18741608, %v1063_v39  ;;  %v6664_v9 = vmul.f32 0.70710677, %v6623_v40  ;;  %590 = vmatmul.f32.gmra.mxu2 %v249_v62  ;;  %682 = vmatmul.f32.gmra.mxu3 %v249_v62 }
  0xe5   : > { %v6667_v28 = vadd.f32 %v445_v53, %v6329_v58  ;;  %v1011_v19 = vsel %vm6594_vm9, %v1010_v59, %v1006_v32  ;;  %v1040_v22 = vsub.f32 1.0, %v1039_v46  ;;  %v1102_v30 = vadd.f32 0.05243302, %v1101_v47 }
  0xe6   : > { %10658 = vst [vmem:[#allocation11_spill] sm:$0xff] %v6658_v0  ;;  %v1140_v25 = vadd.f32 0.0036580483, %v1139_v49  ;;  %v6672_v14 = vmul.f32 %v4895_v43, %v6452_v52  ;;  %v1178_v39 = vadd.f32 0.00028619796, %v1177_v50  ;;  %v1335_v42 = vmul.f32 %v6652_v1, %v6652_v1 }
  0xe7   : > { %v1218_v41 = vadd.f32 0.00028619796, %v1217_v54  ;;  %v6677_v44 = vmul.f32 %v4896_v56, %v6455_v55  ;;  %vm1043_vm12 = vweird.f32 %v6548_v13  ;;  %v1258_v15 = vadd.f32 0.00028619796, %v1257_v5  ;;  %v629_v55 = vpop.f32.mrf.mxu3 }
  0xe8   : > { %v1297_v59 = vmul.f32 2.1237322e-06, %v6658_v0  ;;  %v6682_v46 = vadd.f32 %v537_v27, %v6344_v2  ;;  %v1012_v47 = vmul.f32 %v1011_v19, %v6581_v48  ;;  %v1065_v52 = vmul.f32 %v1064_v38, %v6442_v45  ;;  %v540_v23 = vpop.f32.mrf.mxu2 }
  0xe9   : > { %v1375_v43 = vmul.f32 %v6664_v9, %v6664_v9  ;;  %v6689_v49 = vmul.f32 0.70710677, %v6667_v28  ;;  %v1041_v53 = vmul.f32 %v6599_v12, %v1040_v22  ;;  %v1103_v32 = vmul.f32 %v1102_v30, %v6493_v33  ;;  %v356_v22 = vpop.f32.mrf.mxu0 }
  0xea   : > { %v1141_v50 = vmul.f32 %v1140_v25, %v6553_v6  ;;  %v6695_v54 = vmul.f32 0.5, %v6490_v7  ;;  %vm1044_vm13 = vweird.f32 %v6599_v12  ;;  %v1179_v48 = vmul.f32 %v1178_v39, %v6602_v63 }
  0xeb   : > { %v1219_v56 = vmul.f32 %v1218_v41, %v6604_v16  ;;  %v6700_v5 = vmin.f32 %v1335_v42, 16.0  ;;  %vm6702_vm14 = vcmp.eq.f32.partialorder %v1047_v29, 8.507059e+37  ;;  %v1259_v38 = vmul.f32 %v1258_v15, %v6612_v18  ;;  %vm6735_vm15 = vmor %vm1043_vm12, %vm1044_vm13 }
  0xec   : > { %10659 = vst [vmem:[#allocation12_spill] sm:$0xff] %v6695_v54  ;;  %v1298_v27 = vadd.f32 0.00028619796, %v1297_v59  ;;  %v6708_v19 = vmul.f32 0.70710677, %v6682_v46  ;;  %v6711_v7 = vadd.f32 %v629_v55, %v6346_v3  ;;  %v5621_v30 = vclamps-f32 %v1012_v47, 1.0 }
  0xed   : > { %10660 = vst [vmem:[#allocation13_spill] sm:$0xff] %v6700_v5  ;;  %v1066_v25 = vadd.f32 1.1283791, %v1065_v52  ;;  %v6713_v39 = vmin.f32 %v1375_v43, 16.0  ;;  %v1415_v29 = vmul.f32 %v6689_v49, %v6689_v49  ;;  %v1042_v41 = vadd.f32 %v6599_v12, %v1041_v53 }
  0xee   : > { %v1104_v42 = vadd.f32 0.18741608, %v1103_v32  ;;  %v1142_v54 = vadd.f32 0.05243302, %v1141_v50  ;;  %v6719_v15 = vmul.f32 0.5, %v6542_v8  ;;  %v6723_v26 = vadd.f32 %v356_v22, %v6327_v57  ;;  %v448_v32 = vpop.f32.mrf.mxu1 }
  0xef   : > { %10663 = vst [vmem:[#allocation14_spill] sm:$0xff] %v6713_v39  ;;  %v1180_v59 = vadd.f32 0.0036580483, %v1179_v48  ;;  %v1220_v17 = vadd.f32 0.0036580483, %v1219_v56  ;;  %v1299_v52 = vmul.f32 %v1298_v27, %v6658_v0  ;;  %v1455_v43 = vmul.f32 %v6708_v19, %v6708_v19 }
  0xf0   : > { %10664 = vst [vmem:[#allocation15_spill] sm:$0xff] %v6719_v15  ;;  %v1337_v55 = vmul.f32 2.1237322e-06, %v6700_v5  ;;  %v1260_v47 = vadd.f32 0.0036580483, %v1259_v38  ;;  %v4897_v50 = vadd.f32 1.0, %v5621_v30  ;;  %v6740_v48 = vmul.f32 %v1066_v25, %v6422_v24 }
  0xf1   : > { %v6729_v53 = vmul.f32 0.70710677, %v6711_v7  ;;  %v1377_v56 = vmul.f32 2.1237322e-06, %v6713_v39  ;;  %v6743_v38 = vmin.f32 %v1415_v29, 16.0  ;;  %v1046_v27 = vsel %vm6735_vm15, %v6599_v12, %v1042_v41 }
  0xf2   : > { %10667 = vst [vmem:[#allocation16_spill] sm:$0xff] %v6740_v48  ;;  %v1105_v22 = vmul.f32 %v1104_v42, %v6493_v33  ;;  %v1143_v13 = vmul.f32 %v1142_v54, %v6553_v6  ;;  %v6751_v30 = vmul.f32 0.70710677, %v6723_v26  ;;  %v1181_v15 = vmul.f32 %v1180_v59, %v6602_v63 }
  0xf3   : > { %10668 = vst [vmem:[#allocation17_spill] sm:$0xff] %v6743_v38  ;;  %v1221_v24 = vmul.f32 %v1220_v17, %v6604_v16  ;;  %v1338_v25 = vadd.f32 0.00028619796, %v1337_v55  ;;  %v6756_v29 = vadd.f32 %v448_v32, %v6329_v58  ;;  %v1261_v8 = vmul.f32 %v1260_v47, %v6612_v18  ;;  %v250_v32 = vld [vmem:[%s6174_s28 + $0xb0] sm:$0xff] }
  0xf4   : > { %v1300_v12 = vadd.f32 0.0036580483, %v1299_v52  ;;  %v6759_v41 = vmin.f32 %v1455_v43, 16.0  ;;  %v1495_v54 = vmul.f32 %v6729_v53, %v6729_v53  ;;  %v1051_v42 = vsel %vm6702_vm14, %v6661_v4, %v1046_v27  ;;  %409 = vmatmul.f32.gmra.mxu0 %v250_v32  ;;  %501 = vmatmul.f32.gmra.mxu1 %v250_v32 }
  0xf5   : > { %v1378_v59 = vadd.f32 0.00028619796, %v1377_v56  ;;  %v1417_v17 = vmul.f32 2.1237322e-06, %v6743_v38  ;;  %v1535_v55 = vmul.f32 %v6751_v30, %v6751_v30  ;;  %v6771_v21 = vmul.f32 %v4897_v50, %v6460_v60  ;;  %593 = vmatmul.f32.gmra.mxu2 %v250_v32  ;;  %685 = vmatmul.f32.gmra.mxu3 %v250_v32 }
  0xf6   : > { %10669 = vst [vmem:[#allocation18_spill] sm:$0xff] %v6759_v41  ;;  %v1106_v47 = vadd.f32 1.1283791, %v1105_v22  ;;  %v1144_v52 = vadd.f32 0.18741608, %v1143_v13  ;;  %v6774_v43 = vadd.f32 %v540_v23, %v6344_v2  ;;  %v1339_v4 = vmul.f32 %v1338_v25, %v6700_v5  ;;  %v5129_v25 = vld [vmem:[%s10474_s3 + $0x110] sm:$0xff] }
  0xf7   : > { %v1182_v48 = vadd.f32 0.05243302, %v1181_v15  ;;  %v1222_v62 = vadd.f32 0.05243302, %v1221_v24  ;;  %v6778_v56 = vmul.f32 0.70710677, %v6756_v29  ;;  %v1052_v27 = vmul.f32 %v1051_v42, %v6655_v61  ;;  %5360 = vmatpush.msrb.mxu2 %v5129_v25 }
  0xf8   : > { %v1262_v60 = vadd.f32 0.05243302, %v1261_v8  ;;  %v1457_v50 = vmul.f32 2.1237322e-06, %v6759_v41  ;;  %v6782_v22 = vmin.f32 %v1495_v54, 16.0  ;;  %v1301_v23 = vmul.f32 %v1300_v12, %v6658_v0 }
  0xf9   : > { %10670 = vst [vmem:[#allocation19_spill] sm:$0xff] %v6778_v56  ;;  %v1379_v13 = vmul.f32 %v1378_v59, %v6713_v39  ;;  %v1418_v15 = vadd.f32 0.00028619796, %v1417_v17  ;;  %v6786_v24 = vmin.f32 %v1535_v55, 16.0  ;;  %v1145_v32 = vmul.f32 %v1144_v52, %v6553_v6  ;;  %v632_v6 = vpop.f32.mrf.mxu3 }
  0xfa   : > { %10671 = vst [vmem:[#allocation20_spill] sm:$0xff] %v6782_v22  ;;  %v6793_v61 = vmul.f32 0.5, %v6570_v36  ;;  %v1575_v8 = vmul.f32 %v6778_v56, %v6778_v56  ;;  %v6798_v54 = vmul.f32 0.70710677, %v6774_v43  ;;  %v6801_v12 = vmul.f32 %v1106_v47, %v6449_v51 }
  0xfb   : > { %10672 = vst [vmem:[#allocation21_spill] sm:$0xff] %v6786_v24  ;;  %v1183_v42 = vmul.f32 %v1182_v48, %v6602_v63  ;;  %v1223_v59 = vmul.f32 %v1222_v62, %v6604_v16  ;;  %v1340_v17 = vadd.f32 0.0036580483, %v1339_v4  ;;  %v5622_v55 = vclamps-f32 %v1052_v27, 1.0 }
  0xfc   : > { %10673 = vst [vmem:[#allocation22_spill] sm:$0xff] %v6793_v61  ;;  %v1263_v52 = vmul.f32 %v1262_v60, %v6612_v18  ;;  %v1458_v36 = vadd.f32 0.00028619796, %v1457_v50  ;;  %v1497_v61 = vmul.f32 2.1237322e-06, %v6782_v22  ;;  %v1419_v56 = vmul.f32 %v1418_v15, %v6743_v38 }
  0xfd   : > { %10674 = vst [vmem:[#allocation23_spill] sm:$0xff] %v6798_v54  ;;  %v1302_v33 = vadd.f32 0.05243302, %v1301_v23  ;;  %v1380_v45 = vadd.f32 0.0036580483, %v1379_v13  ;;  %v6810_v47 = vmul.f32 0.5, %v6607_v10  ;;  %v1615_v62 = vmul.f32 %v6798_v54, %v6798_v54  ;;  %v359_v23 = vpop.f32.mrf.mxu0 }
  0xfe   : > { %10675 = vst [vmem:[#allocation24_spill] sm:$0xff] %v6801_v12  ;;  %v1537_v25 = vmul.f32 2.1237322e-06, %v6786_v24  ;;  %v1146_v51 = vadd.f32 1.1283791, %v1145_v32  ;;  %v6812_v48 = vmin.f32 %v1575_v8, 16.0  ;;  %v1341_v60 = vmul.f32 %v1340_v17, %v6700_v5 }
  0xff   : > { %10676 = vst [vmem:[#allocation25_spill] sm:$0xff] %v6810_v47  ;;  %v1184_v4 = vadd.f32 0.18741608, %v1183_v42  ;;  %v1224_v27 = vadd.f32 0.18741608, %v1223_v59  ;;  %v6818_v50 = vadd.f32 %v632_v6, %v6346_v3  ;;  %v5097_v13 = vld [vmem:[%s10474_s3 + $0x10] sm:$0xff]  ;;  %v1459_v8 = vmul.f32 %v1458_v36, %v6759_v41 }
 0x100   : > { %10677 = vst [vmem:[#allocation26_spill] sm:$0xff] %v6812_v48  ;;  %v5145_v10 = vld [vmem:[%s10474_s3 + $0x190] sm:$0xff]  ;;  %v4898_v15 = vadd.f32 1.0, %v5622_v55  ;;  %v1264_v32 = vadd.f32 0.18741608, %v1263_v52  ;;  %5176 = vmatpush.msrb.mxu0 %v5097_v13  ;;  %v1303_v59 = vmul.f32 %v1302_v33, %v6658_v0  ;;  %v1381_v17 = vmul.f32 %v1380_v45, %v6713_v39 }
 0x101   : > { %v1498_v42 = vadd.f32 0.00028619796, %v1497_v61  ;;  %5452 = vmatpush.msrb.mxu3 %v5145_v10  ;;  %v5113_v6 = vld [vmem:[%s10474_s3 + $0x90] sm:$0xff]  ;;  %v1420_v47 = vadd.f32 0.0036580483, %v1419_v56  ;;  %v6833_v54 = vmul.f32 %v1146_v51, %v6495_v34  ;;  %v6836_v52 = vmin.f32 %v1615_v62, 16.0  ;;  %v451_v62 = vpop.f32.mrf.mxu1 }
 0x102   : > { %v1538_v12 = vadd.f32 0.00028619796, %v1537_v25  ;;  %5268 = vmatpush.msrb.mxu1 %v5113_v6  ;;  %v1577_v55 = vmul.f32 2.1237322e-06, %v6812_v48  ;;  %v6839_v61 = vadd.f32 %v359_v23, %v6327_v57  ;;  %v1185_v36 = vmul.f32 %v1184_v4, %v6602_v63 }
 0x103   : > { %10678 = vst [vmem:[#allocation27_spill] sm:$0xff] %v6833_v54  ;;  %v1342_v13 = vadd.f32 0.05243302, %v1341_v60  ;;  %v6843_v33 = vmul.f32 0.5, %v6623_v40  ;;  %v6846_v45 = vmul.f32 0.70710677, %v6818_v50  ;;  %v1225_v56 = vmul.f32 %v1224_v27, %v6604_v16 }
 0x104   : > { %10679 = vst [vmem:[#allocation28_spill] sm:$0xff] %v6836_v52  ;;  %v1265_v34 = vmul.f32 %v1264_v32, %v6612_v18  ;;  %v1460_v25 = vadd.f32 0.0036580483, %v1459_v8  ;;  %v1499_v51 = vmul.f32 %v1498_v42, %v6782_v22  ;;  %v1304_v10 = vadd.f32 0.18741608, %v1303_v59 }
 0x105   : > { %10680 = vst [vmem:[#allocation29_spill] sm:$0xff] %v6843_v33  ;;  %v1382_v23 = vadd.f32 0.05243302, %v1381_v17  ;;  %v1421_v4 = vmul.f32 %v1420_v47, %v6743_v38  ;;  %v1539_v60 = vmul.f32 %v1538_v12, %v6786_v24  ;;  %v6854_v40 = vmul.f32 %v4898_v15, %v6477_v20  ;;  %v251_v17 = vld [vmem:[%s6174_s28 + $0xb8] sm:$0xff] }
 0x106   : > { %v1578_v6 = vadd.f32 0.00028619796, %v1577_v55  ;;  %v1617_v33 = vmul.f32 2.1237322e-06, %v6836_v52  ;;  %v6858_v27 = vmul.f32 0.70710677, %v6839_v61  ;;  %v1343_v8 = vmul.f32 %v1342_v13, %v6700_v5  ;;  %412 = vmatmul.f32.gmra.mxu0 %v251_v17  ;;  %504 = vmatmul.f32.gmra.mxu1 %v251_v17 }
 0x107   : > { %v1186_v32 = vadd.f32 1.1283791, %v1185_v36  ;;  %v1655_v42 = vmul.f32 %v6846_v45, %v6846_v45  ;;  %v6864_v59 = vadd.f32 %v451_v62, %v6329_v58  ;;  %v1226_v47 = vadd.f32 1.1283791, %v1225_v56  ;;  %v543_v56 = vpop.f32.mrf.mxu2  ;;  %596 = vmatmul.f32.gmra.mxu2 %v251_v17  ;;  %688 = vmatmul.f32.gmra.mxu3 %v251_v17 }
 0x108   : > { %v6867_v12 = vmul.f32 0.5, %v6667_v28  ;;  %v1461_v20 = vmul.f32 %v1460_v25, %v6759_v41  ;;  %v1500_v15 = vadd.f32 0.0036580483, %v1499_v51  ;;  %v1266_v55 = vadd.f32 1.1283791, %v1265_v34 }
 0x109   : > { %v1305_v54 = vmul.f32 %v1304_v10, %v6658_v0  ;;  %v1422_v36 = vadd.f32 0.05243302, %v1421_v4  ;;  %v1540_v18 = vadd.f32 0.0036580483, %v1539_v60  ;;  %v1383_v13 = vmul.f32 %v1382_v23, %v6713_v39 }
 0x10a   : > { %10681 = vst [vmem:[#allocation30_spill] sm:$0xff] %v6867_v12  ;;  %v1579_v62 = vmul.f32 %v1578_v6, %v6812_v48  ;;  %v1618_v16 = vadd.f32 0.00028619796, %v1617_v33  ;;  %v1695_v28 = vmul.f32 %v6858_v27, %v6858_v27  ;;  %v1344_v25 = vadd.f32 0.18741608, %v1343_v8  ;;  %v5128_v6 = vld [vmem:[%s10474_s3 + $0x108] sm:$0xff] }
 0x10b   : > { %v6877_v34 = vmul.f32 0.5, %v6682_v46  ;;  %v6879_v51 = vmin.f32 %v1655_v42, 16.0  ;;  %v6882_v10 = vmul.f32 0.70710677, %v6864_v59  ;;  %v6885_v23 = vmul.f32 %v1186_v32, %v6559_v31  ;;  %v5096_v46 = vld [vmem:[%s10474_s3 + $0x8] sm:$0xff]  ;;  %5361 = vmatpush.msrb.mxu2 %v5128_v6 }
 0x10c   : > { %v1462_v4 = vadd.f32 0.05243302, %v1461_v20  ;;  %v6888_v33 = vmul.f32 0.5, %v6711_v7  ;;  %v1501_v60 = vmul.f32 %v1500_v15, %v6782_v22  ;;  %v5144_v8 = vld [vmem:[%s10474_s3 + $0x188] sm:$0xff]  ;;  %v1306_v31 = vadd.f32 1.1283791, %v1305_v54  ;;  %5177 = vmatpush.msrb.mxu0 %v5096_v46 }
 0x10d   : > { %10682 = vst [vmem:[#allocation31_spill] sm:$0xff] %v6877_v34  ;;  %v1423_v32 = vmul.f32 %v1422_v36, %v6743_v38  ;;  %v1541_v7 = vmul.f32 %v1540_v18, %v6786_v24  ;;  %v6903_v42 = vadd.f32 %v543_v56, %v6344_v2  ;;  %v5112_v20 = vld [vmem:[%s10474_s3 + $0x88] sm:$0xff]  ;;  %v1384_v15 = vadd.f32 0.18741608, %v1383_v13  ;;  %5453 = vmatpush.msrb.mxu3 %v5144_v8  ;;  %v362_v8 = vpop.f32.mrf.mxu0 }
 0x10e   : > { %10683 = vst [vmem:[#allocation32_spill] sm:$0xff] %v6879_v51  ;;  %v1580_v17 = vadd.f32 0.0036580483, %v1579_v62  ;;  %v6909_v34 = vmin.f32 %v1695_v28, 16.0  ;;  %5269 = vmatpush.msrb.mxu1 %v5112_v20  ;;  %v6912_v54 = vmul.f32 %v1226_v47, %v6562_v11  ;;  %v1345_v18 = vmul.f32 %v1344_v25, %v6700_v5  ;;  %v635_v28 = vpop.f32.mrf.mxu3 }
 0x10f   : > { %10684 = vst [vmem:[#allocation33_spill] sm:$0xff] %v6885_v23  ;;  %v1657_v36 = vmul.f32 2.1237322e-06, %v6879_v51  ;;  %v1735_v56 = vmul.f32 %v6882_v10, %v6882_v10  ;;  %v6919_v6 = vmul.f32 %v1266_v55, %v6567_v35  ;;  %v1463_v13 = vmul.f32 %v1462_v4, %v6759_v41  ;;  %v546_v12 = vpop.f32.mrf.mxu2 }
 0x110   : > { %10685 = vst [vmem:[#allocation34_spill] sm:$0xff] %v6888_v33  ;;  %v1619_v33 = vmul.f32 %v1618_v16, %v6836_v52  ;;  %v1502_v16 = vadd.f32 0.05243302, %v1501_v60  ;;  %v6923_v62 = vmul.f32 0.5, %v6723_v26  ;;  %v6926_v11 = vmul.f32 %v1306_v31, %v6592_v37 }
 0x111   : > { %10686 = vst [vmem:[#allocation35_spill] sm:$0xff] %v6909_v34  ;;  %v1424_v47 = vadd.f32 0.18741608, %v1423_v32  ;;  %v1542_v25 = vadd.f32 0.05243302, %v1541_v7  ;;  %v1385_v20 = vmul.f32 %v1384_v15, %v6713_v39  ;;  %v1581_v35 = vmul.f32 %v1580_v17, %v6812_v48 }
 0x112   : > { %10687 = vst [vmem:[#allocation36_spill] sm:$0xff] %v6912_v54  ;;  %v6929_v46 = vmul.f32 0.70710677, %v6903_v42  ;;  %v1620_v55 = vadd.f32 0.0036580483, %v1619_v33  ;;  %v6937_v37 = vadd.f32 %v635_v28, %v6346_v3  ;;  %v1503_v32 = vmul.f32 %v1502_v16, %v6782_v22 }
 0x113   : > { %10688 = vst [vmem:[#allocation37_spill] sm:$0xff] %v6919_v6  ;;  %v1697_v4 = vmul.f32 2.1237322e-06, %v6909_v34  ;;  %v1346_v26 = vadd.f32 1.1283791, %v1345_v18  ;;  %v6941_v7 = vmul.f32 0.5, %v6756_v29  ;;  %v6944_v15 = vadd.f32 %v362_v8, %v6327_v57 }
 0x114   : > { %10689 = vst [vmem:[#allocation38_spill] sm:$0xff] %v6923_v62  ;;  %v1658_v60 = vadd.f32 0.00028619796, %v1657_v36  ;;  %v6934_v62 = vmin.f32 %v1735_v56, 16.0  ;;  %v1464_v31 = vadd.f32 0.18741608, %v1463_v13  ;;  %v1425_v33 = vmul.f32 %v1424_v47, %v6743_v38  ;;  %v454_v56 = vpop.f32.mrf.mxu1 }
 0x115   : > { %10690 = vst [vmem:[#allocation39_spill] sm:$0xff] %v6926_v11  ;;  %v1543_v17 = vmul.f32 %v1542_v25, %v6786_v24  ;;  %v6949_v18 = vmul.f32 0.5, %v6774_v43  ;;  %v1775_v36 = vmul.f32 %v6929_v46, %v6929_v46  ;;  %v252_v13 = vld [vmem:[%s6174_s28 + $0xc0] sm:$0xff]  ;;  %v1386_v28 = vadd.f32 1.1283791, %v1385_v20 }
 0x116   : > { %10691 = vst [vmem:[#allocation40_spill] sm:$0xff] %v6934_v62  ;;  %v1582_v16 = vadd.f32 0.05243302, %v1581_v35  ;;  %v1621_v29 = vmul.f32 %v1620_v55, %v6836_v52  ;;  %415 = vmatmul.f32.gmra.mxu0 %v252_v13  ;;  %507 = vmatmul.f32.gmra.mxu1 %v252_v13  ;;  %v6956_v47 = vmul.f32 %v1346_v26, %v6652_v1  ;;  %v1737_v43 = vmul.f32 2.1237322e-06, %v6934_v62  ;;  %v5127_v20 = vld [vmem:[%s10474_s3 + $0x100] sm:$0xff] }
 0x117   : > { %10692 = vst [vmem:[#allocation41_spill] sm:$0xff] %v6941_v7  ;;  %v1698_v7 = vadd.f32 0.00028619796, %v1697_v4  ;;  %v1659_v25 = vmul.f32 %v1658_v60, %v6879_v51  ;;  %v6961_v8 = vmul.f32 0.70710677, %v6937_v37  ;;  %599 = vmatmul.f32.gmra.mxu2 %v252_v13  ;;  %691 = vmatmul.f32.gmra.mxu3 %v252_v13  ;;  %v1465_v35 = vmul.f32 %v1464_v31, %v6759_v41 }
 0x118   : > { %10693 = vst [vmem:[#allocation42_spill] sm:$0xff] %v6949_v18  ;;  %v1504_v55 = vadd.f32 0.18741608, %v1503_v32  ;;  %v6968_v4 = vmul.f32 0.70710677, %v6944_v15  ;;  %v6971_v1 = vadd.f32 %v454_v56, %v6329_v58  ;;  %5362 = vmatpush.msrb.mxu2 %v5127_v20  ;;  %v6973_v18 = vmin.f32 %v1775_v36, 16.0 }
 0x119   : > { %10694 = vst [vmem:[#allocation43_spill] sm:$0xff] %v6956_v47  ;;  %v1426_v26 = vadd.f32 1.1283791, %v1425_v33  ;;  %v1544_v60 = vadd.f32 0.18741608, %v1543_v17  ;;  %v6976_v47 = vadd.f32 %v546_v12, %v6344_v2  ;;  %v6979_v11 = vmul.f32 %v1386_v28, %v6664_v9  ;;  %v638_v17 = vpop.f32.mrf.mxu3 }
 0x11a   : > { %10695 = vst [vmem:[#allocation44_spill] sm:$0xff] %v6973_v18  ;;  %v1583_v31 = vmul.f32 %v1582_v16, %v6812_v48  ;;  %v1622_v32 = vadd.f32 0.05243302, %v1621_v29  ;;  %v1699_v13 = vmul.f32 %v1698_v7, %v6909_v34  ;;  %v6984_v41 = vmul.f32 0.5, %v6818_v50  ;;  %v5095_v50 = vld [vmem:[%s10474_s3] sm:$0xff] }
 0x11b   : > { %10696 = vst [vmem:[#allocation45_spill] sm:$0xff] %v6979_v11  ;;  %v1660_v56 = vadd.f32 0.0036580483, %v1659_v25  ;;  %v1738_v20 = vadd.f32 0.00028619796, %v1737_v43  ;;  %v1815_v33 = vmul.f32 %v6961_v8, %v6961_v8  ;;  %v1505_v12 = vmul.f32 %v1504_v55, %v6782_v22  ;;  %v5143_v7 = vld [vmem:[%s10474_s3 + $0x180] sm:$0xff]  ;;  %5178 = vmatpush.msrb.mxu0 %v5095_v50 }
 0x11c   : > { %10697 = vst [vmem:[#allocation46_spill] sm:$0xff] %v6984_v41  ;;  %v1466_v36 = vadd.f32 1.1283791, %v1465_v35  ;;  %v1855_v9 = vmul.f32 %v6968_v4, %v6968_v4  ;;  %v6992_v28 = vmul.f32 0.70710677, %v6971_v1  ;;  %v7001_v16 = vmul.f32 %v1426_v26, %v6689_v49  ;;  %5454 = vmatpush.msrb.mxu3 %v5143_v7  ;;  %v5111_v35 = vld [vmem:[%s10474_s3 + $0x80] sm:$0xff]  ;;  %v365_v26 = vpop.f32.mrf.mxu0 }
 0x11d   : > { %v1545_v29 = vmul.f32 %v1544_v60, %v6786_v24  ;;  %v1777_v25 = vmul.f32 2.1237322e-06, %v6973_v18  ;;  %v7006_v43 = vmul.f32 0.70710677, %v6976_v47  ;;  %v1584_v55 = vadd.f32 0.18741608, %v1583_v31  ;;  %5270 = vmatpush.msrb.mxu1 %v5111_v35 }
 0x11e   : > { %10698 = vst [vmem:[#allocation47_spill] sm:$0xff] %v7001_v16  ;;  %v1623_v41 = vmul.f32 %v1622_v32, %v6836_v52  ;;  %v1700_v11 = vadd.f32 0.0036580483, %v1699_v13  ;;  %v7013_v49 = vadd.f32 %v638_v17, %v6346_v3  ;;  %5179 = vmatmul.f32.vlgmr.msrb.gmra.mxu0 %v6672_v14  ;;  %v1661_v60 = vmul.f32 %v1660_v56, %v6879_v51 }
 0x11f   : > { %v7018_v50 = vmul.f32 0.5, %v6839_v61  ;;  %v1739_v7 = vmul.f32 %v1738_v20, %v6934_v62  ;;  %v7021_v16 = vmin.f32 %v1815_v33, 16.0  ;;  %5271 = vmatmul.f32.vlgmr.msrb.gmra.mxu1 %v6677_v44  ;;  %5363 = vmatmul.f32.vlgmr.msrb.gmra.mxu2 %v6771_v21  ;;  %v1506_v31 = vadd.f32 1.1283791, %v1505_v12  ;;  %v457_v21 = vpop.f32.mrf.mxu1 }
 0x120   : > { %v7026_v32 = vmul.f32 0.5, %v6864_v59  ;;  %v7028_v13 = vmin.f32 %v1855_v9, 16.0  ;;  %v1895_v14 = vmul.f32 %v6992_v28, %v6992_v28  ;;  %5455 = vmatmul.f32.vlgmr.msrb.gmra.mxu3 %v6854_v40  ;;  %v1546_v61 = vadd.f32 1.1283791, %v1545_v29 }
 0x121   : > { %10699 = vst [vmem:[#allocation48_spill] sm:$0xff] %v7018_v50  ;;  %v1778_v56 = vadd.f32 0.00028619796, %v1777_v25  ;;  %v1935_v20 = vmul.f32 %v7006_v43, %v7006_v43  ;;  %v7036_v44 = vadd.f32 %v365_v26, %v6327_v57  ;;  %v1585_v33 = vmul.f32 %v1584_v55, %v6812_v48 }
 0x122   : > { %10700 = vst [vmem:[#allocation49_spill] sm:$0xff] %v7021_v16  ;;  %v1624_v59 = vadd.f32 0.18741608, %v1623_v41  ;;  %v1701_v17 = vmul.f32 %v1700_v11, %v6909_v34  ;;  %v7041_v12 = vmul.f32 0.70710677, %v7013_v49  ;;  %v7044_v9 = vmul.f32 %v1466_v36, %v6708_v19 }
 0x123   : > { %10701 = vst [vmem:[#allocation50_spill] sm:$0xff] %v7026_v32  ;;  %v1662_v40 = vadd.f32 0.05243302, %v1661_v60  ;;  %v1740_v29 = vadd.f32 0.0036580483, %v1739_v7  ;;  %v7048_v35 = vmul.f32 0.5, %v6903_v42  ;;  %v7054_v41 = vadd.f32 %v457_v21, %v6329_v58  ;;  %v549_v60 = vpop.f32.mrf.mxu2 }
 0x124   : > { %10702 = vst [vmem:[#allocation51_spill] sm:$0xff] %v7028_v13  ;;  %v1817_v25 = vmul.f32 2.1237322e-06, %v7021_v16  ;;  %v1857_v26 = vmul.f32 2.1237322e-06, %v7028_v13  ;;  %v7051_v32 = vmin.f32 %v1895_v14, 16.0  ;;  %v7057_v11 = vmul.f32 %v1506_v31, %v6729_v53 }
 0x125   : > { %10703 = vst [vmem:[#allocation52_spill] sm:$0xff] %v7044_v9  ;;  %v1779_v19 = vmul.f32 %v1778_v56, %v6973_v18  ;;  %v7060_v36 = vmin.f32 %v1935_v20, 16.0  ;;  %v7063_v55 = vmul.f32 0.70710677, %v7036_v44  ;;  %v7066_v42 = vmul.f32 %v1546_v61, %v6751_v30  ;;  %v641_v61 = vpop.f32.mrf.mxu3  ;;  %v368_v9 = vpop.f32.mrf.mxu0 }
 0x126   : > { %10704 = vst [vmem:[#allocation53_spill] sm:$0xff] %v7048_v35  ;;  %v1586_v7 = vadd.f32 1.1283791, %v1585_v33  ;;  %v1702_v14 = vadd.f32 0.05243302, %v1701_v17  ;;  %v1975_v21 = vmul.f32 %v7041_v12, %v7041_v12  ;;  %v1625_v35 = vmul.f32 %v1624_v59, %v6836_v52 }
 0x127   : > { %10705 = vst [vmem:[#allocation54_spill] sm:$0xff] %v7057_v11  ;;  %v1663_v53 = vmul.f32 %v1662_v40, %v6879_v51  ;;  %v1741_v31 = vmul.f32 %v1740_v29, %v6934_v62  ;;  %v1818_v56 = vadd.f32 0.00028619796, %v1817_v25  ;;  %v1858_v20 = vadd.f32 0.00028619796, %v1857_v26  ;;  %v10709_v29 = vld [vmem:[#allocation19_spill] sm:$0xff] }
 0x128   : > { %10706 = vst [vmem:[#allocation55_spill] sm:$0xff] %v7060_v36  ;;  %v1897_v50 = vmul.f32 2.1237322e-06, %v7051_v32  ;;  %v7075_v11 = vmul.f32 0.70710677, %v7054_v41  ;;  %v7078_v30 = vadd.f32 %v549_v60, %v6344_v2  ;;  %v7081_v17 = vmul.f32 0.5, %v6937_v37 }
 0x129   : > { %10707 = vst [vmem:[#allocation56_spill] sm:$0xff] %v7066_v42  ;;  %v1780_v33 = vadd.f32 0.0036580483, %v1779_v19  ;;  %v1937_v59 = vmul.f32 2.1237322e-06, %v7060_v36  ;;  %v2015_v40 = vmul.f32 %v7063_v55, %v7063_v55  ;;  %v7087_v25 = vmul.f32 %v1586_v7, %v10709_v29 }
 0x12a   : > { %10708 = vst [vmem:[#allocation57_spill] sm:$0xff] %v7081_v17  ;;  %v1703_v26 = vmul.f32 %v1702_v14, %v6909_v34  ;;  %v7090_v42 = vmin.f32 %v1975_v21, 16.0  ;;  %v2055_v60 = vmul.f32 %v7075_v11, %v7075_v11  ;;  %v1664_v52 = vadd.f32 0.18741608, %v1663_v53 }
 0x12b   : > { %10710 = vst [vmem:[#allocation19_spill] sm:$0xff] %v7087_v25  ;;  %v1742_v19 = vadd.f32 0.05243302, %v1741_v31  ;;  %v1819_v37 = vmul.f32 %v1818_v56, %v7021_v16  ;;  %v7096_v17 = vadd.f32 %v641_v61, %v6346_v3  ;;  %v1626_v48 = vadd.f32 1.1283791, %v1625_v35 }
 0x12c   : > { %v1859_v24 = vmul.f32 %v1858_v20, %v7028_v13  ;;  %v1898_v7 = vadd.f32 0.00028619796, %v1897_v50  ;;  %v7100_v29 = vmul.f32 0.70710677, %v7078_v30  ;;  %v1781_v14 = vmul.f32 %v1780_v33, %v6973_v18 }
 0x12d   : > { %v7104_v21 = vmul.f32 0.5, %v6944_v15  ;;  %v1938_v53 = vadd.f32 0.00028619796, %v1937_v59  ;;  %v7106_v31 = vmin.f32 %v2015_v40, 16.0  ;;  %v1704_v56 = vadd.f32 0.18741608, %v1703_v26 }
 0x12e   : > { %v1977_v61 = vmul.f32 2.1237322e-06, %v7090_v42  ;;  %v7109_v25 = vmin.f32 %v2055_v60, 16.0  ;;  %v7112_v35 = vadd.f32 %v368_v9, %v6327_v57  ;;  %v1665_v50 = vmul.f32 %v1664_v52, %v6879_v51  ;;  %v10714_v15 = vld [vmem:[#allocation23_spill] sm:$0xff] }
 0x12f   : > { %10711 = vst [vmem:[#allocation58_spill] sm:$0xff] %v7104_v21  ;;  %v1743_v20 = vmul.f32 %v1742_v19, %v6934_v62  ;;  %v1820_v22 = vadd.f32 0.0036580483, %v1819_v37  ;;  %v7117_v33 = vmul.f32 0.70710677, %v7096_v17  ;;  %v7120_v59 = vmul.f32 %v1626_v48, %v10714_v15 }
 0x130   : > { %10712 = vst [vmem:[#allocation59_spill] sm:$0xff] %v7106_v31  ;;  %v1860_v40 = vadd.f32 0.0036580483, %v1859_v24  ;;  %v1899_v26 = vmul.f32 %v1898_v7, %v7051_v32  ;;  %v2095_v60 = vmul.f32 %v7100_v29, %v7100_v29  ;;  %v1782_v21 = vadd.f32 0.05243302, %v1781_v14  ;;  %v460_v7 = vpop.f32.mrf.mxu1 }
 0x131   : > { %10713 = vst [vmem:[#allocation60_spill] sm:$0xff] %v7109_v25  ;;  %v7126_v9 = vmul.f32 0.5, %v6971_v1  ;;  %v1939_v52 = vmul.f32 %v1938_v53, %v7060_v36  ;;  %v2017_v19 = vmul.f32 2.1237322e-06, %v7106_v31  ;;  %v1705_v37 = vmul.f32 %v1704_v56, %v6909_v34 }
 0x132   : > { %10715 = vst [vmem:[#allocation23_spill] sm:$0xff] %v7120_v59  ;;  %v1978_v51 = vadd.f32 0.00028619796, %v1977_v61  ;;  %v2057_v48 = vmul.f32 2.1237322e-06, %v7109_v25  ;;  %v1821_v14 = vmul.f32 %v1820_v22, %v7021_v16  ;;  %v2135_v1 = vmul.f32 %v7117_v33, %v7117_v33  ;;  %v552_v61 = vpop.f32.mrf.mxu2 }
 0x133   : > { %10716 = vst [vmem:[#allocation61_spill] sm:$0xff] %v7126_v9  ;;  %v7133_v24 = vmul.f32 0.70710677, %v7112_v35  ;;  %v1666_v15 = vadd.f32 1.1283791, %v1665_v50  ;;  %v1861_v53 = vmul.f32 %v1860_v40, %v7028_v13  ;;  %v7139_v6 = vmin.f32 %v2095_v60, 16.0 }
 0x134   : > { %v1744_v59 = vadd.f32 0.18741608, %v1743_v20  ;;  %v1900_v9 = vadd.f32 0.0036580483, %v1899_v26  ;;  %v7144_v34 = vmul.f32 0.5, %v6976_v47  ;;  %v7147_v20 = vadd.f32 %v460_v7, %v6329_v58 }
 0x135   : > { %10717 = vst [vmem:[#allocation62_spill] sm:$0xff] %v7139_v6  ;;  %v2175_v56 = vmul.f32 %v7133_v24, %v7133_v24  ;;  %v1940_v38 = vadd.f32 0.0036580483, %v1939_v52  ;;  %v2018_v50 = vadd.f32 0.00028619796, %v2017_v19  ;;  %v1783_v54 = vmul.f32 %v1782_v21, %v6973_v18 }
 0x136   : > { %10718 = vst [vmem:[#allocation63_spill] sm:$0xff] %v7144_v34  ;;  %v1706_v22 = vadd.f32 1.1283791, %v1705_v37  ;;  %v1979_v40 = vmul.f32 %v1978_v51, %v7090_v42  ;;  %v2058_v26 = vadd.f32 0.00028619796, %v2057_v48  ;;  %v7151_v39 = vmin.f32 %v2135_v1, 16.0 }
 0x137   : > { %v1822_v60 = vadd.f32 0.05243302, %v1821_v14  ;;  %v7153_v5 = vmin.f32 %v2175_v56, 16.0  ;;  %v7156_v0 = vadd.f32 %v552_v61, %v6344_v2  ;;  %v1745_v47 = vmul.f32 %v1744_v59, %v6934_v62 }
 0x138   : > { %10719 = vst [vmem:[#allocation64_spill] sm:$0xff] %v7151_v39  ;;  %v1862_v52 = vadd.f32 0.05243302, %v1861_v53  ;;  %v1901_v19 = vmul.f32 %v1900_v9, %v7051_v32  ;;  %v2097_v37 = vmul.f32 2.1237322e-06, %v7139_v6  ;;  %v7162_v21 = vmul.f32 %v1666_v15, %v6846_v45  ;;  %v644_v9 = vpop.f32.mrf.mxu3 }
 0x139   : > { %10720 = vst [vmem:[#allocation65_spill] sm:$0xff] %v7153_v5  ;;  %v1941_v51 = vmul.f32 %v1940_v38, %v7060_v36  ;;  %v2019_v48 = vmul.f32 %v2018_v50, %v7106_v31  ;;  %v7167_v7 = vmul.f32 0.70710677, %v7147_v20  ;;  %v7170_v14 = vmul.f32 %v1706_v22, %v6858_v27 }
 0x13a   : > { %10721 = vst [vmem:[#allocation66_spill] sm:$0xff] %v7162_v21  ;;  %v1784_v1 = vadd.f32 0.18741608, %v1783_v54  ;;  %v1980_v59 = vadd.f32 0.0036580483, %v1979_v40  ;;  %v2059_v53 = vmul.f32 %v2058_v26, %v7109_v25  ;;  %v1823_v56 = vmul.f32 %v1822_v60, %v7021_v16 }
 0x13b   : > { %10722 = vst [vmem:[#allocation67_spill] sm:$0xff] %v7170_v14  ;;  %v2137_v45 = vmul.f32 2.1237322e-06, %v7151_v39  ;;  %v2177_v15 = vmul.f32 2.1237322e-06, %v7153_v5  ;;  %v1863_v50 = vmul.f32 %v1862_v52, %v7028_v13  ;;  %v2215_v40 = vmul.f32 %v7167_v7, %v7167_v7 }
 0x13c   : > { %v7177_v38 = vmul.f32 0.70710677, %v7156_v0  ;;  %v1746_v61 = vadd.f32 1.1283791, %v1745_v47  ;;  %v1902_v34 = vadd.f32 0.05243302, %v1901_v19  ;;  %v7183_v26 = vadd.f32 %v644_v9, %v6346_v3 }
 0x13d   : > { %v2098_v27 = vadd.f32 0.00028619796, %v2097_v37  ;;  %v1942_v22 = vadd.f32 0.05243302, %v1941_v51  ;;  %v2020_v54 = vadd.f32 0.0036580483, %v2019_v48  ;;  %v1785_v60 = vmul.f32 %v1784_v1, %v6973_v18  ;;  %v371_v51 = vpop.f32.mrf.mxu0 }
 0x13e   : > { %v7187_v14 = vmul.f32 0.5, %v7013_v49  ;;  %v1981_v21 = vmul.f32 %v1980_v59, %v7090_v42  ;;  %v2060_v47 = vadd.f32 0.0036580483, %v2059_v53  ;;  %v1824_v62 = vadd.f32 0.18741608, %v1823_v56 }
 0x13f   : > { %v2138_v52 = vadd.f32 0.00028619796, %v2137_v45  ;;  %v2178_v19 = vadd.f32 0.00028619796, %v2177_v15  ;;  %v2255_v37 = vmul.f32 %v7177_v38, %v7177_v38  ;;  %v1864_v48 = vadd.f32 0.18741608, %v1863_v50 }
 0x140   : > { %10723 = vst [vmem:[#allocation68_spill] sm:$0xff] %v7187_v14  ;;  %v1903_v23 = vmul.f32 %v1902_v34, %v7051_v32  ;;  %v7194_v9 = vmul.f32 0.5, %v7036_v44  ;;  %v2099_v1 = vmul.f32 %v2098_v27, %v7139_v6  ;;  %v1943_v49 = vmul.f32 %v1942_v22, %v7060_v36 }
 0x141   : > { %v2021_v59 = vmul.f32 %v2020_v54, %v7106_v31  ;;  %v7199_v53 = vmin.f32 %v2215_v40, 16.0  ;;  %v7202_v56 = vmul.f32 0.70710677, %v7183_v26  ;;  %v1786_v45 = vadd.f32 1.1283791, %v1785_v60  ;;  %v463_v54 = vpop.f32.mrf.mxu1 }
 0x142   : > { %10724 = vst [vmem:[#allocation69_spill] sm:$0xff] %v7194_v9  ;;  %v1982_v15 = vadd.f32 0.05243302, %v1981_v21  ;;  %v2061_v50 = vmul.f32 %v2060_v47, %v7109_v25  ;;  %v7206_v34 = vadd.f32 %v371_v51, %v6327_v57  ;;  %v1825_v44 = vmul.f32 %v1824_v62, %v7021_v16 }
 0x143   : > { %10725 = vst [vmem:[#allocation70_spill] sm:$0xff] %v7199_v53  ;;  %v2139_v27 = vmul.f32 %v2138_v52, %v7151_v39  ;;  %v2179_v22 = vmul.f32 %v2178_v19, %v7153_v5  ;;  %v7211_v9 = vmin.f32 %v2255_v37, 16.0  ;;  %v1865_v40 = vmul.f32 %v1864_v48, %v7028_v13 }
 0x144   : > { %10726 = vst [vmem:[#allocation71_spill] sm:$0xff] %v7202_v56  ;;  %v1904_v14 = vadd.f32 0.18741608, %v1903_v23  ;;  %v7215_v60 = vmul.f32 0.5, %v7054_v41  ;;  %v2100_v21 = vadd.f32 0.0036580483, %v2099_v1  ;;  %v2295_v62 = vmul.f32 %v7202_v56, %v7202_v56 }
 0x145   : > { %10727 = vst [vmem:[#allocation72_spill] sm:$0xff] %v7211_v9  ;;  %v1944_v47 = vadd.f32 0.18741608, %v1943_v49  ;;  %v2022_v18 = vadd.f32 0.05243302, %v2021_v59  ;;  %v1983_v52 = vmul.f32 %v1982_v15, %v7090_v42  ;;  %v7225_v48 = vadd.f32 %v463_v54, %v6329_v58 }
 0x146   : > { %10728 = vst [vmem:[#allocation73_spill] sm:$0xff] %v7215_v60  ;;  %v2217_v51 = vmul.f32 2.1237322e-06, %v7199_v53  ;;  %v2062_v19 = vadd.f32 0.05243302, %v2061_v50  ;;  %v7228_v23 = vmul.f32 %v1746_v61, %v6882_v10  ;;  %v7232_v59 = vmul.f32 %v1786_v45, %v6929_v46 }
 0x147   : > { %v7222_v37 = vmul.f32 0.70710677, %v7206_v34  ;;  %v2140_v41 = vadd.f32 0.0036580483, %v2139_v27  ;;  %v2180_v1 = vadd.f32 0.0036580483, %v2179_v22  ;;  %v1905_v15 = vmul.f32 %v1904_v14, %v7051_v32 }
 0x148   : > { %v2257_v49 = vmul.f32 2.1237322e-06, %v7211_v9  ;;  %v1826_v60 = vadd.f32 1.1283791, %v1825_v44  ;;  %v2101_v50 = vmul.f32 %v2100_v21, %v7139_v6  ;;  %v1866_v13 = vadd.f32 1.1283791, %v1865_v40 }
 0x149   : > { %v2023_v16 = vmul.f32 %v2022_v18, %v7106_v31  ;;  %v2218_v54 = vadd.f32 0.00028619796, %v2217_v51  ;;  %v7237_v56 = vmin.f32 %v2295_v62, 16.0  ;;  %v1984_v10 = vadd.f32 0.18741608, %v1983_v52 }
 0x14a   : > { %v2063_v61 = vmul.f32 %v2062_v19, %v7109_v25  ;;  %v2335_v27 = vmul.f32 %v7222_v37, %v7222_v37  ;;  %v7243_v46 = vmul.f32 0.70710677, %v7225_v48  ;;  %v1945_v45 = vmul.f32 %v1944_v47, %v7060_v36 }
 0x14b   : > { %10729 = vst [vmem:[#allocation74_spill] sm:$0xff] %v7237_v56  ;;  %v2141_v14 = vmul.f32 %v2140_v41, %v7151_v39  ;;  %v2181_v44 = vmul.f32 %v2180_v1, %v7153_v5  ;;  %v2258_v22 = vadd.f32 0.00028619796, %v2257_v49  ;;  %v7249_v18 = vmul.f32 %v1826_v60, %v6961_v8  ;;  %v555_v41 = vpop.f32.mrf.mxu2 }
 0x14c   : > { %v1906_v40 = vadd.f32 1.1283791, %v1905_v15  ;;  %v7252_v21 = vmul.f32 0.5, %v7078_v30  ;;  %v2102_v51 = vadd.f32 0.05243302, %v2101_v50  ;;  %v7255_v62 = vmul.f32 %v1866_v13, %v6968_v4 }
 0x14d   : > { %v2024_v52 = vadd.f32 0.18741608, %v2023_v16  ;;  %v2219_v19 = vmul.f32 %v2218_v54, %v7199_v53  ;;  %v2297_v47 = vmul.f32 2.1237322e-06, %v7237_v56  ;;  %v1985_v1 = vmul.f32 %v1984_v10, %v7090_v42 }
 0x14e   : > { %10730 = vst [vmem:[#allocation75_spill] sm:$0xff] %v7252_v21  ;;  %v2064_v49 = vadd.f32 0.18741608, %v2063_v61  ;;  %v7260_v36 = vmin.f32 %v2335_v27, 16.0  ;;  %v2375_v8 = vmul.f32 %v7243_v46, %v7243_v46  ;;  %v1946_v30 = vadd.f32 1.1283791, %v1945_v45 }
 0x14f   : > { %10731 = vst [vmem:[#allocation76_spill] sm:$0xff] %v7255_v62  ;;  %v2142_v60 = vadd.f32 0.05243302, %v2141_v14  ;;  %v2182_v15 = vadd.f32 0.05243302, %v2181_v44  ;;  %v2259_v4 = vmul.f32 %v2258_v22, %v7211_v9  ;;  %v7266_v16 = vmul.f32 %v1906_v40, %v6992_v28  ;;  %v647_v14 = vpop.f32.mrf.mxu3  ;;  %v10800_v62 = vld [vmem:[#allocation45_spill] sm:$0xff] }
 0x150   : > { %10732 = vst [vmem:[#allocation77_spill] sm:$0xff] %v7260_v36  ;;  %v2103_v13 = vmul.f32 %v2102_v51, %v7139_v6  ;;  %v7270_v50 = vmul.f32 0.5, %v7096_v17  ;;  %v556_v54 = vadd.f32 %v555_v41, %v6344_v2  ;;  %v2025_v10 = vmul.f32 %v2024_v52, %v7106_v31 }
 0x151   : > { %10733 = vst [vmem:[#allocation78_spill] sm:$0xff] %v7266_v16  ;;  %v7275_v61 = vmul.f32 0.5, %v7112_v35  ;;  %v2220_v27 = vadd.f32 0.0036580483, %v2219_v19  ;;  %v2298_v45 = vadd.f32 0.00028619796, %v2297_v47  ;;  %v2065_v22 = vmul.f32 %v2064_v49, %v7109_v25 }
 0x152   : > { %10734 = vst [vmem:[#allocation79_spill] sm:$0xff] %v7270_v50  ;;  %v1986_v44 = vadd.f32 1.1283791, %v1985_v1  ;;  %v2337_v28 = vmul.f32 2.1237322e-06, %v7260_v36  ;;  %v7279_v40 = vmin.f32 %v2375_v8, 16.0  ;;  %v7282_v17 = vmul.f32 %v1946_v30, %v7006_v43 }
 0x153   : > { %10735 = vst [vmem:[#allocation80_spill] sm:$0xff] %v7275_v61  ;;  %v2143_v51 = vmul.f32 %v2142_v60, %v7151_v39  ;;  %v2183_v52 = vmul.f32 %v2182_v15, %v7153_v5  ;;  %v2260_v41 = vadd.f32 0.0036580483, %v2259_v4  ;;  %v2104_v35 = vadd.f32 0.18741608, %v2103_v13 }
 0x154   : > { %10736 = vst [vmem:[#allocation81_spill] sm:$0xff] %v7279_v40  ;;  %v7287_v19 = vmul.f32 0.5, %v7147_v20  ;;  %v7289_v47 = vmul.f32 0.70710677, %v556_v54  ;;  %v7292_v1 = vadd.f32 %v647_v14, %v6346_v3  ;;  %v2026_v49 = vadd.f32 1.1283791, %v2025_v10 }
 0x155   : > { %10737 = vst [vmem:[#allocation82_spill] sm:$0xff] %v7282_v17  ;;  %v2221_v8 = vmul.f32 %v2220_v27, %v7199_v53  ;;  %v7296_v43 = vmul.f32 0.5, %v7156_v0  ;;  %v2299_v30 = vmul.f32 %v2298_v45, %v7237_v56  ;;  %v7300_v60 = vmul.f32 %v1986_v44, %v7041_v12  ;;  %v10742_v12 = vld [vmem:[#allocation2_spill] sm:$0xff] }
 0x156   : > { %10738 = vst [vmem:[#allocation83_spill] sm:$0xff] %v7287_v19  ;;  %v2066_v15 = vadd.f32 1.1283791, %v2065_v22  ;;  %v2338_v4 = vadd.f32 0.00028619796, %v2337_v28  ;;  %v2261_v14 = vmul.f32 %v2260_v41, %v7211_v9  ;;  %v7305_v10 = vmul.f32 0.5, %v7183_v26 }
 0x157   : > { %10739 = vst [vmem:[#allocation84_spill] sm:$0xff] %v7296_v43  ;;  %v2377_v20 = vmul.f32 2.1237322e-06, %v7279_v40  ;;  %v2144_v13 = vadd.f32 0.18741608, %v2143_v51  ;;  %v2105_v27 = vmul.f32 %v2104_v35, %v7139_v6  ;;  %v2415_v0 = vmul.f32 %v7289_v47, %v7289_v47 }
 0x158   : > { %10740 = vst [vmem:[#allocation85_spill] sm:$0xff] %v7300_v60  ;;  %v2184_v19 = vadd.f32 0.18741608, %v2183_v52  ;;  %v7311_v45 = vmul.f32 0.70710677, %v7292_v1  ;;  %v7315_v22 = vmul.f32 %v2026_v49, %v7063_v55  ;;  %v10744_v52 = vld [vmem:[#allocation6_spill] sm:$0xff]  ;;  %v7319_v26 = vmul.f32 %v2066_v15, %v7075_v11  ;;  %v374_v55 = vpop.f32.mrf.mxu0 }
 0x159   : > { %10741 = vst [vmem:[#allocation86_spill] sm:$0xff] %v7305_v10  ;;  %v1068_v44 = vmul.f32 3.8918573e-05, %v10742_v12  ;;  %v2222_v28 = vadd.f32 0.05243302, %v2221_v8  ;;  %v7322_v35 = vmul.f32 0.5, %v7206_v34  ;;  %v2339_v10 = vmul.f32 %v2338_v4, %v7260_v36 }
 0x15a   : > { %10743 = vst [vmem:[#allocation2_spill] sm:$0xff] %v7315_v22  ;;  %v2300_v51 = vadd.f32 0.0036580483, %v2299_v30  ;;  %v1108_v41 = vmul.f32 3.8918573e-05, %v10744_v52  ;;  %v2145_v61 = vmul.f32 %v2144_v13, %v7151_v39  ;;  %v2185_v50 = vmul.f32 %v2184_v19, %v7153_v5 }
 0x15b   : > { %10745 = vst [vmem:[#allocation6_spill] sm:$0xff] %v7319_v26  ;;  %v2378_v43 = vadd.f32 0.00028619796, %v2377_v20  ;;  %v2262_v21 = vadd.f32 0.05243302, %v2261_v14  ;;  %v7327_v30 = vmin.f32 %v2415_v0, 16.0  ;;  %v2455_v11 = vmul.f32 %v7311_v45, %v7311_v45 }
 0x15c   : > { %10746 = vst [vmem:[#allocation87_spill] sm:$0xff] %v7322_v35  ;;  %v1069_v49 = vadd.f32 0.001143296, %v1068_v44  ;;  %v2106_v8 = vadd.f32 1.1283791, %v2105_v27  ;;  %v2223_v34 = vmul.f32 %v2222_v28, %v7199_v53  ;;  %v2301_v35 = vmul.f32 %v2300_v51, %v7237_v56 }
 0x15d   : > { %10747 = vst [vmem:[#allocation88_spill] sm:$0xff] %v7327_v30  ;;  %v1109_v15 = vadd.f32 0.001143296, %v1108_v41  ;;  %v7334_v4 = vmul.f32 0.5, %v7225_v48  ;;  %v2340_v19 = vadd.f32 0.0036580483, %v2339_v10  ;;  %v2379_v13 = vmul.f32 %v2378_v43, %v7279_v40 }
 0x15e   : > { %v1070_v20 = vmul.f32 %v1069_v49, %v10742_v12  ;;  %v7339_v14 = vadd.f32 %v374_v55, %v6327_v57  ;;  %v2146_v0 = vadd.f32 1.1283791, %v2145_v61  ;;  %v2186_v44 = vadd.f32 1.1283791, %v2185_v50  ;;  %v10751_v55 = vld [vmem:[#allocation7_spill] sm:$0xff] }
 0x15f   : > { %10748 = vst [vmem:[#allocation89_spill] sm:$0xff] %v7334_v4  ;;  %v1110_v27 = vmul.f32 %v1109_v15, %v10744_v52  ;;  %v2263_v41 = vmul.f32 %v2262_v21, %v7211_v9  ;;  %v7343_v26 = vmul.f32 0.5, %v556_v54  ;;  %v2417_v48 = vmul.f32 2.1237322e-06, %v7327_v30  ;;  %v466_v21 = vpop.f32.mrf.mxu1 }
 0x160   : > { %v1071_v28 = vadd.f32 0.014752088, %v1070_v20  ;;  %v7346_v51 = vmin.f32 %v2455_v11, 16.0  ;;  %v2224_v10 = vadd.f32 0.18741608, %v2223_v34  ;;  %v2341_v15 = vmul.f32 %v2340_v19, %v7260_v36 }
 0x161   : > { %10749 = vst [vmem:[#allocation90_spill] sm:$0xff] %v7343_v26  ;;  %v1111_v49 = vadd.f32 0.014752088, %v1110_v27  ;;  %v2302_v4 = vadd.f32 0.05243302, %v2301_v35  ;;  %v7356_v20 = vmul.f32 %v2106_v8, %v7100_v29  ;;  %v7359_v35 = vmul.f32 %v2146_v0, %v7117_v33 }
 0x162   : > { %10750 = vst [vmem:[#allocation91_spill] sm:$0xff] %v7346_v51  ;;  %v1072_v43 = vmul.f32 %v1071_v28, %v10742_v12  ;;  %v1148_v22 = vmul.f32 3.8918573e-05, %v10751_v55  ;;  %v2380_v61 = vadd.f32 0.0036580483, %v2379_v13  ;;  %v7363_v13 = vadd.f32 %v466_v21, %v6329_v58 }
 0x163   : > { %v7352_v50 = vmul.f32 0.70710677, %v7339_v14  ;;  %v1112_v54 = vmul.f32 %v1111_v49, %v10744_v52  ;;  %10752 = vst [vmem:[#allocation7_spill] sm:$0xff] %v7356_v20  ;;  %v2264_v11 = vadd.f32 0.18741608, %v2263_v41  ;;  %v2225_v0 = vmul.f32 %v2224_v10, %v7199_v53 }
 0x164   : > { %v1073_v27 = vadd.f32 0.112945676, %v1072_v43  ;;  %v1149_v34 = vadd.f32 0.001143296, %v1148_v22  ;;  %10753 = vst [vmem:[#allocation92_spill] sm:$0xff] %v7359_v35  ;;  %v2381_v41 = vmul.f32 %v2380_v61, %v7279_v40 }
 0x165   : > { %v2418_v28 = vadd.f32 0.00028619796, %v2417_v48  ;;  %v2457_v26 = vmul.f32 2.1237322e-06, %v7346_v51  ;;  %v1113_v19 = vadd.f32 0.112945676, %v1112_v54  ;;  %v2495_v33 = vmul.f32 %v7352_v50, %v7352_v50 }
 0x166   : > { %v1074_v5 = vmul.f32 %v1073_v27, %v10742_v12  ;;  %v1150_v49 = vmul.f32 %v1149_v34, %v10751_v55  ;;  %v1188_v29 = vmul.f32 3.8918573e-05, %v6602_v63  ;;  %v2342_v8 = vadd.f32 0.05243302, %v2341_v15 }
 0x167   : > { %v1114_v22 = vmul.f32 %v1113_v19, %v10744_v52  ;;  %v2303_v54 = vmul.f32 %v2302_v4, %v7237_v56  ;;  %v2419_v27 = vmul.f32 %v2418_v28, %v7327_v30  ;;  %v2458_v34 = vadd.f32 0.00028619796, %v2457_v26 }
 0x168   : > { %v1075_v48 = vadd.f32 0.4994258, %v1074_v5  ;;  %v1151_v43 = vadd.f32 0.014752088, %v1150_v49  ;;  %v1189_v21 = vadd.f32 0.001143296, %v1188_v29  ;;  %v2265_v10 = vmul.f32 %v2264_v11, %v7211_v9 }
 0x169   : > { %v1115_v35 = vadd.f32 0.4994258, %v1114_v22  ;;  %v7376_v15 = vmul.f32 0.70710677, %v7363_v13  ;;  %v2382_v5 = vadd.f32 0.05243302, %v2381_v41  ;;  %v2343_v28 = vmul.f32 %v2342_v8, %v7260_v36 }
 0x16a   : > { %v1076_v61 = vmul.f32 %v1075_v48, %v10742_v12  ;;  %v1152_v20 = vmul.f32 %v1151_v43, %v10751_v55  ;;  %v1190_v19 = vmul.f32 %v1189_v21, %v6602_v63  ;;  %v7382_v49 = vmin.f32 %v2495_v33, 16.0  ;;  %v10755_v22 = vld [vmem:[#allocation8_spill] sm:$0xff] }
 0x16b   : > { %v1116_v4 = vmul.f32 %v1115_v35, %v10744_v52  ;;  %v1228_v53 = vmul.f32 3.8918573e-05, %v10755_v22  ;;  %v2420_v39 = vadd.f32 0.0036580483, %v2419_v27  ;;  %v2459_v12 = vmul.f32 %v2458_v34, %v7346_v51 }
 0x16c   : > { %10754 = vst [vmem:[#allocation93_spill] sm:$0xff] %v7382_v49  ;;  %v7386_v26 = vadd.f32 1.0, %v1076_v61  ;;  %v1153_v29 = vadd.f32 0.112945676, %v1152_v20  ;;  %v1191_v43 = vadd.f32 0.014752088, %v1190_v19  ;;  %v7393_v11 = vmul.f32 %v2186_v44, %v7133_v24 }
 0x16d   : > { %v7390_v48 = vadd.f32 1.0, %v1116_v4  ;;  %v2226_v41 = vadd.f32 1.1283791, %v2225_v0  ;;  %v2535_v52 = vmul.f32 %v7376_v15, %v7376_v15  ;;  %v2266_v35 = vadd.f32 1.1283791, %v2265_v10 }
 0x16e   : > { %10756 = vst [vmem:[#allocation8_spill] sm:$0xff] %v7393_v11  ;;  %5738 = vrcp.f32 %v7386_v26  ;;  %v2304_v8 = vadd.f32 0.18741608, %v2303_v54  ;;  %v2497_v20 = vmul.f32 2.1237322e-06, %v7382_v49  ;;  %v2383_v21 = vmul.f32 %v2382_v5, %v7279_v40  ;;  %v10763_v11 = vld [vmem:[#allocation16_spill] sm:$0xff] }
 0x16f   : > { %5740 = vrcp.f32 %v7390_v48  ;;  %v2344_v33 = vadd.f32 0.18741608, %v2343_v28  ;;  %v1154_v27 = vmul.f32 %v1153_v29, %v10751_v55  ;;  %v1229_v34 = vadd.f32 0.001143296, %v1228_v53 }
 0x170   : > { %v2421_v24 = vmul.f32 %v2420_v39, %v7327_v30  ;;  %v7404_v44 = vmul.f32 0.5, %v7292_v1  ;;  %v2460_v0 = vadd.f32 0.0036580483, %v2459_v12  ;;  %v1192_v61 = vmul.f32 %v1191_v43, %v6602_v63 }
 0x171   : > { %v7408_v54 = vmul.f32 %v2226_v41, %v7167_v7  ;;  %v7411_v19 = vmul.f32 0.5, %v7339_v14  ;;  %v7413_v10 = vmin.f32 %v2535_v52, 16.0  ;;  %v1155_v5 = vadd.f32 0.4994258, %v1154_v27 }
 0x172   : > { %10757 = vst [vmem:[#allocation94_spill] sm:$0xff] %v7404_v44  ;;  %v7416_v4 = vmul.f32 %v2266_v35, %v7177_v38  ;;  %v7419_v39 = vmul.f32 %v2304_v8, %v7237_v56  ;;  %v2498_v53 = vadd.f32 0.00028619796, %v2497_v20  ;;  %v1193_v1 = vadd.f32 0.112945676, %v1192_v61 }
 0x173   : > { %10758 = vst [vmem:[#allocation95_spill] sm:$0xff] %v7408_v54  ;;  %v7422_v29 = vmul.f32 %v2344_v33, %v7260_v36  ;;  %v7424_v7 = vadd.f32 0.18741608, %v2383_v21  ;;  %v1156_v14 = vmul.f32 %v1155_v5, %v10751_v55  ;;  %v1230_v12 = vmul.f32 %v1229_v34, %v10755_v22  ;;  %v10762_v21 = vld [vmem:[#allocation10_spill] sm:$0xff] }
 0x174   : > { %10759 = vst [vmem:[#allocation96_spill] sm:$0xff] %v7411_v19  ;;  %v5739_v28 = vpop.eup %5738  ;;  %v2422_v41 = vadd.f32 0.05243302, %v2421_v24  ;;  %v7429_v38 = vmul.f32 %v2460_v0, %v7346_v51  ;;  %v1194_v35 = vmul.f32 %v1193_v1, %v6602_v63  ;;  %v2537_v8 = vmul.f32 2.1237322e-06, %v7413_v10  ;;  %v558_v1 = vpop.f32.mrf.mxu2 }
 0x175   : > { %10760 = vst [vmem:[#allocation97_spill] sm:$0xff] %v7413_v10  ;;  %v5741_v43 = vpop.eup %5740  ;;  %v1079_v52 = vmul.f32 %v5739_v28, %v7386_v26  ;;  %v7435_v33 = vadd.f32 1.0, %v1156_v14  ;;  %v1268_v27 = vmul.f32 3.8918573e-05, %v10762_v21  ;;  %v2499_v55 = vmul.f32 %v2498_v53, %v7382_v49 }
 0x176   : > { %10761 = vst [vmem:[#allocation98_spill] sm:$0xff] %v7416_v4  ;;  %v1119_v20 = vmul.f32 %v5741_v43, %v7390_v48  ;;  %v1087_v24 = vand.u32 2147483647, %v7386_v26  ;;  %v1195_v61 = vadd.f32 0.4994258, %v1194_v35  ;;  %v1089_v0 = vand.u32 2147483648, %v7386_v26 }
 0x177   : > { %v1080_v34 = vsub.f32 1.0, %v1079_v52  ;;  %5742 = vrcp.f32 %v7435_v33  ;;  %v1231_v19 = vadd.f32 0.014752088, %v1230_v12  ;;  %vm1084_vm0 = vweird.f32 %v5739_v28 }
 0x178   : > { %v1120_v5 = vsub.f32 1.0, %v1119_v20  ;;  %v1129_v14 = vand.u32 2147483648, %v7390_v48  ;;  %v1196_v4 = vmul.f32 %v1195_v61, %v6602_v63  ;;  %vm1083_vm1 = vweird.f32 %v7386_v26 }
 0x179   : > { %v1081_v44 = vmul.f32 %v5739_v28, %v1080_v34  ;;  %vm1124_vm2 = vweird.f32 %v5741_v43  ;;  %v1127_v52 = vand.u32 2147483647, %v7390_v48  ;;  %vm1123_vm3 = vweird.f32 %v7390_v48  ;;  %vm1085_vm4 = vmor %vm1083_vm1, %vm1084_vm0 }
 0x17a   : > { %v1121_v53 = vmul.f32 %v5741_v43, %v1120_v5  ;;  %v7447_v20 = vadd.f32 1.0, %v1196_v4  ;;  %v7450_v54 = vadd.f32 %v558_v1, %v6344_v2  ;;  %v1090_v12 = vor.u32 1.1754944e-38, %v1089_v0  ;;  %vm1125_vm6 = vmor %vm1123_vm3, %vm1124_vm2 }
 0x17b   : > { %v1082_v35 = vadd.f32 %v5739_v28, %v1081_v44  ;;  %v1232_v36 = vmul.f32 %v1231_v19, %v10755_v22  ;;  %v1269_v63 = vadd.f32 0.001143296, %v1268_v27  ;;  %vm1088_vm5 = vcmp.eq.f32.partialorder %v1087_v24, 8.507059e+37  ;;  %v650_v19 = vpop.f32.mrf.mxu3  ;;  %v10764_v27 = vld [vmem:[#allocation24_spill] sm:$0xff] }
 0x17c   : > { %v1122_v34 = vadd.f32 %v5741_v43, %v1121_v53  ;;  %v1130_v26 = vor.u32 1.1754944e-38, %v1129_v14  ;;  %5744 = vrcp.f32 %v7447_v20  ;;  %v2538_v5 = vadd.f32 0.00028619796, %v2537_v8 }
 0x17d   : > { %v1086_v61 = vsel %vm1085_vm4, %v5739_v28, %v1082_v35  ;;  %v5743_v44 = vpop.eup %5742  ;;  %vm1128_vm7 = vcmp.eq.f32.partialorder %v1127_v52, 8.507059e+37  ;;  %v7457_v53 = vmul.f32 0.70710677, %v7450_v54  ;;  %v2423_v28 = vmul.f32 %v2422_v41, %v7327_v30 }
 0x17e   : > { %v1091_v48 = vsel %vm1088_vm5, %v1090_v12, %v1086_v61  ;;  %v1126_v4 = vsel %vm1125_vm6, %v5741_v43, %v1122_v34  ;;  %v1159_v0 = vmul.f32 %v5743_v44, %v7435_v33  ;;  %v1233_v14 = vadd.f32 0.112945676, %v1232_v36 }
 0x17f   : > { %v1092_v1 = vmul.f32 %v1091_v48, %v10763_v11  ;;  %v1131_v56 = vsel %vm1128_vm7, %v1130_v26, %v1126_v4  ;;  %v1270_v35 = vmul.f32 %v1269_v63, %v10762_v21  ;;  %v2500_v8 = vadd.f32 0.0036580483, %v2499_v55 }
 0x180   : > { %v1132_v24 = vmul.f32 %v1131_v56, %v10764_v27  ;;  %v1160_v43 = vsub.f32 1.0, %v1159_v0  ;;  %v1167_v52 = vand.u32 2147483647, %v7435_v33  ;;  %v2539_v11 = vmul.f32 %v2538_v5, %v7413_v10  ;;  %v10765_v5 = vld [vmem:[#allocation3_spill] sm:$0xff] }
 0x181   : > { %v5623_v12 = vclamps-f32 %v1092_v1, 1.0  ;;  %v1169_v61 = vand.u32 2147483648, %v7435_v33  ;;  %v7466_v26 = vadd.f32 %v650_v19, %v6346_v3  ;;  %vm1164_vm8 = vweird.f32 %v5743_v44  ;;  %v10766_v19 = vld [vmem:[#allocation4_spill] sm:$0xff] }
 0x182   : > { %v5624_v34 = vclamps-f32 %v1132_v24, 1.0  ;;  %v5745_v48 = vpop.eup %5744  ;;  %v1161_v4 = vmul.f32 %v5743_v44, %v1160_v43  ;;  %v2575_v36 = vmul.f32 %v7457_v53, %v7457_v53  ;;  %v1234_v63 = vmul.f32 %v1233_v14, %v10755_v22 }
 0x183   : > { %v4899_v41 = vadd.f32 1.0, %v5623_v12  ;;  %v1199_v55 = vmul.f32 %v5745_v48, %v7447_v20  ;;  %v1271_v1 = vadd.f32 0.014752088, %v1270_v35  ;;  %vm1163_vm9 = vweird.f32 %v7435_v33 }
 0x184   : > { %v4900_v56 = vadd.f32 1.0, %v5624_v34  ;;  %v1162_v27 = vadd.f32 %v5743_v44, %v1161_v4  ;;  %vm1168_vm10 = vcmp.eq.f32.partialorder %v1167_v52, 8.507059e+37  ;;  %vm1165_vm11 = vmor %vm1163_vm9, %vm1164_vm8  ;;  %v1170_v12 = vor.u32 1.1754944e-38, %v1169_v61 }
 0x185   : > { %v4999_v0 = vmul.f32 %v4899_v41, %v10765_v5  ;;  %v1200_v43 = vsub.f32 1.0, %v1199_v55  ;;  %v7476_v9 = vmul.f32 0.70710677, %v7466_v26  ;;  %v1207_v60 = vand.u32 2147483647, %v7447_v20  ;;  %v10768_v55 = vld [vmem:[#allocation27_spill] sm:$0xff] }
 0x186   : > { %v5000_v24 = vmul.f32 %v4900_v56, %v10766_v19  ;;  %v1166_v34 = vsel %vm1165_vm11, %v5743_v44, %v1162_v27  ;;  %v1209_v14 = vand.u32 2147483648, %v7447_v20  ;;  %v7480_v35 = vmin.f32 %v2575_v36, 16.0 }
 0x187   : > { %5182 = vmatmul.f32.gmra.mxu0 %v4999_v0  ;;  %v1171_v41 = vsel %vm1168_vm10, %v1170_v12, %v1166_v34  ;;  %v1201_v33 = vmul.f32 %v5745_v48, %v1200_v43  ;;  %vm1204_vm12 = vweird.f32 %v5745_v48  ;;  %v1235_v52 = vadd.f32 0.4994258, %v1234_v63  ;;  %v377_v63 = vpop.f32.mrf.mxu0 }
 0x188   : > { %10767 = vst [vmem:[#allocation10_spill] sm:$0xff] %v7480_v35  ;;  %5274 = vmatmul.f32.gmra.mxu1 %v5000_v24  ;;  %v2424_v4 = vadd.f32 0.18741608, %v2423_v28  ;;  %v2462_v61 = vadd.f32 0.05243302, %v7429_v38  ;;  %v1172_v5 = vmul.f32 %v1171_v41, %v10768_v55  ;;  %vm1203_vm13 = vweird.f32 %v7447_v20  ;;  %v10769_v41 = vld [vmem:[#allocation33_spill] sm:$0xff] }
 0x189   : > { %v2540_v56 = vadd.f32 0.0036580483, %v2539_v11  ;;  %v1202_v19 = vadd.f32 %v5745_v48, %v1201_v33  ;;  %v1236_v44 = vmul.f32 %v1235_v52, %v10755_v22  ;;  %v1272_v0 = vmul.f32 %v1271_v1, %v10762_v21  ;;  %vm1205_vm14 = vmor %vm1203_vm13, %vm1204_vm12  ;;  %v10770_v52 = vld [vmem:[#allocation5_spill] sm:$0xff] }
 0x18a   : > { %v5625_v36 = vclamps-f32 %v1172_v5, 1.0  ;;  %v1210_v27 = vor.u32 1.1754944e-38, %v1209_v14  ;;  %v2577_v24 = vmul.f32 2.1237322e-06, %v7480_v35  ;;  %v2615_v28 = vmul.f32 %v7476_v9, %v7476_v9 }
 0x18b   : > { %v2501_v38 = vmul.f32 %v2500_v8, %v7382_v49  ;;  %v1206_v11 = vsel %vm1205_vm14, %v5745_v48, %v1202_v19  ;;  %vm1208_vm15 = vcmp.eq.f32.partialorder %v1207_v60, 8.507059e+37  ;;  %v7491_v12 = vadd.f32 1.0, %v1236_v44 }
 0x18c   : > { %v2541_v20 = vmul.f32 %v2540_v56, %v7413_v10  ;;  %v4901_v22 = vadd.f32 1.0, %v5625_v36  ;;  %v1211_v43 = vsel %vm1208_vm15, %v1210_v27, %v1206_v11  ;;  %v1273_v1 = vadd.f32 0.112945676, %v1272_v0  ;;  %v469_v56 = vpop.f32.mrf.mxu1 }
 0x18d   : > { %v2306_v34 = vadd.f32 1.1283791, %v7419_v39  ;;  %v2346_v14 = vadd.f32 1.1283791, %v7422_v29  ;;  %v1212_v33 = vmul.f32 %v1211_v43, %v10769_v41  ;;  %5746 = vrcp.f32 %v7491_v12 }
 0x18e   : > { %v5001_v8 = vmul.f32 %v4901_v22, %v10770_v52  ;;  %v2578_v48 = vadd.f32 0.00028619796, %v2577_v24  ;;  %v7499_v60 = vmin.f32 %v2615_v28, 16.0  ;;  %v7502_v55 = vadd.f32 %v377_v63, %v6327_v57  ;;  %v10772_v24 = vld [vmem:[#allocation71_spill] sm:$0xff] }
 0x18f   : > { %v2385_v5 = vmul.f32 %v7424_v7, %v7279_v40  ;;  %v2463_v39 = vmul.f32 %v2462_v61, %v7346_v51  ;;  %v7508_v29 = vmul.f32 0.5, %v7363_v13  ;;  %v5626_v19 = vclamps-f32 %v1212_v33, 1.0  ;;  %v10774_v7 = vld [vmem:[#allocation11_spill] sm:$0xff] }
 0x190   : > { %v2425_v44 = vmul.f32 %v2424_v4, %v7327_v30  ;;  %v2502_v0 = vadd.f32 0.05243302, %v2501_v38  ;;  %v2542_v36 = vadd.f32 0.05243302, %v2541_v20  ;;  %5366 = vmatmul.f32.gmra.mxu2 %v5001_v8  ;;  %v1274_v27 = vmul.f32 %v1273_v1, %v10762_v21 }
 0x191   : > { %10771 = vst [vmem:[#allocation16_spill] sm:$0xff] %v7508_v29  ;;  %v7513_v28 = vmul.f32 %v2306_v34, %v10772_v24  ;;  %v4902_v11 = vadd.f32 1.0, %v5626_v19  ;;  %v7516_v63 = vadd.f32 %v469_v56, %v6329_v58  ;;  %v1308_v61 = vmul.f32 3.8918573e-05, %v10774_v7  ;;  %v10776_v34 = vld [vmem:[#allocation9_spill] sm:$0xff] }
 0x192   : > { %v7520_v13 = vmul.f32 %v2346_v14, %v7222_v37  ;;  %v2579_v22 = vmul.f32 %v2578_v48, %v7480_v35  ;;  %v2617_v4 = vmul.f32 2.1237322e-06, %v7499_v60  ;;  %v7525_v38 = vmul.f32 0.70710677, %v7502_v55  ;;  %v10777_v19 = vld [vmem:[#allocation13_spill] sm:$0xff] }
 0x193   : > { %10773 = vst [vmem:[#allocation24_spill] sm:$0xff] %v7513_v28  ;;  %v5747_v20 = vpop.eup %5746  ;;  %v7527_v43 = vadd.f32 1.1283791, %v2385_v5  ;;  %v2464_v1 = vadd.f32 0.18741608, %v2463_v39  ;;  %v5002_v41 = vmul.f32 %v4902_v11, %v10776_v34  ;;  %v2503_v8 = vmul.f32 %v2502_v0, %v7382_v49 }
 0x194   : > { %10775 = vst [vmem:[#allocation3_spill] sm:$0xff] %v7520_v13  ;;  %v1275_v33 = vadd.f32 0.4994258, %v1274_v27  ;;  %v7530_v52 = vadd.f32 1.1283791, %v2425_v44  ;;  %v2543_v37 = vmul.f32 %v2542_v36, %v7413_v10  ;;  %v1239_v14 = vmul.f32 %v5747_v20, %v7491_v12 }
 0x195   : > { %5458 = vmatmul.f32.gmra.mxu3 %v5002_v41  ;;  %v7536_v48 = vmul.f32 0.70710677, %v7516_v63  ;;  %v1309_v5 = vadd.f32 0.001143296, %v1308_v61  ;;  %v1348_v39 = vmul.f32 3.8918573e-05, %v10777_v19  ;;  %v2655_v44 = vmul.f32 %v7525_v38, %v7525_v38 }
 0x196   : > { %v1276_v56 = vmul.f32 %v1275_v33, %v10762_v21  ;;  %v2580_v24 = vadd.f32 0.0036580483, %v2579_v22  ;;  %v2618_v11 = vadd.f32 0.00028619796, %v2617_v4  ;;  %v1240_v27 = vsub.f32 1.0, %v1239_v14  ;;  %v10778_v61 = vld [vmem:[#allocation14_spill] sm:$0xff] }
 0x197   : > { %v1249_v0 = vand.u32 2147483648, %v7491_v12  ;;  %v1310_v34 = vmul.f32 %v1309_v5, %v10774_v7  ;;  %v1349_v41 = vadd.f32 0.001143296, %v1348_v39  ;;  %vm1244_vm0 = vweird.f32 %v5747_v20 }
 0x198   : > { %v7543_v36 = vadd.f32 1.0, %v1276_v56  ;;  %v1241_v29 = vmul.f32 %v5747_v20, %v1240_v27  ;;  %v1247_v21 = vand.u32 2147483647, %v7491_v12  ;;  %v1388_v33 = vmul.f32 3.8918573e-05, %v10778_v61 }
 0x199   : > { %v2504_v13 = vadd.f32 0.18741608, %v2503_v8  ;;  %v2544_v22 = vadd.f32 0.18741608, %v2543_v37  ;;  %v2695_v4 = vmul.f32 %v7536_v48, %v7536_v48  ;;  %v7551_v14 = vmin.f32 %v2655_v44, 16.0 }
 0x19a   : > { %5748 = vrcp.f32 %v7543_v36  ;;  %v1242_v56 = vadd.f32 %v5747_v20, %v1241_v29  ;;  %vm1243_vm1 = vweird.f32 %v7491_v12  ;;  %v1311_v5 = vadd.f32 0.014752088, %v1310_v34 }
 0x19b   : > { %v2619_v39 = vmul.f32 %v2618_v11, %v7499_v60  ;;  %vm1245_vm2 = vmor %vm1243_vm1, %vm1244_vm0  ;;  %v1250_v27 = vor.u32 1.1754944e-38, %v1249_v0  ;;  %v1350_v28 = vmul.f32 %v1349_v41, %v10777_v19  ;;  %v1389_v30 = vadd.f32 0.001143296, %v1388_v33  ;;  %v10780_v0 = vld [vmem:[#allocation36_spill] sm:$0xff] }
 0x19c   : > { %v2581_v8 = vmul.f32 %v2580_v24, %v7480_v35  ;;  %v1246_v37 = vsel %vm1245_vm2, %v5747_v20, %v1242_v56  ;;  %vm1248_vm3 = vcmp.eq.f32.partialorder %v1247_v21, 8.507059e+37  ;;  %v1312_v40 = vmul.f32 %v1311_v5, %v10774_v7 }
 0x19d   : > { %v7558_v17 = vmin.f32 %v2695_v4, 16.0  ;;  %v1251_v44 = vsel %vm1248_vm3, %v1250_v27, %v1246_v37  ;;  %v1351_v29 = vadd.f32 0.014752088, %v1350_v28  ;;  %v1390_v12 = vmul.f32 %v1389_v30, %v10778_v61 }
 0x19e   : > { %v2465_v34 = vmul.f32 %v2464_v1, %v7346_v51  ;;  %v2657_v11 = vmul.f32 2.1237322e-06, %v7551_v14  ;;  %v1252_v16 = vmul.f32 %v1251_v44, %v10780_v0  ;;  %v1313_v41 = vadd.f32 0.112945676, %v1312_v40  ;;  %v10782_v51 = vld [vmem:[#allocation17_spill] sm:$0xff] }
 0x19f   : > { %10779 = vst [vmem:[#allocation4_spill] sm:$0xff] %v7558_v17  ;;  %v2505_v24 = vmul.f32 %v2504_v13, %v7382_v49  ;;  %v2620_v20 = vadd.f32 0.0036580483, %v2619_v39  ;;  %v1352_v21 = vmul.f32 %v1351_v29, %v10777_v19  ;;  %v1391_v56 = vadd.f32 0.014752088, %v1390_v12 }
 0x1a0   : > { %v5749_v33 = vpop.eup %5748  ;;  %v2545_v4 = vmul.f32 %v2544_v22, %v7413_v10  ;;  %v5627_v5 = vclamps-f32 %v1252_v16, 1.0  ;;  %v1314_v30 = vmul.f32 %v1313_v41, %v10774_v7  ;;  %v2582_v1 = vadd.f32 0.05243302, %v2581_v8  ;;  %v10781_v10 = vld [vmem:[#allocation12_spill] sm:$0xff] }
 0x1a1   : > { %v1279_v28 = vmul.f32 %v5749_v33, %v7543_v36  ;;  %v2697_v27 = vmul.f32 2.1237322e-06, %v7558_v17  ;;  %v1353_v37 = vadd.f32 0.112945676, %v1352_v21  ;;  %v1392_v40 = vmul.f32 %v1391_v56, %v10778_v61 }
 0x1a2   : > { %v2658_v44 = vadd.f32 0.00028619796, %v2657_v11  ;;  %v4903_v0 = vadd.f32 1.0, %v5627_v5  ;;  %v1315_v39 = vadd.f32 0.4994258, %v1314_v30  ;;  %v2621_v29 = vmul.f32 %v2620_v20, %v7499_v60 }
 0x1a3   : > { %v1280_v13 = vsub.f32 1.0, %v1279_v28  ;;  %v1287_v12 = vand.u32 2147483647, %v7543_v36  ;;  %v1289_v16 = vand.u32 2147483648, %v7543_v36  ;;  %v1354_v22 = vmul.f32 %v1353_v37, %v10777_v19  ;;  %v561_v28 = vpop.f32.mrf.mxu2 }
 0x1a4   : > { %v5003_v41 = vmul.f32 %v4903_v0, %v10781_v10  ;;  %vm1284_vm4 = vweird.f32 %v5749_v33  ;;  %v1316_v21 = vmul.f32 %v1315_v39, %v10774_v7  ;;  %v2583_v56 = vmul.f32 %v2582_v1, %v7480_v35 }
 0x1a5   : > { %v1281_v8 = vmul.f32 %v5749_v33, %v1280_v13  ;;  %v2698_v11 = vadd.f32 0.00028619796, %v2697_v27  ;;  %v1355_v5 = vadd.f32 0.4994258, %v1354_v22  ;;  %v1393_v30 = vadd.f32 0.112945676, %v1392_v40 }
 0x1a6   : > { %5185 = vmatmul.f32.gmra.mxu0 %v5003_v41  ;;  %vm1283_vm5 = vweird.f32 %v7543_v36  ;;  %v7579_v49 = vadd.f32 1.0, %v1316_v21  ;;  %v1428_v37 = vmul.f32 3.8918573e-05, %v10782_v51  ;;  %v2622_v6 = vadd.f32 0.05243302, %v2621_v29  ;;  %v10783_v22 = vld [vmem:[#allocation37_spill] sm:$0xff]  ;;  %v653_v41 = vpop.f32.mrf.mxu3 }
 0x1a7   : > { %v1282_v20 = vadd.f32 %v5749_v33, %v1281_v8  ;;  %v2659_v10 = vmul.f32 %v2658_v44, %v7551_v14  ;;  %vm1285_vm6 = vmor %vm1283_vm5, %vm1284_vm4  ;;  %v1290_v0 = vor.u32 1.1754944e-38, %v1289_v16  ;;  %v1356_v7 = vmul.f32 %v1355_v5, %v10777_v19 }
 0x1a8   : > { %vm1288_vm7 = vcmp.eq.f32.partialorder %v1287_v12, 8.507059e+37  ;;  %5750 = vrcp.f32 %v7579_v49  ;;  %v7586_v27 = vadd.f32 %v561_v28, %v6344_v2  ;;  %v2699_v36 = vmul.f32 %v2698_v11, %v7558_v17 }
 0x1a9   : > { %v1286_v1 = vsel %vm1285_vm6, %v5749_v33, %v1282_v20  ;;  %v7589_v13 = vadd.f32 1.0, %v1356_v7  ;;  %v1394_v39 = vmul.f32 %v1393_v30, %v10778_v61  ;;  %v2466_v29 = vadd.f32 1.1283791, %v2465_v34 }
 0x1aa   : > { %v1291_v40 = vsel %vm1288_vm7, %v1290_v0, %v1286_v1  ;;  %v2506_v44 = vadd.f32 1.1283791, %v2505_v24  ;;  %v1429_v19 = vadd.f32 0.001143296, %v1428_v37  ;;  %v2546_v33 = vadd.f32 1.1283791, %v2545_v4  ;;  %v380_v0 = vpop.f32.mrf.mxu0 }
 0x1ab   : > { %v1292_v16 = vmul.f32 %v1291_v40, %v10783_v22  ;;  %v2584_v12 = vadd.f32 0.18741608, %v2583_v56  ;;  %v2660_v8 = vadd.f32 0.0036580483, %v2659_v10  ;;  %5752 = vrcp.f32 %v7589_v13 }
 0x1ac   : > { %v7596_v21 = vmul.f32 %v7527_v43, %v7243_v46  ;;  %v2623_v11 = vmul.f32 %v2622_v6, %v7499_v60  ;;  %v7600_v28 = vmul.f32 0.70710677, %v7586_v27  ;;  %v7604_v34 = vmul.f32 %v7530_v52, %v7289_v47 }
 0x1ad   : > { %v5628_v5 = vclamps-f32 %v1292_v16, 1.0  ;;  %v2700_v24 = vadd.f32 0.0036580483, %v2699_v36  ;;  %v7607_v4 = vadd.f32 %v653_v41, %v6346_v3  ;;  %v1395_v56 = vadd.f32 0.4994258, %v1394_v39 }
 0x1ae   : > { %10784 = vst [vmem:[#allocation27_spill] sm:$0xff] %v7596_v21  ;;  %v5751_v30 = vpop.eup %5750  ;;  %v7610_v20 = vmul.f32 %v2466_v29, %v7311_v45  ;;  %v7613_v46 = vmul.f32 %v2506_v44, %v7352_v50  ;;  %v1430_v43 = vmul.f32 %v1429_v19, %v10782_v51  ;;  %v7617_v37 = vmul.f32 %v2546_v33, %v7376_v15  ;;  %v10789_v45 = vld [vmem:[#allocation15_spill] sm:$0xff]  ;;  %v10790_v19 = vld [vmem:[#allocation18_spill] sm:$0xff] }
 0x1af   : > { %10785 = vst [vmem:[#allocation33_spill] sm:$0xff] %v7604_v34  ;;  %v4904_v6 = vadd.f32 1.0, %v5628_v5  ;;  %v7620_v47 = vmul.f32 %v2584_v12, %v7480_v35  ;;  %v2661_v52 = vmul.f32 %v2660_v8, %v7551_v14  ;;  %v1319_v10 = vmul.f32 %v5751_v30, %v7579_v49 }
 0x1b0   : > { %10786 = vst [vmem:[#allocation5_spill] sm:$0xff] %v7610_v20  ;;  %v7624_v7 = vadd.f32 0.18741608, %v2623_v11  ;;  %v1329_v50 = vand.u32 2147483648, %v7579_v49  ;;  %v2735_v36 = vmul.f32 %v7600_v28, %v7600_v28  ;;  %v2701_v15 = vmul.f32 %v2700_v24, %v7558_v17 }
 0x1b1   : > { %10787 = vst [vmem:[#allocation71_spill] sm:$0xff] %v7613_v46  ;;  %v5004_v1 = vmul.f32 %v4904_v6, %v10789_v45  ;;  %v5753_v40 = vpop.eup %5752  ;;  %v1320_v39 = vsub.f32 1.0, %v1319_v10  ;;  %v7632_v29 = vmul.f32 0.70710677, %v7607_v4  ;;  %v1396_v44 = vmul.f32 %v1395_v56, %v10778_v61 }
 0x1b2   : > { %10788 = vst [vmem:[#allocation11_spill] sm:$0xff] %v7617_v37  ;;  %v1359_v22 = vmul.f32 %v5753_v40, %v7589_v13  ;;  %v7637_v16 = vadd.f32 %v380_v0, %v6327_v57  ;;  %v1431_v41 = vadd.f32 0.014752088, %v1430_v43  ;;  %v1468_v33 = vmul.f32 3.8918573e-05, %v10790_v19 }
 0x1b3   : > { %5277 = vmatmul.f32.gmra.mxu1 %v5004_v1  ;;  %v1321_v12 = vmul.f32 %v5751_v30, %v1320_v39  ;;  %vm1324_vm8 = vweird.f32 %v5751_v30  ;;  %v1327_v8 = vand.u32 2147483647, %v7579_v49  ;;  %v7641_v11 = vadd.f32 1.0, %v1396_v44 }
 0x1b4   : > { %vm1323_vm9 = vweird.f32 %v7579_v49  ;;  %v1330_v5 = vor.u32 1.1754944e-38, %v1329_v50  ;;  %v1360_v24 = vsub.f32 1.0, %v1359_v22  ;;  %v7644_v61 = vmin.f32 %v2735_v36, 16.0  ;;  %v472_v22 = vpop.f32.mrf.mxu1 }
 0x1b5   : > { %v1322_v56 = vadd.f32 %v5751_v30, %v1321_v12  ;;  %v1369_v6 = vand.u32 2147483648, %v7589_v13  ;;  %v2775_v43 = vmul.f32 %v7632_v29, %v7632_v29  ;;  %5754 = vrcp.f32 %v7641_v11  ;;  %vm1325_vm10 = vmor %vm1323_vm9, %vm1324_vm8  ;;  %v10792_v12 = vld [vmem:[#allocation39_spill] sm:$0xff] }
 0x1b6   : > { %10791 = vst [vmem:[#allocation9_spill] sm:$0xff] %v7644_v61  ;;  %v1361_v10 = vmul.f32 %v5753_v40, %v1360_v24  ;;  %vm1364_vm11 = vweird.f32 %v5753_v40  ;;  %v1367_v0 = vand.u32 2147483647, %v7589_v13  ;;  %v7652_v45 = vmul.f32 0.70710677, %v7637_v16 }
 0x1b7   : > { %v2662_v49 = vadd.f32 0.05243302, %v2661_v52  ;;  %v1326_v1 = vsel %vm1325_vm10, %v5751_v30, %v1322_v56  ;;  %vm1328_vm12 = vcmp.eq.f32.partialorder %v1327_v8, 8.507059e+37  ;;  %v1469_v50 = vadd.f32 0.001143296, %v1468_v33  ;;  %v10794_v56 = vld [vmem:[#allocation20_spill] sm:$0xff] }
 0x1b8   : > { %v1331_v36 = vsel %vm1328_vm12, %v1330_v5, %v1326_v1  ;;  %v1362_v39 = vadd.f32 %v5753_v40, %v1361_v10  ;;  %vm1363_vm13 = vweird.f32 %v7589_v13  ;;  %v2737_v44 = vmul.f32 2.1237322e-06, %v7644_v61 }
 0x1b9   : > { %v1332_v37 = vmul.f32 %v1331_v36, %v10792_v12  ;;  %vm1365_vm14 = vmor %vm1363_vm13, %vm1364_vm11  ;;  %v1370_v24 = vor.u32 1.1754944e-38, %v1369_v6  ;;  %v7657_v46 = vmin.f32 %v2775_v43, 16.0  ;;  %v1432_v20 = vmul.f32 %v1431_v41, %v10782_v51  ;;  %v10795_v43 = vld [vmem:[#allocation43_spill] sm:$0xff] }
 0x1ba   : > { %v2702_v34 = vadd.f32 0.05243302, %v2701_v15  ;;  %v1366_v52 = vsel %vm1365_vm14, %v5753_v40, %v1362_v39  ;;  %vm1368_vm15 = vcmp.eq.f32.partialorder %v1367_v0, 8.507059e+37  ;;  %v2815_v30 = vmul.f32 %v7652_v45, %v7652_v45 }
 0x1bb   : > { %10793 = vst [vmem:[#allocation13_spill] sm:$0xff] %v7657_v46  ;;  %v5755_v33 = vpop.eup %5754  ;;  %v5629_v8 = vclamps-f32 %v1332_v37, 1.0  ;;  %v1371_v13 = vsel %vm1368_vm15, %v1370_v24, %v1366_v52  ;;  %v7663_v5 = vadd.f32 %v472_v22, %v6329_v58  ;;  %v1508_v10 = vmul.f32 3.8918573e-05, %v10794_v56  ;;  %v10797_v52 = vld [vmem:[#allocation22_spill] sm:$0xff] }
 0x1bc   : > { %v2663_v6 = vmul.f32 %v2662_v49, %v7551_v14  ;;  %v1372_v1 = vmul.f32 %v1371_v13, %v10795_v43  ;;  %v2738_v36 = vadd.f32 0.00028619796, %v2737_v44  ;;  %v1399_v15 = vmul.f32 %v5755_v33, %v7641_v11 }
 0x1bd   : > { %v4905_v40 = vadd.f32 1.0, %v5629_v8  ;;  %v2777_v41 = vmul.f32 2.1237322e-06, %v7657_v46  ;;  %v1433_v0 = vadd.f32 0.112945676, %v1432_v20  ;;  %v1470_v39 = vmul.f32 %v1469_v50, %v10790_v19 }
 0x1be   : > { %v2703_v37 = vmul.f32 %v2702_v34, %v7558_v17  ;;  %v5630_v12 = vclamps-f32 %v1372_v1, 1.0  ;;  %v7672_v22 = vmin.f32 %v2815_v30, 16.0  ;;  %v1400_v24 = vsub.f32 1.0, %v1399_v15  ;;  %v10798_v15 = vld [vmem:[#allocation25_spill] sm:$0xff] }
 0x1bf   : > { %v5005_v35 = vmul.f32 %v4905_v40, %v10797_v52  ;;  %v7676_v49 = vmul.f32 0.70710677, %v7663_v5  ;;  %v1409_v44 = vand.u32 2147483648, %v7641_v11  ;;  %v1509_v13 = vadd.f32 0.001143296, %v1508_v10 }
 0x1c0   : > { %10796 = vst [vmem:[#allocation14_spill] sm:$0xff] %v7672_v22  ;;  %v4906_v8 = vadd.f32 1.0, %v5630_v12  ;;  %v1401_v43 = vmul.f32 %v5755_v33, %v1400_v24  ;;  %vm1404_vm0 = vweird.f32 %v5755_v33  ;;  %v1407_v20 = vand.u32 2147483647, %v7641_v11 }
 0x1c1   : > { %5369 = vmatmul.f32.gmra.mxu2 %v5005_v35  ;;  %v2739_v34 = vmul.f32 %v2738_v36, %v7644_v61  ;;  %v2778_v50 = vadd.f32 0.00028619796, %v2777_v41  ;;  %v1434_v30 = vmul.f32 %v1433_v0, %v10782_v51  ;;  %v1471_v1 = vadd.f32 0.014752088, %v1470_v39  ;;  %v10799_v0 = vld [vmem:[#allocation21_spill] sm:$0xff] }
 0x1c2   : > { %v5006_v40 = vmul.f32 %v4906_v8, %v10798_v15  ;;  %v2817_v52 = vmul.f32 2.1237322e-06, %v7672_v22  ;;  %v1402_v21 = vadd.f32 %v5755_v33, %v1401_v43  ;;  %vm1403_vm1 = vweird.f32 %v7641_v11 }
 0x1c3   : > { %v2855_v10 = vmul.f32 %v7676_v49, %v7676_v49  ;;  %vm1405_vm2 = vmor %vm1403_vm1, %vm1404_vm0  ;;  %v1410_v12 = vor.u32 1.1754944e-38, %v1409_v44  ;;  %v1435_v24 = vadd.f32 0.4994258, %v1434_v30  ;;  %v1472_v35 = vmul.f32 %v1471_v1, %v10790_v19 }
 0x1c4   : > { %5461 = vmatmul.f32.gmra.mxu3 %v5006_v40  ;;  %v1406_v36 = vsel %vm1405_vm2, %v5755_v33, %v1402_v21  ;;  %vm1408_vm3 = vcmp.eq.f32.partialorder %v1407_v20, 8.507059e+37  ;;  %v1510_v41 = vmul.f32 %v1509_v13, %v10794_v56  ;;  %v1548_v39 = vmul.f32 3.8918573e-05, %v10799_v0 }
 0x1c5   : > { %v2740_v8 = vadd.f32 0.0036580483, %v2739_v34  ;;  %v2779_v43 = vmul.f32 %v2778_v50, %v7657_v46  ;;  %v1411_v15 = vsel %vm1408_vm3, %v1410_v12, %v1406_v36  ;;  %v1436_v11 = vmul.f32 %v1435_v24, %v10782_v51 }
 0x1c6   : > { %v2664_v25 = vadd.f32 0.18741608, %v2663_v6  ;;  %v1412_v31 = vmul.f32 %v1411_v15, %v10800_v62  ;;  %v1473_v44 = vadd.f32 0.112945676, %v1472_v35  ;;  %v1511_v30 = vadd.f32 0.014752088, %v1510_v41 }
 0x1c7   : > { %v2625_v1 = vmul.f32 %v7624_v7, %v7499_v60  ;;  %v2704_v21 = vadd.f32 0.18741608, %v2703_v37  ;;  %v7695_v33 = vadd.f32 1.0, %v1436_v11  ;;  %v1549_v13 = vadd.f32 0.001143296, %v1548_v39 }
 0x1c8   : > { %v7697_v20 = vmin.f32 %v2855_v10, 16.0  ;;  %v5631_v34 = vclamps-f32 %v1412_v31, 1.0  ;;  %v1474_v50 = vmul.f32 %v1473_v44, %v10790_v19  ;;  %v1512_v40 = vmul.f32 %v1511_v30, %v10794_v56  ;;  %v10805_v30 = vld [vmem:[#allocation26_spill] sm:$0xff] }
 0x1c9   : > { %v2741_v51 = vmul.f32 %v2740_v8, %v7644_v61  ;;  %v2780_v6 = vadd.f32 0.0036580483, %v2779_v43  ;;  %v2818_v62 = vadd.f32 0.00028619796, %v2817_v52  ;;  %5756 = vrcp.f32 %v7695_v33  ;;  %v10804_v52 = vld [vmem:[#allocation29_spill] sm:$0xff] }
 0x1ca   : > { %10801 = vst [vmem:[#allocation36_spill] sm:$0xff] %v7697_v20  ;;  %v7704_v12 = vmul.f32 0.5, %v7450_v54  ;;  %v4907_v7 = vadd.f32 1.0, %v5631_v34  ;;  %v1475_v37 = vadd.f32 0.4994258, %v1474_v50  ;;  %v7708_v31 = vmul.f32 0.5, %v7466_v26 }
 0x1cb   : > { %v1513_v24 = vadd.f32 0.112945676, %v1512_v40  ;;  %v2586_v10 = vadd.f32 1.1283791, %v7620_v47  ;;  %v2665_v35 = vmul.f32 %v2664_v25, %v7551_v14  ;;  %v1550_v36 = vmul.f32 %v1549_v13, %v10799_v0 }
 0x1cc   : > { %10802 = vst [vmem:[#allocation12_spill] sm:$0xff] %v7704_v12  ;;  %v2857_v41 = vmul.f32 2.1237322e-06, %v7697_v20  ;;  %v5007_v39 = vmul.f32 %v4907_v7, %v10804_v52  ;;  %v1476_v8 = vmul.f32 %v1475_v37, %v10790_v19  ;;  %v2626_v43 = vadd.f32 1.1283791, %v2625_v1  ;;  %v475_v12 = vpop.f32.mrf.mxu1 }
 0x1cd   : > { %10803 = vst [vmem:[#allocation17_spill] sm:$0xff] %v7708_v31  ;;  %v1514_v54 = vmul.f32 %v1513_v24, %v10794_v56  ;;  %v2705_v15 = vmul.f32 %v2704_v21, %v7558_v17  ;;  %v2742_v11 = vadd.f32 0.05243302, %v2741_v51  ;;  %v2819_v47 = vmul.f32 %v2818_v62, %v7672_v22  ;;  %v564_v62 = vpop.f32.mrf.mxu2 }
 0x1ce   : > { %v2781_v26 = vmul.f32 %v2780_v6, %v7657_v46  ;;  %5188 = vmatmul.f32.gmra.mxu0 %v5007_v39  ;;  %v7719_v25 = vadd.f32 1.0, %v1476_v8  ;;  %v1588_v13 = vmul.f32 3.8918573e-05, %v10805_v30  ;;  %v7723_v50 = vmul.f32 %v2586_v10, %v7457_v53 }
 0x1cf   : > { %v1515_v44 = vadd.f32 0.4994258, %v1514_v54  ;;  %v5757_v34 = vpop.eup %5756  ;;  %v7726_v19 = vmul.f32 0.5, %v7502_v55  ;;  %v7729_v1 = vmul.f32 0.5, %v7516_v63  ;;  %v1551_v21 = vadd.f32 0.014752088, %v1550_v36 }
 0x1d0   : > { %10806 = vst [vmem:[#allocation37_spill] sm:$0xff] %v7723_v50  ;;  %v7731_v40 = vadd.f32 1.1283791, %v2665_v35  ;;  %v2858_v51 = vadd.f32 0.00028619796, %v2857_v41  ;;  %v1439_v6 = vmul.f32 %v5757_v34, %v7695_v33  ;;  %5758 = vrcp.f32 %v7719_v25  ;;  %v656_v35 = vpop.f32.mrf.mxu3 }
 0x1d1   : > { %10807 = vst [vmem:[#allocation15_spill] sm:$0xff] %v7726_v19  ;;  %v7735_v7 = vadd.f32 1.1283791, %v2705_v15  ;;  %v2743_v53 = vmul.f32 %v2742_v11, %v7644_v61  ;;  %v2820_v37 = vadd.f32 0.0036580483, %v2819_v47  ;;  %v1516_v55 = vmul.f32 %v1515_v44, %v10794_v56 }
 0x1d2   : > { %10808 = vst [vmem:[#allocation18_spill] sm:$0xff] %v7729_v1  ;;  %v7740_v24 = vmul.f32 %v2626_v43, %v7476_v9  ;;  %v2782_v63 = vadd.f32 0.05243302, %v2781_v26  ;;  %v1440_v10 = vsub.f32 1.0, %v1439_v6  ;;  %v1589_v36 = vadd.f32 0.001143296, %v1588_v13 }
 0x1d3   : > { %v1449_v41 = vand.u32 2147483648, %v7695_v33  ;;  %v7743_v52 = vadd.f32 1.0, %v1516_v55  ;;  %v7746_v39 = vadd.f32 %v564_v62, %v6344_v2  ;;  %v1552_v8 = vmul.f32 %v1551_v21, %v10799_v0 }
 0x1d4   : > { %10809 = vst [vmem:[#allocation39_spill] sm:$0xff] %v7740_v24  ;;  %v2859_v54 = vmul.f32 %v2858_v51, %v7697_v20  ;;  %v1441_v15 = vmul.f32 %v5757_v34, %v1440_v10  ;;  %vm1444_vm4 = vweird.f32 %v5757_v34  ;;  %v1447_v9 = vand.u32 2147483647, %v7695_v33 }
 0x1d5   : > { %v7751_v56 = vadd.f32 0.18741608, %v2743_v53  ;;  %v2821_v43 = vmul.f32 %v2820_v37, %v7672_v22  ;;  %5760 = vrcp.f32 %v7743_v52  ;;  %v7756_v11 = vadd.f32 %v656_v35, %v6346_v3 }
 0x1d6   : > { %v5759_v47 = vpop.eup %5758  ;;  %v2783_v26 = vmul.f32 %v2782_v63, %v7657_v46  ;;  %v1442_v44 = vadd.f32 %v5757_v34, %v1441_v15  ;;  %vm1443_vm5 = vweird.f32 %v7695_v33  ;;  %v1590_v13 = vmul.f32 %v1589_v36, %v10805_v30  ;;  %v10810_v15 = vld [vmem:[#allocation47_spill] sm:$0xff] }
 0x1d7   : > { %vm1445_vm6 = vmor %vm1443_vm5, %vm1444_vm4  ;;  %v1450_v21 = vor.u32 1.1754944e-38, %v1449_v41  ;;  %v1479_v51 = vmul.f32 %v5759_v47, %v7719_v25  ;;  %v7763_v6 = vmul.f32 0.70710677, %v7746_v39  ;;  %v1553_v62 = vadd.f32 0.112945676, %v1552_v8 }
 0x1d8   : > { %v2860_v53 = vadd.f32 0.0036580483, %v2859_v54  ;;  %v1446_v37 = vsel %vm1445_vm6, %v5757_v34, %v1442_v44  ;;  %vm1448_vm7 = vcmp.eq.f32.partialorder %v1447_v9, 8.507059e+37  ;;  %v1487_v55 = vand.u32 2147483647, %v7719_v25 }
 0x1d9   : > { %v1451_v10 = vsel %vm1448_vm7, %v1450_v21, %v1446_v37  ;;  %v1480_v63 = vsub.f32 1.0, %v1479_v51  ;;  %v1489_v35 = vand.u32 2147483648, %v7719_v25  ;;  %v7768_v33 = vmul.f32 0.70710677, %v7756_v11 }
 0x1da   : > { %v7770_v36 = vadd.f32 0.18741608, %v2783_v26  ;;  %v2822_v41 = vadd.f32 0.05243302, %v2821_v43  ;;  %v1452_v1 = vmul.f32 %v1451_v10, %v10810_v15  ;;  %v1591_v19 = vadd.f32 0.014752088, %v1590_v13  ;;  %v383_v10 = vpop.f32.mrf.mxu0 }
 0x1db   : > { %v5761_v31 = vpop.eup %5760  ;;  %v1481_v8 = vmul.f32 %v5759_v47, %v1480_v63  ;;  %vm1484_vm8 = vweird.f32 %v5759_v47  ;;  %v2895_v34 = vmul.f32 %v7763_v6, %v7763_v6  ;;  %v1554_v54 = vmul.f32 %v1553_v62, %v10799_v0 }
 0x1dc   : > { %v2861_v9 = vmul.f32 %v2860_v53, %v7697_v20  ;;  %v5632_v44 = vclamps-f32 %v1452_v1, 1.0  ;;  %vm1483_vm9 = vweird.f32 %v7719_v25  ;;  %v1519_v26 = vmul.f32 %v5761_v31, %v7743_v52 }
 0x1dd   : > { %v1482_v21 = vadd.f32 %v5759_v47, %v1481_v8  ;;  %vm1488_vm10 = vcmp.eq.f32.partialorder %v1487_v55, 8.507059e+37  ;;  %v1490_v43 = vor.u32 1.1754944e-38, %v1489_v35  ;;  %v2935_v13 = vmul.f32 %v7768_v33, %v7768_v33  ;;  %vm1485_vm11 = vmor %vm1483_vm9, %vm1484_vm8  ;;  %v10812_v8 = vld [vmem:[#allocation30_spill] sm:$0xff] }
 0x1de   : > { %v4908_v51 = vadd.f32 1.0, %v5632_v44  ;;  %v1520_v37 = vsub.f32 1.0, %v1519_v26  ;;  %v1555_v63 = vadd.f32 0.4994258, %v1554_v54  ;;  %v1592_v62 = vmul.f32 %v1591_v19, %v10805_v30  ;;  %v10813_v26 = vld [vmem:[#allocation52_spill] sm:$0xff] }
 0x1df   : > { %v1486_v15 = vsel %vm1485_vm11, %v5759_v47, %v1482_v21  ;;  %v1527_v1 = vand.u32 2147483647, %v7743_v52  ;;  %v1529_v25 = vand.u32 2147483648, %v7743_v52  ;;  %v7784_v53 = vmin.f32 %v2895_v34, 16.0 }
 0x1e0   : > { %v5008_v55 = vmul.f32 %v4908_v51, %v10812_v8  ;;  %v1491_v35 = vsel %vm1488_vm10, %v1490_v43, %v1486_v15  ;;  %v1521_v24 = vmul.f32 %v5761_v31, %v1520_v37  ;;  %vm1524_vm12 = vweird.f32 %v5761_v31 }
 0x1e1   : > { %10811 = vst [vmem:[#allocation20_spill] sm:$0xff] %v7784_v53  ;;  %v2823_v44 = vmul.f32 %v2822_v41, %v7672_v22  ;;  %v1492_v50 = vmul.f32 %v1491_v35, %v10813_v26  ;;  %v7789_v54 = vmin.f32 %v2935_v13, 16.0  ;;  %v7792_v19 = vadd.f32 %v383_v10, %v6327_v57  ;;  %v10819_v26 = vld [vmem:[#allocation28_spill] sm:$0xff] }
 0x1e2   : > { %5280 = vmatmul.f32.gmra.mxu1 %v5008_v55  ;;  %v1522_v47 = vadd.f32 %v5761_v31, %v1521_v24  ;;  %vm1523_vm13 = vweird.f32 %v7743_v52  ;;  %v1556_v34 = vmul.f32 %v1555_v63, %v10799_v0  ;;  %v1593_v21 = vadd.f32 0.112945676, %v1592_v62 }
 0x1e3   : > { %10814 = vst [vmem:[#allocation43_spill] sm:$0xff] %v7789_v54  ;;  %v2862_v43 = vadd.f32 0.05243302, %v2861_v9  ;;  %v5633_v51 = vclamps-f32 %v1492_v50, 1.0  ;;  %vm1525_vm14 = vmor %vm1523_vm13, %vm1524_vm12  ;;  %v1530_v37 = vor.u32 1.1754944e-38, %v1529_v25  ;;  %v7797_v41 = vadd.f32 %v475_v12, %v6329_v58  ;;  %v10816_v9 = vld [vmem:[#allocation54_spill] sm:$0xff] }
 0x1e4   : > { %v1526_v15 = vsel %vm1525_vm14, %v5761_v31, %v1522_v47  ;;  %vm1528_vm15 = vcmp.eq.f32.partialorder %v1527_v1, 8.507059e+37  ;;  %v2897_v13 = vmul.f32 2.1237322e-06, %v7784_v53  ;;  %v7800_v10 = vadd.f32 1.0, %v1556_v34  ;;  %v10818_v1 = vld [vmem:[#allocation31_spill] sm:$0xff] }
 0x1e5   : > { %v4909_v8 = vadd.f32 1.0, %v5633_v51  ;;  %v1531_v24 = vsel %vm1528_vm15, %v1530_v37, %v1526_v15  ;;  %v2937_v52 = vmul.f32 2.1237322e-06, %v7789_v54  ;;  %v1594_v0 = vmul.f32 %v1593_v21, %v10805_v30  ;;  %v10821_v37 = vld [vmem:[#allocation32_spill] sm:$0xff] }
 0x1e6   : > { %v7806_v50 = vmul.f32 %v7731_v40, %v7525_v38  ;;  %v1532_v63 = vmul.f32 %v1531_v24, %v10816_v9  ;;  %v7810_v12 = vmul.f32 0.70710677, %v7792_v19  ;;  %5762 = vrcp.f32 %v7800_v10 }
 0x1e7   : > { %v7815_v31 = vmul.f32 %v7735_v7, %v7536_v48  ;;  %v2824_v62 = vadd.f32 0.18741608, %v2823_v44  ;;  %v5009_v25 = vmul.f32 %v4909_v8, %v10818_v1  ;;  %v7819_v55 = vmul.f32 0.70710677, %v7797_v41 }
 0x1e8   : > { %10815 = vst [vmem:[#allocation22_spill] sm:$0xff] %v7806_v50  ;;  %v2863_v38 = vmul.f32 %v2862_v43, %v7697_v20  ;;  %v5634_v40 = vclamps-f32 %v1532_v63, 1.0  ;;  %v2898_v35 = vadd.f32 0.00028619796, %v2897_v13  ;;  %v1628_v47 = vmul.f32 3.8918573e-05, %v10819_v26 }
 0x1e9   : > { %10817 = vst [vmem:[#allocation25_spill] sm:$0xff] %v7815_v31  ;;  %v2745_v34 = vmul.f32 %v7751_v56, %v7644_v61  ;;  %v2785_v21 = vmul.f32 %v7770_v36, %v7657_v46  ;;  %5372 = vmatmul.f32.gmra.mxu2 %v5009_v25  ;;  %v2938_v48 = vadd.f32 0.00028619796, %v2937_v52  ;;  %v1595_v7 = vadd.f32 0.4994258, %v1594_v0  ;;  %v10825_v46 = vld [vmem:[#allocation56_spill] sm:$0xff] }
 0x1ea   : > { %v7828_v44 = vmul.f32 0.5, %v7586_v27  ;;  %v4910_v51 = vadd.f32 1.0, %v5634_v40  ;;  %v2975_v43 = vmul.f32 %v7810_v12, %v7810_v12  ;;  %v1668_v15 = vmul.f32 3.8918573e-05, %v10821_v37  ;;  %v10823_v27 = vld [vmem:[#allocation34_spill] sm:$0xff] }
 0x1eb   : > { %v7834_v13 = vmul.f32 0.5, %v7607_v4  ;;  %v2825_v56 = vmul.f32 %v2824_v62, %v7672_v22  ;;  %v3015_v36 = vmul.f32 %v7819_v55, %v7819_v55  ;;  %v1596_v8 = vmul.f32 %v1595_v7, %v10805_v30 }
 0x1ec   : > { %10820 = vst [vmem:[#allocation21_spill] sm:$0xff] %v7828_v44  ;;  %v5763_v24 = vpop.eup %5762  ;;  %v2864_v52 = vadd.f32 0.18741608, %v2863_v38  ;;  %v5010_v0 = vmul.f32 %v4910_v51, %v10823_v27  ;;  %v2899_v9 = vmul.f32 %v2898_v35, %v7784_v53  ;;  %v1629_v63 = vadd.f32 0.001143296, %v1628_v47 }
 0x1ed   : > { %10822 = vst [vmem:[#allocation45_spill] sm:$0xff] %v7834_v13  ;;  %v7842_v1 = vadd.f32 1.1283791, %v2745_v34  ;;  %v7844_v25 = vadd.f32 1.1283791, %v2785_v21  ;;  %v2939_v4 = vmul.f32 %v2938_v48, %v7789_v54  ;;  %v1559_v62 = vmul.f32 %v5763_v24, %v7800_v10  ;;  %v10824_v34 = vld [vmem:[#allocation35_spill] sm:$0xff] }
 0x1ee   : > { %5464 = vmatmul.f32.gmra.mxu3 %v5010_v0  ;;  %v7848_v40 = vmin.f32 %v2975_v43, 16.0  ;;  %v7850_v13 = vadd.f32 1.0, %v1596_v8  ;;  %v1630_v30 = vmul.f32 %v1629_v63, %v10819_v26  ;;  %v1669_v38 = vadd.f32 0.001143296, %v1668_v15 }
 0x1ef   : > { %v7853_v7 = vadd.f32 1.1283791, %v2825_v56  ;;  %v7855_v35 = vmin.f32 %v3015_v36, 16.0  ;;  %v1560_v47 = vsub.f32 1.0, %v1559_v62  ;;  %v1708_v21 = vmul.f32 3.8918573e-05, %v10824_v34 }
 0x1f0   : > { %v2865_v51 = vmul.f32 %v2864_v52, %v7697_v20  ;;  %v2900_v48 = vadd.f32 0.0036580483, %v2899_v9  ;;  %v1569_v27 = vand.u32 2147483648, %v7800_v10  ;;  %5764 = vrcp.f32 %v7850_v13 }
 0x1f1   : > { %v1561_v43 = vmul.f32 %v5763_v24, %v1560_v47  ;;  %vm1564_vm0 = vweird.f32 %v5763_v24  ;;  %v1567_v8 = vand.u32 2147483647, %v7800_v10  ;;  %v1631_v0 = vadd.f32 0.014752088, %v1630_v30 }
 0x1f2   : > { %v2940_v15 = vadd.f32 0.0036580483, %v2939_v4  ;;  %v2977_v56 = vmul.f32 2.1237322e-06, %v7848_v40  ;;  %v1670_v36 = vmul.f32 %v1669_v38, %v10821_v37  ;;  %v1709_v63 = vadd.f32 0.001143296, %v1708_v21 }
 0x1f3   : > { %v3017_v62 = vmul.f32 2.1237322e-06, %v7855_v35  ;;  %v1562_v44 = vadd.f32 %v5763_v24, %v1561_v43  ;;  %vm1563_vm1 = vweird.f32 %v7800_v10  ;;  %v1632_v52 = vmul.f32 %v1631_v0, %v10819_v26 }
 0x1f4   : > { %v2901_v9 = vmul.f32 %v2900_v48, %v7784_v53  ;;  %vm1565_vm2 = vmor %vm1563_vm1, %vm1564_vm0  ;;  %v1570_v47 = vor.u32 1.1754944e-38, %v1569_v27  ;;  %v1671_v31 = vadd.f32 0.014752088, %v1670_v36  ;;  %v1710_v30 = vmul.f32 %v1709_v63, %v10824_v34 }
 0x1f5   : > { %v7869_v4 = vadd.f32 1.1283791, %v2865_v51  ;;  %v1566_v20 = vsel %vm1565_vm2, %v5763_v24, %v1562_v44  ;;  %vm1568_vm3 = vcmp.eq.f32.partialorder %v1567_v8, 8.507059e+37  ;;  %v1633_v38 = vadd.f32 0.112945676, %v1632_v52 }
 0x1f6   : > { %v5765_v21 = vpop.eup %5764  ;;  %v2941_v50 = vmul.f32 %v2940_v15, %v7789_v54  ;;  %v1571_v43 = vsel %vm1568_vm3, %v1570_v47, %v1566_v20  ;;  %v1672_v10 = vmul.f32 %v1671_v31, %v10821_v37  ;;  %v1711_v22 = vadd.f32 0.014752088, %v1710_v30  ;;  %v10826_v15 = vld [vmem:[#allocation40_spill] sm:$0xff] }
 0x1f7   : > { %v2978_v0 = vadd.f32 0.00028619796, %v2977_v56  ;;  %v1572_v48 = vmul.f32 %v1571_v43, %v10825_v46  ;;  %v1599_v27 = vmul.f32 %v5765_v21, %v7850_v13  ;;  %v1634_v36 = vmul.f32 %v1633_v38, %v10819_v26 }
 0x1f8   : > { %v2902_v63 = vadd.f32 0.05243302, %v2901_v9  ;;  %v3018_v51 = vadd.f32 0.00028619796, %v3017_v62  ;;  %v1673_v61 = vadd.f32 0.112945676, %v1672_v10  ;;  %v1712_v44 = vmul.f32 %v1711_v22, %v10824_v34 }
 0x1f9   : > { %v5635_v24 = vclamps-f32 %v1572_v48, 1.0  ;;  %v1600_v8 = vsub.f32 1.0, %v1599_v27  ;;  %v1635_v52 = vadd.f32 0.4994258, %v1634_v36  ;;  %v1748_v20 = vmul.f32 3.8918573e-05, %v10826_v15  ;;  %v567_v36 = vpop.f32.mrf.mxu2 }
 0x1fa   : > { %v2942_v47 = vadd.f32 0.05243302, %v2941_v50  ;;  %v1607_v31 = vand.u32 2147483647, %v7850_v13  ;;  %v1609_v56 = vand.u32 2147483648, %v7850_v13  ;;  %v1674_v46 = vmul.f32 %v1673_v61, %v10821_v37  ;;  %v10827_v10 = vld [vmem:[#allocation38_spill] sm:$0xff] }
 0x1fb   : > { %v4911_v30 = vadd.f32 1.0, %v5635_v24  ;;  %v1601_v43 = vmul.f32 %v5765_v21, %v1600_v8  ;;  %vm1604_vm4 = vweird.f32 %v5765_v21  ;;  %v1636_v62 = vmul.f32 %v1635_v52, %v10819_v26 }
 0x1fc   : > { %v2979_v9 = vmul.f32 %v2978_v0, %v7848_v40  ;;  %vm1603_vm5 = vweird.f32 %v7850_v13  ;;  %v1675_v22 = vadd.f32 0.4994258, %v1674_v46  ;;  %v1713_v38 = vadd.f32 0.112945676, %v1712_v44 }
 0x1fd   : > { %v5011_v48 = vmul.f32 %v4911_v30, %v10827_v10  ;;  %v1602_v50 = vadd.f32 %v5765_v21, %v1601_v43  ;;  %v7885_v27 = vadd.f32 1.0, %v1636_v62  ;;  %v1749_v17 = vadd.f32 0.001143296, %v1748_v20  ;;  %vm1605_vm6 = vmor %vm1603_vm5, %vm1604_vm4 }
 0x1fe   : > { %v2903_v61 = vmul.f32 %v2902_v63, %v7784_v53  ;;  %v3019_v24 = vmul.f32 %v3018_v51, %v7855_v35  ;;  %v1610_v8 = vor.u32 1.1754944e-38, %v1609_v56  ;;  %v1676_v26 = vmul.f32 %v1675_v22, %v10821_v37 }
 0x1ff   : > { %v2943_v0 = vmul.f32 %v2942_v47, %v7789_v54  ;;  %5191 = vmatmul.f32.gmra.mxu0 %v5011_v48  ;;  %v1606_v13 = vsel %vm1605_vm6, %v5765_v21, %v1602_v50  ;;  %vm1608_vm7 = vcmp.eq.f32.partialorder %v1607_v31, 8.507059e+37  ;;  %5766 = vrcp.f32 %v7885_v27  ;;  %v10830_v47 = vld [vmem:[#allocation19_spill] sm:$0xff]  ;;  %v386_v50 = vpop.f32.mrf.mxu0 }
 0x200   : > { %v1611_v44 = vsel %vm1608_vm7, %v1610_v8, %v1606_v13  ;;  %v7892_v52 = vadd.f32 1.0, %v1676_v26  ;;  %v7895_v20 = vadd.f32 %v567_v36, %v6344_v2  ;;  %v1714_v63 = vmul.f32 %v1713_v38, %v10824_v34  ;;  %v659_v38 = vpop.f32.mrf.mxu3  ;;  %v478_v8 = vpop.f32.mrf.mxu1 }
 0x201   : > { %v7899_v51 = vmul.f32 0.5, %v7637_v16  ;;  %v7902_v37 = vmul.f32 0.5, %v7663_v5  ;;  %v1612_v56 = vmul.f32 %v1611_v44, %v10830_v47  ;;  %v1750_v21 = vmul.f32 %v1749_v17, %v10826_v15 }
 0x202   : > { %v2904_v31 = vadd.f32 0.18741608, %v2903_v61  ;;  %v2980_v46 = vadd.f32 0.0036580483, %v2979_v9  ;;  %v3020_v30 = vadd.f32 0.0036580483, %v3019_v24  ;;  %5768 = vrcp.f32 %v7892_v52 }
 0x203   : > { %10828 = vst [vmem:[#allocation29_spill] sm:$0xff] %v7899_v51  ;;  %v7909_v43 = vmul.f32 %v7842_v1, %v7600_v28  ;;  %v7913_v16 = vmul.f32 %v7844_v25, %v7632_v29  ;;  %v2944_v62 = vadd.f32 0.18741608, %v2943_v0  ;;  %v5636_v5 = vclamps-f32 %v1612_v56, 1.0 }
 0x204   : > { %10829 = vst [vmem:[#allocation26_spill] sm:$0xff] %v7902_v37  ;;  %v7917_v22 = vmul.f32 %v7853_v7, %v7652_v45  ;;  %v7921_v17 = vmul.f32 %v7869_v4, %v7676_v49  ;;  %v7924_v9 = vmul.f32 0.70710677, %v7895_v20  ;;  %v1715_v28 = vadd.f32 0.4994258, %v1714_v63  ;;  %v10838_v63 = vld [vmem:[#allocation44_spill] sm:$0xff] }
 0x205   : > { %10831 = vst [vmem:[#allocation47_spill] sm:$0xff] %v7909_v43  ;;  %v5767_v1 = vpop.eup %5766  ;;  %v7927_v10 = vmul.f32 0.5, %v7746_v39  ;;  %v7930_v29 = vmul.f32 0.5, %v7756_v11  ;;  %v4912_v25 = vadd.f32 1.0, %v5636_v5  ;;  %v1751_v48 = vadd.f32 0.014752088, %v1750_v21 }
 0x206   : > { %10832 = vst [vmem:[#allocation30_spill] sm:$0xff] %v7913_v16  ;;  %v7933_v45 = vmul.f32 %v2904_v31, %v7784_v53  ;;  %v2981_v49 = vmul.f32 %v2980_v46, %v7848_v40  ;;  %v3021_v7 = vmul.f32 %v3020_v30, %v7855_v35  ;;  %v1639_v4 = vmul.f32 %v5767_v1, %v7885_v27  ;;  %v10837_v39 = vld [vmem:[#allocation41_spill] sm:$0xff] }
 0x207   : > { %10833 = vst [vmem:[#allocation52_spill] sm:$0xff] %v7917_v22  ;;  %v7939_v36 = vmul.f32 %v2944_v62, %v7789_v54  ;;  %v5012_v61 = vmul.f32 %v4912_v25, %v10837_v39  ;;  %v1649_v11 = vand.u32 2147483648, %v7885_v27  ;;  %v7944_v24 = vadd.f32 %v659_v38, %v6346_v3  ;;  %v10845_v54 = vld [vmem:[#allocation42_spill] sm:$0xff] }
 0x208   : > { %10834 = vst [vmem:[#allocation54_spill] sm:$0xff] %v7921_v17  ;;  %v5769_v26 = vpop.eup %5768  ;;  %v1640_v0 = vsub.f32 1.0, %v1639_v4  ;;  %v3055_v13 = vmul.f32 %v7924_v9, %v7924_v9  ;;  %v1716_v44 = vmul.f32 %v1715_v28, %v10824_v34  ;;  %v1788_v47 = vmul.f32 3.8918573e-05, %v10838_v63 }
 0x209   : > { %10835 = vst [vmem:[#allocation31_spill] sm:$0xff] %v7927_v10  ;;  %5283 = vmatmul.f32.gmra.mxu1 %v5012_v61  ;;  %v1647_v56 = vand.u32 2147483647, %v7885_v27  ;;  %v1679_v21 = vmul.f32 %v5769_v26, %v7892_v52  ;;  %v7953_v31 = vadd.f32 %v386_v50, %v6327_v57  ;;  %v1752_v46 = vmul.f32 %v1751_v48, %v10826_v15 }
 0x20a   : > { %10836 = vst [vmem:[#allocation28_spill] sm:$0xff] %v7930_v29  ;;  %v1641_v30 = vmul.f32 %v5767_v1, %v1640_v0  ;;  %vm1644_vm8 = vweird.f32 %v5767_v1  ;;  %v7957_v62 = vadd.f32 %v478_v8, %v6329_v58  ;;  %v7959_v5 = vadd.f32 1.0, %v1716_v44  ;;  %v10840_v8 = vld [vmem:[#allocation49_spill] sm:$0xff] }
 0x20b   : > { %vm1643_vm9 = vweird.f32 %v7885_v27  ;;  %v1650_v34 = vor.u32 1.1754944e-38, %v1649_v11  ;;  %v1680_v38 = vsub.f32 1.0, %v1679_v21  ;;  %v7963_v28 = vmul.f32 0.70710677, %v7944_v24 }
 0x20c   : > { %v1642_v25 = vadd.f32 %v5767_v1, %v1641_v30  ;;  %v1689_v4 = vand.u32 2147483648, %v7892_v52  ;;  %v7966_v50 = vmin.f32 %v3055_v13, 16.0  ;;  %5770 = vrcp.f32 %v7959_v5  ;;  %vm1645_vm10 = vmor %vm1643_vm9, %vm1644_vm8  ;;  %v10841_v30 = vld [vmem:[#allocation23_spill] sm:$0xff] }
 0x20d   : > { %v1681_v48 = vmul.f32 %v5769_v26, %v1680_v38  ;;  %vm1684_vm11 = vweird.f32 %v5769_v26  ;;  %v1687_v39 = vand.u32 2147483647, %v7892_v52  ;;  %v7971_v61 = vmul.f32 0.70710677, %v7953_v31 }
 0x20e   : > { %10839 = vst [vmem:[#allocation32_spill] sm:$0xff] %v7966_v50  ;;  %v1646_v27 = vsel %vm1645_vm10, %v5767_v1, %v1642_v25  ;;  %vm1648_vm12 = vcmp.eq.f32.partialorder %v1647_v56, 8.507059e+37  ;;  %v7974_v11 = vmul.f32 0.70710677, %v7957_v62  ;;  %v1828_v0 = vmul.f32 3.8918573e-05, %v10840_v8 }
 0x20f   : > { %v1651_v44 = vsel %vm1648_vm12, %v1650_v34, %v1646_v27  ;;  %v1682_v13 = vadd.f32 %v5769_v26, %v1681_v48  ;;  %vm1683_vm13 = vweird.f32 %v7892_v52  ;;  %v3095_v21 = vmul.f32 %v7963_v28, %v7963_v28 }
 0x210   : > { %v1652_v38 = vmul.f32 %v1651_v44, %v10841_v30  ;;  %vm1685_vm14 = vmor %vm1683_vm13, %vm1684_vm11  ;;  %v1690_v29 = vor.u32 1.1754944e-38, %v1689_v4  ;;  %v3057_v10 = vmul.f32 2.1237322e-06, %v7966_v50  ;;  %v1753_v1 = vadd.f32 0.112945676, %v1752_v46  ;;  %v10842_v44 = vld [vmem:[#allocation66_spill] sm:$0xff] }
 0x211   : > { %v2982_v56 = vadd.f32 0.05243302, %v2981_v49  ;;  %v1686_v25 = vsel %vm1685_vm14, %v5769_v26, %v1682_v13  ;;  %vm1688_vm15 = vcmp.eq.f32.partialorder %v1687_v39, 8.507059e+37  ;;  %v3135_v37 = vmul.f32 %v7971_v61, %v7971_v61 }
 0x212   : > { %v5771_v34 = vpop.eup %5770  ;;  %v5637_v48 = vclamps-f32 %v1652_v38, 1.0  ;;  %v1691_v27 = vsel %vm1688_vm15, %v1690_v29, %v1686_v25  ;;  %v3175_v52 = vmul.f32 %v7974_v11, %v7974_v11  ;;  %v1789_v17 = vadd.f32 0.001143296, %v1788_v47 }
 0x213   : > { %v3022_v51 = vadd.f32 0.05243302, %v3021_v7  ;;  %v1692_v30 = vmul.f32 %v1691_v27, %v10842_v44  ;;  %v1719_v4 = vmul.f32 %v5771_v34, %v7959_v5  ;;  %v1829_v22 = vadd.f32 0.001143296, %v1828_v0 }
 0x214   : > { %v4913_v46 = vadd.f32 1.0, %v5637_v48  ;;  %v3058_v49 = vadd.f32 0.00028619796, %v3057_v10  ;;  %v7988_v26 = vmin.f32 %v3095_v21, 16.0  ;;  %v1754_v39 = vmul.f32 %v1753_v1, %v10826_v15 }
 0x215   : > { %v2983_v13 = vmul.f32 %v2982_v56, %v7848_v40  ;;  %v5638_v38 = vclamps-f32 %v1692_v30, 1.0  ;;  %v7992_v29 = vmin.f32 %v3135_v37, 16.0  ;;  %v1720_v25 = vsub.f32 1.0, %v1719_v4 }
 0x216   : > { %10843 = vst [vmem:[#allocation34_spill] sm:$0xff] %v7988_v26  ;;  %v5013_v47 = vmul.f32 %v4913_v46, %v10845_v54  ;;  %v7995_v7 = vmin.f32 %v3175_v52, 16.0  ;;  %v1729_v27 = vand.u32 2147483648, %v7959_v5  ;;  %v1790_v0 = vmul.f32 %v1789_v17, %v10838_v63  ;;  %v10847_v54 = vld [vmem:[#allocation46_spill] sm:$0xff] }
 0x217   : > { %10844 = vst [vmem:[#allocation35_spill] sm:$0xff] %v7992_v29  ;;  %v4914_v48 = vadd.f32 1.0, %v5638_v38  ;;  %v1721_v10 = vmul.f32 %v5771_v34, %v1720_v25  ;;  %vm1724_vm0 = vweird.f32 %v5771_v34  ;;  %v1727_v21 = vand.u32 2147483647, %v7959_v5 }
 0x218   : > { %10846 = vst [vmem:[#allocation56_spill] sm:$0xff] %v7995_v7  ;;  %5375 = vmatmul.f32.gmra.mxu2 %v5013_v47  ;;  %v3059_v1 = vmul.f32 %v3058_v49, %v7966_v50  ;;  %v3097_v37 = vmul.f32 2.1237322e-06, %v7988_v26  ;;  %v1755_v56 = vadd.f32 0.4994258, %v1754_v39  ;;  %v1830_v44 = vmul.f32 %v1829_v22, %v10840_v8  ;;  %v10848_v47 = vld [vmem:[#allocation51_spill] sm:$0xff] }
 0x219   : > { %v5014_v52 = vmul.f32 %v4914_v48, %v10847_v54  ;;  %v3137_v30 = vmul.f32 2.1237322e-06, %v7992_v29  ;;  %v1722_v4 = vadd.f32 %v5771_v34, %v1721_v10  ;;  %vm1723_vm1 = vweird.f32 %v7959_v5  ;;  %v10849_v10 = vld [vmem:[#allocation67_spill] sm:$0xff] }
 0x21a   : > { %v3177_v17 = vmul.f32 2.1237322e-06, %v7995_v7  ;;  %vm1725_vm2 = vmor %vm1723_vm1, %vm1724_vm0  ;;  %v1730_v46 = vor.u32 1.1754944e-38, %v1729_v27  ;;  %v1756_v38 = vmul.f32 %v1755_v56, %v10826_v15  ;;  %v1791_v25 = vadd.f32 0.014752088, %v1790_v0 }
 0x21b   : > { %5467 = vmatmul.f32.gmra.mxu3 %v5014_v52  ;;  %v1726_v49 = vsel %vm1725_vm2, %v5771_v34, %v1722_v4  ;;  %vm1728_vm3 = vcmp.eq.f32.partialorder %v1727_v21, 8.507059e+37  ;;  %v1831_v39 = vadd.f32 0.014752088, %v1830_v44  ;;  %v1868_v22 = vmul.f32 3.8918573e-05, %v10848_v47 }
 0x21c   : > { %v3060_v16 = vadd.f32 0.0036580483, %v3059_v1  ;;  %v3098_v48 = vadd.f32 0.00028619796, %v3097_v37  ;;  %v1731_v54 = vsel %vm1728_vm3, %v1730_v46, %v1726_v49  ;;  %v8009_v43 = vadd.f32 1.0, %v1756_v38  ;;  %v10852_v49 = vld [vmem:[#allocation48_spill] sm:$0xff] }
 0x21d   : > { %v3023_v5 = vmul.f32 %v3022_v51, %v7855_v35  ;;  %v1732_v53 = vmul.f32 %v1731_v54, %v10849_v10  ;;  %v1792_v27 = vmul.f32 %v1791_v25, %v10838_v63  ;;  %v1832_v15 = vmul.f32 %v1831_v39, %v10840_v8 }
 0x21e   : > { %v2984_v0 = vadd.f32 0.18741608, %v2983_v13  ;;  %v3138_v56 = vadd.f32 0.00028619796, %v3137_v30  ;;  %v3178_v34 = vadd.f32 0.00028619796, %v3177_v17  ;;  %5772 = vrcp.f32 %v8009_v43 }
 0x21f   : > { %v8017_v21 = vmul.f32 0.5, %v7792_v19  ;;  %v5639_v1 = vclamps-f32 %v1732_v53, 1.0  ;;  %v1793_v37 = vadd.f32 0.112945676, %v1792_v27  ;;  %v1869_v44 = vadd.f32 0.001143296, %v1868_v22 }
 0x220   : > { %v2906_v52 = vadd.f32 1.1283791, %v7933_v45  ;;  %v3061_v51 = vmul.f32 %v3060_v16, %v7966_v50  ;;  %v3099_v4 = vmul.f32 %v3098_v48, %v7988_v26  ;;  %v1833_v46 = vadd.f32 0.112945676, %v1832_v15  ;;  %v570_v48 = vpop.f32.mrf.mxu2 }
 0x221   : > { %10850 = vst [vmem:[#allocation40_spill] sm:$0xff] %v8017_v21  ;;  %v2946_v38 = vadd.f32 1.1283791, %v7939_v36  ;;  %v3024_v13 = vadd.f32 0.18741608, %v3023_v5  ;;  %v4915_v30 = vadd.f32 1.0, %v5639_v1  ;;  %v1794_v17 = vmul.f32 %v1793_v37, %v10838_v63 }
 0x222   : > { %v8025_v25 = vmul.f32 0.5, %v7797_v41  ;;  %v3139_v53 = vmul.f32 %v3138_v56, %v7992_v29  ;;  %v3179_v19 = vmul.f32 %v3178_v34, %v7995_v7  ;;  %v1834_v45 = vmul.f32 %v1833_v46, %v10840_v8 }
 0x223   : > { %v2985_v16 = vmul.f32 %v2984_v0, %v7848_v40  ;;  %v5015_v39 = vmul.f32 %v4915_v30, %v10852_v49  ;;  %v1795_v22 = vadd.f32 0.4994258, %v1794_v17  ;;  %v1870_v36 = vmul.f32 %v1869_v44, %v10848_v47  ;;  %v662_v17 = vpop.f32.mrf.mxu3 }
 0x224   : > { %10851 = vst [vmem:[#allocation38_spill] sm:$0xff] %v8025_v25  ;;  %v5773_v54 = vpop.eup %5772  ;;  %v8034_v5 = vmul.f32 %v2906_v52, %v7763_v6  ;;  %v3062_v41 = vadd.f32 0.05243302, %v3061_v51  ;;  %v3100_v10 = vadd.f32 0.0036580483, %v3099_v4  ;;  %v8037_v15 = vmul.f32 %v2946_v38, %v7768_v33 }
 0x225   : > { %v1835_v27 = vadd.f32 0.4994258, %v1834_v45  ;;  %v3025_v56 = vmul.f32 %v3024_v13, %v7855_v35  ;;  %5194 = vmatmul.f32.gmra.mxu0 %v5015_v39  ;;  %v1759_v0 = vmul.f32 %v5773_v54, %v8009_v43  ;;  %v1796_v34 = vmul.f32 %v1795_v22, %v10838_v63 }
 0x226   : > { %10853 = vst [vmem:[#allocation19_spill] sm:$0xff] %v8037_v15  ;;  %v3140_v1 = vadd.f32 0.0036580483, %v3139_v53  ;;  %v3180_v37 = vadd.f32 0.0036580483, %v3179_v19  ;;  %v8044_v6 = vadd.f32 %v570_v48, %v6344_v2  ;;  %v3063_v46 = vmul.f32 %v3062_v41, %v7966_v50  ;;  %v389_v53 = vpop.f32.mrf.mxu0 }
 0x227   : > { %v1836_v44 = vmul.f32 %v1835_v27, %v10840_v8  ;;  %v2986_v52 = vadd.f32 1.1283791, %v2985_v16  ;;  %v1760_v51 = vsub.f32 1.0, %v1759_v0  ;;  %v8046_v4 = vadd.f32 1.0, %v1796_v34  ;;  %v481_v34 = vpop.f32.mrf.mxu1 }
 0x228   : > { %v1871_v33 = vadd.f32 0.014752088, %v1870_v36  ;;  %v3101_v38 = vmul.f32 %v3100_v10, %v7988_v26  ;;  %v1769_v13 = vand.u32 2147483648, %v8009_v43  ;;  %vm1764_vm4 = vweird.f32 %v5773_v54 }
 0x229   : > { %v8051_v30 = vadd.f32 1.0, %v1836_v44  ;;  %v1761_v63 = vmul.f32 %v5773_v54, %v1760_v51  ;;  %v1767_v8 = vand.u32 2147483647, %v8009_v43  ;;  %5774 = vrcp.f32 %v8046_v4 }
 0x22a   : > { %v3141_v19 = vmul.f32 %v3140_v1, %v7992_v29  ;;  %v3181_v45 = vmul.f32 %v3180_v37, %v7995_v7  ;;  %v8059_v16 = vmul.f32 0.70710677, %v8044_v6  ;;  %vm1763_vm5 = vweird.f32 %v8009_v43 }
 0x22b   : > { %5776 = vrcp.f32 %v8051_v30  ;;  %v1762_v49 = vadd.f32 %v5773_v54, %v1761_v63  ;;  %v1872_v39 = vmul.f32 %v1871_v33, %v10848_v47  ;;  %v1908_v22 = vmul.f32 3.8918573e-05, %v7051_v32  ;;  %vm1765_vm6 = vmor %vm1763_vm5, %vm1764_vm4 }
 0x22c   : > { %v8064_v48 = vadd.f32 1.1283791, %v3025_v56  ;;  %v1770_v36 = vor.u32 1.1754944e-38, %v1769_v13  ;;  %v8067_v41 = vadd.f32 %v662_v17, %v6346_v3  ;;  %v8070_v10 = vadd.f32 %v389_v53, %v6327_v57 }
 0x22d   : > { %v8073_v27 = vmul.f32 %v2986_v52, %v7810_v12  ;;  %v8075_v0 = vadd.f32 0.05243302, %v3101_v38  ;;  %v1766_v43 = vsel %vm1765_vm6, %v5773_v54, %v1762_v49  ;;  %vm1768_vm7 = vcmp.eq.f32.partialorder %v1767_v8, 8.507059e+37 }
 0x22e   : > { %v3064_v1 = vadd.f32 0.18741608, %v3063_v46  ;;  %v8077_v37 = vadd.f32 0.05243302, %v3141_v19  ;;  %v1771_v56 = vsel %vm1768_vm7, %v1770_v36, %v1766_v43  ;;  %v3215_v44 = vmul.f32 %v8059_v16, %v8059_v16 }
 0x22f   : > { %10854 = vst [vmem:[#allocation41_spill] sm:$0xff] %v8073_v27  ;;  %v5775_v51 = vpop.eup %5774  ;;  %v3182_v33 = vadd.f32 0.05243302, %v3181_v45  ;;  %v1772_v13 = vmul.f32 %v1771_v56, %v7228_v23  ;;  %v1873_v63 = vadd.f32 0.112945676, %v1872_v39  ;;  %v8090_v38 = vadd.f32 %v481_v34, %v6329_v58 }
 0x230   : > { %v1909_v17 = vadd.f32 0.001143296, %v1908_v22  ;;  %v1799_v52 = vmul.f32 %v5775_v51, %v8046_v4  ;;  %v8084_v54 = vmul.f32 0.70710677, %v8067_v41  ;;  %v8087_v46 = vmul.f32 0.70710677, %v8070_v10 }
 0x231   : > { %v5777_v12 = vpop.eup %5776  ;;  %v5640_v8 = vclamps-f32 %v1772_v13, 1.0  ;;  %vm1803_vm8 = vweird.f32 %v8046_v4  ;;  %v1807_v53 = vand.u32 2147483647, %v8046_v4  ;;  %v1809_v45 = vand.u32 2147483648, %v8046_v4 }
 0x232   : > { %v1839_v23 = vmul.f32 %v5777_v12, %v8051_v30  ;;  %v1800_v19 = vsub.f32 1.0, %v1799_v52  ;;  %vm1843_vm9 = vweird.f32 %v8051_v30  ;;  %v8097_v49 = vmin.f32 %v3215_v44, 16.0  ;;  %v10856_v52 = vld [vmem:[#allocation50_spill] sm:$0xff] }
 0x233   : > { %v4916_v39 = vadd.f32 1.0, %v5640_v8  ;;  %v1847_v36 = vand.u32 2147483647, %v8051_v30  ;;  %v1874_v43 = vmul.f32 %v1873_v63, %v10848_v47  ;;  %vm1804_vm10 = vweird.f32 %v5775_v51 }
 0x234   : > { %10855 = vst [vmem:[#allocation44_spill] sm:$0xff] %v8097_v49  ;;  %v1840_v22 = vsub.f32 1.0, %v1839_v23  ;;  %v1801_v34 = vmul.f32 %v5775_v51, %v1800_v19  ;;  %v1849_v56 = vand.u32 2147483648, %v8051_v30  ;;  %v3255_v13 = vmul.f32 %v8084_v54, %v8084_v54  ;;  %vm1805_vm13 = vmor %vm1803_vm8, %vm1804_vm10 }
 0x235   : > { %v5016_v25 = vmul.f32 %v4916_v39, %v10856_v52  ;;  %vm1844_vm11 = vweird.f32 %v5777_v12  ;;  %v1875_v27 = vadd.f32 0.4994258, %v1874_v43  ;;  %vm1808_vm12 = vcmp.eq.f32.partialorder %v1807_v53, 8.507059e+37 }
 0x236   : > { %v1841_v21 = vmul.f32 %v5777_v12, %v1840_v22  ;;  %v1802_v44 = vadd.f32 %v5775_v51, %v1801_v34  ;;  %v3217_v8 = vmul.f32 2.1237322e-06, %v8097_v49  ;;  %v3295_v23 = vmul.f32 %v8087_v46, %v8087_v46  ;;  %vm1845_vm15 = vmor %vm1843_vm9, %vm1844_vm11 }
 0x237   : > { %5286 = vmatmul.f32.gmra.mxu1 %v5016_v25  ;;  %v1810_v63 = vor.u32 1.1754944e-38, %v1809_v45  ;;  %vm1848_vm14 = vcmp.eq.f32.partialorder %v1847_v36, 8.507059e+37  ;;  %v1876_v15 = vmul.f32 %v1875_v27, %v10848_v47  ;;  %v1850_v22 = vor.u32 1.1754944e-38, %v1849_v56 }
 0x238   : > { %v1842_v19 = vadd.f32 %v5777_v12, %v1841_v21  ;;  %v1806_v39 = vsel %vm1805_vm13, %v5775_v51, %v1802_v44  ;;  %v8113_v53 = vmin.f32 %v3255_v13, 16.0  ;;  %v8116_v43 = vmul.f32 0.70710677, %v8090_v38 }
 0x239   : > { %v1811_v34 = vsel %vm1808_vm12, %v1810_v63, %v1806_v39  ;;  %v8118_v52 = vadd.f32 1.0, %v1876_v15  ;;  %v1910_v4 = vmul.f32 %v1909_v17, %v7051_v32  ;;  %v3218_v47 = vadd.f32 0.00028619796, %v3217_v8  ;;  %v10862_v63 = vld [vmem:[#allocation55_spill] sm:$0xff] }
 0x23a   : > { %10857 = vst [vmem:[#allocation49_spill] sm:$0xff] %v8113_v53  ;;  %v1846_v25 = vsel %vm1845_vm15, %v5777_v12, %v1842_v19  ;;  %v1812_v21 = vmul.f32 %v1811_v34, %v7232_v59  ;;  %v8122_v27 = vmin.f32 %v3295_v23, 16.0  ;;  %v8125_v30 = vmul.f32 0.5, %v7895_v20 }
 0x23b   : > { %v1851_v45 = vsel %vm1848_vm14, %v1850_v22, %v1846_v25  ;;  %v8128_v51 = vmul.f32 0.5, %v7944_v24  ;;  %5778 = vrcp.f32 %v8118_v52  ;;  %v3065_v15 = vmul.f32 %v3064_v1, %v7966_v50  ;;  %v10863_v22 = vld [vmem:[#allocation53_spill] sm:$0xff] }
 0x23c   : > { %10858 = vst [vmem:[#allocation23_spill] sm:$0xff] %v8122_v27  ;;  %v1852_v36 = vmul.f32 %v1851_v45, %v7249_v18  ;;  %v3103_v17 = vmul.f32 %v8075_v0, %v7988_v26  ;;  %v5641_v59 = vclamps-f32 %v1812_v21, 1.0  ;;  %v3335_v12 = vmul.f32 %v8116_v43, %v8116_v43 }
 0x23d   : > { %10859 = vst [vmem:[#allocation66_spill] sm:$0xff] %v8125_v30  ;;  %v3143_v20 = vmul.f32 %v8077_v37, %v7992_v29  ;;  %v3183_v56 = vmul.f32 %v3182_v33, %v7995_v7  ;;  %v1911_v13 = vadd.f32 0.014752088, %v1910_v4  ;;  %v3219_v18 = vmul.f32 %v3218_v47, %v8097_v49  ;;  %v10865_v47 = vld [vmem:[#allocation57_spill] sm:$0xff] }
 0x23e   : > { %10860 = vst [vmem:[#allocation42_spill] sm:$0xff] %v8128_v51  ;;  %v5642_v24 = vclamps-f32 %v1852_v36, 1.0  ;;  %v4917_v44 = vadd.f32 1.0, %v5641_v59  ;;  %v3257_v8 = vmul.f32 2.1237322e-06, %v8113_v53  ;;  %v8144_v0 = vmul.f32 0.5, %v7953_v31 }
 0x23f   : > { %v3297_v1 = vmul.f32 2.1237322e-06, %v8122_v27  ;;  %v1948_v19 = vmul.f32 3.8918573e-05, %v10862_v63  ;;  %v1988_v39 = vmul.f32 3.8918573e-05, %v7090_v42  ;;  %v1912_v31 = vmul.f32 %v1911_v13, %v7051_v32 }
 0x240   : > { %10861 = vst [vmem:[#allocation46_spill] sm:$0xff] %v8144_v0  ;;  %v4918_v23 = vadd.f32 1.0, %v5642_v24  ;;  %v8148_v37 = vadd.f32 1.1283791, %v3065_v15  ;;  %v3104_v33 = vadd.f32 0.18741608, %v3103_v17  ;;  %v5017_v34 = vmul.f32 %v4917_v44, %v10863_v22 }
 0x241   : > { %v8151_v25 = vmin.f32 %v3335_v12, 16.0  ;;  %v5779_v4 = vpop.eup %5778  ;;  %v3144_v21 = vadd.f32 0.18741608, %v3143_v20  ;;  %v3184_v45 = vadd.f32 0.18741608, %v3183_v56  ;;  %v8158_v15 = vmul.f32 %v8064_v48, %v7819_v55 }
 0x242   : > { %v5018_v36 = vmul.f32 %v4918_v23, %v10865_v47  ;;  %5378 = vmatmul.f32.gmra.mxu2 %v5017_v34  ;;  %v3220_v59 = vadd.f32 0.0036580483, %v3219_v18  ;;  %v3258_v24 = vadd.f32 0.00028619796, %v3257_v8  ;;  %v3298_v0 = vadd.f32 0.00028619796, %v3297_v1 }
 0x243   : > { %10864 = vst [vmem:[#allocation51_spill] sm:$0xff] %v8151_v25  ;;  %v1879_v51 = vmul.f32 %v5779_v4, %v8118_v52  ;;  %v1913_v17 = vadd.f32 0.112945676, %v1912_v31  ;;  %v1949_v12 = vadd.f32 0.001143296, %v1948_v19  ;;  %v8161_v20 = vmul.f32 0.5, %v7957_v62 }
 0x244   : > { %10866 = vst [vmem:[#allocation67_spill] sm:$0xff] %v8158_v15  ;;  %5470 = vmatmul.f32.gmra.mxu3 %v5018_v36  ;;  %v1989_v44 = vadd.f32 0.001143296, %v1988_v39  ;;  %v3337_v56 = vmul.f32 2.1237322e-06, %v8151_v25  ;;  %v10868_v23 = vld [vmem:[#allocation59_spill] sm:$0xff]  ;;  %vm1884_vm0 = vweird.f32 %v5779_v4  ;;  %v3105_v62 = vmul.f32 %v3104_v33, %v7988_v26 }
 0x245   : > { %10867 = vst [vmem:[#allocation48_spill] sm:$0xff] %v8161_v20  ;;  %v1880_v13 = vsub.f32 1.0, %v1879_v51  ;;  %v2028_v18 = vmul.f32 3.8918573e-05, %v10868_v23  ;;  %v1889_v8 = vand.u32 2147483648, %v8118_v52  ;;  %v1914_v1 = vmul.f32 %v1913_v17, %v7051_v32  ;;  %v10869_v20 = vld [vmem:[#allocation76_spill] sm:$0xff] }
 0x246   : > { %v1950_v22 = vmul.f32 %v1949_v12, %v10862_v63  ;;  %v1990_v55 = vmul.f32 %v1989_v44, %v7090_v42  ;;  %v1887_v19 = vand.u32 2147483647, %v8118_v52  ;;  %v3259_v36 = vmul.f32 %v3258_v24, %v8113_v53  ;;  %v10909_v15 = vld [vmem:[#allocation92_spill] sm:$0xff] }
 0x247   : > { %v1881_v48 = vmul.f32 %v5779_v4, %v1880_v13  ;;  %v2029_v39 = vadd.f32 0.001143296, %v2028_v18  ;;  %v1915_v34 = vadd.f32 0.4994258, %v1914_v1  ;;  %vm1883_vm1 = vweird.f32 %v8118_v52 }
 0x248   : > { %v1951_v47 = vadd.f32 0.014752088, %v1950_v22  ;;  %v1991_v51 = vadd.f32 0.014752088, %v1990_v55  ;;  %vm1885_vm2 = vmor %vm1883_vm1, %vm1884_vm0  ;;  %v1890_v12 = vor.u32 1.1754944e-38, %v1889_v8  ;;  %v3145_v33 = vmul.f32 %v3144_v21, %v7992_v29 }
 0x249   : > { %v1882_v31 = vadd.f32 %v5779_v4, %v1881_v48  ;;  %v2030_v17 = vmul.f32 %v2029_v39, %v10868_v23  ;;  %v1916_v44 = vmul.f32 %v1915_v34, %v7051_v32  ;;  %v3185_v1 = vmul.f32 %v3184_v45, %v7995_v7 }
 0x24a   : > { %v1952_v13 = vmul.f32 %v1951_v47, %v10862_v63  ;;  %v1992_v18 = vmul.f32 %v1991_v51, %v7090_v42  ;;  %vm1888_vm3 = vcmp.eq.f32.partialorder %v1887_v19, 8.507059e+37  ;;  %v3338_v24 = vadd.f32 0.00028619796, %v3337_v56  ;;  %v10870_v56 = vld [vmem:[#allocation60_spill] sm:$0xff] }
 0x24b   : > { %v1886_v22 = vsel %vm1885_vm2, %v5779_v4, %v1882_v31  ;;  %v8179_v48 = vadd.f32 1.0, %v1916_v44  ;;  %v3106_v39 = vadd.f32 1.1283791, %v3105_v62  ;;  %v2031_v32 = vadd.f32 0.014752088, %v2030_v17 }
 0x24c   : > { %v1891_v55 = vsel %vm1888_vm3, %v1890_v12, %v1886_v22  ;;  %v1953_v52 = vadd.f32 0.112945676, %v1952_v13  ;;  %v1993_v30 = vadd.f32 0.112945676, %v1992_v18  ;;  %v3221_v34 = vmul.f32 %v3220_v59, %v8097_v49  ;;  %v10873_v22 = vld [vmem:[#allocation58_spill] sm:$0xff] }
 0x24d   : > { %v1892_v8 = vmul.f32 %v1891_v55, %v10869_v20  ;;  %v3260_v47 = vadd.f32 0.0036580483, %v3259_v36  ;;  %v3299_v51 = vmul.f32 %v3298_v0, %v8122_v27  ;;  %5780 = vrcp.f32 %v8179_v48 }
 0x24e   : > { %v1954_v4 = vmul.f32 %v1953_v52, %v10862_v63  ;;  %v1994_v45 = vmul.f32 %v1993_v30, %v7090_v42  ;;  %v2068_v19 = vmul.f32 3.8918573e-05, %v10870_v56  ;;  %v8190_v62 = vmul.f32 %v8148_v37, %v7924_v9 }
 0x24f   : > { %v5643_v21 = vclamps-f32 %v1892_v8, 1.0  ;;  %v3146_v20 = vadd.f32 1.1283791, %v3145_v33  ;;  %v3186_v31 = vadd.f32 1.1283791, %v3185_v1  ;;  %v3339_v59 = vmul.f32 %v3338_v24, %v8151_v25  ;;  %v573_v33 = vpop.f32.mrf.mxu2  ;;  %v665_v1 = vpop.f32.mrf.mxu3 }
 0x250   : > { %10871 = vst [vmem:[#allocation50_spill] sm:$0xff] %v8190_v62  ;;  %v1955_v17 = vadd.f32 0.4994258, %v1954_v4  ;;  %v1995_v0 = vadd.f32 0.4994258, %v1994_v45  ;;  %v2032_v12 = vmul.f32 %v2031_v32, %v10868_v23  ;;  %v8195_v44 = vmul.f32 %v3106_v39, %v7963_v28 }
 0x251   : > { %v4919_v36 = vadd.f32 1.0, %v5643_v21  ;;  %v3222_v13 = vadd.f32 0.05243302, %v3221_v34  ;;  %v3261_v30 = vmul.f32 %v3260_v47, %v8113_v53  ;;  %v3300_v18 = vadd.f32 0.0036580483, %v3299_v51 }
 0x252   : > { %10872 = vst [vmem:[#allocation55_spill] sm:$0xff] %v8195_v44  ;;  %v1956_v9 = vmul.f32 %v1955_v17, %v10862_v63  ;;  %v1996_v37 = vmul.f32 %v1995_v0, %v7090_v42  ;;  %v2069_v24 = vadd.f32 0.001143296, %v2068_v19  ;;  %v8202_v8 = vmul.f32 %v3146_v20, %v7971_v61 }
 0x253   : > { %v5019_v55 = vmul.f32 %v4919_v36, %v10873_v22  ;;  %v5781_v52 = vpop.eup %5780  ;;  %v8205_v28 = vmul.f32 %v3186_v31, %v7974_v11  ;;  %v8208_v39 = vmul.f32 0.5, %v8044_v6  ;;  %v3340_v32 = vadd.f32 0.0036580483, %v3339_v59  ;;  %v10877_v31 = vld [vmem:[#allocation62_spill] sm:$0xff] }
 0x254   : > { %10874 = vst [vmem:[#allocation53_spill] sm:$0xff] %v8202_v8  ;;  %v1919_v34 = vmul.f32 %v5781_v52, %v8179_v48  ;;  %v8211_v63 = vadd.f32 1.0, %v1956_v9  ;;  %v8213_v42 = vadd.f32 1.0, %v1996_v37  ;;  %v2033_v47 = vadd.f32 0.112945676, %v2032_v12 }
 0x255   : > { %10875 = vst [vmem:[#allocation57_spill] sm:$0xff] %v8205_v28  ;;  %5197 = vmatmul.f32.gmra.mxu0 %v5019_v55  ;;  %v3223_v51 = vmul.f32 %v3222_v13, %v8097_v49  ;;  %v3301_v61 = vmul.f32 %v3300_v18, %v8122_v27  ;;  %v8218_v21 = vadd.f32 %v573_v33, %v6344_v2  ;;  %v3262_v6 = vadd.f32 0.05243302, %v3261_v30 }
 0x256   : > { %10876 = vst [vmem:[#allocation59_spill] sm:$0xff] %v8208_v39  ;;  %v8221_v11 = vadd.f32 %v665_v1, %v6346_v3  ;;  %v1920_v4 = vsub.f32 1.0, %v1919_v34  ;;  %5782 = vrcp.f32 %v8211_v63  ;;  %v2070_v45 = vmul.f32 %v2069_v24, %v10870_v56  ;;  %v392_v1 = vpop.f32.mrf.mxu0 }
 0x257   : > { %v3341_v19 = vmul.f32 %v3340_v32, %v8151_v25  ;;  %v1929_v20 = vand.u32 2147483648, %v8179_v48  ;;  %5784 = vrcp.f32 %v8213_v42  ;;  %v2108_v59 = vmul.f32 3.8918573e-05, %v10877_v31 }
 0x258   : > { %v1921_v36 = vmul.f32 %v5781_v52, %v1920_v4  ;;  %vm1924_vm4 = vweird.f32 %v5781_v52  ;;  %v1927_v17 = vand.u32 2147483647, %v8179_v48  ;;  %v2034_v0 = vmul.f32 %v2033_v47, %v10868_v23 }
 0x259   : > { %v8232_v12 = vmul.f32 0.5, %v8067_v41  ;;  %v8235_v13 = vmul.f32 0.5, %v8070_v10  ;;  %v8238_v30 = vmul.f32 0.70710677, %v8218_v21  ;;  %v8241_v18 = vmul.f32 0.70710677, %v8221_v11 }
 0x25a   : > { %v3302_v22 = vadd.f32 0.05243302, %v3301_v61  ;;  %v1922_v55 = vadd.f32 %v5781_v52, %v1921_v36  ;;  %vm1923_vm5 = vweird.f32 %v8179_v48  ;;  %v2071_v9 = vadd.f32 0.014752088, %v2070_v45 }
 0x25b   : > { %10878 = vst [vmem:[#allocation76_spill] sm:$0xff] %v8232_v12  ;;  %v8244_v37 = vadd.f32 0.18741608, %v3223_v51  ;;  %v3263_v33 = vmul.f32 %v3262_v6, %v8113_v53  ;;  %v8247_v41 = vadd.f32 0.05243302, %v3341_v19  ;;  %vm1925_vm6 = vmor %vm1923_vm5, %vm1924_vm4  ;;  %v1930_v10 = vor.u32 1.1754944e-38, %v1929_v20 }
 0x25c   : > { %10879 = vst [vmem:[#allocation60_spill] sm:$0xff] %v8235_v13  ;;  %v5783_v24 = vpop.eup %5782  ;;  %v1926_v32 = vsel %vm1925_vm6, %v5781_v52, %v1922_v55  ;;  %vm1928_vm7 = vcmp.eq.f32.partialorder %v1927_v17, 8.507059e+37  ;;  %v2035_v34 = vadd.f32 0.4994258, %v2034_v0  ;;  %v2109_v47 = vadd.f32 0.001143296, %v2108_v59 }
 0x25d   : > { %v5785_v4 = vpop.eup %5784  ;;  %v1931_v61 = vsel %vm1928_vm7, %v1930_v10, %v1926_v32  ;;  %v1959_v36 = vmul.f32 %v5783_v24, %v8211_v63  ;;  %v3375_v48 = vmul.f32 %v8238_v30, %v8238_v30  ;;  %v3415_v51 = vmul.f32 %v8241_v18, %v8241_v18  ;;  %v10880_v6 = vld [vmem:[#allocation78_spill] sm:$0xff] }
 0x25e   : > { %v1932_v45 = vmul.f32 %v1931_v61, %v10880_v6  ;;  %v1999_v19 = vmul.f32 %v5785_v4, %v8213_v42  ;;  %v8257_v20 = vadd.f32 %v392_v1, %v6327_v57  ;;  %v2072_v52 = vmul.f32 %v2071_v9, %v10870_v56 }
 0x25f   : > { %v1960_v59 = vsub.f32 1.0, %v1959_v36  ;;  %v1967_v17 = vand.u32 2147483647, %v8211_v63  ;;  %v1969_v0 = vand.u32 2147483648, %v8211_v63  ;;  %v2007_v55 = vand.u32 2147483647, %v8213_v42 }
 0x260   : > { %v5644_v10 = vclamps-f32 %v1932_v45, 1.0  ;;  %v2000_v32 = vsub.f32 1.0, %v1999_v19  ;;  %v2009_v13 = vand.u32 2147483648, %v8213_v42  ;;  %v2036_v61 = vmul.f32 %v2035_v34, %v10868_v23  ;;  %v10883_v23 = vld [vmem:[#allocation61_spill] sm:$0xff] }
 0x261   : > { %v1961_v6 = vmul.f32 %v5783_v24, %v1960_v59  ;;  %vm1964_vm8 = vweird.f32 %v5783_v24  ;;  %v8265_v12 = vmin.f32 %v3375_v48, 16.0  ;;  %v8267_v1 = vmin.f32 %v3415_v51, 16.0 }
 0x262   : > { %v4920_v9 = vadd.f32 1.0, %v5644_v10  ;;  %v2001_v36 = vmul.f32 %v5785_v4, %v2000_v32  ;;  %vm2004_vm9 = vweird.f32 %v5785_v4  ;;  %v8269_v39 = vadd.f32 1.0, %v2036_v61 }
 0x263   : > { %10881 = vst [vmem:[#allocation58_spill] sm:$0xff] %v8265_v12  ;;  %v1962_v28 = vadd.f32 %v5783_v24, %v1961_v6  ;;  %vm1963_vm10 = vweird.f32 %v8211_v63  ;;  %vm2003_vm11 = vweird.f32 %v8213_v42  ;;  %v8274_v45 = vmul.f32 0.70710677, %v8257_v20  ;;  %v10884_v6 = vld [vmem:[#allocation82_spill] sm:$0xff] }
 0x264   : > { %10882 = vst [vmem:[#allocation62_spill] sm:$0xff] %v8267_v1  ;;  %v5020_v34 = vmul.f32 %v4920_v9, %v10883_v23  ;;  %vm1965_vm12 = vmor %vm1963_vm10, %vm1964_vm8  ;;  %v1970_v48 = vor.u32 1.1754944e-38, %v1969_v0  ;;  %v2002_v19 = vadd.f32 %v5785_v4, %v2001_v36  ;;  %5786 = vrcp.f32 %v8269_v39  ;;  %v484_v36 = vpop.f32.mrf.mxu1 }
 0x265   : > { %v1966_v51 = vsel %vm1965_vm12, %v5783_v24, %v1962_v28  ;;  %vm1968_vm13 = vcmp.eq.f32.partialorder %v1967_v17, 8.507059e+37  ;;  %vm2005_vm14 = vmor %vm2003_vm11, %vm2004_vm9  ;;  %v2010_v59 = vor.u32 1.1754944e-38, %v2009_v13  ;;  %v3377_v10 = vmul.f32 2.1237322e-06, %v8265_v12  ;;  %v10885_v28 = vld [vmem:[#allocation85_spill] sm:$0xff] }
 0x266   : > { %5289 = vmatmul.f32.gmra.mxu1 %v5020_v34  ;;  %v1971_v63 = vsel %vm1968_vm13, %v1970_v48, %v1966_v51  ;;  %v2006_v32 = vsel %vm2005_vm14, %v5785_v4, %v2002_v19  ;;  %vm2008_vm15 = vcmp.eq.f32.partialorder %v2007_v55, 8.507059e+37  ;;  %v3417_v42 = vmul.f32 2.1237322e-06, %v8267_v1 }
 0x267   : > { %v3303_v61 = vmul.f32 %v3302_v22, %v8122_v27  ;;  %v1972_v9 = vmul.f32 %v1971_v63, %v10884_v6  ;;  %v2011_v0 = vsel %vm2008_vm15, %v2010_v59, %v2006_v32  ;;  %v2073_v23 = vadd.f32 0.112945676, %v2072_v52 }
 0x268   : > { %v3264_v8 = vadd.f32 0.18741608, %v3263_v33  ;;  %v2012_v24 = vmul.f32 %v2011_v0, %v10885_v28  ;;  %v3455_v13 = vmul.f32 %v8274_v45, %v8274_v45  ;;  %v2110_v17 = vmul.f32 %v2109_v47, %v10877_v31  ;;  %v10888_v0 = vld [vmem:[#allocation63_spill] sm:$0xff] }
 0x269   : > { %v8287_v4 = vmul.f32 0.5, %v8090_v38  ;;  %v3343_v55 = vmul.f32 %v8247_v41, %v8151_v25  ;;  %v5645_v22 = vclamps-f32 %v1972_v9, 1.0  ;;  %v3378_v34 = vadd.f32 0.00028619796, %v3377_v10 }
 0x26a   : > { %v5787_v48 = vpop.eup %5786  ;;  %v3225_v52 = vmul.f32 %v8244_v37, %v8097_v49  ;;  %v5646_v33 = vclamps-f32 %v2012_v24, 1.0  ;;  %v3418_v19 = vadd.f32 0.00028619796, %v3417_v42  ;;  %v8294_v51 = vadd.f32 %v484_v36, %v6329_v58  ;;  %v10889_v36 = vld [vmem:[#allocation68_spill] sm:$0xff] }
 0x26b   : > { %10886 = vst [vmem:[#allocation78_spill] sm:$0xff] %v8287_v4  ;;  %v3304_v59 = vadd.f32 0.18741608, %v3303_v61  ;;  %v4921_v63 = vadd.f32 1.0, %v5645_v22  ;;  %v2039_v47 = vmul.f32 %v5787_v48, %v8269_v39  ;;  %v2074_v38 = vmul.f32 %v2073_v23, %v10870_v56 }
 0x26c   : > { %v3265_v32 = vmul.f32 %v3264_v8, %v8113_v53  ;;  %v4922_v41 = vadd.f32 1.0, %v5646_v33  ;;  %v8299_v6 = vmin.f32 %v3455_v13, 16.0  ;;  %v2111_v10 = vadd.f32 0.014752088, %v2110_v17  ;;  %v10890_v33 = vld [vmem:[#allocation64_spill] sm:$0xff] }
 0x26d   : > { %v3344_v9 = vadd.f32 0.18741608, %v3343_v55  ;;  %v5021_v37 = vmul.f32 %v4921_v63, %v10888_v0  ;;  %v3379_v42 = vmul.f32 %v3378_v34, %v8265_v12  ;;  %v2040_v28 = vsub.f32 1.0, %v2039_v47  ;;  %v10891_v47 = vld [vmem:[#allocation65_spill] sm:$0xff] }
 0x26e   : > { %10887 = vst [vmem:[#allocation61_spill] sm:$0xff] %v8299_v6  ;;  %v5022_v24 = vmul.f32 %v4922_v41, %v10889_v36  ;;  %v3419_v61 = vmul.f32 %v3418_v19, %v8267_v1  ;;  %v8306_v22 = vmul.f32 0.70710677, %v8294_v51  ;;  %v2049_v23 = vand.u32 2147483648, %v8269_v39 }
 0x26f   : > { %5381 = vmatmul.f32.gmra.mxu2 %v5021_v37  ;;  %v2041_v8 = vmul.f32 %v5787_v48, %v2040_v28  ;;  %vm2044_vm0 = vweird.f32 %v5787_v48  ;;  %v2047_v13 = vand.u32 2147483647, %v8269_v39  ;;  %v2075_v17 = vadd.f32 0.4994258, %v2074_v38 }
 0x270   : > { %5473 = vmatmul.f32.gmra.mxu3 %v5022_v24  ;;  %v3457_v55 = vmul.f32 2.1237322e-06, %v8299_v6  ;;  %v2112_v34 = vmul.f32 %v2111_v10, %v10877_v31  ;;  %v2148_v63 = vmul.f32 3.8918573e-05, %v10890_v33  ;;  %v2188_v19 = vmul.f32 3.8918573e-05, %v10891_v47 }
 0x271   : > { %v3380_v41 = vadd.f32 0.0036580483, %v3379_v42  ;;  %v2042_v0 = vadd.f32 %v5787_v48, %v2041_v8  ;;  %vm2043_vm1 = vweird.f32 %v8269_v39  ;;  %v2076_v37 = vmul.f32 %v2075_v17, %v10870_v56 }
 0x272   : > { %v3305_v28 = vmul.f32 %v3304_v59, %v8122_v27  ;;  %vm2045_vm2 = vmor %vm2043_vm1, %vm2044_vm0  ;;  %v2050_v36 = vor.u32 1.1754944e-38, %v2049_v23  ;;  %v2113_v38 = vadd.f32 0.112945676, %v2112_v34  ;;  %v2149_v24 = vadd.f32 0.001143296, %v2148_v63  ;;  %v10892_v59 = vld [vmem:[#allocation2_spill] sm:$0xff] }
 0x273   : > { %v2046_v4 = vsel %vm2045_vm2, %v5787_v48, %v2042_v0  ;;  %vm2048_vm3 = vcmp.eq.f32.partialorder %v2047_v13, 8.507059e+37  ;;  %v8317_v44 = vadd.f32 1.0, %v2076_v37  ;;  %v2189_v10 = vadd.f32 0.001143296, %v2188_v19 }
 0x274   : > { %v3345_v53 = vmul.f32 %v3344_v9, %v8151_v25  ;;  %v2051_v62 = vsel %vm2048_vm3, %v2050_v36, %v2046_v4  ;;  %v2114_v42 = vmul.f32 %v2113_v38, %v10877_v31  ;;  %v2150_v39 = vmul.f32 %v2149_v24, %v10890_v33  ;;  %v10893_v36 = vld [vmem:[#allocation70_spill] sm:$0xff] }
 0x275   : > { %v3420_v8 = vadd.f32 0.0036580483, %v3419_v61  ;;  %v3495_v56 = vmul.f32 %v8306_v22, %v8306_v22  ;;  %v2052_v23 = vmul.f32 %v2051_v62, %v10892_v59  ;;  %5788 = vrcp.f32 %v8317_v44 }
 0x276   : > { %v3226_v48 = vadd.f32 1.1283791, %v3225_v52  ;;  %v3266_v13 = vadd.f32 1.1283791, %v3265_v32  ;;  %v2115_v17 = vadd.f32 0.4994258, %v2114_v42  ;;  %v2190_v34 = vmul.f32 %v2189_v10, %v10891_v47 }
 0x277   : > { %v3381_v9 = vmul.f32 %v3380_v41, %v8265_v12  ;;  %v3458_v4 = vadd.f32 0.00028619796, %v3457_v55  ;;  %v5647_v63 = vclamps-f32 %v2052_v23, 1.0  ;;  %v2151_v19 = vadd.f32 0.014752088, %v2150_v39  ;;  %v10897_v39 = vld [vmem:[#allocation69_spill] sm:$0xff] }
 0x278   : > { %v3306_v0 = vadd.f32 1.1283791, %v3305_v28  ;;  %v3346_v37 = vadd.f32 1.1283791, %v3345_v53  ;;  %v2116_v61 = vmul.f32 %v2115_v17, %v10877_v31  ;;  %v2228_v38 = vmul.f32 3.8918573e-05, %v10893_v36 }
 0x279   : > { %v3421_v62 = vmul.f32 %v3420_v8, %v8267_v1  ;;  %v8331_v24 = vmin.f32 %v3495_v56, 16.0  ;;  %v4923_v52 = vadd.f32 1.0, %v5647_v63  ;;  %v2152_v32 = vmul.f32 %v2151_v19, %v10890_v33 }
 0x27a   : > { %v8335_v10 = vmul.f32 %v3226_v48, %v8059_v16  ;;  %v8338_v55 = vmul.f32 %v3266_v13, %v8084_v54  ;;  %v8340_v41 = vadd.f32 1.0, %v2116_v61  ;;  %v2191_v53 = vadd.f32 0.014752088, %v2190_v34  ;;  %v668_v61 = vpop.f32.mrf.mxu3 }
 0x27b   : > { %10894 = vst [vmem:[#allocation82_spill] sm:$0xff] %v8331_v24  ;;  %v5789_v28 = vpop.eup %5788  ;;  %v3382_v31 = vadd.f32 0.05243302, %v3381_v9  ;;  %v3459_v42 = vmul.f32 %v3458_v4, %v8299_v6  ;;  %v5023_v8 = vmul.f32 %v4923_v52, %v10897_v39  ;;  %v2153_v56 = vadd.f32 0.112945676, %v2152_v32  ;;  %v576_v4 = vpop.f32.mrf.mxu2 }
 0x27c   : > { %10895 = vst [vmem:[#allocation85_spill] sm:$0xff] %v8335_v10  ;;  %v8345_v59 = vmul.f32 %v3306_v0, %v8087_v46  ;;  %v2079_v23 = vmul.f32 %v5789_v28, %v8317_v44  ;;  %5790 = vrcp.f32 %v8340_v41  ;;  %v2229_v16 = vadd.f32 0.001143296, %v2228_v38 }
 0x27d   : > { %10896 = vst [vmem:[#allocation63_spill] sm:$0xff] %v8338_v55  ;;  %v8350_v54 = vmul.f32 %v3346_v37, %v8116_v43  ;;  %v3422_v48 = vadd.f32 0.05243302, %v3421_v62  ;;  %v3497_v13 = vmul.f32 2.1237322e-06, %v8331_v24  ;;  %5200 = vmatmul.f32.gmra.mxu0 %v5023_v8  ;;  %v2154_v17 = vmul.f32 %v2153_v56, %v10890_v33  ;;  %v10905_v55 = vld [vmem:[#allocation7_spill] sm:$0xff] }
 0x27e   : > { %10898 = vst [vmem:[#allocation68_spill] sm:$0xff] %v8345_v59  ;;  %v8355_v34 = vmul.f32 0.5, %v8218_v21  ;;  %v8358_v46 = vmul.f32 0.5, %v8221_v11  ;;  %v2080_v9 = vsub.f32 1.0, %v2079_v23  ;;  %v2192_v63 = vmul.f32 %v2191_v53, %v10891_v47 }
 0x27f   : > { %10899 = vst [vmem:[#allocation64_spill] sm:$0xff] %v8350_v54  ;;  %v3383_v19 = vmul.f32 %v3382_v31, %v8265_v12  ;;  %v3460_v43 = vadd.f32 0.0036580483, %v3459_v42  ;;  %v2089_v0 = vand.u32 2147483648, %v8317_v44  ;;  %v2155_v37 = vadd.f32 0.4994258, %v2154_v17  ;;  %v395_v17 = vpop.f32.mrf.mxu0 }
 0x280   : > { %10900 = vst [vmem:[#allocation65_spill] sm:$0xff] %v8355_v34  ;;  %v2081_v38 = vmul.f32 %v5789_v28, %v2080_v9  ;;  %vm2084_vm4 = vweird.f32 %v5789_v28  ;;  %v2087_v62 = vand.u32 2147483647, %v8317_v44  ;;  %v2230_v21 = vmul.f32 %v2229_v16, %v10893_v36  ;;  %v10904_v54 = vld [vmem:[#allocation73_spill] sm:$0xff] }
 0x281   : > { %10901 = vst [vmem:[#allocation2_spill] sm:$0xff] %v8358_v46  ;;  %v3423_v11 = vmul.f32 %v3422_v48, %v8267_v1  ;;  %v3498_v52 = vadd.f32 0.00028619796, %v3497_v13  ;;  %v2156_v32 = vmul.f32 %v2155_v37, %v10890_v33  ;;  %v8368_v53 = vadd.f32 %v576_v4, %v6344_v2 }
 0x282   : > { %v5791_v31 = vpop.eup %5790  ;;  %v2082_v42 = vadd.f32 %v5789_v28, %v2081_v38  ;;  %vm2083_vm5 = vweird.f32 %v8317_v44  ;;  %v8372_v39 = vadd.f32 %v668_v61, %v6346_v3  ;;  %v2193_v8 = vadd.f32 0.112945676, %v2192_v63 }
 0x283   : > { %v3461_v56 = vmul.f32 %v3460_v43, %v8299_v6  ;;  %vm2085_vm6 = vmor %vm2083_vm5, %vm2084_vm4  ;;  %v2090_v23 = vor.u32 1.1754944e-38, %v2089_v0  ;;  %v2119_v16 = vmul.f32 %v5791_v31, %v8340_v41  ;;  %v8376_v48 = vadd.f32 1.0, %v2156_v32  ;;  %v10902_v43 = vld [vmem:[#allocation6_spill] sm:$0xff] }
 0x284   : > { %v8378_v33 = vadd.f32 0.18741608, %v3383_v19  ;;  %v2086_v13 = vsel %vm2085_vm6, %v5789_v28, %v2082_v42  ;;  %vm2088_vm7 = vcmp.eq.f32.partialorder %v2087_v62, 8.507059e+37  ;;  %v2231_v9 = vadd.f32 0.014752088, %v2230_v21 }
 0x285   : > { %v2091_v4 = vsel %vm2088_vm7, %v2090_v23, %v2086_v13  ;;  %v2120_v44 = vsub.f32 1.0, %v2119_v16  ;;  %5792 = vrcp.f32 %v8376_v48  ;;  %v8382_v63 = vmul.f32 0.70710677, %v8368_v53  ;;  %v487_v23 = vpop.f32.mrf.mxu1  ;;  %v10903_v16 = vld [vmem:[#allocation72_spill] sm:$0xff] }
 0x286   : > { %v2092_v37 = vmul.f32 %v2091_v4, %v10902_v43  ;;  %v2129_v0 = vand.u32 2147483648, %v8340_v41  ;;  %v8387_v61 = vmul.f32 0.70710677, %v8372_v39  ;;  %v2194_v19 = vmul.f32 %v2193_v8, %v10891_v47 }
 0x287   : > { %v2121_v28 = vmul.f32 %v5791_v31, %v2120_v44  ;;  %vm2124_vm8 = vweird.f32 %v5791_v31  ;;  %v2127_v38 = vand.u32 2147483647, %v8340_v41  ;;  %v8392_v62 = vadd.f32 %v395_v17, %v6327_v57 }
 0x288   : > { %v3424_v21 = vadd.f32 0.18741608, %v3423_v11  ;;  %v3499_v32 = vmul.f32 %v3498_v52, %v8331_v24  ;;  %v5648_v42 = vclamps-f32 %v2092_v37, 1.0  ;;  %v2268_v13 = vmul.f32 3.8918573e-05, %v10903_v16 }
 0x289   : > { %v2122_v4 = vadd.f32 %v5791_v31, %v2121_v28  ;;  %vm2123_vm9 = vweird.f32 %v8340_v41  ;;  %v3535_v8 = vmul.f32 %v8382_v63, %v8382_v63  ;;  %v2232_v44 = vmul.f32 %v2231_v9, %v10893_v36 }
 0x28a   : > { %v4924_v43 = vadd.f32 1.0, %v5648_v42  ;;  %vm2125_vm10 = vmor %vm2123_vm9, %vm2124_vm8  ;;  %v2130_v46 = vor.u32 1.1754944e-38, %v2129_v0  ;;  %v3575_v11 = vmul.f32 %v8387_v61, %v8387_v61  ;;  %v2195_v17 = vadd.f32 0.4994258, %v2194_v19 }
 0x28b   : > { %v5793_v52 = vpop.eup %5792  ;;  %v2126_v37 = vsel %vm2125_vm10, %v5791_v31, %v2122_v4  ;;  %vm2128_vm11 = vcmp.eq.f32.partialorder %v2127_v38, 8.507059e+37  ;;  %v8403_v34 = vmul.f32 0.70710677, %v8392_v62  ;;  %v8406_v41 = vadd.f32 %v487_v23, %v6329_v58 }
 0x28c   : > { %v3462_v28 = vadd.f32 0.05243302, %v3461_v56  ;;  %v5024_v59 = vmul.f32 %v4924_v43, %v10904_v54  ;;  %v2131_v9 = vsel %vm2128_vm11, %v2130_v46, %v2126_v37  ;;  %v2159_v42 = vmul.f32 %v5793_v52, %v8376_v48 }
 0x28d   : > { %v3500_v0 = vadd.f32 0.0036580483, %v3499_v32  ;;  %v2132_v10 = vmul.f32 %v2131_v9, %v10905_v55  ;;  %v8411_v25 = vmin.f32 %v3535_v8, 16.0  ;;  %v2269_v19 = vadd.f32 0.001143296, %v2268_v13 }
 0x28e   : > { %5292 = vmatmul.f32.gmra.mxu1 %v5024_v59  ;;  %v2160_v31 = vsub.f32 1.0, %v2159_v42  ;;  %v2169_v38 = vand.u32 2147483648, %v8376_v48  ;;  %v8414_v4 = vmin.f32 %v3575_v11, 16.0  ;;  %v2196_v23 = vmul.f32 %v2195_v17, %v10891_v47  ;;  %v10906_v47 = vld [vmem:[#allocation74_spill] sm:$0xff] }
 0x28f   : > { %v5649_v56 = vclamps-f32 %v2132_v10, 1.0  ;;  %v3615_v54 = vmul.f32 %v8403_v34, %v8403_v34  ;;  %v8420_v46 = vmul.f32 0.70710677, %v8406_v41  ;;  %v2233_v32 = vadd.f32 0.112945676, %v2232_v44  ;;  %v10907_v44 = vld [vmem:[#allocation75_spill] sm:$0xff] }
 0x290   : > { %v2161_v55 = vmul.f32 %v5793_v52, %v2160_v31  ;;  %vm2164_vm12 = vweird.f32 %v5793_v52  ;;  %v2167_v13 = vand.u32 2147483647, %v8376_v48  ;;  %v8423_v59 = vadd.f32 1.0, %v2196_v23 }
 0x291   : > { %v4925_v8 = vadd.f32 1.0, %v5649_v56  ;;  %vm2163_vm13 = vweird.f32 %v8376_v48  ;;  %v3537_v43 = vmul.f32 2.1237322e-06, %v8411_v25  ;;  %v2308_v10 = vmul.f32 3.8918573e-05, %v10906_v47 }
 0x292   : > { %v2162_v11 = vadd.f32 %v5793_v52, %v2161_v55  ;;  %v2170_v17 = vor.u32 1.1754944e-38, %v2169_v38  ;;  %v3577_v37 = vmul.f32 2.1237322e-06, %v8414_v4  ;;  %5794 = vrcp.f32 %v8423_v59  ;;  %vm2165_vm14 = vmor %vm2163_vm13, %vm2164_vm12 }
 0x293   : > { %v5025_v9 = vmul.f32 %v4925_v8, %v10907_v44  ;;  %v8431_v42 = vmin.f32 %v3615_v54, 16.0  ;;  %v3655_v31 = vmul.f32 %v8420_v46, %v8420_v46  ;;  %v2234_v48 = vmul.f32 %v2233_v32, %v10893_v36 }
 0x294   : > { %v3385_v23 = vmul.f32 %v8378_v33, %v8265_v12  ;;  %v2166_v56 = vsel %vm2165_vm14, %v5793_v52, %v2162_v11  ;;  %vm2168_vm15 = vcmp.eq.f32.partialorder %v2167_v13, 8.507059e+37  ;;  %v2270_v38 = vmul.f32 %v2269_v19, %v10903_v16 }
 0x295   : > { %10908 = vst [vmem:[#allocation70_spill] sm:$0xff] %v8431_v42  ;;  %v3425_v55 = vmul.f32 %v3424_v21, %v8267_v1  ;;  %v3463_v27 = vmul.f32 %v3462_v28, %v8299_v6  ;;  %5384 = vmatmul.f32.gmra.mxu2 %v5025_v9  ;;  %v2171_v8 = vsel %vm2168_vm15, %v2170_v17, %v2166_v56  ;;  %v3538_v54 = vadd.f32 0.00028619796, %v3537_v43 }
 0x296   : > { %v3501_v44 = vmul.f32 %v3500_v0, %v8331_v24  ;;  %v2172_v49 = vmul.f32 %v2171_v8, %v10909_v15  ;;  %v3578_v7 = vadd.f32 0.00028619796, %v3577_v37  ;;  %v2309_v32 = vadd.f32 0.001143296, %v2308_v10 }
 0x297   : > { %v8444_v29 = vmul.f32 0.5, %v8257_v20  ;;  %v3617_v33 = vmul.f32 2.1237322e-06, %v8431_v42  ;;  %v8447_v52 = vmin.f32 %v3655_v31, 16.0  ;;  %v2235_v19 = vadd.f32 0.4994258, %v2234_v48 }
 0x298   : > { %v5795_v21 = vpop.eup %5794  ;;  %v3386_v13 = vadd.f32 1.1283791, %v3385_v23  ;;  %v8450_v28 = vmul.f32 0.5, %v8294_v51  ;;  %v5650_v43 = vclamps-f32 %v2172_v49, 1.0  ;;  %v2271_v11 = vadd.f32 0.014752088, %v2270_v38 }
 0x299   : > { %10910 = vst [vmem:[#allocation69_spill] sm:$0xff] %v8444_v29  ;;  %v3426_v0 = vadd.f32 1.1283791, %v3425_v55  ;;  %v3464_v17 = vadd.f32 0.18741608, %v3463_v27  ;;  %v3539_v15 = vmul.f32 %v3538_v54, %v8411_v25  ;;  %v2199_v10 = vmul.f32 %v5795_v21, %v8423_v59  ;;  %v10913_v49 = vld [vmem:[#allocation79_spill] sm:$0xff] }
 0x29a   : > { %10911 = vst [vmem:[#allocation6_spill] sm:$0xff] %v8447_v52  ;;  %v3502_v20 = vadd.f32 0.05243302, %v3501_v44  ;;  %v4926_v37 = vadd.f32 1.0, %v5650_v43  ;;  %v3579_v9 = vmul.f32 %v3578_v7, %v8414_v4  ;;  %v2236_v31 = vmul.f32 %v2235_v19, %v10893_v36 }
 0x29b   : > { %10912 = vst [vmem:[#allocation72_spill] sm:$0xff] %v8450_v28  ;;  %v3618_v48 = vadd.f32 0.00028619796, %v3617_v33  ;;  %v3657_v23 = vmul.f32 2.1237322e-06, %v8447_v52  ;;  %v2200_v56 = vsub.f32 1.0, %v2199_v10  ;;  %v2310_v51 = vmul.f32 %v2309_v32, %v10906_v47 }
 0x29c   : > { %v5026_v38 = vmul.f32 %v4926_v37, %v10913_v49  ;;  %v2209_v27 = vand.u32 2147483648, %v8423_v59  ;;  %v8460_v55 = vadd.f32 1.0, %v2236_v31  ;;  %v2272_v8 = vmul.f32 %v2271_v11, %v10903_v16 }
 0x29d   : > { %v3540_v54 = vadd.f32 0.0036580483, %v3539_v15  ;;  %v2201_v44 = vmul.f32 %v5795_v21, %v2200_v56  ;;  %vm2204_vm0 = vweird.f32 %v5795_v21  ;;  %v2207_v7 = vand.u32 2147483647, %v8423_v59 }
 0x29e   : > { %v8465_v36 = vmul.f32 %v3386_v13, %v8238_v30  ;;  %v3465_v33 = vmul.f32 %v3464_v17, %v8299_v6  ;;  %5476 = vmatmul.f32.gmra.mxu3 %v5026_v38  ;;  %v3580_v32 = vadd.f32 0.0036580483, %v3579_v9  ;;  %5796 = vrcp.f32 %v8460_v55 }
 0x29f   : > { %v3503_v19 = vmul.f32 %v3502_v20, %v8331_v24  ;;  %v2202_v43 = vadd.f32 %v5795_v21, %v2201_v44  ;;  %vm2203_vm1 = vweird.f32 %v8423_v59  ;;  %v2273_v11 = vadd.f32 0.112945676, %v2272_v8 }
 0x2a0   : > { %10914 = vst [vmem:[#allocation73_spill] sm:$0xff] %v8465_v36  ;;  %v3619_v15 = vmul.f32 %v3618_v48, %v8431_v42  ;;  %v3658_v10 = vadd.f32 0.00028619796, %v3657_v23  ;;  %vm2205_vm2 = vmor %vm2203_vm1, %vm2204_vm0  ;;  %v2210_v37 = vor.u32 1.1754944e-38, %v2209_v27  ;;  %v2311_v31 = vadd.f32 0.014752088, %v2310_v51 }
 0x2a1   : > { %v3541_v30 = vmul.f32 %v3540_v54, %v8411_v25  ;;  %v2206_v13 = vsel %vm2205_vm2, %v5795_v21, %v2202_v43  ;;  %vm2208_vm3 = vcmp.eq.f32.partialorder %v2207_v7, 8.507059e+37  ;;  %v2274_v17 = vmul.f32 %v2273_v11, %v10903_v16  ;;  %v10916_v48 = vld [vmem:[#allocation8_spill] sm:$0xff]  ;;  %v10917_v27 = vld [vmem:[#allocation77_spill] sm:$0xff] }
 0x2a2   : > { %v8475_v9 = vmul.f32 %v3426_v0, %v8241_v18  ;;  %v3581_v20 = vmul.f32 %v3580_v32, %v8414_v4  ;;  %v2211_v56 = vsel %vm2208_vm3, %v2210_v37, %v2206_v13  ;;  %v2312_v59 = vmul.f32 %v2311_v31, %v10906_v47 }
 0x2a3   : > { %v3466_v49 = vadd.f32 1.1283791, %v3465_v33  ;;  %v2212_v23 = vmul.f32 %v2211_v56, %v10916_v48  ;;  %v2275_v38 = vadd.f32 0.4994258, %v2274_v17  ;;  %v2348_v51 = vmul.f32 3.8918573e-05, %v10917_v27 }
 0x2a4   : > { %10915 = vst [vmem:[#allocation7_spill] sm:$0xff] %v8475_v9  ;;  %v5797_v8 = vpop.eup %5796  ;;  %v3504_v54 = vadd.f32 0.18741608, %v3503_v19  ;;  %v3620_v21 = vadd.f32 0.0036580483, %v3619_v15  ;;  %v3659_v44 = vmul.f32 %v3658_v10, %v8447_v52  ;;  %v2249_v37 = vand.u32 2147483648, %v8460_v55  ;;  %v579_v15 = vpop.f32.mrf.mxu2 }
 0x2a5   : > { %v2313_v7 = vadd.f32 0.112945676, %v2312_v59  ;;  %v3542_v43 = vadd.f32 0.05243302, %v3541_v30  ;;  %v5651_v18 = vclamps-f32 %v2212_v23, 1.0  ;;  %v2239_v0 = vmul.f32 %v5797_v8, %v8460_v55  ;;  %v671_v10 = vpop.f32.mrf.mxu3  ;;  %v10919_v23 = vld [vmem:[#allocation80_spill] sm:$0xff] }
 0x2a6   : > { %v2276_v32 = vmul.f32 %v2275_v38, %v10903_v16  ;;  %v3582_v11 = vadd.f32 0.05243302, %v3581_v20  ;;  %v2247_v33 = vand.u32 2147483647, %v8460_v55  ;;  %v2349_v56 = vadd.f32 0.001143296, %v2348_v51 }
 0x2a7   : > { %v2314_v31 = vmul.f32 %v2313_v7, %v10906_v47  ;;  %v4927_v13 = vadd.f32 1.0, %v5651_v18  ;;  %v2240_v17 = vsub.f32 1.0, %v2239_v0  ;;  %v8490_v59 = vadd.f32 %v579_v15, %v6344_v2  ;;  %v10918_v20 = vld [vmem:[#allocation81_spill] sm:$0xff] }
 0x2a8   : > { %v8487_v19 = vadd.f32 1.0, %v2276_v32  ;;  %v8493_v16 = vadd.f32 %v671_v10, %v6346_v3  ;;  %v2388_v48 = vmul.f32 3.8918573e-05, %v10918_v20  ;;  %vm2244_vm4 = vweird.f32 %v5797_v8 }
 0x2a9   : > { %v2315_v30 = vadd.f32 0.4994258, %v2314_v31  ;;  %v5027_v38 = vmul.f32 %v4927_v13, %v10919_v23  ;;  %v2241_v28 = vmul.f32 %v5797_v8, %v2240_v17  ;;  %v3505_v7 = vmul.f32 %v3504_v54, %v8331_v24 }
 0x2aa   : > { %5798 = vrcp.f32 %v8487_v19  ;;  %v3543_v18 = vmul.f32 %v3542_v43, %v8411_v25  ;;  %v3621_v51 = vmul.f32 %v3620_v21, %v8431_v42  ;;  %vm2243_vm5 = vweird.f32 %v8460_v55 }
 0x2ab   : > { %v2316_v0 = vmul.f32 %v2315_v30, %v10906_v47  ;;  %5203 = vmatmul.f32.gmra.mxu0 %v5027_v38  ;;  %v2242_v32 = vadd.f32 %v5797_v8, %v2241_v28  ;;  %v8504_v31 = vmul.f32 0.70710677, %v8490_v59  ;;  %v2350_v13 = vmul.f32 %v2349_v56, %v10917_v27  ;;  %vm2245_vm6 = vmor %vm2243_vm5, %vm2244_vm4  ;;  %v10921_v38 = vld [vmem:[#allocation95_spill] sm:$0xff] }
 0x2ac   : > { %v2250_v17 = vor.u32 1.1754944e-38, %v2249_v37  ;;  %v8510_v54 = vmul.f32 0.70710677, %v8493_v16  ;;  %v2389_v43 = vadd.f32 0.001143296, %v2388_v48  ;;  %v3583_v21 = vmul.f32 %v3582_v11, %v8414_v4 }
 0x2ad   : > { %v8507_v15 = vadd.f32 1.0, %v2316_v0  ;;  %v3660_v47 = vadd.f32 0.0036580483, %v3659_v44  ;;  %v2246_v10 = vsel %vm2245_vm6, %v5797_v8, %v2242_v32  ;;  %vm2248_vm7 = vcmp.eq.f32.partialorder %v2247_v33, 8.507059e+37  ;;  %v398_v33 = vpop.f32.mrf.mxu0 }
 0x2ae   : > { %v3622_v28 = vadd.f32 0.05243302, %v3621_v51  ;;  %v2251_v55 = vsel %vm2248_vm7, %v2250_v17, %v2246_v10  ;;  %v3695_v56 = vmul.f32 %v8504_v31, %v8504_v31  ;;  %v8517_v37 = vmul.f32 %v3466_v49, %v8274_v45  ;;  %v490_v51 = vpop.f32.mrf.mxu1 }
 0x2af   : > { %5800 = vrcp.f32 %v8507_v15  ;;  %v8519_v23 = vadd.f32 1.1283791, %v3505_v7  ;;  %v2252_v48 = vmul.f32 %v2251_v55, %v10921_v38  ;;  %v2351_v0 = vadd.f32 0.014752088, %v2350_v13 }
 0x2b0   : > { %v5799_v30 = vpop.eup %5798  ;;  %10920 = vst [vmem:[#allocation74_spill] sm:$0xff] %v8517_v37  ;;  %v8522_v11 = vadd.f32 0.18741608, %v3543_v18  ;;  %v3735_v44 = vmul.f32 %v8510_v54, %v8510_v54  ;;  %v2390_v32 = vmul.f32 %v2389_v43, %v10918_v20  ;;  %v3584_v17 = vadd.f32 0.18741608, %v3583_v21 }
 0x2b1   : > { %v2279_v8 = vmul.f32 %v5799_v30, %v8487_v19  ;;  %v3661_v45 = vmul.f32 %v3660_v47, %v8447_v52  ;;  %v5652_v49 = vclamps-f32 %v2252_v48, 1.0  ;;  %v2287_v7 = vand.u32 2147483647, %v8487_v19 }
 0x2b2   : > { %v3623_v10 = vmul.f32 %v3622_v28, %v8431_v42  ;;  %v2289_v18 = vand.u32 2147483648, %v8487_v19  ;;  %v8532_v55 = vmin.f32 %v3695_v56, 16.0  ;;  %v8535_v29 = vadd.f32 %v398_v33, %v6327_v57 }
 0x2b3   : > { %v2280_v13 = vsub.f32 1.0, %v2279_v8  ;;  %v4928_v38 = vadd.f32 1.0, %v5652_v49  ;;  %v8538_v37 = vadd.f32 %v490_v51, %v6329_v58  ;;  %v2352_v43 = vmul.f32 %v2351_v0, %v10917_v27  ;;  %v10924_v8 = vld [vmem:[#allocation83_spill] sm:$0xff] }
 0x2b4   : > { %10922 = vst [vmem:[#allocation75_spill] sm:$0xff] %v8532_v55  ;;  %vm2284_vm8 = vweird.f32 %v5799_v30  ;;  %v8541_v48 = vmin.f32 %v3735_v44, 16.0  ;;  %v2391_v28 = vadd.f32 0.014752088, %v2390_v32  ;;  %vm2283_vm9 = vweird.f32 %v8487_v19 }
 0x2b5   : > { %v5801_v21 = vpop.eup %5800  ;;  %v2281_v47 = vmul.f32 %v5799_v30, %v2280_v13  ;;  %v5028_v9 = vmul.f32 %v4928_v38, %v10924_v8  ;;  %vm8545_vm10 = vcmp.eq.f32.partialorder %v2287_v7, 8.507059e+37  ;;  %v2290_v49 = vor.u32 1.1754944e-38, %v2289_v18  ;;  %vm2285_vm11 = vmor %vm2283_vm9, %vm2284_vm8 }
 0x2b6   : > { %10923 = vst [vmem:[#allocation92_spill] sm:$0xff] %v8541_v48  ;;  %v2319_v33 = vmul.f32 %v5801_v21, %v8507_v15  ;;  %v2327_v0 = vand.u32 2147483647, %v8507_v15  ;;  %v3697_v13 = vmul.f32 2.1237322e-06, %v8532_v55  ;;  %v2329_v32 = vand.u32 2147483648, %v8507_v15 }
 0x2b7   : > { %v2282_v51 = vadd.f32 %v5799_v30, %v2281_v47  ;;  %5295 = vmatmul.f32.gmra.mxu1 %v5028_v9  ;;  %v2353_v38 = vadd.f32 0.112945676, %v2352_v43  ;;  %v2392_v19 = vmul.f32 %v2391_v28, %v10918_v20  ;;  %v3737_v8 = vmul.f32 2.1237322e-06, %v8541_v48  ;;  %v10927_v43 = vld [vmem:[#allocation98_spill] sm:$0xff] }
 0x2b8   : > { %v2320_v44 = vsub.f32 1.0, %v2319_v33  ;;  %v8556_v36 = vmul.f32 0.70710677, %v8535_v29  ;;  %v8559_v18 = vmul.f32 0.70710677, %v8538_v37  ;;  %vm2324_vm12 = vweird.f32 %v5801_v21 }
 0x2b9   : > { %v2286_v7 = vsel %vm2285_vm11, %v5799_v30, %v2282_v51  ;;  %v2354_v33 = vmul.f32 %v2353_v38, %v10917_v27  ;;  %v3662_v24 = vadd.f32 0.05243302, %v3661_v45  ;;  %vm2323_vm13 = vweird.f32 %v8507_v15 }
 0x2ba   : > { %v2291_v47 = vsel %vm8545_vm10, %v2290_v49, %v2286_v7  ;;  %v2321_v9 = vmul.f32 %v5801_v21, %v2320_v44  ;;  %v3698_v30 = vadd.f32 0.00028619796, %v3697_v13  ;;  %vm2328_vm14 = vcmp.eq.f32.partialorder %v2327_v0, 8.507059e+37  ;;  %vm2325_vm15 = vmor %vm2323_vm13, %vm2324_vm12 }
 0x2bb   : > { %v2292_v6 = vmul.f32 %v2291_v47, %v10927_v43  ;;  %v2355_v51 = vadd.f32 0.4994258, %v2354_v33  ;;  %v2393_v1 = vadd.f32 0.112945676, %v2392_v19  ;;  %v2330_v26 = vor.u32 1.1754944e-38, %v2329_v32  ;;  %v10928_v19 = vld [vmem:[#allocation88_spill] sm:$0xff] }
 0x2bc   : > { %v2322_v28 = vadd.f32 %v5801_v21, %v2321_v9  ;;  %v3738_v50 = vadd.f32 0.00028619796, %v3737_v8  ;;  %v3775_v56 = vmul.f32 %v8556_v36, %v8556_v36  ;;  %v3815_v45 = vmul.f32 %v8559_v18, %v8559_v18  ;;  %v10929_v8 = vld [vmem:[#allocation24_spill] sm:$0xff] }
 0x2bd   : > { %v5653_v12 = vclamps-f32 %v2292_v6, 1.0  ;;  %v2356_v44 = vmul.f32 %v2355_v51, %v10917_v27  ;;  %v2394_v15 = vmul.f32 %v2393_v1, %v10918_v20  ;;  %v3699_v0 = vmul.f32 %v3698_v30, %v8532_v55  ;;  %v10930_v33 = vld [vmem:[#allocation84_spill] sm:$0xff] }
 0x2be   : > { %v2326_v49 = vsel %vm2325_vm15, %v5801_v21, %v2322_v28  ;;  %v2428_v6 = vmul.f32 3.8918573e-05, %v10928_v19  ;;  %v3545_v32 = vmul.f32 %v8522_v11, %v8411_v25  ;;  %v3585_v7 = vmul.f32 %v3584_v17, %v8414_v4 }
 0x2bf   : > { %v4929_v13 = vadd.f32 1.0, %v5653_v12  ;;  %v2331_v38 = vsel %vm2328_vm14, %v2330_v26, %v2326_v49  ;;  %v8578_v47 = vadd.f32 1.0, %v2356_v44  ;;  %v3624_v9 = vadd.f32 0.18741608, %v3623_v10  ;;  %v10936_v49 = vld [vmem:[#allocation91_spill] sm:$0xff] }
 0x2c0   : > { %v2332_v21 = vmul.f32 %v2331_v38, %v10929_v8  ;;  %v3739_v1 = vmul.f32 %v3738_v50, %v8541_v48  ;;  %v2395_v12 = vadd.f32 0.4994258, %v2394_v15  ;;  %v8582_v43 = vmin.f32 %v3775_v56, 16.0  ;;  %v10937_v38 = vld [vmem:[#allocation86_spill] sm:$0xff] }
 0x2c1   : > { %v5029_v27 = vmul.f32 %v4929_v13, %v10930_v33  ;;  %v8584_v30 = vmin.f32 %v3815_v45, 16.0  ;;  %5802 = vrcp.f32 %v8578_v47  ;;  %v8588_v11 = vmul.f32 0.5, %v8368_v53 }
 0x2c2   : > { %v5654_v26 = vclamps-f32 %v2332_v21, 1.0  ;;  %10931 = vst [vmem:[#allocation79_spill] sm:$0xff] %v8582_v43  ;;  %v8591_v17 = vmul.f32 0.5, %v8372_v39  ;;  %v3700_v10 = vadd.f32 0.0036580483, %v3699_v0  ;;  %v8594_v51 = vmul.f32 0.5, %v8392_v62 }
 0x2c3   : > { %10932 = vst [vmem:[#allocation8_spill] sm:$0xff] %v8584_v30  ;;  %5387 = vmatmul.f32.gmra.mxu2 %v5029_v27  ;;  %v2429_v28 = vadd.f32 0.001143296, %v2428_v6  ;;  %v3663_v50 = vmul.f32 %v3662_v24, %v8447_v52  ;;  %v2468_v45 = vmul.f32 3.8918573e-05, %v10936_v49  ;;  %v3625_v13 = vmul.f32 %v3624_v9, %v8431_v42  ;;  %v10940_v27 = vld [vmem:[#allocation93_spill] sm:$0xff] }
 0x2c4   : > { %10933 = vst [vmem:[#allocation77_spill] sm:$0xff] %v8588_v11  ;;  %v4930_v56 = vadd.f32 1.0, %v5654_v26  ;;  %v3546_v44 = vadd.f32 1.1283791, %v3545_v32  ;;  %v3586_v15 = vadd.f32 1.1283791, %v3585_v7  ;;  %v2396_v53 = vmul.f32 %v2395_v12, %v10918_v20 }
 0x2c5   : > { %10934 = vst [vmem:[#allocation81_spill] sm:$0xff] %v8591_v17  ;;  %v3740_v8 = vadd.f32 0.0036580483, %v3739_v1  ;;  %v3777_v0 = vmul.f32 2.1237322e-06, %v8582_v43  ;;  %v8604_v62 = vmul.f32 0.5, %v8406_v41  ;;  %v3701_v24 = vmul.f32 %v3700_v10, %v8532_v55 }
 0x2c6   : > { %10935 = vst [vmem:[#allocation80_spill] sm:$0xff] %v8594_v51  ;;  %v5030_v39 = vmul.f32 %v4930_v56, %v10937_v38  ;;  %v3817_v6 = vmul.f32 2.1237322e-06, %v8584_v30  ;;  %v8607_v21 = vadd.f32 1.0, %v2396_v53  ;;  %v2430_v32 = vmul.f32 %v2429_v28, %v10928_v19 }
 0x2c7   : > { %10938 = vst [vmem:[#allocation95_spill] sm:$0xff] %v8604_v62  ;;  %v5803_v7 = vpop.eup %5802  ;;  %v8612_v20 = vmul.f32 %v8519_v23, %v8306_v22  ;;  %v3664_v9 = vadd.f32 0.18741608, %v3663_v50  ;;  %v2469_v33 = vadd.f32 0.001143296, %v2468_v45  ;;  %v8616_v12 = vmul.f32 %v3546_v44, %v8382_v63 }
 0x2c8   : > { %5479 = vmatmul.f32.gmra.mxu3 %v5030_v39  ;;  %v2508_v1 = vmul.f32 3.8918573e-05, %v10940_v27  ;;  %v8619_v41 = vmul.f32 %v3586_v15, %v8387_v61  ;;  %v2359_v26 = vmul.f32 %v5803_v7, %v8578_v47  ;;  %5804 = vrcp.f32 %v8607_v21 }
 0x2c9   : > { %10939 = vst [vmem:[#allocation83_spill] sm:$0xff] %v8612_v20  ;;  %v8623_v10 = vadd.f32 1.1283791, %v3625_v13  ;;  %v3741_v22 = vmul.f32 %v3740_v8, %v8541_v48  ;;  %v3778_v23 = vadd.f32 0.00028619796, %v3777_v0  ;;  %v2470_v53 = vmul.f32 %v2469_v33, %v10936_v49 }
 0x2ca   : > { %10941 = vst [vmem:[#allocation98_spill] sm:$0xff] %v8616_v12  ;;  %v3818_v28 = vadd.f32 0.00028619796, %v3817_v6  ;;  %v3702_v50 = vadd.f32 0.05243302, %v3701_v24  ;;  %v2360_v56 = vsub.f32 1.0, %v2359_v26  ;;  %v3665_v63 = vmul.f32 %v3664_v9, %v8447_v52 }
 0x2cb   : > { %10942 = vst [vmem:[#allocation88_spill] sm:$0xff] %v8619_v41  ;;  %v2431_v45 = vadd.f32 0.014752088, %v2430_v32  ;;  %v2367_v61 = vand.u32 2147483647, %v8578_v47  ;;  %v2369_v44 = vand.u32 2147483648, %v8578_v47  ;;  %vm2364_vm0 = vweird.f32 %v5803_v7 }
 0x2cc   : > { %v2509_v15 = vadd.f32 0.001143296, %v2508_v1  ;;  %v2361_v38 = vmul.f32 %v5803_v7, %v2360_v56  ;;  %v2471_v39 = vadd.f32 0.014752088, %v2470_v53  ;;  %v3742_v8 = vadd.f32 0.05243302, %v3741_v22 }
 0x2cd   : > { %v2432_v13 = vmul.f32 %v2431_v45, %v10928_v19  ;;  %v3779_v0 = vmul.f32 %v3778_v23, %v8582_v43  ;;  %v3819_v6 = vmul.f32 %v3818_v28, %v8584_v30  ;;  %vm2363_vm1 = vweird.f32 %v8578_v47 }
 0x2ce   : > { %v2510_v24 = vmul.f32 %v2509_v15, %v10940_v27  ;;  %v5805_v32 = vpop.eup %5804  ;;  %v2362_v33 = vadd.f32 %v5803_v7, %v2361_v38  ;;  %v2472_v26 = vmul.f32 %v2471_v39, %v10936_v49  ;;  %v3703_v1 = vmul.f32 %v3702_v50, %v8532_v55  ;;  %vm2365_vm2 = vmor %vm2363_vm1, %vm2364_vm0 }
 0x2cf   : > { %v2433_v9 = vadd.f32 0.112945676, %v2432_v13  ;;  %v2370_v56 = vor.u32 1.1754944e-38, %v2369_v44  ;;  %v2399_v45 = vmul.f32 %v5805_v32, %v8607_v21  ;;  %vm2368_vm3 = vcmp.eq.f32.partialorder %v2367_v61, 8.507059e+37  ;;  %v10943_v13 = vld [vmem:[#allocation3_spill] sm:$0xff] }
 0x2d0   : > { %v2511_v22 = vadd.f32 0.014752088, %v2510_v24  ;;  %v2366_v53 = vsel %vm2365_vm2, %v5803_v7, %v2362_v33  ;;  %v2473_v28 = vadd.f32 0.112945676, %v2472_v26  ;;  %v2407_v38 = vand.u32 2147483647, %v8607_v21  ;;  %v582_v26 = vpop.f32.mrf.mxu2 }
 0x2d1   : > { %v2434_v23 = vmul.f32 %v2433_v9, %v10928_v19  ;;  %v2371_v15 = vsel %vm2368_vm3, %v2370_v56, %v2366_v53  ;;  %v2400_v62 = vsub.f32 1.0, %v2399_v45  ;;  %v2409_v47 = vand.u32 2147483648, %v8607_v21  ;;  %v674_v56 = vpop.f32.mrf.mxu3 }
 0x2d2   : > { %v2372_v39 = vmul.f32 %v2371_v15, %v10943_v13  ;;  %v2474_v50 = vmul.f32 %v2473_v28, %v10936_v49  ;;  %v2512_v44 = vmul.f32 %v2511_v22, %v10940_v27  ;;  %v3780_v17 = vadd.f32 0.0036580483, %v3779_v0  ;;  %v401_v28 = vpop.f32.mrf.mxu0 }
 0x2d3   : > { %v2435_v51 = vadd.f32 0.4994258, %v2434_v23  ;;  %v3820_v24 = vadd.f32 0.0036580483, %v3819_v6  ;;  %v2401_v7 = vmul.f32 %v5805_v32, %v2400_v62  ;;  %vm2404_vm4 = vweird.f32 %v5805_v32 }
 0x2d4   : > { %v5655_v61 = vclamps-f32 %v2372_v39, 1.0  ;;  %vm2403_vm5 = vweird.f32 %v8607_v21  ;;  %v2475_v9 = vadd.f32 0.4994258, %v2474_v50  ;;  %vm2408_vm6 = vcmp.eq.f32.partialorder %v2407_v38, 8.507059e+37 }
 0x2d5   : > { %v2436_v33 = vmul.f32 %v2435_v51, %v10928_v19  ;;  %v2402_v45 = vadd.f32 %v5805_v32, %v2401_v7  ;;  %v2410_v53 = vor.u32 1.1754944e-38, %v2409_v47  ;;  %v8647_v23 = vadd.f32 %v582_v26, %v6344_v2  ;;  %vm2405_vm7 = vmor %vm2403_vm5, %vm2404_vm4  ;;  %v10944_v47 = vld [vmem:[#allocation87_spill] sm:$0xff]  ;;  %v10946_v7 = vld [vmem:[#allocation97_spill] sm:$0xff] }
 0x2d6   : > { %v4931_v22 = vadd.f32 1.0, %v5655_v61  ;;  %v2476_v62 = vmul.f32 %v2475_v9, %v10936_v49  ;;  %v2513_v6 = vadd.f32 0.112945676, %v2512_v44  ;;  %v8656_v51 = vadd.f32 %v674_v56, %v6346_v3  ;;  %v10945_v49 = vld [vmem:[#allocation27_spill] sm:$0xff] }
 0x2d7   : > { %v8649_v0 = vadd.f32 1.0, %v2436_v33  ;;  %v2406_v21 = vsel %vm2405_vm7, %v5805_v32, %v2402_v45  ;;  %v8653_v19 = vmul.f32 0.70710677, %v8647_v23  ;;  %v8659_v15 = vadd.f32 %v401_v28, %v6327_v57  ;;  %v10948_v28 = vld [vmem:[#allocation10_spill] sm:$0xff] }
 0x2d8   : > { %v3781_v38 = vmul.f32 %v3780_v17, %v8582_v43  ;;  %v5031_v13 = vmul.f32 %v4931_v22, %v10944_v47  ;;  %v2411_v39 = vsel %vm2408_vm6, %v2410_v53, %v2406_v21  ;;  %v3666_v50 = vadd.f32 1.1283791, %v3665_v63 }
 0x2d9   : > { %5806 = vrcp.f32 %v8649_v0  ;;  %v2412_v44 = vmul.f32 %v2411_v39, %v10945_v49  ;;  %v8665_v32 = vadd.f32 1.0, %v2476_v62  ;;  %v2548_v61 = vmul.f32 3.8918573e-05, %v10946_v7 }
 0x2da   : > { %v3704_v33 = vadd.f32 0.18741608, %v3703_v1  ;;  %v3743_v9 = vmul.f32 %v3742_v8, %v8541_v48  ;;  %5206 = vmatmul.f32.gmra.mxu0 %v5031_v13  ;;  %v3855_v26 = vmul.f32 %v8653_v19, %v8653_v19  ;;  %v2514_v17 = vmul.f32 %v2513_v6, %v10940_v27 }
 0x2db   : > { %v5656_v56 = vclamps-f32 %v2412_v44, 1.0  ;;  %5808 = vrcp.f32 %v8665_v32  ;;  %v8674_v63 = vmul.f32 0.70710677, %v8656_v51  ;;  %v8677_v45 = vmul.f32 0.70710677, %v8659_v15 }
 0x2dc   : > { %v8681_v1 = vmul.f32 %v8623_v10, %v8403_v34  ;;  %v3782_v8 = vadd.f32 0.05243302, %v3781_v38  ;;  %v3821_v53 = vmul.f32 %v3820_v24, %v8584_v30  ;;  %v2588_v22 = vmul.f32 3.8918573e-05, %v10948_v28  ;;  %v10952_v38 = vld [vmem:[#allocation89_spill] sm:$0xff] }
 0x2dd   : > { %v8686_v62 = vmul.f32 %v3666_v50, %v8420_v46  ;;  %v4932_v6 = vadd.f32 1.0, %v5656_v56  ;;  %v8688_v21 = vmin.f32 %v3855_v26, 16.0  ;;  %v2549_v47 = vadd.f32 0.001143296, %v2548_v61  ;;  %v493_v61 = vpop.f32.mrf.mxu1 }
 0x2de   : > { %10947 = vst [vmem:[#allocation24_spill] sm:$0xff] %v8681_v1  ;;  %v8691_v39 = vmul.f32 0.5, %v8490_v59  ;;  %v8694_v49 = vmul.f32 %v3704_v33, %v8532_v55  ;;  %v3744_v34 = vadd.f32 0.18741608, %v3743_v9  ;;  %v2515_v10 = vadd.f32 0.4994258, %v2514_v17 }
 0x2df   : > { %10949 = vst [vmem:[#allocation84_spill] sm:$0xff] %v8686_v62  ;;  %v5807_v13 = vpop.eup %5806  ;;  %v5032_v24 = vmul.f32 %v4932_v6, %v10952_v38  ;;  %v3895_v46 = vmul.f32 %v8674_v63, %v8674_v63  ;;  %v3935_v50 = vmul.f32 %v8677_v45, %v8677_v45  ;;  %v3783_v26 = vmul.f32 %v3782_v8, %v8582_v43 }
 0x2e0   : > { %10950 = vst [vmem:[#allocation91_spill] sm:$0xff] %v8688_v21  ;;  %v2439_v44 = vmul.f32 %v5807_v13, %v8649_v0  ;;  %v3822_v59 = vadd.f32 0.05243302, %v3821_v53  ;;  %v2449_v56 = vand.u32 2147483648, %v8649_v0  ;;  %v2589_v33 = vadd.f32 0.001143296, %v2588_v22 }
 0x2e1   : > { %10951 = vst [vmem:[#allocation86_spill] sm:$0xff] %v8691_v39  ;;  %v5809_v39 = vpop.eup %5808  ;;  %5298 = vmatmul.f32.gmra.mxu1 %v5032_v24  ;;  %v3857_v17 = vmul.f32 2.1237322e-06, %v8688_v21  ;;  %v2516_v6 = vmul.f32 %v2515_v10, %v10940_v27  ;;  %v2550_v38 = vmul.f32 %v2549_v47, %v10946_v7  ;;  %vm2444_vm8 = vweird.f32 %v5807_v13 }
 0x2e2   : > { %v2440_v9 = vsub.f32 1.0, %v2439_v44  ;;  %v2447_v62 = vand.u32 2147483647, %v8649_v0  ;;  %v2479_v1 = vmul.f32 %v5809_v39, %v8665_v32  ;;  %v8710_v8 = vadd.f32 %v493_v61, %v6329_v58 }
 0x2e3   : > { %v8712_v11 = vmin.f32 %v3895_v46, 16.0  ;;  %v8714_v22 = vmin.f32 %v3935_v50, 16.0  ;;  %v8716_v24 = vadd.f32 1.0, %v2516_v6  ;;  %vm2443_vm9 = vweird.f32 %v8649_v0  ;;  %v10955_v6 = vld [vmem:[#allocation33_spill] sm:$0xff] }
 0x2e4   : > { %v2441_v53 = vmul.f32 %v5807_v13, %v2440_v9  ;;  %v2450_v27 = vor.u32 1.1754944e-38, %v2449_v56  ;;  %v2480_v10 = vsub.f32 1.0, %v2479_v1  ;;  %v2590_v47 = vmul.f32 %v2589_v33, %v10948_v28  ;;  %vm2445_vm10 = vmor %vm2443_vm9, %vm2444_vm8 }
 0x2e5   : > { %10953 = vst [vmem:[#allocation93_spill] sm:$0xff] %v8712_v11  ;;  %v2489_v41 = vand.u32 2147483648, %v8665_v32  ;;  %v3858_v12 = vadd.f32 0.00028619796, %v3857_v17  ;;  %5810 = vrcp.f32 %v8716_v24  ;;  %vm2484_vm11 = vweird.f32 %v5809_v39 }
 0x2e6   : > { %10954 = vst [vmem:[#allocation3_spill] sm:$0xff] %v8714_v22  ;;  %v2442_v44 = vadd.f32 %v5807_v13, %v2441_v53  ;;  %v2481_v46 = vmul.f32 %v5809_v39, %v2480_v10  ;;  %v2487_v50 = vand.u32 2147483647, %v8665_v32  ;;  %v8725_v61 = vmul.f32 0.70710677, %v8710_v8 }
 0x2e7   : > { %vm2448_vm12 = vcmp.eq.f32.partialorder %v2447_v62, 8.507059e+37  ;;  %v3897_v1 = vmul.f32 2.1237322e-06, %v8712_v11  ;;  %v3937_v56 = vmul.f32 2.1237322e-06, %v8714_v22  ;;  %vm2483_vm13 = vweird.f32 %v8665_v32 }
 0x2e8   : > { %v2446_v0 = vsel %vm2445_vm10, %v5807_v13, %v2442_v44  ;;  %v2482_v9 = vadd.f32 %v5809_v39, %v2481_v46  ;;  %v2551_v17 = vadd.f32 0.014752088, %v2550_v38  ;;  %vm2485_vm14 = vmor %vm2483_vm13, %vm2484_vm11  ;;  %v2490_v10 = vor.u32 1.1754944e-38, %v2489_v41  ;;  %v10956_v41 = vld [vmem:[#allocation5_spill] sm:$0xff] }
 0x2e9   : > { %v2451_v33 = vsel %vm2448_vm12, %v2450_v27, %v2446_v0  ;;  %v3859_v20 = vmul.f32 %v3858_v12, %v8688_v21  ;;  %v2591_v55 = vadd.f32 0.014752088, %v2590_v47  ;;  %v8733_v52 = vmul.f32 %v3744_v34, %v8541_v48 }
 0x2ea   : > { %v2452_v53 = vmul.f32 %v2451_v33, %v10955_v6  ;;  %v2486_v62 = vsel %vm2485_vm14, %v5809_v39, %v2482_v9  ;;  %vm2488_vm15 = vcmp.eq.f32.partialorder %v2487_v50, 8.507059e+37  ;;  %v3975_v13 = vmul.f32 %v8725_v61, %v8725_v61 }
 0x2eb   : > { %v5811_v27 = vpop.eup %5810  ;;  %v2491_v46 = vsel %vm2488_vm15, %v2490_v10, %v2486_v62  ;;  %v3898_v32 = vadd.f32 0.00028619796, %v3897_v1  ;;  %v3938_v38 = vadd.f32 0.00028619796, %v3937_v56  ;;  %v3784_v0 = vadd.f32 0.18741608, %v3783_v26 }
 0x2ec   : > { %v5657_v44 = vclamps-f32 %v2452_v53, 1.0  ;;  %v3823_v33 = vmul.f32 %v3822_v59, %v8584_v30  ;;  %v2492_v6 = vmul.f32 %v2491_v46, %v10956_v41  ;;  %v2519_v12 = vmul.f32 %v5811_v27, %v8716_v24  ;;  %v10958_v56 = vld [vmem:[#allocation90_spill] sm:$0xff] }
 0x2ed   : > { %v3860_v34 = vadd.f32 0.0036580483, %v3859_v20  ;;  %v2552_v39 = vmul.f32 %v2551_v17, %v10946_v7  ;;  %v2592_v50 = vmul.f32 %v2591_v55, %v10948_v28  ;;  %v8742_v48 = vmin.f32 %v3975_v13, 16.0 }
 0x2ee   : > { %v4933_v47 = vadd.f32 1.0, %v5657_v44  ;;  %v5658_v9 = vclamps-f32 %v2492_v6, 1.0  ;;  %v2520_v53 = vsub.f32 1.0, %v2519_v12  ;;  %v2628_v1 = vmul.f32 3.8918573e-05, %v7499_v60  ;;  %v10959_v6 = vld [vmem:[#allocation94_spill] sm:$0xff] }
 0x2ef   : > { %10957 = vst [vmem:[#allocation87_spill] sm:$0xff] %v8742_v48  ;;  %v3899_v59 = vmul.f32 %v3898_v32, %v8712_v11  ;;  %v3939_v10 = vmul.f32 %v3938_v38, %v8714_v22  ;;  %v2529_v62 = vand.u32 2147483648, %v8716_v24  ;;  %vm2524_vm0 = vweird.f32 %v5811_v27 }
 0x2f0   : > { %v5033_v26 = vmul.f32 %v4933_v47, %v10958_v56  ;;  %v4934_v44 = vadd.f32 1.0, %v5658_v9  ;;  %v2521_v20 = vmul.f32 %v5811_v27, %v2520_v53  ;;  %v2527_v17 = vand.u32 2147483647, %v8716_v24 }
 0x2f1   : > { %v3824_v55 = vadd.f32 0.18741608, %v3823_v33  ;;  %v3861_v13 = vmul.f32 %v3860_v34, %v8688_v21  ;;  %v2553_v46 = vadd.f32 0.112945676, %v2552_v39  ;;  %v2593_v41 = vadd.f32 0.112945676, %v2592_v50 }
 0x2f2   : > { %5390 = vmatmul.f32.gmra.mxu2 %v5033_v26  ;;  %v5034_v12 = vmul.f32 %v4934_v44, %v10959_v6  ;;  %v3977_v47 = vmul.f32 2.1237322e-06, %v8742_v48  ;;  %v2522_v32 = vadd.f32 %v5811_v27, %v2521_v20  ;;  %vm2523_vm1 = vweird.f32 %v8716_v24  ;;  %v10960_v24 = vld [vmem:[#allocation71_spill] sm:$0xff] }
 0x2f3   : > { %v3900_v38 = vadd.f32 0.0036580483, %v3899_v59  ;;  %vm2525_vm2 = vmor %vm2523_vm1, %vm2524_vm0  ;;  %v2530_v9 = vor.u32 1.1754944e-38, %v2529_v62  ;;  %v2554_v53 = vmul.f32 %v2553_v46, %v10946_v7  ;;  %v2594_v56 = vmul.f32 %v2593_v41, %v10948_v28 }
 0x2f4   : > { %5482 = vmatmul.f32.gmra.mxu3 %v5034_v12  ;;  %v3940_v33 = vadd.f32 0.0036580483, %v3939_v10  ;;  %v2526_v26 = vsel %vm2525_vm2, %v5811_v27, %v2522_v32  ;;  %vm2528_vm3 = vcmp.eq.f32.partialorder %v2527_v17, 8.507059e+37  ;;  %v2629_v34 = vadd.f32 0.001143296, %v2628_v1 }
 0x2f5   : > { %v3706_v39 = vadd.f32 1.1283791, %v8694_v49  ;;  %v3785_v50 = vmul.f32 %v3784_v0, %v8582_v43  ;;  %v2531_v44 = vsel %vm2528_vm3, %v2530_v9, %v2526_v26  ;;  %v2555_v20 = vadd.f32 0.4994258, %v2554_v53 }
 0x2f6   : > { %v3978_v6 = vadd.f32 0.00028619796, %v3977_v47  ;;  %v2532_v59 = vmul.f32 %v2531_v44, %v10960_v24  ;;  %v2595_v42 = vadd.f32 0.4994258, %v2594_v56  ;;  %v2630_v62 = vmul.f32 %v2629_v34, %v7499_v60  ;;  %v10966_v24 = vld [vmem:[#allocation4_spill] sm:$0xff] }
 0x2f7   : > { %v3825_v46 = vmul.f32 %v3824_v55, %v8584_v30  ;;  %v3862_v41 = vadd.f32 0.05243302, %v3861_v13  ;;  %v3901_v10 = vmul.f32 %v3900_v38, %v8712_v11  ;;  %v2556_v27 = vmul.f32 %v2555_v20, %v10946_v7 }
 0x2f8   : > { %v3941_v1 = vmul.f32 %v3940_v33, %v8714_v22  ;;  %v5659_v49 = vclamps-f32 %v2532_v59, 1.0  ;;  %v2596_v0 = vmul.f32 %v2595_v42, %v10948_v28  ;;  %v2631_v17 = vadd.f32 0.014752088, %v2630_v62  ;;  %v10967_v62 = vld [vmem:[#allocation9_spill] sm:$0xff] }
 0x2f9   : > { %v8766_v12 = vmul.f32 0.5, %v8493_v16  ;;  %v3746_v47 = vadd.f32 1.1283791, %v8733_v52  ;;  %v8769_v32 = vadd.f32 1.0, %v2556_v27  ;;  %v2668_v55 = vmul.f32 3.8918573e-05, %v7551_v14 }
 0x2fa   : > { %v3979_v13 = vmul.f32 %v3978_v6, %v8742_v48  ;;  %v4935_v38 = vadd.f32 1.0, %v5659_v49  ;;  %v8773_v9 = vadd.f32 1.0, %v2596_v0  ;;  %v2632_v7 = vmul.f32 %v2631_v17, %v7499_v60  ;;  %v10962_v52 = vld [vmem:[#allocation96_spill] sm:$0xff]  ;;  %v677_v49 = vpop.f32.mrf.mxu3 }
 0x2fb   : > { %10961 = vst [vmem:[#allocation27_spill] sm:$0xff] %v8766_v12  ;;  %v3786_v53 = vadd.f32 1.1283791, %v3785_v50  ;;  %v3826_v56 = vadd.f32 1.1283791, %v3825_v46  ;;  %v3863_v42 = vmul.f32 %v3862_v41, %v8688_v21  ;;  %5812 = vrcp.f32 %v8769_v32 }
 0x2fc   : > { %v3902_v16 = vadd.f32 0.05243302, %v3901_v10  ;;  %v3942_v28 = vadd.f32 0.05243302, %v3941_v1  ;;  %v5035_v33 = vmul.f32 %v4935_v38, %v10962_v52  ;;  %5814 = vrcp.f32 %v8773_v9  ;;  %v404_v38 = vpop.f32.mrf.mxu0 }
 0x2fd   : > { %v8781_v26 = vmul.f32 0.5, %v8535_v29  ;;  %v8784_v34 = vmul.f32 0.5, %v8538_v37  ;;  %v2633_v44 = vadd.f32 0.112945676, %v2632_v7  ;;  %v2669_v20 = vadd.f32 0.001143296, %v2668_v55 }
 0x2fe   : > { %v8787_v50 = vmul.f32 %v3706_v39, %v8504_v31  ;;  %v3980_v6 = vadd.f32 0.0036580483, %v3979_v13  ;;  %5209 = vmatmul.f32.gmra.mxu0 %v5035_v33  ;;  %v2708_v59 = vmul.f32 3.8918573e-05, %v10966_v24  ;;  %v2748_v46 = vmul.f32 3.8918573e-05, %v10967_v62 }
 0x2ff   : > { %10963 = vst [vmem:[#allocation97_spill] sm:$0xff] %v8781_v26  ;;  %v8792_v41 = vmul.f32 %v3746_v47, %v8510_v54  ;;  %v8795_v29 = vmul.f32 %v3786_v53, %v8556_v36  ;;  %v8798_v37 = vmul.f32 %v3826_v56, %v8559_v18  ;;  %v2634_v10 = vmul.f32 %v2633_v44, %v7499_v60  ;;  %v585_v54 = vpop.f32.mrf.mxu2  ;;  %v10973_v26 = vld [vmem:[#allocation11_spill] sm:$0xff] }
 0x300   : > { %10964 = vst [vmem:[#allocation10_spill] sm:$0xff] %v8784_v34  ;;  %v8802_v31 = vmul.f32 0.5, %v8647_v23  ;;  %v8804_v39 = vadd.f32 0.18741608, %v3863_v42  ;;  %v3903_v27 = vmul.f32 %v3902_v16, %v8712_v11  ;;  %v8808_v1 = vmul.f32 %v3942_v28, %v8714_v22 }
 0x301   : > { %10965 = vst [vmem:[#allocation89_spill] sm:$0xff] %v8787_v50  ;;  %v5813_v0 = vpop.eup %5812  ;;  %v2635_v36 = vadd.f32 0.4994258, %v2634_v10  ;;  %v8811_v17 = vadd.f32 %v585_v54, %v6344_v2  ;;  %v8814_v18 = vadd.f32 %v677_v49, %v6346_v3  ;;  %v2670_v23 = vmul.f32 %v2669_v20, %v7551_v14  ;;  %v496_v49 = vpop.f32.mrf.mxu1  ;;  %v10975_v50 = vld [vmem:[#allocation37_spill] sm:$0xff] }
 0x302   : > { %10968 = vst [vmem:[#allocation33_spill] sm:$0xff] %v8792_v41  ;;  %v5815_v47 = vpop.eup %5814  ;;  %v3981_v55 = vmul.f32 %v3980_v6, %v8742_v48  ;;  %v2559_v13 = vmul.f32 %v5813_v0, %v8769_v32  ;;  %v2709_v7 = vadd.f32 0.001143296, %v2708_v59  ;;  %v2749_v53 = vadd.f32 0.001143296, %v2748_v46 }
 0x303   : > { %10969 = vst [vmem:[#allocation5_spill] sm:$0xff] %v8795_v29  ;;  %vm2563_vm4 = vweird.f32 %v8769_v32  ;;  %v2567_v56 = vand.u32 2147483647, %v8769_v32  ;;  %v2599_v42 = vmul.f32 %v5815_v47, %v8773_v9  ;;  %v2636_v16 = vmul.f32 %v2635_v36, %v7499_v60 }
 0x304   : > { %10970 = vst [vmem:[#allocation90_spill] sm:$0xff] %v8798_v37  ;;  %v2560_v28 = vsub.f32 1.0, %v2559_v13  ;;  %v2569_v52 = vand.u32 2147483648, %v8769_v32  ;;  %v8825_v33 = vmul.f32 0.70710677, %v8811_v17  ;;  %v8833_v59 = vadd.f32 %v404_v38, %v6327_v57 }
 0x305   : > { %10971 = vst [vmem:[#allocation94_spill] sm:$0xff] %v8802_v31  ;;  %v8828_v44 = vmul.f32 0.70710677, %v8814_v18  ;;  %v2600_v20 = vsub.f32 1.0, %v2599_v42  ;;  %v8830_v6 = vadd.f32 1.0, %v2636_v16  ;;  %vm2564_vm5 = vweird.f32 %v5813_v0 }
 0x306   : > { %v2671_v46 = vadd.f32 0.014752088, %v2670_v23  ;;  %v2561_v10 = vmul.f32 %v5813_v0, %v2560_v28  ;;  %v2607_v60 = vand.u32 2147483647, %v8773_v9  ;;  %v2609_v54 = vand.u32 2147483648, %v8773_v9  ;;  %vm2565_vm8 = vmor %vm2563_vm4, %vm2564_vm5 }
 0x307   : > { %v2601_v36 = vmul.f32 %v5815_v47, %v2600_v20  ;;  %vm2604_vm6 = vweird.f32 %v5815_v47  ;;  %5816 = vrcp.f32 %v8830_v6  ;;  %v4015_v13 = vmul.f32 %v8825_v33, %v8825_v33 }
 0x308   : > { %v2562_v42 = vadd.f32 %v5813_v0, %v2561_v10  ;;  %v2570_v16 = vor.u32 1.1754944e-38, %v2569_v52  ;;  %vm2603_vm7 = vweird.f32 %v8773_v9  ;;  %v4055_v23 = vmul.f32 %v8828_v44, %v8828_v44 }
 0x309   : > { %v2602_v38 = vadd.f32 %v5815_v47, %v2601_v36  ;;  %v8846_v28 = vmul.f32 0.70710677, %v8833_v59  ;;  %v8849_v20 = vadd.f32 %v496_v49, %v6329_v58  ;;  %v2672_v31 = vmul.f32 %v2671_v46, %v7551_v14  ;;  %vm2605_vm10 = vmor %vm2603_vm7, %vm2604_vm6 }
 0x30a   : > { %v2566_v34 = vsel %vm2565_vm8, %v5813_v0, %v2562_v42  ;;  %vm2568_vm9 = vcmp.eq.f32.partialorder %v2567_v56, 8.507059e+37  ;;  %v2610_v52 = vor.u32 1.1754944e-38, %v2609_v54  ;;  %v2710_v9 = vmul.f32 %v2709_v7, %v10966_v24 }
 0x30b   : > { %v2571_v10 = vsel %vm2568_vm9, %v2570_v16, %v2566_v34  ;;  %v2606_v37 = vsel %vm2605_vm10, %v5815_v47, %v2602_v38  ;;  %vm2608_vm11 = vcmp.eq.f32.partialorder %v2607_v60, 8.507059e+37  ;;  %v8853_v32 = vmin.f32 %v4015_v13, 16.0  ;;  %v10977_v38 = vld [vmem:[#allocation16_spill] sm:$0xff] }
 0x30c   : > { %v3904_v36 = vadd.f32 0.18741608, %v3903_v27  ;;  %v2572_v29 = vmul.f32 %v2571_v10, %v10973_v26  ;;  %v2611_v12 = vsel %vm2608_vm11, %v2610_v52, %v2606_v37  ;;  %v8856_v41 = vmin.f32 %v4055_v23, 16.0 }
 0x30d   : > { %10972 = vst [vmem:[#allocation71_spill] sm:$0xff] %v8853_v32  ;;  %v5817_v49 = vpop.eup %5816  ;;  %v2612_v46 = vmul.f32 %v2611_v12, %v10975_v50  ;;  %v4095_v0 = vmul.f32 %v8846_v28, %v8846_v28  ;;  %v8862_v56 = vmul.f32 0.70710677, %v8849_v20  ;;  %v2673_v34 = vadd.f32 0.112945676, %v2672_v31 }
 0x30e   : > { %10974 = vst [vmem:[#allocation96_spill] sm:$0xff] %v8856_v41  ;;  %v3982_v47 = vadd.f32 0.05243302, %v3981_v55  ;;  %v5660_v7 = vclamps-f32 %v2572_v29, 1.0  ;;  %v2639_v60 = vmul.f32 %v5817_v49, %v8830_v6  ;;  %v2711_v27 = vadd.f32 0.014752088, %v2710_v9 }
 0x30f   : > { %v5661_v54 = vclamps-f32 %v2612_v46, 1.0  ;;  %v2647_v26 = vand.u32 2147483647, %v8830_v6  ;;  %v4017_v37 = vmul.f32 2.1237322e-06, %v8853_v32  ;;  %v2750_v13 = vmul.f32 %v2749_v53, %v10967_v62  ;;  %v10978_v53 = vld [vmem:[#allocation12_spill] sm:$0xff] }
 0x310   : > { %v4936_v12 = vadd.f32 1.0, %v5660_v7  ;;  %v2640_v50 = vsub.f32 1.0, %v2639_v60  ;;  %v4057_v42 = vmul.f32 2.1237322e-06, %v8856_v41  ;;  %v2674_v16 = vmul.f32 %v2673_v34, %v7551_v14  ;;  %v10979_v60 = vld [vmem:[#allocation13_spill] sm:$0xff] }
 0x311   : > { %v4937_v23 = vadd.f32 1.0, %v5661_v54  ;;  %v2649_v31 = vand.u32 2147483648, %v8830_v6  ;;  %v8871_v29 = vmin.f32 %v4095_v0, 16.0  ;;  %v4135_v55 = vmul.f32 %v8862_v56, %v8862_v56 }
 0x312   : > { %v5036_v52 = vmul.f32 %v4936_v12, %v10977_v38  ;;  %v2641_v9 = vmul.f32 %v5817_v49, %v2640_v50  ;;  %vm2644_vm12 = vweird.f32 %v5817_v49  ;;  %v2675_v10 = vadd.f32 0.4994258, %v2674_v16 }
 0x313   : > { %10976 = vst [vmem:[#allocation4_spill] sm:$0xff] %v8871_v29  ;;  %v5037_v46 = vmul.f32 %v4937_v23, %v10978_v53  ;;  %vm2643_vm13 = vweird.f32 %v8830_v6  ;;  %v4018_v7 = vadd.f32 0.00028619796, %v4017_v37  ;;  %v2788_v34 = vmul.f32 3.8918573e-05, %v10979_v60 }
 0x314   : > { %5301 = vmatmul.f32.gmra.mxu1 %v5036_v52  ;;  %v2642_v54 = vadd.f32 %v5817_v49, %v2641_v9  ;;  %v4058_v30 = vadd.f32 0.00028619796, %v4057_v42  ;;  %v2676_v0 = vmul.f32 %v2675_v10, %v7551_v14  ;;  %v2712_v43 = vmul.f32 %v2711_v27, %v10966_v24  ;;  %vm2645_vm14 = vmor %vm2643_vm13, %vm2644_vm12 }
 0x315   : > { %5393 = vmatmul.f32.gmra.mxu2 %v5037_v46  ;;  %vm2648_vm15 = vcmp.eq.f32.partialorder %v2647_v26, 8.507059e+37  ;;  %v2650_v12 = vor.u32 1.1754944e-38, %v2649_v31  ;;  %v4097_v50 = vmul.f32 2.1237322e-06, %v8871_v29  ;;  %v2751_v16 = vadd.f32 0.014752088, %v2750_v13 }
 0x316   : > { %v2646_v23 = vsel %vm2645_vm14, %v5817_v49, %v2642_v54  ;;  %v8882_v38 = vmin.f32 %v4135_v55, 16.0  ;;  %v8884_v6 = vadd.f32 1.0, %v2676_v0  ;;  %v2713_v37 = vadd.f32 0.112945676, %v2712_v43  ;;  %v10982_v26 = vld [vmem:[#allocation39_spill] sm:$0xff] }
 0x317   : > { %v3944_v52 = vadd.f32 0.18741608, %v8808_v1  ;;  %v3983_v42 = vmul.f32 %v3982_v47, %v8742_v48  ;;  %v2651_v14 = vsel %vm2648_vm15, %v2650_v12, %v2646_v23  ;;  %v4019_v27 = vmul.f32 %v4018_v7, %v8853_v32 }
 0x318   : > { %10980 = vst [vmem:[#allocation9_spill] sm:$0xff] %v8882_v38  ;;  %v8890_v9 = vmul.f32 0.5, %v8656_v51  ;;  %v2652_v31 = vmul.f32 %v2651_v14, %v10982_v26  ;;  %v4059_v13 = vmul.f32 %v4058_v30, %v8856_v41  ;;  %5818 = vrcp.f32 %v8884_v6 }
 0x319   : > { %v3865_v49 = vmul.f32 %v8804_v39, %v8688_v21  ;;  %v3905_v43 = vmul.f32 %v3904_v36, %v8712_v11  ;;  %v4098_v1 = vadd.f32 0.00028619796, %v4097_v50  ;;  %v2752_v47 = vmul.f32 %v2751_v16, %v10967_v62 }
 0x31a   : > { %10981 = vst [vmem:[#allocation11_spill] sm:$0xff] %v8890_v9  ;;  %v5662_v55 = vclamps-f32 %v2652_v31, 1.0  ;;  %v4137_v10 = vmul.f32 2.1237322e-06, %v8882_v38  ;;  %v2714_v51 = vmul.f32 %v2713_v37, %v10966_v24  ;;  %v2789_v53 = vadd.f32 0.001143296, %v2788_v34 }
 0x31b   : > { %v8902_v46 = vmul.f32 0.5, %v8659_v15  ;;  %v3945_v30 = vmul.f32 %v3944_v52, %v8714_v22  ;;  %v3984_v7 = vadd.f32 0.18741608, %v3983_v42  ;;  %v4020_v54 = vadd.f32 0.0036580483, %v4019_v27  ;;  %v10985_v34 = vld [vmem:[#allocation17_spill] sm:$0xff] }
 0x31c   : > { %v8906_v39 = vmul.f32 0.5, %v8710_v8  ;;  %v4938_v36 = vadd.f32 1.0, %v5662_v55  ;;  %v4060_v0 = vadd.f32 0.0036580483, %v4059_v13  ;;  %v2715_v12 = vadd.f32 0.4994258, %v2714_v51 }
 0x31d   : > { %10983 = vst [vmem:[#allocation37_spill] sm:$0xff] %v8902_v46  ;;  %v3866_v50 = vadd.f32 1.1283791, %v3865_v49  ;;  %v3906_v16 = vadd.f32 1.1283791, %v3905_v43  ;;  %v4099_v23 = vmul.f32 %v4098_v1, %v8871_v29  ;;  %v2790_v52 = vmul.f32 %v2789_v53, %v10979_v60  ;;  %v10987_v51 = vld [vmem:[#allocation14_spill] sm:$0xff] }
 0x31e   : > { %10984 = vst [vmem:[#allocation16_spill] sm:$0xff] %v8906_v39  ;;  %v2753_v14 = vadd.f32 0.112945676, %v2752_v47  ;;  %v5819_v37 = vpop.eup %5818  ;;  %v5038_v26 = vmul.f32 %v4938_v36, %v10985_v34  ;;  %v4138_v15 = vadd.f32 0.00028619796, %v4137_v10  ;;  %v2716_v31 = vmul.f32 %v2715_v12, %v10966_v24  ;;  %v10998_v22 = vld [vmem:[#allocation47_spill] sm:$0xff] }
 0x31f   : > { %v3946_v42 = vadd.f32 1.1283791, %v3945_v30  ;;  %v3985_v8 = vmul.f32 %v3984_v7, %v8742_v48  ;;  %v4021_v27 = vmul.f32 %v4020_v54, %v8853_v32  ;;  %v2679_v13 = vmul.f32 %v5819_v37, %v8884_v6 }
 0x320   : > { %5485 = vmatmul.f32.gmra.mxu3 %v5038_v26  ;;  %v4061_v49 = vmul.f32 %v4060_v0, %v8856_v41  ;;  %v8916_v43 = vadd.f32 1.0, %v2716_v31  ;;  %v2754_v1 = vmul.f32 %v2753_v14, %v10967_v62  ;;  %v2791_v47 = vadd.f32 0.014752088, %v2790_v52 }
 0x321   : > { %v8920_v55 = vmul.f32 %v3866_v50, %v8653_v19  ;;  %v4100_v24 = vadd.f32 0.0036580483, %v4099_v23  ;;  %v2680_v10 = vsub.f32 1.0, %v2679_v13  ;;  %v2828_v53 = vmul.f32 3.8918573e-05, %v10987_v51 }
 0x322   : > { %v4139_v30 = vmul.f32 %v4138_v15, %v8882_v38  ;;  %v2687_v7 = vand.u32 2147483647, %v8884_v6  ;;  %v2689_v54 = vand.u32 2147483648, %v8884_v6  ;;  %5820 = vrcp.f32 %v8916_v43 }
 0x323   : > { %10986 = vst [vmem:[#allocation12_spill] sm:$0xff] %v8920_v55  ;;  %v2681_v36 = vmul.f32 %v5819_v37, %v2680_v10  ;;  %vm2684_vm0 = vweird.f32 %v5819_v37  ;;  %v2755_v0 = vadd.f32 0.4994258, %v2754_v1  ;;  %v2792_v12 = vmul.f32 %v2791_v47, %v10979_v60  ;;  %v10991_v10 = vld [vmem:[#allocation22_spill] sm:$0xff] }
 0x324   : > { %v8929_v19 = vmul.f32 %v3906_v16, %v8674_v63  ;;  %v3986_v50 = vadd.f32 1.1283791, %v3985_v8  ;;  %v4022_v23 = vadd.f32 0.05243302, %v4021_v27  ;;  %v4062_v14 = vadd.f32 0.05243302, %v4061_v49 }
 0x325   : > { %v2682_v34 = vadd.f32 %v5819_v37, %v2681_v36  ;;  %vm2683_vm1 = vweird.f32 %v8884_v6  ;;  %v2756_v26 = vmul.f32 %v2755_v0, %v10967_v62  ;;  %v2793_v15 = vadd.f32 0.112945676, %v2792_v12 }
 0x326   : > { %10988 = vst [vmem:[#allocation13_spill] sm:$0xff] %v8929_v19  ;;  %v4101_v31 = vmul.f32 %v4100_v24, %v8871_v29  ;;  %v4140_v52 = vadd.f32 0.0036580483, %v4139_v30  ;;  %vm2685_vm2 = vmor %vm2683_vm1, %vm2684_vm0  ;;  %vm2688_vm3 = vcmp.eq.f32.partialorder %v2687_v7, 8.507059e+37  ;;  %v2690_v13 = vor.u32 1.1754944e-38, %v2689_v54  ;;  %v588_v7 = vpop.f32.mrf.mxu2 }
 0x327   : > { %v2686_v1 = vsel %vm2685_vm2, %v5819_v37, %v2682_v34  ;;  %v8934_v47 = vadd.f32 1.0, %v2756_v26  ;;  %v2794_v63 = vmul.f32 %v2793_v15, %v10979_v60  ;;  %v2829_v16 = vadd.f32 0.001143296, %v2828_v53  ;;  %v10992_v26 = vld [vmem:[#allocation36_spill] sm:$0xff] }
 0x328   : > { %v5821_v8 = vpop.eup %5820  ;;  %v8938_v27 = vmul.f32 %v3946_v42, %v8677_v45  ;;  %v8941_v6 = vmul.f32 %v3986_v50, %v8725_v61  ;;  %v4023_v62 = vmul.f32 %v4022_v23, %v8853_v32  ;;  %v2691_v49 = vsel %vm2688_vm3, %v2690_v13, %v2686_v1  ;;  %v680_v61 = vpop.f32.mrf.mxu3 }
 0x329   : > { %v4063_v24 = vmul.f32 %v4062_v14, %v8856_v41  ;;  %v2692_v30 = vmul.f32 %v2691_v49, %v10991_v10  ;;  %v2719_v37 = vmul.f32 %v5821_v8, %v8916_v43  ;;  %5822 = vrcp.f32 %v8934_v47  ;;  %v407_v50 = vpop.f32.mrf.mxu0  ;;  %v10993_v10 = vld [vmem:[#allocation15_spill] sm:$0xff] }
 0x32a   : > { %10989 = vst [vmem:[#allocation39_spill] sm:$0xff] %v8938_v27  ;;  %v4102_v53 = vadd.f32 0.05243302, %v4101_v31  ;;  %v4141_v54 = vmul.f32 %v4140_v52, %v8882_v38  ;;  %v2727_v45 = vand.u32 2147483647, %v8916_v43  ;;  %v8951_v12 = vadd.f32 %v588_v7, %v6344_v2  ;;  %v10997_v27 = vld [vmem:[#allocation18_spill] sm:$0xff] }
 0x32b   : > { %10990 = vst [vmem:[#allocation17_spill] sm:$0xff] %v8941_v6  ;;  %v2795_v42 = vadd.f32 0.4994258, %v2794_v63  ;;  %v5663_v36 = vclamps-f32 %v2692_v30, 1.0  ;;  %v2720_v0 = vsub.f32 1.0, %v2719_v37  ;;  %v2830_v23 = vmul.f32 %v2829_v16, %v10987_v51 }
 0x32c   : > { %vm2724_vm4 = vweird.f32 %v5821_v8  ;;  %v2729_v14 = vand.u32 2147483648, %v8916_v43  ;;  %v2868_v15 = vmul.f32 3.8918573e-05, %v10992_v26  ;;  %v8958_v13 = vmul.f32 0.70710677, %v8951_v12 }
 0x32d   : > { %v2796_v34 = vmul.f32 %v2795_v42, %v10979_v60  ;;  %v4939_v31 = vadd.f32 1.0, %v5663_v36  ;;  %v2721_v52 = vmul.f32 %v5821_v8, %v2720_v0  ;;  %v8961_v1 = vadd.f32 %v680_v61, %v6346_v3 }
 0x32e   : > { %v8963_v63 = vadd.f32 0.18741608, %v4023_v62  ;;  %vm2723_vm5 = vweird.f32 %v8916_v43  ;;  %v8969_v49 = vadd.f32 %v407_v50, %v6327_v57  ;;  %v4175_v7 = vmul.f32 %v8958_v13, %v8958_v13 }
 0x32f   : > { %v8966_v16 = vadd.f32 1.0, %v2796_v34  ;;  %v5823_v60 = vpop.eup %5822  ;;  %v5039_v30 = vmul.f32 %v4939_v31, %v10993_v10  ;;  %v2722_v37 = vadd.f32 %v5821_v8, %v2721_v52  ;;  %v2831_v42 = vadd.f32 0.014752088, %v2830_v23  ;;  %vm2725_vm6 = vmor %vm2723_vm5, %vm2724_vm4 }
 0x330   : > { %v8974_v36 = vadd.f32 0.18741608, %v4063_v24  ;;  %v2730_v62 = vor.u32 1.1754944e-38, %v2729_v14  ;;  %v2759_v43 = vmul.f32 %v5823_v60, %v8934_v47  ;;  %vm2728_vm7 = vcmp.eq.f32.partialorder %v2727_v45, 8.507059e+37  ;;  %v10995_v14 = vld [vmem:[#allocation25_spill] sm:$0xff] }
 0x331   : > { %5824 = vrcp.f32 %v8966_v16  ;;  %5212 = vmatmul.f32.gmra.mxu0 %v5039_v30  ;;  %v2726_v61 = vsel %vm2725_vm6, %v5821_v8, %v2722_v37  ;;  %v8980_v0 = vmul.f32 0.70710677, %v8961_v1  ;;  %v2869_v50 = vadd.f32 0.001143296, %v2868_v15 }
 0x332   : > { %v2731_v34 = vsel %vm2728_vm7, %v2730_v62, %v2726_v61  ;;  %v2760_v31 = vsub.f32 1.0, %v2759_v43  ;;  %v8982_v52 = vmin.f32 %v4175_v7, 16.0  ;;  %v8985_v24 = vmul.f32 0.70710677, %v8969_v49  ;;  %v10996_v43 = vld [vmem:[#allocation20_spill] sm:$0xff] }
 0x333   : > { %v8988_v23 = vmul.f32 %v4102_v53, %v8871_v29  ;;  %v2732_v10 = vmul.f32 %v2731_v34, %v10995_v14  ;;  %v2769_v30 = vand.u32 2147483648, %v8934_v47  ;;  %v2832_v8 = vmul.f32 %v2831_v42, %v10987_v51 }
 0x334   : > { %10994 = vst [vmem:[#allocation14_spill] sm:$0xff] %v8982_v52  ;;  %v8993_v45 = vadd.f32 0.05243302, %v4141_v54  ;;  %v2761_v37 = vmul.f32 %v5823_v60, %v2760_v31  ;;  %vm2764_vm8 = vweird.f32 %v5823_v60  ;;  %v2767_v15 = vand.u32 2147483647, %v8934_v47  ;;  %v499_v31 = vpop.f32.mrf.mxu1 }
 0x335   : > { %v5664_v7 = vclamps-f32 %v2732_v10, 1.0  ;;  %vm2763_vm9 = vweird.f32 %v8934_v47  ;;  %v2870_v62 = vmul.f32 %v2869_v50, %v10992_v26  ;;  %v2908_v53 = vmul.f32 3.8918573e-05, %v10996_v43 }
 0x336   : > { %v2762_v39 = vadd.f32 %v5823_v60, %v2761_v37  ;;  %v4177_v34 = vmul.f32 2.1237322e-06, %v8982_v52  ;;  %v4215_v42 = vmul.f32 %v8980_v0, %v8980_v0  ;;  %v4255_v54 = vmul.f32 %v8985_v24, %v8985_v24  ;;  %vm2765_vm10 = vmor %vm2763_vm9, %vm2764_vm8 }
 0x337   : > { %v5825_v61 = vpop.eup %5824  ;;  %v4940_v14 = vadd.f32 1.0, %v5664_v7  ;;  %v2770_v10 = vor.u32 1.1754944e-38, %v2769_v30  ;;  %v2833_v6 = vadd.f32 0.112945676, %v2832_v8  ;;  %vm2768_vm11 = vcmp.eq.f32.partialorder %v2767_v15, 8.507059e+37 }
 0x338   : > { %v2799_v47 = vmul.f32 %v5825_v61, %v8966_v16  ;;  %v2766_v50 = vsel %vm2765_vm10, %v5823_v60, %v2762_v39  ;;  %v2807_v46 = vand.u32 2147483647, %v8966_v16  ;;  %v2809_v37 = vand.u32 2147483648, %v8966_v16 }
 0x339   : > { %v5040_v9 = vmul.f32 %v4940_v14, %v10997_v27  ;;  %v2771_v19 = vsel %vm2768_vm11, %v2770_v10, %v2766_v50  ;;  %v9009_v48 = vadd.f32 %v499_v31, %v6329_v58  ;;  %v4178_v11 = vadd.f32 0.00028619796, %v4177_v34 }
 0x33a   : > { %v2800_v55 = vsub.f32 1.0, %v2799_v47  ;;  %v2772_v7 = vmul.f32 %v2771_v19, %v10998_v22  ;;  %v9012_v30 = vmin.f32 %v4215_v42, 16.0  ;;  %v9014_v21 = vmin.f32 %v4255_v54, 16.0  ;;  %v11001_v54 = vld [vmem:[#allocation21_spill] sm:$0xff] }
 0x33b   : > { %5304 = vmatmul.f32.gmra.mxu1 %v5040_v9  ;;  %vm2804_vm12 = vweird.f32 %v5825_v61  ;;  %v2834_v60 = vmul.f32 %v2833_v6, %v10987_v51  ;;  %v2871_v8 = vadd.f32 0.014752088, %v2870_v62  ;;  %vm2803_vm13 = vweird.f32 %v8966_v16 }
 0x33c   : > { %10999 = vst [vmem:[#allocation22_spill] sm:$0xff] %v9012_v30  ;;  %v2801_v39 = vmul.f32 %v5825_v61, %v2800_v55  ;;  %v5665_v15 = vclamps-f32 %v2772_v7, 1.0  ;;  %v2810_v27 = vor.u32 1.1754944e-38, %v2809_v37  ;;  %v2909_v14 = vadd.f32 0.001143296, %v2908_v53  ;;  %vm2805_vm14 = vmor %vm2803_vm13, %vm2804_vm12  ;;  %v11002_v7 = vld [vmem:[#allocation30_spill] sm:$0xff] }
 0x33d   : > { %11000 = vst [vmem:[#allocation36_spill] sm:$0xff] %v9014_v21  ;;  %v9019_v10 = vmul.f32 0.70710677, %v9009_v48  ;;  %v2835_v22 = vadd.f32 0.4994258, %v2834_v60  ;;  %v2872_v19 = vmul.f32 %v2871_v8, %v10992_v26  ;;  %v4179_v9 = vmul.f32 %v4178_v11, %v8982_v52 }
 0x33e   : > { %v2802_v31 = vadd.f32 %v5825_v61, %v2801_v39  ;;  %v4941_v34 = vadd.f32 1.0, %v5665_v15  ;;  %v4217_v55 = vmul.f32 2.1237322e-06, %v9012_v30  ;;  %v4257_v6 = vmul.f32 2.1237322e-06, %v9014_v21 }
 0x33f   : > { %vm2808_vm15 = vcmp.eq.f32.partialorder %v2807_v46, 8.507059e+37  ;;  %v2836_v16 = vmul.f32 %v2835_v22, %v10987_v51  ;;  %v2873_v53 = vadd.f32 0.112945676, %v2872_v19  ;;  %v4025_v42 = vmul.f32 %v8963_v63, %v8853_v32 }
 0x340   : > { %v2806_v62 = vsel %vm2805_vm14, %v5825_v61, %v2802_v31  ;;  %v5041_v47 = vmul.f32 %v4941_v34, %v11001_v54  ;;  %v2910_v37 = vmul.f32 %v2909_v14, %v10996_v43  ;;  %v4295_v11 = vmul.f32 %v9019_v10, %v9019_v10  ;;  %v11003_v61 = vld [vmem:[#allocation43_spill] sm:$0xff] }
 0x341   : > { %v2811_v50 = vsel %vm2808_vm15, %v2810_v27, %v2806_v62  ;;  %v9033_v60 = vadd.f32 1.0, %v2836_v16  ;;  %v2948_v46 = vmul.f32 3.8918573e-05, %v11003_v61  ;;  %v4180_v51 = vadd.f32 0.0036580483, %v4179_v9 }
 0x342   : > { %v2812_v39 = vmul.f32 %v2811_v50, %v11002_v7  ;;  %5396 = vmatmul.f32.gmra.mxu2 %v5041_v47  ;;  %v4218_v8 = vadd.f32 0.00028619796, %v4217_v55  ;;  %v4258_v15 = vadd.f32 0.00028619796, %v4257_v6  ;;  %v2874_v63 = vmul.f32 %v2873_v53, %v10992_v26 }
 0x343   : > { %v9038_v31 = vmul.f32 0.5, %v8811_v17  ;;  %v4065_v27 = vmul.f32 %v8974_v36, %v8856_v41  ;;  %5826 = vrcp.f32 %v9033_v60  ;;  %v9044_v22 = vmul.f32 0.5, %v8814_v18 }
 0x344   : > { %v5666_v14 = vclamps-f32 %v2812_v39, 1.0  ;;  %v4104_v19 = vadd.f32 0.18741608, %v8988_v23  ;;  %v4143_v34 = vmul.f32 %v8993_v45, %v8882_v38  ;;  %v2911_v9 = vadd.f32 0.014752088, %v2910_v37  ;;  %v11009_v45 = vld [vmem:[#allocation45_spill] sm:$0xff] }
 0x345   : > { %11004 = vst [vmem:[#allocation15_spill] sm:$0xff] %v9038_v31  ;;  %v4026_v55 = vadd.f32 1.1283791, %v4025_v42  ;;  %v9049_v62 = vmin.f32 %v4295_v11, 16.0  ;;  %v2949_v17 = vadd.f32 0.001143296, %v2948_v46  ;;  %v4181_v16 = vmul.f32 %v4180_v51, %v8982_v52 }
 0x346   : > { %11005 = vst [vmem:[#allocation25_spill] sm:$0xff] %v9044_v22  ;;  %v4942_v6 = vadd.f32 1.0, %v5666_v14  ;;  %v4219_v36 = vmul.f32 %v4218_v8, %v9012_v30  ;;  %v4259_v53 = vmul.f32 %v4258_v15, %v9014_v21  ;;  %v2875_v54 = vadd.f32 0.4994258, %v2874_v63  ;;  %v11018_v31 = vld [vmem:[#allocation26_spill] sm:$0xff] }
 0x347   : > { %11006 = vst [vmem:[#allocation20_spill] sm:$0xff] %v9049_v62  ;;  %v4066_v18 = vadd.f32 1.1283791, %v4065_v27  ;;  %v9055_v47 = vmul.f32 0.5, %v8833_v59  ;;  %v9058_v23 = vmul.f32 0.5, %v8849_v20  ;;  %v4105_v50 = vmul.f32 %v4104_v19, %v8871_v29 }
 0x348   : > { %v5042_v42 = vmul.f32 %v4942_v6, %v11009_v45  ;;  %v4144_v37 = vadd.f32 0.18741608, %v4143_v34  ;;  %v2876_v7 = vmul.f32 %v2875_v54, %v10992_v26  ;;  %v2912_v39 = vmul.f32 %v2911_v9, %v10996_v43 }
 0x349   : > { %11007 = vst [vmem:[#allocation18_spill] sm:$0xff] %v9055_v47  ;;  %v5827_v11 = vpop.eup %5826  ;;  %v9065_v46 = vmul.f32 %v4026_v55, %v8825_v33  ;;  %v4297_v59 = vmul.f32 2.1237322e-06, %v9049_v62  ;;  %v2950_v51 = vmul.f32 %v2949_v17, %v11003_v61  ;;  %v2988_v20 = vmul.f32 3.8918573e-05, %v7848_v40  ;;  %v11015_v47 = vld [vmem:[#allocation54_spill] sm:$0xff] }
 0x34a   : > { %11008 = vst [vmem:[#allocation47_spill] sm:$0xff] %v9058_v23  ;;  %5488 = vmatmul.f32.gmra.mxu3 %v5042_v42  ;;  %v4182_v8 = vadd.f32 0.05243302, %v4181_v16  ;;  %v4220_v15 = vadd.f32 0.0036580483, %v4219_v36  ;;  %v2839_v27 = vmul.f32 %v5827_v11, %v9033_v60  ;;  %v9072_v26 = vmul.f32 %v4066_v18, %v8828_v44 }
 0x34b   : > { %11010 = vst [vmem:[#allocation21_spill] sm:$0xff] %v9065_v46  ;;  %v4260_v63 = vadd.f32 0.0036580483, %v4259_v53  ;;  %v9074_v14 = vadd.f32 1.0, %v2876_v7  ;;  %v2913_v19 = vadd.f32 0.112945676, %v2912_v39  ;;  %v4145_v9 = vmul.f32 %v4144_v37, %v8882_v38 }
 0x34c   : > { %11011 = vst [vmem:[#allocation30_spill] sm:$0xff] %v9072_v26  ;;  %v2951_v33 = vadd.f32 0.014752088, %v2950_v51  ;;  %v9076_v34 = vadd.f32 1.1283791, %v4105_v50  ;;  %v2840_v55 = vsub.f32 1.0, %v2839_v27  ;;  %vm2844_vm0 = vweird.f32 %v5827_v11 }
 0x34d   : > { %v2989_v6 = vadd.f32 0.001143296, %v2988_v20  ;;  %v4298_v17 = vadd.f32 0.00028619796, %v4297_v59  ;;  %v2847_v16 = vand.u32 2147483647, %v9033_v60  ;;  %5828 = vrcp.f32 %v9074_v14 }
 0x34e   : > { %v2849_v36 = vand.u32 2147483648, %v9033_v60  ;;  %v2841_v53 = vmul.f32 %v5827_v11, %v2840_v55  ;;  %v2914_v44 = vmul.f32 %v2913_v19, %v10996_v43  ;;  %v2952_v54 = vmul.f32 %v2951_v33, %v11003_v61 }
 0x34f   : > { %v4183_v18 = vmul.f32 %v4182_v8, %v8982_v52  ;;  %v4221_v45 = vmul.f32 %v4220_v15, %v9012_v30  ;;  %v4261_v42 = vmul.f32 %v4260_v63, %v9014_v21  ;;  %v2990_v50 = vmul.f32 %v2989_v6, %v7848_v40 }
 0x350   : > { %v2842_v37 = vadd.f32 %v5827_v11, %v2841_v53  ;;  %vm2843_vm1 = vweird.f32 %v9033_v60  ;;  %v2915_v7 = vadd.f32 0.4994258, %v2914_v44  ;;  %v2953_v39 = vadd.f32 0.112945676, %v2952_v54 }
 0x351   : > { %v9089_v59 = vadd.f32 1.1283791, %v4145_v9  ;;  %v4299_v51 = vmul.f32 %v4298_v17, %v9049_v62  ;;  %vm2845_vm2 = vmor %vm2843_vm1, %vm2844_vm0  ;;  %vm2848_vm3 = vcmp.eq.f32.partialorder %v2847_v16, 8.507059e+37  ;;  %v2850_v20 = vor.u32 1.1754944e-38, %v2849_v36  ;;  %v11012_v9 = vld [vmem:[#allocation52_spill] sm:$0xff]  ;;  %v683_v36 = vpop.f32.mrf.mxu3 }
 0x352   : > { %v2846_v27 = vsel %vm2845_vm2, %v5827_v11, %v2842_v37  ;;  %v2916_v8 = vmul.f32 %v2915_v7, %v10996_v43  ;;  %v2954_v15 = vmul.f32 %v2953_v39, %v11003_v61  ;;  %v3028_v63 = vmul.f32 3.8918573e-05, %v7855_v35  ;;  %v591_v11 = vpop.f32.mrf.mxu2 }
 0x353   : > { %v5829_v19 = vpop.eup %5828  ;;  %v4222_v33 = vadd.f32 0.05243302, %v4221_v45  ;;  %v4262_v55 = vadd.f32 0.05243302, %v4261_v42  ;;  %v2851_v60 = vsel %vm2848_vm3, %v2850_v20, %v2846_v27  ;;  %v2991_v6 = vadd.f32 0.014752088, %v2990_v50 }
 0x354   : > { %v9095_v53 = vadd.f32 0.18741608, %v4183_v18  ;;  %v2852_v44 = vmul.f32 %v2851_v60, %v11012_v9  ;;  %v2879_v17 = vmul.f32 %v5829_v19, %v9074_v14  ;;  %v9099_v16 = vadd.f32 1.0, %v2916_v8  ;;  %v410_v60 = vpop.f32.mrf.mxu0 }
 0x355   : > { %v4300_v43 = vadd.f32 0.0036580483, %v4299_v51  ;;  %v2955_v54 = vadd.f32 0.4994258, %v2954_v15  ;;  %v9102_v37 = vadd.f32 %v591_v11, %v6344_v2  ;;  %v9105_v45 = vadd.f32 %v683_v36, %v6346_v3  ;;  %v11013_v11 = vld [vmem:[#allocation29_spill] sm:$0xff] }
 0x356   : > { %v5667_v42 = vclamps-f32 %v2852_v44, 1.0  ;;  %v2880_v50 = vsub.f32 1.0, %v2879_v17  ;;  %5830 = vrcp.f32 %v9099_v16  ;;  %v3029_v18 = vadd.f32 0.001143296, %v3028_v63 }
 0x357   : > { %v2887_v7 = vand.u32 2147483647, %v9074_v14  ;;  %v2889_v39 = vand.u32 2147483648, %v9074_v14  ;;  %v2956_v20 = vmul.f32 %v2955_v54, %v11003_v61  ;;  %v2992_v51 = vmul.f32 %v2991_v6, %v7848_v40 }
 0x358   : > { %v4943_v27 = vadd.f32 1.0, %v5667_v42  ;;  %v2881_v8 = vmul.f32 %v5829_v19, %v2880_v50  ;;  %vm2884_vm4 = vweird.f32 %v5829_v19  ;;  %v9113_v15 = vmul.f32 0.70710677, %v9102_v37 }
 0x359   : > { %v4223_v9 = vmul.f32 %v4222_v33, %v9012_v30  ;;  %v4301_v44 = vmul.f32 %v4300_v43, %v9049_v62  ;;  %v9117_v63 = vadd.f32 1.0, %v2956_v20  ;;  %v9120_v17 = vmul.f32 0.70710677, %v9105_v45 }
 0x35a   : > { %v5043_v61 = vmul.f32 %v4943_v27, %v11013_v11  ;;  %v2882_v36 = vadd.f32 %v5829_v19, %v2881_v8  ;;  %vm2883_vm5 = vweird.f32 %v9074_v14  ;;  %v4335_v6 = vmul.f32 %v9113_v15, %v9113_v15 }
 0x35b   : > { %vm2885_vm6 = vmor %vm2883_vm5, %vm2884_vm4  ;;  %vm2888_vm7 = vcmp.eq.f32.partialorder %v2887_v7, 8.507059e+37  ;;  %v2890_v54 = vor.u32 1.1754944e-38, %v2889_v39  ;;  %5832 = vrcp.f32 %v9117_v63  ;;  %v9128_v33 = vadd.f32 %v410_v60, %v6327_v57  ;;  %v502_v39 = vpop.f32.mrf.mxu1 }
 0x35c   : > { %v5831_v43 = vpop.eup %5830  ;;  %5215 = vmatmul.f32.gmra.mxu0 %v5043_v61  ;;  %v2886_v42 = vsel %vm2885_vm6, %v5829_v19, %v2882_v36  ;;  %v9130_v50 = vmin.f32 %v4335_v6, 16.0  ;;  %v2993_v20 = vadd.f32 0.112945676, %v2992_v51  ;;  %v3030_v27 = vmul.f32 %v3029_v18, %v7855_v35 }
 0x35d   : > { %v4263_v14 = vmul.f32 %v4262_v55, %v9014_v21  ;;  %v2891_v8 = vsel %vm2888_vm7, %v2890_v54, %v2886_v42  ;;  %v2919_v11 = vmul.f32 %v5831_v43, %v9099_v16  ;;  %v4375_v7 = vmul.f32 %v9120_v17, %v9120_v17 }
 0x35e   : > { %11014 = vst [vmem:[#allocation43_spill] sm:$0xff] %v9130_v50  ;;  %v9137_v23 = vadd.f32 0.18741608, %v4223_v9  ;;  %v4302_v60 = vadd.f32 0.05243302, %v4301_v44  ;;  %v2892_v61 = vmul.f32 %v2891_v8, %v11015_v47  ;;  %v2929_v51 = vand.u32 2147483648, %v9099_v16 }
 0x35f   : > { %v2927_v19 = vand.u32 2147483647, %v9099_v16  ;;  %v2920_v36 = vsub.f32 1.0, %v2919_v11  ;;  %v4337_v18 = vmul.f32 2.1237322e-06, %v9130_v50  ;;  %v9147_v54 = vadd.f32 %v502_v39, %v6329_v58 }
 0x360   : > { %v9144_v55 = vmul.f32 0.70710677, %v9128_v33  ;;  %v5668_v6 = vclamps-f32 %v2892_v61, 1.0  ;;  %v2994_v9 = vmul.f32 %v2993_v20, %v7848_v40  ;;  %v3031_v42 = vadd.f32 0.014752088, %v3030_v27 }
 0x361   : > { %v5833_v44 = vpop.eup %5832  ;;  %v2921_v22 = vmul.f32 %v5831_v43, %v2920_v36  ;;  %vm2923_vm8 = vweird.f32 %v9099_v16  ;;  %vm2924_vm9 = vweird.f32 %v5831_v43  ;;  %v9151_v47 = vmin.f32 %v4375_v7, 16.0 }
 0x362   : > { %v4944_v8 = vadd.f32 1.0, %v5668_v6  ;;  %vm9153_vm10 = vcmp.eq.f32.partialorder %v2927_v19, 8.507059e+37  ;;  %v2959_v61 = vmul.f32 %v5833_v44, %v9117_v63  ;;  %v4415_v39 = vmul.f32 %v9144_v55, %v9144_v55  ;;  %vm2925_vm11 = vmor %vm2923_vm8, %vm2924_vm9 }
 0x363   : > { %v2922_v26 = vadd.f32 %v5831_v43, %v2921_v22  ;;  %v2930_v20 = vor.u32 1.1754944e-38, %v2929_v51  ;;  %v2967_v27 = vand.u32 2147483647, %v9117_v63  ;;  %v4338_v36 = vadd.f32 0.00028619796, %v4337_v18 }
 0x364   : > { %v5044_v16 = vmul.f32 %v4944_v8, %v11018_v31  ;;  %v2960_v7 = vsub.f32 1.0, %v2959_v61  ;;  %v9163_v6 = vmul.f32 0.70710677, %v9147_v54  ;;  %v2995_v19 = vadd.f32 0.4994258, %v2994_v9 }
 0x365   : > { %v2926_v46 = vsel %vm2925_vm11, %v5831_v43, %v2922_v26  ;;  %vm2964_vm12 = vweird.f32 %v5833_v44  ;;  %v2969_v38 = vand.u32 2147483648, %v9117_v63  ;;  %v4377_v29 = vmul.f32 2.1237322e-06, %v9151_v47 }
 0x366   : > { %5307 = vmatmul.f32.gmra.mxu1 %v5044_v16  ;;  %v2931_v22 = vsel %vm9153_vm10, %v2930_v20, %v2926_v46  ;;  %v2961_v51 = vmul.f32 %v5833_v44, %v2960_v7  ;;  %v9169_v18 = vmin.f32 %v4415_v39, 16.0  ;;  %v2996_v31 = vmul.f32 %v2995_v19, %v7848_v40 }
 0x367   : > { %v4264_v8 = vadd.f32 0.18741608, %v4263_v14  ;;  %v2932_v61 = vmul.f32 %v2931_v22, %v8034_v5  ;;  %v4339_v9 = vmul.f32 %v4338_v36, %v9130_v50  ;;  %v3032_v26 = vmul.f32 %v3031_v42, %v7855_v35 }
 0x368   : > { %v2962_v43 = vadd.f32 %v5833_v44, %v2961_v51  ;;  %vm2963_vm13 = vweird.f32 %v9117_v63  ;;  %v4455_v16 = vmul.f32 %v9163_v6, %v9163_v6  ;;  %v9178_v11 = vadd.f32 1.0, %v2996_v31 }
 0x369   : > { %v4303_v46 = vmul.f32 %v4302_v60, %v9049_v62  ;;  %v5669_v39 = vclamps-f32 %v2932_v61, 1.0  ;;  %vm2965_vm14 = vmor %vm2963_vm13, %vm2964_vm12  ;;  %vm2968_vm15 = vcmp.eq.f32.partialorder %v2967_v27, 8.507059e+37  ;;  %v2970_v40 = vor.u32 1.1754944e-38, %v2969_v38  ;;  %v11020_v60 = vld [vmem:[#allocation19_spill] sm:$0xff]  ;;  %v11021_v27 = vld [vmem:[#allocation32_spill] sm:$0xff] }
 0x36a   : > { %v2966_v5 = vsel %vm2965_vm14, %v5833_v44, %v2962_v43  ;;  %v4378_v14 = vadd.f32 0.00028619796, %v4377_v29  ;;  %v4417_v20 = vmul.f32 2.1237322e-06, %v9169_v18  ;;  %5834 = vrcp.f32 %v9178_v11  ;;  %v11022_v61 = vld [vmem:[#allocation31_spill] sm:$0xff] }
 0x36b   : > { %v4945_v42 = vadd.f32 1.0, %v5669_v39  ;;  %v2971_v63 = vsel %vm2968_vm15, %v2970_v40, %v2966_v5  ;;  %v4340_v36 = vadd.f32 0.0036580483, %v4339_v9  ;;  %v3033_v7 = vadd.f32 0.112945676, %v3032_v26 }
 0x36c   : > { %v9186_v19 = vmul.f32 %v9076_v34, %v8846_v28  ;;  %v2972_v22 = vmul.f32 %v2971_v63, %v11020_v60  ;;  %v9189_v51 = vmin.f32 %v4455_v16, 16.0  ;;  %v3068_v38 = vmul.f32 3.8918573e-05, %v11021_v27 }
 0x36d   : > { %v4185_v29 = vmul.f32 %v9095_v53, %v8982_v52  ;;  %v4225_v44 = vmul.f32 %v9137_v23, %v9012_v30  ;;  %v4265_v31 = vmul.f32 %v4264_v8, %v9014_v21  ;;  %v5045_v9 = vmul.f32 %v4945_v42, %v11022_v61  ;;  %v11041_v21 = vld [vmem:[#allocation50_spill] sm:$0xff] }
 0x36e   : > { %11019 = vst [vmem:[#allocation45_spill] sm:$0xff] %v9186_v19  ;;  %v9200_v28 = vmul.f32 %v9089_v59, %v8862_v56  ;;  %v4304_v34 = vadd.f32 0.18741608, %v4303_v46  ;;  %v5670_v26 = vclamps-f32 %v2972_v22, 1.0  ;;  %v4418_v43 = vadd.f32 0.00028619796, %v4417_v20 }
 0x36f   : > { %v9203_v16 = vmul.f32 0.5, %v8951_v12  ;;  %5399 = vmatmul.f32.gmra.mxu2 %v5045_v9  ;;  %v4341_v53 = vmul.f32 %v4340_v36, %v9130_v50  ;;  %v4379_v39 = vmul.f32 %v4378_v14, %v9151_v47  ;;  %v3034_v23 = vmul.f32 %v3033_v7, %v7855_v35  ;;  %v11026_v36 = vld [vmem:[#allocation28_spill] sm:$0xff] }
 0x370   : > { %11023 = vst [vmem:[#allocation52_spill] sm:$0xff] %v9200_v28  ;;  %v5835_v8 = vpop.eup %5834  ;;  %v9209_v40 = vmul.f32 0.5, %v8961_v1  ;;  %v4946_v5 = vadd.f32 1.0, %v5670_v26  ;;  %v4457_v56 = vmul.f32 2.1237322e-06, %v9189_v51  ;;  %v4305_v63 = vmul.f32 %v4304_v34, %v9049_v62 }
 0x371   : > { %11024 = vst [vmem:[#allocation29_spill] sm:$0xff] %v9203_v16  ;;  %v3069_v59 = vadd.f32 0.001143296, %v3068_v38  ;;  %v4186_v46 = vadd.f32 1.1283791, %v4185_v29  ;;  %v2999_v12 = vmul.f32 %v5835_v8, %v9178_v11  ;;  %v4419_v14 = vmul.f32 %v4418_v43, %v9169_v18 }
 0x372   : > { %11025 = vst [vmem:[#allocation54_spill] sm:$0xff] %v9209_v40  ;;  %v4226_v20 = vadd.f32 1.1283791, %v4225_v44  ;;  %v4266_v42 = vadd.f32 1.1283791, %v4265_v31  ;;  %v5046_v60 = vmul.f32 %v4946_v5, %v11026_v36  ;;  %v3009_v38 = vand.u32 2147483648, %v9178_v11 }
 0x373   : > { %v3035_v7 = vadd.f32 0.4994258, %v3034_v23  ;;  %v4342_v22 = vadd.f32 0.05243302, %v4341_v53  ;;  %v4380_v61 = vadd.f32 0.0036580483, %v4379_v39  ;;  %v3070_v9 = vmul.f32 %v3069_v59, %v11021_v27 }
 0x374   : > { %v3000_v1 = vsub.f32 1.0, %v2999_v12  ;;  %5491 = vmatmul.f32.gmra.mxu3 %v5046_v60  ;;  %v4458_v26 = vadd.f32 0.00028619796, %v4457_v56  ;;  %v11027_v44 = vld [vmem:[#allocation34_spill] sm:$0xff]  ;;  %vm3004_vm0 = vweird.f32 %v5835_v8  ;;  %v3007_v34 = vand.u32 2147483647, %v9178_v11 }
 0x375   : > { %v3036_v29 = vmul.f32 %v3035_v7, %v7855_v35  ;;  %v3108_v31 = vmul.f32 3.8918573e-05, %v11027_v44  ;;  %v3071_v5 = vadd.f32 0.014752088, %v3070_v9  ;;  %v9222_v43 = vmul.f32 0.5, %v8969_v49  ;;  %v11029_v35 = vld [vmem:[#allocation35_spill] sm:$0xff] }
 0x376   : > { %v3001_v40 = vmul.f32 %v5835_v8, %v3000_v1  ;;  %v4420_v53 = vadd.f32 0.0036580483, %v4419_v14  ;;  %vm3003_vm1 = vweird.f32 %v9178_v11  ;;  %v3148_v12 = vmul.f32 3.8918573e-05, %v11029_v35 }
 0x377   : > { %11028 = vst [vmem:[#allocation26_spill] sm:$0xff] %v9222_v43  ;;  %v9224_v39 = vadd.f32 1.0, %v3036_v29  ;;  %v3109_v23 = vadd.f32 0.001143296, %v3108_v31  ;;  %v3072_v56 = vmul.f32 %v3071_v5, %v11021_v27  ;;  %v4343_v36 = vmul.f32 %v4342_v22, %v9130_v50  ;;  %vm3005_vm2 = vmor %vm3003_vm1, %vm3004_vm0  ;;  %v11031_v22 = vld [vmem:[#allocation41_spill] sm:$0xff] }
 0x378   : > { %v3002_v59 = vadd.f32 %v5835_v8, %v3001_v40  ;;  %v4381_v60 = vmul.f32 %v4380_v61, %v9151_v47  ;;  %v3010_v7 = vor.u32 1.1754944e-38, %v3009_v38  ;;  %v4306_v49 = vadd.f32 1.1283791, %v4305_v63 }
 0x379   : > { %5836 = vrcp.f32 %v9224_v39  ;;  %vm3008_vm3 = vcmp.eq.f32.partialorder %v3007_v34, 8.507059e+37  ;;  %v3073_v1 = vadd.f32 0.112945676, %v3072_v56  ;;  %v4421_v40 = vmul.f32 %v4420_v53, %v9169_v18 }
 0x37a   : > { %v3006_v14 = vsel %vm3005_vm2, %v5835_v8, %v3002_v59  ;;  %v4459_v11 = vmul.f32 %v4458_v26, %v9189_v51  ;;  %v3110_v29 = vmul.f32 %v3109_v23, %v11027_v44  ;;  %v9236_v31 = vmul.f32 0.5, %v9009_v48 }
 0x37b   : > { %v3011_v9 = vsel %vm3008_vm3, %v3010_v7, %v3006_v14  ;;  %v3074_v38 = vmul.f32 %v3073_v1, %v11021_v27  ;;  %v3149_v5 = vadd.f32 0.001143296, %v3148_v12  ;;  %v9241_v63 = vmul.f32 %v4186_v46, %v8958_v13 }
 0x37c   : > { %11030 = vst [vmem:[#allocation19_spill] sm:$0xff] %v9236_v31  ;;  %v3012_v61 = vmul.f32 %v3011_v9, %v11031_v22  ;;  %v4344_v8 = vadd.f32 0.18741608, %v4343_v36  ;;  %v4382_v34 = vadd.f32 0.05243302, %v4381_v60  ;;  %v9244_v53 = vmul.f32 %v4226_v20, %v8980_v0 }
 0x37d   : > { %11032 = vst [vmem:[#allocation32_spill] sm:$0xff] %v9241_v63  ;;  %v3111_v59 = vadd.f32 0.014752088, %v3110_v29  ;;  %v9247_v26 = vmul.f32 %v4266_v42, %v8985_v24  ;;  %v3075_v48 = vadd.f32 0.4994258, %v3074_v38  ;;  %v9250_v7 = vmul.f32 %v4306_v49, %v9019_v10  ;;  %v11036_v49 = vld [vmem:[#allocation40_spill] sm:$0xff] }
 0x37e   : > { %11033 = vst [vmem:[#allocation31_spill] sm:$0xff] %v9244_v53  ;;  %v5671_v23 = vclamps-f32 %v3012_v61, 1.0  ;;  %v4422_v14 = vadd.f32 0.05243302, %v4421_v40  ;;  %v4460_v12 = vadd.f32 0.0036580483, %v4459_v11  ;;  %v3150_v0 = vmul.f32 %v3149_v5, %v11029_v35 }
 0x37f   : > { %11034 = vst [vmem:[#allocation28_spill] sm:$0xff] %v9247_v26  ;;  %v5837_v56 = vpop.eup %5836  ;;  %v3112_v13 = vmul.f32 %v3111_v59, %v11027_v44  ;;  %v3076_v60 = vmul.f32 %v3075_v48, %v11021_v27  ;;  %v9257_v24 = vmul.f32 %v4344_v8, %v9130_v50  ;;  %v4383_v20 = vmul.f32 %v4382_v34, %v9151_v47  ;;  %v11037_v61 = vld [vmem:[#allocation56_spill] sm:$0xff]  ;;  %v594_v8 = vpop.f32.mrf.mxu2 }
 0x380   : > { %11035 = vst [vmem:[#allocation34_spill] sm:$0xff] %v9250_v7  ;;  %v4947_v46 = vadd.f32 1.0, %v5671_v23  ;;  %v3039_v36 = vmul.f32 %v5837_v56, %v9224_v39  ;;  %v3047_v42 = vand.u32 2147483647, %v9224_v39  ;;  %v3049_v11 = vand.u32 2147483648, %v9224_v39  ;;  %v686_v34 = vpop.f32.mrf.mxu3 }
 0x381   : > { %v3113_v10 = vadd.f32 0.112945676, %v3112_v13  ;;  %v9263_v9 = vadd.f32 1.0, %v3076_v60  ;;  %v4423_v29 = vmul.f32 %v4422_v14, %v9169_v18  ;;  %v4461_v27 = vmul.f32 %v4460_v12, %v9189_v51  ;;  %v413_v12 = vpop.f32.mrf.mxu0  ;;  %v505_v13 = vpop.f32.mrf.mxu1 }
 0x382   : > { %v5047_v1 = vmul.f32 %v4947_v46, %v11036_v49  ;;  %v3040_v40 = vsub.f32 1.0, %v3039_v36  ;;  %v3188_v38 = vmul.f32 3.8918573e-05, %v11037_v61  ;;  %vm3044_vm4 = vweird.f32 %v5837_v56  ;;  %v11038_v49 = vld [vmem:[#allocation44_spill] sm:$0xff] }
 0x383   : > { %v3114_v22 = vmul.f32 %v3113_v10, %v11027_v44  ;;  %5838 = vrcp.f32 %v9263_v9  ;;  %v3151_v59 = vadd.f32 0.014752088, %v3150_v0  ;;  %vm3043_vm5 = vweird.f32 %v9224_v39 }
 0x384   : > { %5218 = vmatmul.f32.gmra.mxu0 %v5047_v1  ;;  %v3041_v5 = vmul.f32 %v5837_v56, %v3040_v40  ;;  %v9272_v48 = vadd.f32 %v594_v8, %v6344_v2  ;;  %v9275_v14 = vadd.f32 %v686_v34, %v6346_v3  ;;  %vm3048_vm6 = vcmp.eq.f32.partialorder %v3047_v42, 8.507059e+37  ;;  %vm3045_vm7 = vmor %vm3043_vm5, %vm3044_vm4 }
 0x385   : > { %v3115_v23 = vadd.f32 0.4994258, %v3114_v22  ;;  %v3050_v36 = vor.u32 1.1754944e-38, %v3049_v11  ;;  %v9278_v60 = vadd.f32 %v413_v12, %v6327_v57  ;;  %v3189_v10 = vadd.f32 0.001143296, %v3188_v38  ;;  %v11039_v12 = vld [vmem:[#allocation67_spill] sm:$0xff] }
 0x386   : > { %v3042_v46 = vadd.f32 %v5837_v56, %v3041_v5  ;;  %v9283_v39 = vmul.f32 0.70710677, %v9272_v48  ;;  %v3228_v1 = vmul.f32 3.8918573e-05, %v11038_v49  ;;  %v9287_v22 = vmul.f32 0.70710677, %v9275_v14 }
 0x387   : > { %v3116_v0 = vmul.f32 %v3115_v23, %v11027_v44  ;;  %v9290_v42 = vadd.f32 %v505_v13, %v6329_v58  ;;  %v3152_v11 = vmul.f32 %v3151_v59, %v11029_v35  ;;  %v9298_v34 = vmul.f32 0.70710677, %v9278_v60 }
 0x388   : > { %v3046_v40 = vsel %vm3045_vm7, %v5837_v56, %v3042_v46  ;;  %v4495_v44 = vmul.f32 %v9283_v39, %v9283_v39  ;;  %v9300_v23 = vadd.f32 0.18741608, %v4383_v20  ;;  %v4462_v56 = vadd.f32 0.05243302, %v4461_v27 }
 0x389   : > { %v3051_v5 = vsel %vm3048_vm6, %v3050_v36, %v3046_v40  ;;  %v9293_v8 = vadd.f32 1.0, %v3116_v0  ;;  %v5839_v38 = vpop.eup %5838  ;;  %v4535_v13 = vmul.f32 %v9287_v22, %v9287_v22  ;;  %v3190_v36 = vmul.f32 %v3189_v10, %v11037_v61 }
 0x38a   : > { %v3052_v46 = vmul.f32 %v3051_v5, %v11039_v12  ;;  %v3079_v59 = vmul.f32 %v5839_v38, %v9263_v9  ;;  %v3229_v0 = vadd.f32 0.001143296, %v3228_v1  ;;  %v9308_v31 = vmin.f32 %v4495_v44, 16.0 }
 0x38b   : > { %5840 = vrcp.f32 %v9293_v8  ;;  %v9311_v7 = vmul.f32 0.70710677, %v9290_v42  ;;  %v3153_v20 = vadd.f32 0.112945676, %v3152_v11  ;;  %v4424_v27 = vadd.f32 0.18741608, %v4423_v29 }
 0x38c   : > { %v5672_v40 = vclamps-f32 %v3052_v46, 1.0  ;;  %v3080_v43 = vsub.f32 1.0, %v3079_v59  ;;  %v9313_v5 = vmin.f32 %v4535_v13, 16.0  ;;  %v4575_v12 = vmul.f32 %v9298_v34, %v9298_v34  ;;  %v11040_v29 = vld [vmem:[#allocation38_spill] sm:$0xff] }
 0x38d   : > { %v4463_v26 = vmul.f32 %v4462_v56, %v9189_v51  ;;  %v3089_v10 = vand.u32 2147483648, %v9263_v9  ;;  %v4497_v1 = vmul.f32 2.1237322e-06, %v9308_v31  ;;  %vm3084_vm8 = vweird.f32 %v5839_v38 }
 0x38e   : > { %v4948_v16 = vadd.f32 1.0, %v5672_v40  ;;  %v3081_v44 = vmul.f32 %v5839_v38, %v3080_v43  ;;  %v3087_v46 = vand.u32 2147483647, %v9263_v9  ;;  %v3230_v11 = vmul.f32 %v3229_v0, %v11038_v49 }
 0x38f   : > { %v4615_v13 = vmul.f32 %v9311_v7, %v9311_v7  ;;  %v3154_v53 = vmul.f32 %v3153_v20, %v11029_v35  ;;  %v3191_v63 = vadd.f32 0.014752088, %v3190_v36  ;;  %vm3083_vm9 = vweird.f32 %v9263_v9 }
 0x390   : > { %v5048_v59 = vmul.f32 %v4948_v16, %v11040_v29  ;;  %v3082_v40 = vadd.f32 %v5839_v38, %v3081_v44  ;;  %v4537_v28 = vmul.f32 2.1237322e-06, %v9313_v5  ;;  %v9328_v43 = vmin.f32 %v4575_v12, 16.0  ;;  %vm3085_vm10 = vmor %vm3083_vm9, %vm3084_vm8 }
 0x391   : > { %v5841_v56 = vpop.eup %5840  ;;  %v3090_v19 = vor.u32 1.1754944e-38, %v3089_v10  ;;  %v4498_v16 = vadd.f32 0.00028619796, %v4497_v1  ;;  %v3155_v29 = vadd.f32 0.4994258, %v3154_v53  ;;  %vm3088_vm11 = vcmp.eq.f32.partialorder %v3087_v46, 8.507059e+37 }
 0x392   : > { %5310 = vmatmul.f32.gmra.mxu1 %v5048_v59  ;;  %v3119_v0 = vmul.f32 %v5841_v56, %v9293_v8  ;;  %v3086_v50 = vsel %vm3085_vm10, %v5839_v38, %v3082_v40  ;;  %v3127_v20 = vand.u32 2147483647, %v9293_v8  ;;  %v3129_v36 = vand.u32 2147483648, %v9293_v8 }
 0x393   : > { %v3091_v44 = vsel %vm3088_vm11, %v3090_v19, %v3086_v50  ;;  %v9333_v9 = vmin.f32 %v4615_v13, 16.0  ;;  %v3156_v12 = vmul.f32 %v3155_v29, %v11029_v35  ;;  %v4538_v30 = vadd.f32 0.00028619796, %v4537_v28  ;;  %v11042_v19 = vld [vmem:[#allocation49_spill] sm:$0xff] }
 0x394   : > { %v3120_v62 = vsub.f32 1.0, %v3119_v0  ;;  %v3092_v59 = vmul.f32 %v3091_v44, %v11041_v21  ;;  %v4577_v10 = vmul.f32 2.1237322e-06, %v9328_v43  ;;  %v3192_v1 = vmul.f32 %v3191_v63, %v11037_v61 }
 0x395   : > { %vm3124_vm12 = vweird.f32 %v5841_v56  ;;  %v4499_v38 = vmul.f32 %v4498_v16, %v9308_v31  ;;  %v9340_v46 = vadd.f32 1.0, %v3156_v12  ;;  %v4464_v40 = vadd.f32 0.18741608, %v4463_v26 }
 0x396   : > { %v3121_v53 = vmul.f32 %v5841_v56, %v3120_v62  ;;  %v5673_v50 = vclamps-f32 %v3092_v59, 1.0  ;;  %vm3123_vm13 = vweird.f32 %v9293_v8  ;;  %v3268_v13 = vmul.f32 3.8918573e-05, %v11042_v19 }
 0x397   : > { %v3130_v0 = vor.u32 1.1754944e-38, %v3129_v36  ;;  %v4617_v21 = vmul.f32 2.1237322e-06, %v9333_v9  ;;  %5842 = vrcp.f32 %v9340_v46  ;;  %vm3125_vm14 = vmor %vm3123_vm13, %vm3124_vm12  ;;  %v4539_v62 = vmul.f32 %v4538_v30, %v9313_v5  ;;  %v11043_v36 = vld [vmem:[#allocation66_spill] sm:$0xff] }
 0x398   : > { %v3122_v35 = vadd.f32 %v5841_v56, %v3121_v53  ;;  %v4949_v28 = vadd.f32 1.0, %v5673_v50  ;;  %v4578_v63 = vadd.f32 0.00028619796, %v4577_v10  ;;  %v3193_v16 = vadd.f32 0.112945676, %v3192_v1  ;;  %v11044_v50 = vld [vmem:[#allocation55_spill] sm:$0xff] }
 0x399   : > { %vm3128_vm15 = vcmp.eq.f32.partialorder %v3127_v20, 8.507059e+37  ;;  %v4500_v26 = vadd.f32 0.0036580483, %v4499_v38  ;;  %v3231_v44 = vadd.f32 0.014752088, %v3230_v11  ;;  %v4385_v8 = vmul.f32 %v9300_v23, %v9151_v47 }
 0x39a   : > { %v3126_v29 = vsel %vm3125_vm14, %v5841_v56, %v3122_v35  ;;  %v4425_v12 = vmul.f32 %v4424_v27, %v9169_v18  ;;  %v5049_v59 = vmul.f32 %v4949_v28, %v11043_v36  ;;  %v4465_v52 = vmul.f32 %v4464_v40, %v9189_v51 }
 0x39b   : > { %v3131_v53 = vsel %vm3128_vm15, %v3130_v0, %v3126_v29  ;;  %v4618_v32 = vadd.f32 0.00028619796, %v4617_v21  ;;  %v3269_v30 = vadd.f32 0.001143296, %v3268_v13  ;;  %v9354_v10 = vmul.f32 0.5, %v9102_v37 }
 0x39c   : > { %v3132_v41 = vmul.f32 %v3131_v53, %v11044_v50  ;;  %5402 = vmatmul.f32.gmra.mxu2 %v5049_v59  ;;  %v4540_v56 = vadd.f32 0.0036580483, %v4539_v62  ;;  %v4579_v11 = vmul.f32 %v4578_v63, %v9328_v43  ;;  %v3194_v23 = vmul.f32 %v3193_v16, %v11037_v61 }
 0x39d   : > { %v5843_v20 = vpop.eup %5842  ;;  %v9359_v27 = vmul.f32 0.5, %v9105_v45  ;;  %v4501_v38 = vmul.f32 %v4500_v26, %v9308_v31  ;;  %v3232_v40 = vmul.f32 %v3231_v44, %v11038_v49  ;;  %v4346_v13 = vadd.f32 1.1283791, %v9257_v24  ;;  %v11045_v26 = vld [vmem:[#allocation42_spill] sm:$0xff] }
 0x39e   : > { %v5674_v1 = vclamps-f32 %v3132_v41, 1.0  ;;  %v4386_v35 = vadd.f32 1.1283791, %v4385_v8  ;;  %v4426_v37 = vadd.f32 1.1283791, %v4425_v12  ;;  %v3159_v0 = vmul.f32 %v5843_v20, %v9340_v46 }
 0x39f   : > { %v4466_v21 = vadd.f32 1.1283791, %v4465_v52  ;;  %v4619_v62 = vmul.f32 %v4618_v32, %v9333_v9  ;;  %v3270_v63 = vmul.f32 %v3269_v30, %v11042_v19  ;;  %v4541_v45 = vmul.f32 %v4540_v56, %v9313_v5  ;;  %v11046_v30 = vld [vmem:[#allocation23_spill] sm:$0xff] }
 0x3a0   : > { %v4950_v28 = vadd.f32 1.0, %v5674_v1  ;;  %v4580_v16 = vadd.f32 0.0036580483, %v4579_v11  ;;  %v3160_v41 = vsub.f32 1.0, %v3159_v0  ;;  %v3195_v29 = vadd.f32 0.4994258, %v3194_v23 }
 0x3a1   : > { %v4502_v44 = vadd.f32 0.05243302, %v4501_v38  ;;  %v3169_v24 = vand.u32 2147483648, %v9340_v46  ;;  %v3233_v8 = vadd.f32 0.112945676, %v3232_v40  ;;  %vm3164_vm0 = vweird.f32 %v5843_v20 }
 0x3a2   : > { %v5050_v36 = vmul.f32 %v4950_v28, %v11045_v26  ;;  %v3161_v12 = vmul.f32 %v5843_v20, %v3160_v41  ;;  %v3167_v52 = vand.u32 2147483647, %v9340_v46  ;;  %v3196_v59 = vmul.f32 %v3195_v29, %v11037_v61 }
 0x3a3   : > { %v4620_v32 = vadd.f32 0.0036580483, %v4619_v62  ;;  %v3234_v53 = vmul.f32 %v3233_v8, %v11038_v49  ;;  %v3271_v50 = vadd.f32 0.014752088, %v3270_v63  ;;  %v3308_v56 = vmul.f32 3.8918573e-05, %v11046_v30 }
 0x3a4   : > { %5494 = vmatmul.f32.gmra.mxu3 %v5050_v36  ;;  %v4542_v11 = vadd.f32 0.05243302, %v4541_v45  ;;  %v3162_v23 = vadd.f32 %v5843_v20, %v3161_v12  ;;  %vm3163_vm1 = vweird.f32 %v9340_v46  ;;  %v9375_v1 = vadd.f32 1.0, %v3196_v59  ;;  %v11049_v36 = vld [vmem:[#allocation53_spill] sm:$0xff] }
 0x3a5   : > { %v4581_v38 = vmul.f32 %v4580_v16, %v9328_v43  ;;  %vm3165_vm2 = vmor %vm3163_vm1, %vm3164_vm0  ;;  %v3170_v40 = vor.u32 1.1754944e-38, %v3169_v24  ;;  %v3235_v0 = vadd.f32 0.4994258, %v3234_v53  ;;  %v3272_v61 = vmul.f32 %v3271_v50, %v11042_v19  ;;  %v597_v53 = vpop.f32.mrf.mxu2  ;;  %v689_v50 = vpop.f32.mrf.mxu3 }
 0x3a6   : > { %v4503_v28 = vmul.f32 %v4502_v44, %v9308_v31  ;;  %v3166_v62 = vsel %vm3165_vm2, %v5843_v20, %v3162_v23  ;;  %vm3168_vm3 = vcmp.eq.f32.partialorder %v3167_v52, 8.507059e+37  ;;  %5844 = vrcp.f32 %v9375_v1 }
 0x3a7   : > { %v3171_v63 = vsel %vm3168_vm3, %v3170_v40, %v3166_v62  ;;  %v3236_v45 = vmul.f32 %v3235_v0, %v11038_v49  ;;  %v3273_v41 = vadd.f32 0.112945676, %v3272_v61  ;;  %v3309_v46 = vadd.f32 0.001143296, %v3308_v56 }
 0x3a8   : > { %v9383_v29 = vmul.f32 0.5, %v9128_v33  ;;  %v9386_v16 = vmul.f32 0.5, %v9147_v54  ;;  %v4621_v26 = vmul.f32 %v4620_v32, %v9333_v9  ;;  %v3172_v24 = vmul.f32 %v3171_v63, %v11049_v36 }
 0x3a9   : > { %v4543_v20 = vmul.f32 %v4542_v11, %v9313_v5  ;;  %v4582_v44 = vadd.f32 0.05243302, %v4581_v38  ;;  %v9391_v8 = vadd.f32 1.0, %v3236_v45  ;;  %v3274_v12 = vmul.f32 %v3273_v41, %v11042_v19  ;;  %v11052_v38 = vld [vmem:[#allocation46_spill] sm:$0xff] }
 0x3aa   : > { %11047 = vst [vmem:[#allocation35_spill] sm:$0xff] %v9383_v29  ;;  %v9395_v49 = vmul.f32 %v4346_v13, %v9113_v15  ;;  %v9398_v33 = vmul.f32 %v4386_v35, %v9120_v17  ;;  %v9401_v54 = vmul.f32 %v4426_v37, %v9144_v55  ;;  %v5675_v52 = vclamps-f32 %v3172_v24, 1.0  ;;  %v416_v35 = vpop.f32.mrf.mxu0  ;;  %v11059_v29 = vld [vmem:[#allocation48_spill] sm:$0xff] }
 0x3ab   : > { %11048 = vst [vmem:[#allocation41_spill] sm:$0xff] %v9386_v16  ;;  %v9404_v59 = vmul.f32 %v4466_v21, %v9163_v6  ;;  %v9406_v32 = vadd.f32 0.18741608, %v4503_v28  ;;  %5846 = vrcp.f32 %v9391_v8  ;;  %v3310_v56 = vmul.f32 %v3309_v46, %v11046_v30  ;;  %v11053_v28 = vld [vmem:[#allocation51_spill] sm:$0xff]  ;;  %v11058_v16 = vld [vmem:[#allocation85_spill] sm:$0xff] }
 0x3ac   : > { %v5845_v15 = vpop.eup %5844  ;;  %v4951_v13 = vadd.f32 1.0, %v5675_v52  ;;  %v3275_v11 = vadd.f32 0.4994258, %v3274_v12  ;;  %v9411_v17 = vadd.f32 %v597_v53, %v6344_v2  ;;  %v9414_v55 = vadd.f32 %v689_v50, %v6346_v3 }
 0x3ad   : > { %11050 = vst [vmem:[#allocation40_spill] sm:$0xff] %v9404_v59  ;;  %v9416_v6 = vadd.f32 0.18741608, %v4543_v20  ;;  %v4583_v37 = vmul.f32 %v4582_v44, %v9328_v43  ;;  %v4622_v21 = vadd.f32 0.05243302, %v4621_v26  ;;  %v3199_v23 = vmul.f32 %v5845_v15, %v9375_v1 }
 0x3ae   : > { %11051 = vst [vmem:[#allocation56_spill] sm:$0xff] %v9414_v55  ;;  %v5051_v40 = vmul.f32 %v4951_v13, %v11052_v38  ;;  %v3276_v0 = vmul.f32 %v3275_v11, %v11042_v19  ;;  %v9423_v61 = vmul.f32 0.70710677, %v9411_v17  ;;  %v3348_v62 = vmul.f32 3.8918573e-05, %v11053_v28 }
 0x3af   : > { %v3200_v63 = vsub.f32 1.0, %v3199_v23  ;;  %v3209_v45 = vand.u32 2147483648, %v9375_v1  ;;  %v9428_v41 = vmul.f32 0.70710677, %v9414_v55  ;;  %v9431_v46 = vadd.f32 %v416_v35, %v6327_v57 }
 0x3b0   : > { %5221 = vmatmul.f32.gmra.mxu0 %v5051_v40  ;;  %v3207_v26 = vand.u32 2147483647, %v9375_v1  ;;  %v9434_v36 = vadd.f32 1.0, %v3276_v0  ;;  %v4655_v19 = vmul.f32 %v9423_v61, %v9423_v61  ;;  %v3311_v24 = vadd.f32 0.014752088, %v3310_v56 }
 0x3b1   : > { %11054 = vst [vmem:[#allocation44_spill] sm:$0xff] %v9431_v46  ;;  %v5847_v20 = vpop.eup %5846  ;;  %v3201_v44 = vmul.f32 %v5845_v15, %v3200_v63  ;;  %vm3204_vm4 = vweird.f32 %v5845_v15  ;;  %v4695_v12 = vmul.f32 %v9428_v41, %v9428_v41  ;;  %v9441_v52 = vmul.f32 0.70710677, %v9431_v46 }
 0x3b2   : > { %v9444_v57 = vmul.f32 %v4622_v21, %v9333_v9  ;;  %vm3203_vm5 = vweird.f32 %v9375_v1  ;;  %v3239_v53 = vmul.f32 %v5847_v20, %v9391_v8  ;;  %5848 = vrcp.f32 %v9434_v36 }
 0x3b3   : > { %11055 = vst [vmem:[#allocation67_spill] sm:$0xff] %v9441_v52  ;;  %v3202_v50 = vadd.f32 %v5845_v15, %v3201_v44  ;;  %v3210_v56 = vor.u32 1.1754944e-38, %v3209_v45  ;;  %v9449_v13 = vmin.f32 %v4655_v19, 16.0  ;;  %v3349_v11 = vadd.f32 0.001143296, %v3348_v62  ;;  %vm3205_vm6 = vmor %vm3203_vm5, %vm3204_vm4  ;;  %v11056_v44 = vld [vmem:[#allocation57_spill] sm:$0xff] }
 0x3b4   : > { %v3240_v35 = vsub.f32 1.0, %v3239_v53  ;;  %v3247_v23 = vand.u32 2147483647, %v9391_v8  ;;  %v9452_v38 = vmin.f32 %v4695_v12, 16.0  ;;  %v4735_v21 = vmul.f32 %v9441_v52, %v9441_v52  ;;  %v508_v12 = vpop.f32.mrf.mxu1 }
 0x3b5   : > { %v3206_v40 = vsel %vm3205_vm6, %v5845_v15, %v3202_v50  ;;  %vm3208_vm7 = vcmp.eq.f32.partialorder %v3207_v26, 8.507059e+37  ;;  %v3249_v1 = vand.u32 2147483648, %v9391_v8  ;;  %v3312_v0 = vmul.f32 %v3311_v24, %v11046_v30 }
 0x3b6   : > { %v3211_v63 = vsel %vm3208_vm7, %v3210_v56, %v3206_v40  ;;  %v3241_v45 = vmul.f32 %v5847_v20, %v3240_v35  ;;  %vm3244_vm8 = vweird.f32 %v5847_v20  ;;  %v4657_v62 = vmul.f32 2.1237322e-06, %v9449_v13 }
 0x3b7   : > { %v4584_v19 = vadd.f32 0.18741608, %v4583_v37  ;;  %v3212_v53 = vmul.f32 %v3211_v63, %v11056_v44  ;;  %vm3243_vm9 = vweird.f32 %v9391_v8  ;;  %v3350_v46 = vmul.f32 %v3349_v11, %v11053_v28 }
 0x3b8   : > { %v5849_v52 = vpop.eup %5848  ;;  %v3242_v15 = vadd.f32 %v5847_v20, %v3241_v45  ;;  %vm3248_vm10 = vcmp.eq.f32.partialorder %v3247_v23, 8.507059e+37  ;;  %v4697_v26 = vmul.f32 2.1237322e-06, %v9452_v38  ;;  %v9463_v50 = vmin.f32 %v4735_v21, 16.0  ;;  %vm3245_vm11 = vmor %vm3243_vm9, %vm3244_vm8 }
 0x3b9   : > { %v5676_v24 = vclamps-f32 %v3212_v53, 1.0  ;;  %v3250_v56 = vor.u32 1.1754944e-38, %v3249_v1  ;;  %v3279_v35 = vmul.f32 %v5849_v52, %v9434_v36  ;;  %v3313_v37 = vadd.f32 0.112945676, %v3312_v0 }
 0x3ba   : > { %v3246_v40 = vsel %vm3245_vm11, %v5847_v20, %v3242_v15  ;;  %v3287_v63 = vand.u32 2147483647, %v9434_v36  ;;  %v4658_v8 = vadd.f32 0.00028619796, %v4657_v62  ;;  %v9468_v44 = vadd.f32 %v508_v12, %v6329_v58 }
 0x3bb   : > { %v4952_v11 = vadd.f32 1.0, %v5676_v24  ;;  %v3251_v45 = vsel %vm3248_vm10, %v3250_v56, %v3246_v40  ;;  %v3280_v23 = vsub.f32 1.0, %v3279_v35  ;;  %v3351_v55 = vadd.f32 0.014752088, %v3350_v46  ;;  %v11061_v46 = vld [vmem:[#allocation58_spill] sm:$0xff] }
 0x3bc   : > { %11057 = vst [vmem:[#allocation38_spill] sm:$0xff] %v9468_v44  ;;  %v3252_v21 = vmul.f32 %v3251_v45, %v11058_v16  ;;  %v3289_v53 = vand.u32 2147483648, %v9434_v36  ;;  %v4698_v59 = vadd.f32 0.00028619796, %v4697_v26  ;;  %v4737_v1 = vmul.f32 2.1237322e-06, %v9463_v50 }
 0x3bd   : > { %v5052_v0 = vmul.f32 %v4952_v11, %v11059_v29  ;;  %v3281_v20 = vmul.f32 %v5849_v52, %v3280_v23  ;;  %vm3284_vm12 = vweird.f32 %v5849_v52  ;;  %v3314_v62 = vmul.f32 %v3313_v37, %v11046_v30  ;;  %v11062_v23 = vld [vmem:[#allocation59_spill] sm:$0xff] }
 0x3be   : > { %v5677_v15 = vclamps-f32 %v3252_v21, 1.0  ;;  %v4659_v58 = vmul.f32 %v4658_v8, %v9449_v13  ;;  %v9477_v12 = vmul.f32 0.70710677, %v9468_v44  ;;  %v3388_v24 = vmul.f32 3.8918573e-05, %v11061_v46 }
 0x3bf   : > { %5313 = vmatmul.f32.gmra.mxu1 %v5052_v0  ;;  %v3282_v16 = vadd.f32 %v5849_v52, %v3281_v20  ;;  %vm3283_vm13 = vweird.f32 %v9434_v36  ;;  %v3315_v26 = vadd.f32 0.4994258, %v3314_v62  ;;  %v3352_v56 = vmul.f32 %v3351_v55, %v11053_v28 }
 0x3c0   : > { %11060 = vst [vmem:[#allocation50_spill] sm:$0xff] %v9477_v12  ;;  %v4953_v29 = vadd.f32 1.0, %v5677_v15  ;;  %vm3285_vm14 = vmor %vm3283_vm13, %vm3284_vm12  ;;  %vm3288_vm15 = vcmp.eq.f32.partialorder %v3287_v63, 8.507059e+37  ;;  %v3290_v35 = vor.u32 1.1754944e-38, %v3289_v53  ;;  %v4699_v37 = vmul.f32 %v4698_v59, %v9452_v38  ;;  %v11063_v53 = vld [vmem:[#allocation63_spill] sm:$0xff] }
 0x3c1   : > { %v3286_v40 = vsel %vm3285_vm14, %v5849_v52, %v3282_v16  ;;  %v4738_v8 = vadd.f32 0.00028619796, %v4737_v1  ;;  %v3316_v11 = vmul.f32 %v3315_v26, %v11046_v30  ;;  %v3353_v45 = vadd.f32 0.112945676, %v3352_v56 }
 0x3c2   : > { %v5053_v21 = vmul.f32 %v4953_v29, %v11062_v23  ;;  %v3291_v0 = vsel %vm3288_vm15, %v3290_v35, %v3286_v40  ;;  %v4660_v20 = vadd.f32 0.0036580483, %v4659_v58  ;;  %v4775_v36 = vmul.f32 %v9477_v12, %v9477_v12 }
 0x3c3   : > { %v4505_v55 = vmul.f32 %v9406_v32, %v9308_v31  ;;  %v4624_v63 = vadd.f32 0.18741608, %v9444_v57  ;;  %v3292_v62 = vmul.f32 %v3291_v0, %v11063_v53  ;;  %v9491_v59 = vadd.f32 1.0, %v3316_v11 }
 0x3c4   : > { %v9494_v52 = vmul.f32 0.5, %v9272_v48  ;;  %v4545_v30 = vmul.f32 %v9416_v6, %v9313_v5  ;;  %5405 = vmatmul.f32.gmra.mxu2 %v5053_v21  ;;  %v4700_v1 = vadd.f32 0.0036580483, %v4699_v37  ;;  %v3354_v15 = vmul.f32 %v3353_v45, %v11053_v28  ;;  %v11064_v37 = vld [vmem:[#allocation62_spill] sm:$0xff] }
 0x3c5   : > { %v4585_v58 = vmul.f32 %v4584_v19, %v9328_v43  ;;  %v5678_v16 = vclamps-f32 %v3292_v62, 1.0  ;;  %v4739_v32 = vmul.f32 %v4738_v8, %v9463_v50  ;;  %5850 = vrcp.f32 %v9491_v59 }
 0x3c6   : > { %v9503_v57 = vmul.f32 0.5, %v9275_v14  ;;  %v4661_v48 = vmul.f32 %v4660_v20, %v9449_v13  ;;  %v9506_v26 = vmin.f32 %v4775_v36, 16.0  ;;  %v3389_v56 = vadd.f32 0.001143296, %v3388_v24  ;;  %v11067_v24 = vld [vmem:[#allocation76_spill] sm:$0xff] }
 0x3c7   : > { %v4506_v6 = vadd.f32 1.1283791, %v4505_v55  ;;  %v4625_v29 = vmul.f32 %v4624_v63, %v9333_v9  ;;  %v4954_v35 = vadd.f32 1.0, %v5678_v16  ;;  %v3428_v40 = vmul.f32 3.8918573e-05, %v11064_v37 }
 0x3c8   : > { %v9511_v19 = vmul.f32 0.5, %v9278_v60  ;;  %v9514_v8 = vmul.f32 0.5, %v9290_v42  ;;  %v4701_v14 = vmul.f32 %v4700_v1, %v9452_v38  ;;  %v3355_v11 = vadd.f32 0.4994258, %v3354_v15 }
 0x3c9   : > { %v9517_v45 = vadd.f32 1.1283791, %v4545_v30  ;;  %v9519_v23 = vadd.f32 1.1283791, %v4585_v58  ;;  %v5054_v21 = vmul.f32 %v4954_v35, %v11067_v24  ;;  %v4740_v0 = vadd.f32 0.0036580483, %v4739_v32 }
 0x3ca   : > { %11065 = vst [vmem:[#allocation49_spill] sm:$0xff] %v9511_v19  ;;  %v4662_v20 = vadd.f32 0.05243302, %v4661_v48  ;;  %v4777_v36 = vmul.f32 2.1237322e-06, %v9506_v26  ;;  %v3356_v55 = vmul.f32 %v3355_v11, %v11053_v28  ;;  %v3390_v60 = vmul.f32 %v3389_v56, %v11061_v46  ;;  %v11068_v30 = vld [vmem:[#allocation61_spill] sm:$0xff] }
 0x3cb   : > { %11066 = vst [vmem:[#allocation66_spill] sm:$0xff] %v9514_v8  ;;  %v5851_v63 = vpop.eup %5850  ;;  %v9526_v42 = vmul.f32 %v4506_v6, %v9283_v39  ;;  %v9528_v53 = vadd.f32 1.1283791, %v4625_v29  ;;  %5497 = vmatmul.f32.gmra.mxu3 %v5054_v21  ;;  %v3429_v62 = vadd.f32 0.001143296, %v3428_v40  ;;  %v11069_v32 = vld [vmem:[#allocation82_spill] sm:$0xff]  ;;  %v4741_v28 = vmul.f32 %v4740_v0, %v9463_v50 }
 0x3cc   : > { %v3468_v1 = vmul.f32 3.8918573e-05, %v11068_v30  ;;  %v4702_v15 = vadd.f32 0.05243302, %v4701_v14  ;;  %v3319_v58 = vmul.f32 %v5851_v63, %v9491_v59  ;;  %v9532_v16 = vadd.f32 1.0, %v3356_v55 }
 0x3cd   : > { %v3508_v48 = vmul.f32 3.8918573e-05, %v11069_v32  ;;  %v3391_v56 = vadd.f32 0.014752088, %v3390_v60  ;;  %v3430_v35 = vmul.f32 %v3429_v62, %v11064_v37  ;;  %v4663_v6 = vmul.f32 %v4662_v20, %v9449_v13 }
 0x3ce   : > { %v3469_v39 = vadd.f32 0.001143296, %v3468_v1  ;;  %v4778_v29 = vadd.f32 0.00028619796, %v4777_v36  ;;  %v3320_v11 = vsub.f32 1.0, %v3319_v58  ;;  %5852 = vrcp.f32 %v9532_v16 }
 0x3cf   : > { %v3327_v40 = vand.u32 2147483647, %v9491_v59  ;;  %v3329_v14 = vand.u32 2147483648, %v9491_v59  ;;  %v3392_v24 = vmul.f32 %v3391_v56, %v11061_v46  ;;  %v3431_v21 = vadd.f32 0.014752088, %v3430_v35 }
 0x3d0   : > { %v3321_v55 = vmul.f32 %v5851_v63, %v3320_v11  ;;  %vm3324_vm0 = vweird.f32 %v5851_v63  ;;  %v3470_v0 = vmul.f32 %v3469_v39, %v11068_v30  ;;  %v3509_v60 = vadd.f32 0.001143296, %v3508_v48 }
 0x3d1   : > { %v4703_v62 = vmul.f32 %v4702_v15, %v9452_v38  ;;  %v4742_v1 = vadd.f32 0.05243302, %v4741_v28  ;;  %v3393_v20 = vadd.f32 0.112945676, %v3392_v24  ;;  %v3432_v36 = vmul.f32 %v3431_v21, %v11064_v37 }
 0x3d2   : > { %v3322_v58 = vadd.f32 %v5851_v63, %v3321_v55  ;;  %vm3323_vm1 = vweird.f32 %v9491_v59  ;;  %v3471_v44 = vadd.f32 0.014752088, %v3470_v0  ;;  %v3510_v12 = vmul.f32 %v3509_v60, %v11069_v32  ;;  %v11070_v60 = vld [vmem:[#allocation68_spill] sm:$0xff] }
 0x3d3   : > { %v4664_v8 = vadd.f32 0.18741608, %v4663_v6  ;;  %vm3325_vm2 = vmor %vm3323_vm1, %vm3324_vm0  ;;  %v3330_v56 = vor.u32 1.1754944e-38, %v3329_v14  ;;  %v3394_v35 = vmul.f32 %v3393_v20, %v11061_v46  ;;  %v3433_v11 = vadd.f32 0.112945676, %v3432_v36 }
 0x3d4   : > { %v5853_v39 = vpop.eup %5852  ;;  %v3326_v48 = vsel %vm3325_vm2, %v5851_v63, %v3322_v58  ;;  %vm3328_vm3 = vcmp.eq.f32.partialorder %v3327_v40, 8.507059e+37  ;;  %v3472_v15 = vmul.f32 %v3471_v44, %v11068_v30  ;;  %v3511_v28 = vadd.f32 0.014752088, %v3510_v12 }
 0x3d5   : > { %v4779_v24 = vmul.f32 %v4778_v29, %v9506_v26  ;;  %v3331_v21 = vsel %vm3328_vm3, %v3330_v56, %v3326_v48  ;;  %v3359_v59 = vmul.f32 %v5853_v39, %v9532_v16  ;;  %v3395_v55 = vadd.f32 0.4994258, %v3394_v35 }
 0x3d6   : > { %v4704_v0 = vadd.f32 0.18741608, %v4703_v62  ;;  %v4743_v6 = vmul.f32 %v4742_v1, %v9463_v50  ;;  %v3332_v14 = vmul.f32 %v3331_v21, %v11070_v60  ;;  %v3434_v20 = vmul.f32 %v3433_v11, %v11064_v37 }
 0x3d7   : > { %v3360_v36 = vsub.f32 1.0, %v3359_v59  ;;  %v3367_v63 = vand.u32 2147483647, %v9532_v16  ;;  %v3369_v40 = vand.u32 2147483648, %v9532_v16  ;;  %v3396_v44 = vmul.f32 %v3395_v55, %v11061_v46 }
 0x3d8   : > { %v5679_v12 = vclamps-f32 %v3332_v14, 1.0  ;;  %v3435_v29 = vadd.f32 0.4994258, %v3434_v20  ;;  %v3473_v58 = vadd.f32 0.112945676, %v3472_v15  ;;  %v3512_v56 = vmul.f32 %v3511_v28, %v11069_v32  ;;  %v11071_v15 = vld [vmem:[#allocation60_spill] sm:$0xff]  ;;  %v600_v14 = vpop.f32.mrf.mxu2 }
 0x3d9   : > { %v3361_v35 = vmul.f32 %v5853_v39, %v3360_v36  ;;  %vm3364_vm4 = vweird.f32 %v5853_v39  ;;  %v9558_v62 = vadd.f32 1.0, %v3396_v44  ;;  %v3548_v1 = vmul.f32 3.8918573e-05, %v8411_v25 }
 0x3da   : > { %v4665_v11 = vmul.f32 %v4664_v8, %v9449_v13  ;;  %v4780_v48 = vadd.f32 0.0036580483, %v4779_v24  ;;  %v4955_v21 = vadd.f32 1.0, %v5679_v12  ;;  %v3436_v59 = vmul.f32 %v3435_v29, %v11064_v37 }
 0x3db   : > { %v3362_v60 = vadd.f32 %v5853_v39, %v3361_v35  ;;  %vm3363_vm5 = vweird.f32 %v9532_v16  ;;  %v3370_v46 = vor.u32 1.1754944e-38, %v3369_v40  ;;  %5854 = vrcp.f32 %v9558_v62 }
 0x3dc   : > { %v5055_v28 = vmul.f32 %v4955_v21, %v11071_v15  ;;  %vm3365_vm6 = vmor %vm3363_vm5, %vm3364_vm4  ;;  %v9566_v55 = vadd.f32 1.0, %v3436_v59  ;;  %v3474_v20 = vmul.f32 %v3473_v58, %v11068_v30  ;;  %v3513_v36 = vadd.f32 0.112945676, %v3512_v56  ;;  %v11072_v58 = vld [vmem:[#allocation64_spill] sm:$0xff] }
 0x3dd   : > { %v4705_v8 = vmul.f32 %v4704_v0, %v9452_v38  ;;  %v3366_v24 = vsel %vm3365_vm6, %v5853_v39, %v3362_v60  ;;  %vm3368_vm7 = vcmp.eq.f32.partialorder %v3367_v63, 8.507059e+37  ;;  %v3549_v37 = vadd.f32 0.001143296, %v3548_v1 }
 0x3de   : > { %v4666_v44 = vadd.f32 1.1283791, %v4665_v11  ;;  %v4744_v12 = vadd.f32 0.18741608, %v4743_v6  ;;  %5224 = vmatmul.f32.gmra.mxu0 %v5055_v28  ;;  %v3371_v16 = vsel %vm3368_vm7, %v3370_v46, %v3366_v24  ;;  %5856 = vrcp.f32 %v9566_v55 }
 0x3df   : > { %v9573_v40 = vmul.f32 %v9517_v45, %v9287_v22  ;;  %v9577_v29 = vmul.f32 %v9519_v23, %v9298_v34  ;;  %v3372_v56 = vmul.f32 %v3371_v16, %v11072_v58  ;;  %v9581_v39 = vadd.f32 %v600_v14, %v6344_v2  ;;  %v692_v14 = vpop.f32.mrf.mxu3 }
 0x3e0   : > { %v4781_v0 = vmul.f32 %v4780_v48, %v9506_v26  ;;  %v3475_v6 = vadd.f32 0.4994258, %v3474_v20  ;;  %v3514_v63 = vmul.f32 %v3513_v36, %v11069_v32  ;;  %v3588_v35 = vmul.f32 3.8918573e-05, %v8414_v4  ;;  %v11078_v20 = vld [vmem:[#allocation78_spill] sm:$0xff] }
 0x3e1   : > { %11073 = vst [vmem:[#allocation55_spill] sm:$0xff] %v9581_v39  ;;  %v5855_v1 = vpop.eup %5854  ;;  %v9588_v22 = vmul.f32 %v9528_v53, %v9311_v7  ;;  %v9591_v34 = vmul.f32 0.5, %v9411_v17  ;;  %v5680_v45 = vclamps-f32 %v3372_v56, 1.0  ;;  %v3550_v23 = vmul.f32 %v3549_v37, %v8411_v25 }
 0x3e2   : > { %v9595_v2 = vmul.f32 %v4666_v44, %v9423_v61  ;;  %v4706_v11 = vadd.f32 1.1283791, %v4705_v8  ;;  %v4745_v48 = vmul.f32 %v4744_v12, %v9463_v50  ;;  %v3399_v21 = vmul.f32 %v5855_v1, %v9558_v62 }
 0x3e3   : > { %11074 = vst [vmem:[#allocation42_spill] sm:$0xff] %v9588_v22  ;;  %v4956_v59 = vadd.f32 1.0, %v5680_v45  ;;  %v9600_v60 = vmul.f32 0.70710677, %v9581_v39  ;;  %v3476_v7 = vmul.f32 %v3475_v6, %v11068_v30  ;;  %v3515_v53 = vadd.f32 0.4994258, %v3514_v63  ;;  %v5180_v45 = vpop.f32.mrf.mxu0 }
 0x3e4   : > { %11075 = vst [vmem:[#allocation23_spill] sm:$0xff] %v9591_v34  ;;  %v5857_v17 = vpop.eup %5856  ;;  %v4782_v46 = vadd.f32 0.05243302, %v4781_v0  ;;  %v3400_v15 = vsub.f32 1.0, %v3399_v21  ;;  %v3409_v28 = vand.u32 2147483648, %v9558_v62  ;;  %vm3404_vm8 = vweird.f32 %v5855_v1 }
 0x3e5   : > { %11076 = vst [vmem:[#allocation53_spill] sm:$0xff] %v9595_v2  ;;  %v3589_v61 = vadd.f32 0.001143296, %v3588_v35  ;;  %v5056_v36 = vmul.f32 %v4956_v59, %v11078_v20  ;;  %v3407_v8 = vand.u32 2147483647, %v9558_v62  ;;  %v3439_v24 = vmul.f32 %v5857_v17, %v9566_v55  ;;  %v11114_v2 = vld [vmem:[#allocation24_spill] sm:$0xff] }
 0x3e6   : > { %11077 = vst [vmem:[#allocation46_spill] sm:$0xff] %v9600_v60  ;;  %v3551_v37 = vadd.f32 0.014752088, %v3550_v23  ;;  %v3401_v44 = vmul.f32 %v5855_v1, %v3400_v15  ;;  %v9607_v12 = vadd.f32 1.0, %v3476_v7  ;;  %v3516_v30 = vmul.f32 %v3515_v53, %v11069_v32  ;;  %v9620_v35 = vld [vmem:[%s10475_s4] ss:$0 sm:$0xff] }
 0x3e7   : > { %5316 = vmatmul.f32.gmra.mxu1 %v5056_v36  ;;  %vm3403_vm9 = vweird.f32 %v9558_v62  ;;  %v3440_v16 = vsub.f32 1.0, %v3439_v24  ;;  %v4815_v58 = vmul.f32 %v9600_v60, %v9600_v60  ;;  %v9614_v56 = vadd.f32 %v692_v14, %v6346_v3 }
 0x3e8   : > { %v3402_v0 = vadd.f32 %v5855_v1, %v3401_v44  ;;  %v3410_v6 = vor.u32 1.1754944e-38, %v3409_v28  ;;  %v3449_v63 = vand.u32 2147483648, %v9566_v55  ;;  %5858 = vrcp.f32 %v9607_v12  ;;  %vm3405_vm10 = vmor %vm3403_vm9, %vm3404_vm8  ;;  %v11081_v28 = vld [vmem:[#allocation73_spill] sm:$0xff] }
 0x3e9   : > { %11079 = vst [vmem:[#allocation51_spill] sm:$0xff] %v9614_v56  ;;  %v3441_v32 = vmul.f32 %v5857_v17, %v3440_v16  ;;  %vm3444_vm11 = vweird.f32 %v5857_v17  ;;  %v3447_v62 = vand.u32 2147483647, %v9566_v55  ;;  %v3552_v3 = vmul.f32 %v3551_v37, %v8411_v25 }
 0x3ea   : > { %v3406_v23 = vsel %vm3405_vm10, %v5855_v1, %v3402_v0  ;;  %vm3408_vm12 = vcmp.eq.f32.partialorder %v3407_v8, 8.507059e+37  ;;  %v9625_v21 = vadd.f32 1.0, %v3516_v30  ;;  %v3590_v59 = vmul.f32 %v3589_v61, %v8414_v4 }
 0x3eb   : > { %v3411_v7 = vsel %vm3408_vm12, %v3410_v6, %v3406_v23  ;;  %v3442_v53 = vadd.f32 %v5857_v17, %v3441_v32  ;;  %vm3443_vm13 = vweird.f32 %v9566_v55  ;;  %v9630_v15 = vmul.f32 0.70710677, %v9614_v56  ;;  %v11084_v6 = vld [vmem:[#allocation7_spill] sm:$0xff]  ;;  %v5272_v32 = vpop.f32.mrf.mxu1 }
 0x3ec   : > { %v3412_v14 = vmul.f32 %v3411_v7, %v11081_v28  ;;  %vm3445_vm14 = vmor %vm3443_vm13, %vm3444_vm11  ;;  %v3450_v20 = vor.u32 1.1754944e-38, %v3449_v63  ;;  %v5181_v36 = vadd.f32 %v9620_v35, %v5180_v45  ;;  %5860 = vrcp.f32 %v9625_v21  ;;  %v5456_v28 = vpop.f32.mrf.mxu3 }
 0x3ed   : > { %11080 = vst [vmem:[#allocation57_spill] sm:$0xff] %v9630_v15  ;;  %v9636_v1 = vmul.f32 %v4706_v11, %v9428_v41  ;;  %v3446_v8 = vsel %vm3445_vm14, %v5857_v17, %v3442_v53  ;;  %vm3448_vm15 = vcmp.eq.f32.partialorder %v3447_v62, 8.507059e+37  ;;  %v3553_v61 = vadd.f32 0.112945676, %v3552_v3 }
 0x3ee   : > { %v5859_v24 = vpop.eup %5858  ;;  %v5681_v37 = vclamps-f32 %v3412_v14, 1.0  ;;  %v3451_v55 = vsel %vm3448_vm15, %v3450_v20, %v3446_v8  ;;  %v3487_v44 = vand.u32 2147483647, %v9607_v12  ;;  %v3591_v30 = vadd.f32 0.014752088, %v3590_v59  ;;  %v11088_v14 = vld [vmem:[#allocation70_spill] sm:$0xff] }
 0x3ef   : > { %11082 = vst [vmem:[#allocation85_spill] sm:$0xff] %v9636_v1  ;;  %v9639_v16 = vadd.f32 1.1283791, %v4745_v48  ;;  %v4783_v0 = vmul.f32 %v4782_v46, %v9506_v26  ;;  %v3452_v63 = vmul.f32 %v3451_v55, %v11084_v6  ;;  %v3479_v45 = vmul.f32 %v5859_v24, %v9607_v12  ;;  %v11085_v46 = vld [vmem:[#allocation65_spill] sm:$0xff] }
 0x3f0   : > { %v4957_v41 = vadd.f32 1.0, %v5681_v37  ;;  %v9644_v11 = vmin.f32 %v4815_v58, 16.0  ;;  %v4855_v17 = vmul.f32 %v9630_v15, %v9630_v15  ;;  %v5273_v62 = vadd.f32 %v5272_v32, %v5181_v36 }
 0x3f1   : > { %11083 = vst [vmem:[#allocation48_spill] sm:$0xff] %v9639_v16  ;;  %v5682_v3 = vclamps-f32 %v3452_v63, 1.0  ;;  %v3480_v23 = vsub.f32 1.0, %v3479_v45  ;;  %v3489_v59 = vand.u32 2147483648, %v9607_v12  ;;  %v3554_v48 = vmul.f32 %v3553_v61, %v8411_v25 }
 0x3f2   : > { %v5861_v7 = vpop.eup %5860  ;;  %v5057_v53 = vmul.f32 %v4957_v41, %v11085_v46  ;;  %vm9651_vm0 = vcmp.eq.f32.partialorder %v3487_v44, 8.507059e+37  ;;  %v3592_v58 = vmul.f32 %v3591_v30, %v8414_v4  ;;  %v3628_v20 = vmul.f32 3.8918573e-05, %v11088_v14  ;;  %v11089_v44 = vld [vmem:[#allocation2_spill] sm:$0xff] }
 0x3f3   : > { %v4958_v8 = vadd.f32 1.0, %v5682_v3  ;;  %v3481_v37 = vmul.f32 %v5859_v24, %v3480_v23  ;;  %vm3484_vm1 = vweird.f32 %v5859_v24  ;;  %v3519_v36 = vmul.f32 %v5861_v7, %v9625_v21 }
 0x3f4   : > { %5408 = vmatmul.f32.gmra.mxu2 %v5057_v53  ;;  %vm3483_vm2 = vweird.f32 %v9607_v12  ;;  %v3527_v61 = vand.u32 2147483647, %v9625_v21  ;;  %v3555_v55 = vadd.f32 0.4994258, %v3554_v48  ;;  %v3593_v6 = vadd.f32 0.112945676, %v3592_v58 }
 0x3f5   : > { %v5058_v63 = vmul.f32 %v4958_v8, %v11089_v44  ;;  %v3482_v32 = vadd.f32 %v5859_v24, %v3481_v37  ;;  %v3490_v45 = vor.u32 1.1754944e-38, %v3489_v59  ;;  %v3520_v41 = vsub.f32 1.0, %v3519_v36  ;;  %vm3485_vm3 = vmor %vm3483_vm2, %vm3484_vm1  ;;  %v5364_v8 = vpop.f32.mrf.mxu2  ;;  %v11092_v37 = vld [vmem:[#allocation74_spill] sm:$0xff]  ;;  %v11094_v44 = vld [vmem:[#allocation75_spill] sm:$0xff]  ;;  %v5183_v59 = vpop.f32.mrf.mxu0 }
 0x3f6   : > { %v3529_v30 = vand.u32 2147483648, %v9625_v21  ;;  %v3556_v3 = vmul.f32 %v3555_v55, %v8411_v25  ;;  %v3594_v23 = vmul.f32 %v3593_v6, %v8414_v4  ;;  %v3629_v46 = vadd.f32 0.001143296, %v3628_v20 }
 0x3f7   : > { %5500 = vmatmul.f32.gmra.mxu3 %v5058_v63  ;;  %v3486_v53 = vsel %vm3485_vm3, %v5859_v24, %v3482_v32  ;;  %v3521_v12 = vmul.f32 %v5861_v7, %v3520_v41  ;;  %vm3523_vm4 = vweird.f32 %v9625_v21  ;;  %vm3524_vm5 = vweird.f32 %v5861_v7 }
 0x3f8   : > { %v3491_v48 = vsel %vm9651_vm0, %v3490_v45, %v3486_v53  ;;  %vm9667_vm6 = vcmp.eq.f32.partialorder %v3527_v61, 8.507059e+37  ;;  %v9671_v58 = vadd.f32 1.0, %v3556_v3  ;;  %v3595_v25 = vadd.f32 0.4994258, %v3594_v23  ;;  %vm3525_vm7 = vmor %vm3523_vm4, %vm3524_vm5  ;;  %v11093_v61 = vld [vmem:[#allocation6_spill] sm:$0xff] }
 0x3f9   : > { %v3492_v20 = vmul.f32 %v3491_v48, %v11092_v37  ;;  %v3522_v36 = vadd.f32 %v5861_v7, %v3521_v12  ;;  %v5365_v24 = vadd.f32 %v5364_v8, %v5273_v62  ;;  %v3630_v55 = vmul.f32 %v3629_v46, %v11088_v14  ;;  %v11095_v12 = vld [vmem:[#allocation83_spill] sm:$0xff] }
 0x3fa   : > { %v3530_v21 = vor.u32 1.1754944e-38, %v3529_v30  ;;  %5862 = vrcp.f32 %v9671_v58  ;;  %v3668_v6 = vmul.f32 3.8918573e-05, %v11093_v61  ;;  %v3708_v63 = vmul.f32 3.8918573e-05, %v11094_v44 }
 0x3fb   : > { %v5683_v32 = vclamps-f32 %v3492_v20, 1.0  ;;  %v3526_v62 = vsel %vm3525_vm7, %v5861_v7, %v3522_v36  ;;  %v3596_v45 = vmul.f32 %v3595_v25, %v8414_v4  ;;  %v5457_v41 = vadd.f32 %v5456_v28, %v5365_v24  ;;  %v11096_v20 = vld [vmem:[#allocation69_spill] sm:$0xff] }
 0x3fc   : > { %v9686_v30 = vadd.f32 0.18741608, %v4783_v0  ;;  %v4817_v3 = vmul.f32 2.1237322e-06, %v9644_v11  ;;  %v3531_v23 = vsel %vm9667_vm6, %v3530_v21, %v3526_v62  ;;  %v3567_v46 = vand.u32 2147483647, %v9671_v58 }
 0x3fd   : > { %v4959_v53 = vadd.f32 1.0, %v5683_v32  ;;  %v3532_v48 = vmul.f32 %v3531_v23, %v11095_v12  ;;  %v9693_v8 = vadd.f32 1.0, %v3596_v45  ;;  %5531 = vst [vmem:[%s9681_s22] sm:$0xff] %v5457_v41  ;;  %v3631_v37 = vadd.f32 0.014752088, %v3630_v55  ;;  %v11097_v21 = vld [vmem:[#allocation92_spill] sm:$0xff] }
 0x3fe   : > { %v9696_v7 = vmin.f32 %v4855_v17, 16.0  ;;  %v3569_v4 = vand.u32 2147483648, %v9671_v58  ;;  %v3669_v0 = vadd.f32 0.001143296, %v3668_v6  ;;  %v3709_v25 = vadd.f32 0.001143296, %v3708_v63 }
 0x3ff   : > { %v5059_v36 = vmul.f32 %v4959_v53, %v11096_v20  ;;  %v5684_v24 = vclamps-f32 %v3532_v48, 1.0  ;;  %5864 = vrcp.f32 %v9693_v8  ;;  %v3748_v28 = vmul.f32 3.8918573e-05, %v11097_v21  ;;  %v11100_v48 = vld [vmem:[#allocation72_spill] sm:$0xff] }
 0x400   : > { %v5863_v32 = vpop.eup %5862  ;;  %v9702_v62 = vadd.f32 0.00028619796, %v4817_v3  ;;  %vm3563_vm8 = vweird.f32 %v9671_v58  ;;  %v3632_v17 = vmul.f32 %v3631_v37, %v11088_v14  ;;  %v3670_v55 = vmul.f32 %v3669_v0, %v11093_v61 }
 0x401   : > { %5227 = vmatmul.f32.gmra.mxu0 %v5059_v36  ;;  %v4960_v6 = vadd.f32 1.0, %v5684_v24  ;;  %v3559_v63 = vmul.f32 %v5863_v32, %v9671_v58  ;;  %vm9708_vm9 = vcmp.eq.f32.partialorder %v3567_v46, 8.507059e+37  ;;  %v3710_v41 = vmul.f32 %v3709_v25, %v11094_v44  ;;  %v11101_v25 = vld [vmem:[#allocation79_spill] sm:$0xff] }
 0x402   : > { %v3570_v23 = vor.u32 1.1754944e-38, %v3569_v4  ;;  %v9714_v3 = vadd.f32 %v9620_v35, %v5183_v59  ;;  %v3633_v53 = vadd.f32 0.112945676, %v3632_v17  ;;  %v3671_v12 = vadd.f32 0.014752088, %v3670_v55 }
 0x403   : > { %v5060_v37 = vmul.f32 %v4960_v6, %v11100_v48  ;;  %v3560_v20 = vsub.f32 1.0, %v3559_v63  ;;  %v3711_v0 = vadd.f32 0.014752088, %v3710_v41  ;;  %v3749_v36 = vadd.f32 0.001143296, %v3748_v28 }
 0x404   : > { %vm3603_vm10 = vweird.f32 %v9693_v8  ;;  %v3607_v46 = vand.u32 2147483647, %v9693_v8  ;;  %v3634_v24 = vmul.f32 %v3633_v53, %v11088_v14  ;;  %v3672_v56 = vmul.f32 %v3671_v12, %v11093_v61 }
 0x405   : > { %v3788_v4 = vmul.f32 3.8918573e-05, %v11101_v25  ;;  %v5865_v15 = vpop.eup %5864  ;;  %5319 = vmatmul.f32.gmra.mxu1 %v5060_v37  ;;  %v3561_v59 = vmul.f32 %v5863_v32, %v3560_v20  ;;  %vm3564_vm11 = vweird.f32 %v5863_v32  ;;  %v3712_v17 = vmul.f32 %v3711_v0, %v11094_v44 }
 0x406   : > { %v3750_v55 = vmul.f32 %v3749_v36, %v11097_v21  ;;  %v3599_v28 = vmul.f32 %v5865_v15, %v9693_v8  ;;  %v3609_v6 = vand.u32 2147483648, %v9693_v8  ;;  %v3635_v63 = vadd.f32 0.4994258, %v3634_v24  ;;  %vm3565_vm12 = vmor %vm3563_vm8, %vm3564_vm11 }
 0x407   : > { %v3673_v41 = vadd.f32 0.112945676, %v3672_v56  ;;  %v3562_v48 = vadd.f32 %v5863_v32, %v3561_v59  ;;  %v3713_v53 = vadd.f32 0.112945676, %v3712_v17  ;;  %v3789_v12 = vadd.f32 0.001143296, %v3788_v4 }
 0x408   : > { %v3751_v39 = vadd.f32 0.014752088, %v3750_v55  ;;  %v3600_v37 = vsub.f32 1.0, %v3599_v28  ;;  %vm3604_vm13 = vweird.f32 %v5865_v15  ;;  %v3636_v20 = vmul.f32 %v3635_v63, %v11088_v14  ;;  %v11102_v17 = vld [vmem:[#allocation98_spill] sm:$0xff] }
 0x409   : > { %v3674_v0 = vmul.f32 %v3673_v41, %v11093_v61  ;;  %v3566_v36 = vsel %vm3565_vm12, %v5863_v32, %v3562_v48  ;;  %v3714_v60 = vmul.f32 %v3713_v53, %v11094_v44  ;;  %v3790_v56 = vmul.f32 %v3789_v12, %v11101_v25  ;;  %vm3605_vm15 = vmor %vm3603_vm10, %vm3604_vm13  ;;  %v11103_v48 = vld [vmem:[#allocation8_spill] sm:$0xff] }
 0x40a   : > { %v3752_v16 = vmul.f32 %v3751_v39, %v11097_v21  ;;  %v3571_v24 = vsel %vm9708_vm9, %v3570_v23, %v3566_v36  ;;  %v3601_v4 = vmul.f32 %v5865_v15, %v3600_v37  ;;  %v9735_v59 = vadd.f32 1.0, %v3636_v20  ;;  %v5275_v36 = vpop.f32.mrf.mxu1 }
 0x40b   : > { %v3675_v58 = vadd.f32 0.4994258, %v3674_v0  ;;  %v3572_v55 = vmul.f32 %v3571_v24, %v11102_v17  ;;  %v3715_v28 = vadd.f32 0.4994258, %v3714_v60  ;;  %v3791_v63 = vadd.f32 0.014752088, %v3790_v56 }
 0x40c   : > { %v3753_v14 = vadd.f32 0.112945676, %v3752_v16  ;;  %v3602_v41 = vadd.f32 %v5865_v15, %v3601_v4  ;;  %vm3608_vm14 = vcmp.eq.f32.partialorder %v3607_v46, 8.507059e+37  ;;  %v3610_v32 = vor.u32 1.1754944e-38, %v3609_v6  ;;  %v11105_v24 = vld [vmem:[#allocation77_spill] sm:$0xff]  ;;  %v11106_v17 = vld [vmem:[#allocation91_spill] sm:$0xff] }
 0x40d   : > { %5866 = vrcp.f32 %v9735_v59  ;;  %v5685_v39 = vclamps-f32 %v3572_v55, 1.0  ;;  %v3676_v45 = vmul.f32 %v3675_v58, %v11093_v61  ;;  %v3716_v23 = vmul.f32 %v3715_v28, %v11094_v44  ;;  %v11104_v61 = vld [vmem:[#allocation88_spill] sm:$0xff] }
 0x40e   : > { %v3828_v53 = vmul.f32 3.8918573e-05, %v11103_v48  ;;  %v3606_v12 = vsel %vm3605_vm15, %v5865_v15, %v3602_v41  ;;  %v3647_v60 = vand.u32 2147483647, %v9735_v59  ;;  %v3754_v16 = vmul.f32 %v3753_v14, %v11097_v21 }
 0x40f   : > { %v3792_v46 = vmul.f32 %v3791_v63, %v11101_v25  ;;  %v4961_v6 = vadd.f32 1.0, %v5685_v39  ;;  %v3611_v37 = vsel %vm3608_vm14, %v3610_v32, %v3606_v12  ;;  %v3649_v20 = vand.u32 2147483648, %v9735_v59  ;;  %v5367_v63 = vpop.f32.mrf.mxu2 }
 0x410   : > { %v9749_v0 = vadd.f32 1.0, %v3676_v45  ;;  %v9752_v8 = vmul.f32 2.1237322e-06, %v9696_v7  ;;  %v3612_v44 = vmul.f32 %v3611_v37, %v11104_v61  ;;  %v9755_v56 = vadd.f32 1.0, %v3716_v23 }
 0x411   : > { %v3755_v15 = vadd.f32 0.4994258, %v3754_v16  ;;  %v5061_v4 = vmul.f32 %v4961_v6, %v11105_v24  ;;  %v5276_v58 = vadd.f32 %v5275_v36, %v9714_v3  ;;  %v3868_v55 = vmul.f32 3.8918573e-05, %v11106_v17  ;;  %v5186_v24 = vpop.f32.mrf.mxu0 }
 0x412   : > { %5868 = vrcp.f32 %v9749_v0  ;;  %v5686_v14 = vclamps-f32 %v3612_v44, 1.0  ;;  %v3793_v41 = vadd.f32 0.112945676, %v3792_v46  ;;  %v3829_v32 = vadd.f32 0.001143296, %v3828_v53  ;;  %v11109_v44 = vld [vmem:[#allocation81_spill] sm:$0xff] }
 0x413   : > { %v5867_v28 = vpop.eup %5866  ;;  %5870 = vrcp.f32 %v9755_v56  ;;  %5411 = vmatmul.f32.gmra.mxu2 %v5061_v4  ;;  %vm3643_vm0 = vweird.f32 %v9735_v59  ;;  %vm9764_vm1 = vcmp.eq.f32.partialorder %v3647_v60, 8.507059e+37  ;;  %v3650_v3 = vor.u32 1.1754944e-38, %v3649_v20  ;;  %v5459_v20 = vpop.f32.mrf.mxu3 }
 0x414   : > { %v3639_v39 = vmul.f32 %v5867_v28, %v9735_v59  ;;  %v4962_v23 = vadd.f32 1.0, %v5686_v14  ;;  %v3687_v12 = vand.u32 2147483647, %v9749_v0  ;;  %v3689_v16 = vand.u32 2147483648, %v9749_v0 }
 0x415   : > { %v3756_v6 = vmul.f32 %v3755_v15, %v11097_v21  ;;  %v3727_v53 = vand.u32 2147483647, %v9755_v56  ;;  %v3729_v46 = vand.u32 2147483648, %v9755_v56  ;;  %v5368_v61 = vadd.f32 %v5367_v63, %v5276_v58 }
 0x416   : > { %v3640_v37 = vsub.f32 1.0, %v3639_v39  ;;  %v5062_v36 = vmul.f32 %v4962_v23, %v11109_v44  ;;  %vm3683_vm2 = vweird.f32 %v9749_v0  ;;  %v3794_v4 = vmul.f32 %v3793_v41, %v11101_v25 }
 0x417   : > { %v9775_v60 = vadd.f32 1.0, %v3756_v6  ;;  %vm3644_vm3 = vweird.f32 %v5867_v28  ;;  %vm3723_vm4 = vweird.f32 %v9755_v56  ;;  %v5460_v21 = vadd.f32 %v5459_v20, %v5368_v61 }
 0x418   : > { %v5869_v14 = vpop.eup %5868  ;;  %v3641_v1 = vmul.f32 %v5867_v28, %v3640_v37  ;;  %v3830_v15 = vmul.f32 %v3829_v32, %v11103_v48  ;;  %5503 = vmatmul.f32.gmra.mxu3 %v5062_v36  ;;  %vm9781_vm5 = vcmp.eq.f32.partialorder %v3687_v12, 8.507059e+37  ;;  %v3690_v23 = vor.u32 1.1754944e-38, %v3689_v16  ;;  %vm3645_vm7 = vmor %vm3643_vm0, %vm3644_vm3 }
 0x419   : > { %v5871_v58 = vpop.eup %5870  ;;  %v3679_v63 = vmul.f32 %v5869_v14, %v9749_v0  ;;  %5872 = vrcp.f32 %v9775_v60  ;;  %vm9787_vm6 = vcmp.eq.f32.partialorder %v3727_v53, 8.507059e+37  ;;  %v3730_v61 = vor.u32 1.1754944e-38, %v3729_v46  ;;  %5532 = vst [vmem:[%s9681_s22 + $0x8] sm:$0xff] %v5460_v21 }
 0x41a   : > { %v3642_v41 = vadd.f32 %v5867_v28, %v3641_v1  ;;  %v3719_v6 = vmul.f32 %v5871_v58, %v9755_v56  ;;  %v9793_v32 = vadd.f32 %v9620_v35, %v5186_v24  ;;  %v3769_v16 = vand.u32 2147483648, %v9775_v60 }
 0x41b   : > { %v3680_v12 = vsub.f32 1.0, %v3679_v63  ;;  %v3795_v44 = vadd.f32 0.4994258, %v3794_v4  ;;  %v3831_v1 = vadd.f32 0.014752088, %v3830_v15  ;;  %vm3684_vm8 = vweird.f32 %v5869_v14 }
 0x41c   : > { %v3646_v36 = vsel %vm3645_vm7, %v5867_v28, %v3642_v41  ;;  %v3720_v20 = vsub.f32 1.0, %v3719_v6  ;;  %v3767_v53 = vand.u32 2147483647, %v9775_v60  ;;  %v3869_v34 = vadd.f32 0.001143296, %v3868_v55  ;;  %vm3685_vm11 = vmor %vm3683_vm2, %vm3684_vm8 }
 0x41d   : > { %v3651_v46 = vsel %vm9764_vm1, %v3650_v3, %v3646_v36  ;;  %v3681_v21 = vmul.f32 %v5869_v14, %v3680_v12  ;;  %v3796_v24 = vmul.f32 %v3795_v44, %v11101_v25  ;;  %vm3724_vm9 = vweird.f32 %v5871_v58  ;;  %v11117_v12 = vld [vmem:[#allocation93_spill] sm:$0xff]  ;;  %v11118_v44 = vld [vmem:[#allocation3_spill] sm:$0xff] }
 0x41e   : > { %v3652_v59 = vmul.f32 %v3651_v46, %v11114_v2  ;;  %v3721_v22 = vmul.f32 %v5871_v58, %v3720_v20  ;;  %vm3763_vm10 = vweird.f32 %v9775_v60  ;;  %v3770_v28 = vor.u32 1.1754944e-38, %v3769_v16  ;;  %vm3725_vm13 = vmor %vm3723_vm4, %vm3724_vm9 }
 0x41f   : > { %v5873_v4 = vpop.eup %5872  ;;  %v3682_v15 = vadd.f32 %v5869_v14, %v3681_v21  ;;  %v9805_v63 = vadd.f32 1.0, %v3796_v24  ;;  %v3832_v55 = vmul.f32 %v3831_v1, %v11103_v48  ;;  %vm9811_vm12 = vcmp.eq.f32.partialorder %v3767_v53, 8.507059e+37  ;;  %v11119_v53 = vld [vmem:[#allocation84_spill] sm:$0xff]  ;;  %v11121_v24 = vld [vmem:[#allocation89_spill] sm:$0xff] }
 0x420   : > { %v5687_v41 = vclamps-f32 %v3652_v59, 1.0  ;;  %v3722_v45 = vadd.f32 %v5871_v58, %v3721_v22  ;;  %v3759_v25 = vmul.f32 %v5873_v4, %v9775_v60  ;;  %v3870_v3 = vmul.f32 %v3869_v34, %v11106_v17  ;;  %v11124_v60 = vld [vmem:[#allocation86_spill] sm:$0xff] }
 0x421   : > { %v3686_v6 = vsel %vm3685_vm11, %v5869_v14, %v3682_v15  ;;  %5874 = vrcp.f32 %v9805_v63  ;;  %v3908_v16 = vmul.f32 3.8918573e-05, %v11117_v12  ;;  %v3948_v0 = vmul.f32 3.8918573e-05, %v11118_v44  ;;  %v11120_v14 = vld [vmem:[#allocation80_spill] sm:$0xff] }
 0x422   : > { %v4963_v1 = vadd.f32 1.0, %v5687_v41  ;;  %v3691_v22 = vsel %vm9781_vm5, %v3690_v23, %v3686_v6  ;;  %v3726_v36 = vsel %vm3725_vm13, %v5871_v58, %v3722_v45  ;;  %v3760_v20 = vsub.f32 1.0, %v3759_v25 }
 0x423   : > { %v3692_v46 = vmul.f32 %v3691_v22, %v11119_v53  ;;  %v3731_v34 = vsel %vm9787_vm6, %v3730_v61, %v3726_v36  ;;  %vm3764_vm14 = vweird.f32 %v5873_v4  ;;  %v3807_v56 = vand.u32 2147483647, %v9805_v63  ;;  %v11122_v36 = vld [vmem:[#allocation87_spill] sm:$0xff] }
 0x424   : > { %v5063_v21 = vmul.f32 %v4963_v1, %v11120_v14  ;;  %v3732_v59 = vmul.f32 %v3731_v34, %v11121_v24  ;;  %v3761_v15 = vmul.f32 %v5873_v4, %v3760_v20  ;;  %v3833_v19 = vadd.f32 0.112945676, %v3832_v55  ;;  %vm3765_vm15 = vmor %vm3763_vm10, %vm3764_vm14  ;;  %v11125_v24 = vld [vmem:[#allocation33_spill] sm:$0xff] }
 0x425   : > { %v5688_v41 = vclamps-f32 %v3692_v46, 1.0  ;;  %v3809_v39 = vand.u32 2147483648, %v9805_v63  ;;  %v3871_v23 = vadd.f32 0.014752088, %v3870_v3  ;;  %v3909_v58 = vadd.f32 0.001143296, %v3908_v16 }
 0x426   : > { %5230 = vmatmul.f32.gmra.mxu0 %v5063_v21  ;;  %v5689_v45 = vclamps-f32 %v3732_v59, 1.0  ;;  %v3762_v25 = vadd.f32 %v5873_v4, %v3761_v15  ;;  %v3834_v37 = vmul.f32 %v3833_v19, %v11103_v48  ;;  %v3949_v61 = vadd.f32 0.001143296, %v3948_v0  ;;  %v11123_v46 = vld [vmem:[#allocation95_spill] sm:$0xff] }
 0x427   : > { %v5875_v6 = vpop.eup %5874  ;;  %v4964_v22 = vadd.f32 1.0, %v5688_v41  ;;  %v3872_v1 = vmul.f32 %v3871_v23, %v11106_v17  ;;  %v3910_v55 = vmul.f32 %v3909_v58, %v11117_v12  ;;  %v3988_v20 = vmul.f32 3.8918573e-05, %v11122_v36 }
 0x428   : > { %v4965_v3 = vadd.f32 1.0, %v5689_v45  ;;  %v3766_v16 = vsel %vm3765_vm15, %v5873_v4, %v3762_v25  ;;  %v3799_v53 = vmul.f32 %v5875_v6, %v9805_v63  ;;  %vm3804_vm0 = vweird.f32 %v5875_v6 }
 0x429   : > { %v5064_v19 = vmul.f32 %v4964_v22, %v11123_v46  ;;  %v3771_v0 = vsel %vm9811_vm12, %v3770_v28, %v3766_v16  ;;  %v3835_v34 = vadd.f32 0.4994258, %v3834_v37  ;;  %v3873_v14 = vadd.f32 0.112945676, %v3872_v1  ;;  %v11126_v37 = vld [vmem:[#allocation71_spill] sm:$0xff] }
 0x42a   : > { %v5065_v21 = vmul.f32 %v4965_v3, %v11124_v60  ;;  %v3772_v59 = vmul.f32 %v3771_v0, %v11125_v24  ;;  %v3800_v15 = vsub.f32 1.0, %v3799_v53  ;;  %v3911_v41 = vadd.f32 0.014752088, %v3910_v55 }
 0x42b   : > { %5322 = vmatmul.f32.gmra.mxu1 %v5064_v19  ;;  %v3836_v23 = vmul.f32 %v3835_v34, %v11103_v48  ;;  %v3874_v4 = vmul.f32 %v3873_v14, %v11106_v17  ;;  %v3950_v58 = vmul.f32 %v3949_v61, %v11118_v44  ;;  %v3989_v45 = vadd.f32 0.001143296, %v3988_v20  ;;  %v11127_v19 = vld [vmem:[#allocation27_spill] sm:$0xff]  ;;  %v5278_v34 = vpop.f32.mrf.mxu1 }
 0x42c   : > { %5414 = vmatmul.f32.gmra.mxu2 %v5065_v21  ;;  %v5690_v25 = vclamps-f32 %v3772_v59, 1.0  ;;  %v3801_v2 = vmul.f32 %v5875_v6, %v3800_v15  ;;  %v3912_v28 = vmul.f32 %v3911_v41, %v11117_v12  ;;  %v4028_v22 = vmul.f32 3.8918573e-05, %v11126_v37  ;;  %v11128_v59 = vld [vmem:[#allocation5_spill] sm:$0xff] }
 0x42d   : > { %vm3803_vm1 = vweird.f32 %v9805_v63  ;;  %v9849_v1 = vadd.f32 1.0, %v3836_v23  ;;  %v3875_v55 = vadd.f32 0.4994258, %v3874_v4  ;;  %v3951_v3 = vadd.f32 0.014752088, %v3950_v58  ;;  %v5370_v4 = vpop.f32.mrf.mxu2 }
 0x42e   : > { %v4966_v16 = vadd.f32 1.0, %v5690_v25  ;;  %v3802_v48 = vadd.f32 %v5875_v6, %v3801_v2  ;;  %vm3808_vm2 = vcmp.eq.f32.partialorder %v3807_v56, 8.507059e+37  ;;  %v3913_v53 = vadd.f32 0.112945676, %v3912_v28  ;;  %vm3805_vm3 = vmor %vm3803_vm1, %vm3804_vm0  ;;  %v5462_v25 = vpop.f32.mrf.mxu3 }
 0x42f   : > { %v3810_v61 = vor.u32 1.1754944e-38, %v3809_v39  ;;  %5876 = vrcp.f32 %v9849_v1  ;;  %v3990_v20 = vmul.f32 %v3989_v45, %v11122_v36  ;;  %v4029_v46 = vadd.f32 0.001143296, %v4028_v22 }
 0x430   : > { %v5066_v0 = vmul.f32 %v4966_v16, %v11127_v19  ;;  %v3806_v63 = vsel %vm3805_vm3, %v5875_v6, %v3802_v48  ;;  %v3876_v14 = vmul.f32 %v3875_v55, %v11106_v17  ;;  %v3914_v60 = vmul.f32 %v3913_v53, %v11117_v12 }
 0x431   : > { %v4819_v56 = vmul.f32 %v9702_v62, %v9644_v11  ;;  %v5279_v21 = vadd.f32 %v5278_v34, %v9793_v32  ;;  %v3811_v24 = vsel %vm3808_vm2, %v3810_v61, %v3806_v63  ;;  %v3952_v39 = vmul.f32 %v3951_v3, %v11118_v44  ;;  %v5189_v63 = vpop.f32.mrf.mxu0 }
 0x432   : > { %5506 = vmatmul.f32.gmra.mxu3 %v5066_v0  ;;  %v3812_v15 = vmul.f32 %v3811_v24, %v11128_v59  ;;  %v3847_v41 = vand.u32 2147483647, %v9849_v1  ;;  %v9863_v23 = vadd.f32 1.0, %v3876_v14  ;;  %v3915_v6 = vadd.f32 0.4994258, %v3914_v60  ;;  %v11131_v0 = vld [vmem:[#allocation97_spill] sm:$0xff] }
 0x433   : > { %v9867_v17 = vmul.f32 %v9686_v30, %v9506_v26  ;;  %v3849_v62 = vand.u32 2147483648, %v9849_v1  ;;  %v5371_v58 = vadd.f32 %v5370_v4, %v5279_v21  ;;  %v3953_v32 = vadd.f32 0.112945676, %v3952_v39  ;;  %v11132_v21 = vld [vmem:[#allocation96_spill] sm:$0xff] }
 0x434   : > { %v5691_v45 = vclamps-f32 %v3812_v15, 1.0  ;;  %5878 = vrcp.f32 %v9863_v23  ;;  %v3991_v2 = vadd.f32 0.014752088, %v3990_v20  ;;  %v4030_v28 = vmul.f32 %v4029_v46, %v11126_v37 }
 0x435   : > { %v5877_v22 = vpop.eup %5876  ;;  %v9872_v55 = vadd.f32 0.0036580483, %v4819_v56  ;;  %v9875_v3 = vadd.f32 0.00028619796, %v9752_v8  ;;  %v3916_v30 = vmul.f32 %v3915_v6, %v11117_v12  ;;  %v5463_v16 = vadd.f32 %v5462_v25, %v5371_v58 }
 0x436   : > { %v4967_v48 = vadd.f32 1.0, %v5691_v45  ;;  %v3839_v53 = vmul.f32 %v5877_v22, %v9849_v1  ;;  %vm3843_vm4 = vweird.f32 %v9849_v1  ;;  %vm9880_vm5 = vcmp.eq.f32.partialorder %v3847_v41, 8.507059e+37  ;;  %v11135_v1 = vld [vmem:[#allocation4_spill] sm:$0xff] }
 0x437   : > { %v3850_v20 = vor.u32 1.1754944e-38, %v3849_v62  ;;  %v3887_v46 = vand.u32 2147483647, %v9863_v23  ;;  %v9885_v19 = vadd.f32 1.0, %v3916_v30  ;;  %5533 = vst [vmem:[%s9681_s22 + $0x10] sm:$0xff] %v5463_v16  ;;  %v3954_v8 = vmul.f32 %v3953_v32, %v11118_v44 }
 0x438   : > { %v5067_v12 = vmul.f32 %v4967_v48, %v11131_v0  ;;  %v3840_v34 = vsub.f32 1.0, %v3839_v53  ;;  %v3992_v14 = vmul.f32 %v3991_v2, %v11122_v36  ;;  %v4031_v60 = vadd.f32 0.014752088, %v4030_v28 }
 0x439   : > { %vm3844_vm6 = vweird.f32 %v5877_v22  ;;  %v3889_v56 = vand.u32 2147483648, %v9863_v23  ;;  %5880 = vrcp.f32 %v9885_v19  ;;  %v4068_v24 = vmul.f32 3.8918573e-05, %v11132_v21 }
 0x43a   : > { %v5879_v39 = vpop.eup %5878  ;;  %5233 = vmatmul.f32.gmra.mxu0 %v5067_v12  ;;  %v3841_v59 = vmul.f32 %v5877_v22, %v3840_v34  ;;  %v3955_v15 = vadd.f32 0.4994258, %v3954_v8  ;;  %v3993_v41 = vadd.f32 0.112945676, %v3992_v14  ;;  %v4032_v6 = vmul.f32 %v4031_v60, %v11126_v37  ;;  %vm3845_vm9 = vmor %vm3843_vm4, %vm3844_vm6  ;;  %v5281_v12 = vpop.f32.mrf.mxu1  ;;  %v11136_v14 = vld [vmem:[#allocation90_spill] sm:$0xff] }
 0x43b   : > { %v3879_v4 = vmul.f32 %v5879_v39, %v9863_v23  ;;  %vm3883_vm7 = vweird.f32 %v9863_v23  ;;  %vm9897_vm8 = vcmp.eq.f32.partialorder %v3887_v46, 8.507059e+37  ;;  %v5190_v58 = vadd.f32 %v9620_v35, %v5189_v63 }
 0x43c   : > { %v3842_v32 = vadd.f32 %v5877_v22, %v3841_v59  ;;  %v3956_v45 = vmul.f32 %v3955_v15, %v11118_v44  ;;  %v3994_v25 = vmul.f32 %v3993_v41, %v11122_v36  ;;  %v4033_v2 = vadd.f32 0.112945676, %v4032_v6 }
 0x43d   : > { %v3880_v28 = vsub.f32 1.0, %v3879_v4  ;;  %vm3884_vm10 = vweird.f32 %v5879_v39  ;;  %v3890_v30 = vor.u32 1.1754944e-38, %v3889_v56  ;;  %v4069_v16 = vadd.f32 0.001143296, %v4068_v24 }
 0x43e   : > { %v3846_v48 = vsel %vm3845_vm9, %v5877_v22, %v3842_v32  ;;  %v9907_v53 = vadd.f32 1.0, %v3956_v45  ;;  %v3995_v46 = vadd.f32 0.4994258, %v3994_v25  ;;  %v4034_v35 = vmul.f32 %v4033_v2, %v11126_v37  ;;  %vm3885_vm12 = vmor %vm3883_vm7, %vm3884_vm10 }
 0x43f   : > { %v5881_v8 = vpop.eup %5880  ;;  %v3851_v44 = vsel %vm9880_vm5, %v3850_v20, %v3846_v48  ;;  %v3881_v0 = vmul.f32 %v5879_v39, %v3880_v28  ;;  %v4070_v34 = vmul.f32 %v4069_v16, %v11132_v21  ;;  %v4108_v63 = vmul.f32 3.8918573e-05, %v11135_v1  ;;  %v11137_v16 = vld [vmem:[#allocation12_spill] sm:$0xff] }
 0x440   : > { %v3852_v60 = vmul.f32 %v3851_v44, %v11136_v14  ;;  %v3919_v56 = vmul.f32 %v5881_v8, %v9885_v19  ;;  %v9916_v22 = vadd.f32 %v5281_v12, %v5190_v58  ;;  %5882 = vrcp.f32 %v9907_v53 }
 0x441   : > { %v3882_v24 = vadd.f32 %v5879_v39, %v3881_v0  ;;  %vm3923_vm11 = vweird.f32 %v9885_v19  ;;  %v3927_v61 = vand.u32 2147483647, %v9885_v19  ;;  %v3929_v20 = vand.u32 2147483648, %v9885_v19 }
 0x442   : > { %v5692_v59 = vclamps-f32 %v3852_v60, 1.0  ;;  %v3920_v15 = vsub.f32 1.0, %v3919_v56  ;;  %v3996_v41 = vmul.f32 %v3995_v46, %v11122_v36  ;;  %v4035_v6 = vadd.f32 0.4994258, %v4034_v35  ;;  %v11140_v35 = vld [vmem:[#allocation10_spill] sm:$0xff] }
 0x443   : > { %v3886_v4 = vsel %vm3885_vm12, %v5879_v39, %v3882_v24  ;;  %vm3924_vm13 = vweird.f32 %v5881_v8  ;;  %v4071_v58 = vadd.f32 0.014752088, %v4070_v34  ;;  %v4109_v32 = vadd.f32 0.001143296, %v4108_v63 }
 0x444   : > { %v4968_v45 = vadd.f32 1.0, %v5692_v59  ;;  %v3891_v25 = vsel %vm9897_vm8, %v3890_v30, %v3886_v4  ;;  %v3921_v2 = vmul.f32 %v5881_v8, %v3920_v15  ;;  %v9928_v28 = vadd.f32 1.0, %v3996_v41  ;;  %vm3925_vm15 = vmor %vm3923_vm11, %vm3924_vm13  ;;  %v11141_v15 = vld [vmem:[#allocation13_spill] sm:$0xff] }
 0x445   : > { %v3892_v48 = vmul.f32 %v3891_v25, %v11137_v16  ;;  %vm9931_vm14 = vcmp.eq.f32.partialorder %v3927_v61, 8.507059e+37  ;;  %v4036_v36 = vmul.f32 %v4035_v6, %v11126_v37  ;;  %v4072_v39 = vmul.f32 %v4071_v58, %v11132_v21 }
 0x446   : > { %v5883_v46 = vpop.eup %5882  ;;  %v5068_v44 = vmul.f32 %v4968_v45, %v11140_v35  ;;  %v3922_v0 = vadd.f32 %v5881_v8, %v3921_v2  ;;  %v3967_v62 = vand.u32 2147483647, %v9907_v53  ;;  %5884 = vrcp.f32 %v9928_v28  ;;  %v5373_v35 = vpop.f32.mrf.mxu2 }
 0x447   : > { %v5693_v30 = vclamps-f32 %v3892_v48, 1.0  ;;  %v3930_v12 = vor.u32 1.1754944e-38, %v3929_v20  ;;  %v3959_v34 = vmul.f32 %v5883_v46, %v9907_v53  ;;  %v3969_v37 = vand.u32 2147483648, %v9907_v53 }
 0x448   : > { %5325 = vmatmul.f32.gmra.mxu1 %v5068_v44  ;;  %v3926_v63 = vsel %vm3925_vm15, %v5881_v8, %v3922_v0  ;;  %v9945_v14 = vadd.f32 1.0, %v4036_v36  ;;  %v4073_v60 = vadd.f32 0.112945676, %v4072_v39  ;;  %v4110_v56 = vmul.f32 %v4109_v32, %v11135_v1  ;;  %v11144_v8 = vld [vmem:[#allocation94_spill] sm:$0xff] }
 0x449   : > { %v4969_v24 = vadd.f32 1.0, %v5693_v30  ;;  %v3931_v61 = vsel %vm9931_vm14, %v3930_v12, %v3926_v63  ;;  %v3960_v59 = vsub.f32 1.0, %v3959_v34  ;;  %v4007_v19 = vand.u32 2147483647, %v9928_v28  ;;  %v11147_v30 = vld [vmem:[#allocation9_spill] sm:$0xff] }
 0x44a   : > { %v3932_v20 = vmul.f32 %v3931_v61, %v11141_v15  ;;  %vm3963_vm0 = vweird.f32 %v9907_v53  ;;  %vm9953_vm1 = vcmp.eq.f32.partialorder %v3967_v62, 8.507059e+37  ;;  %5886 = vrcp.f32 %v9945_v14  ;;  %v11148_v61 = vld [vmem:[#allocation11_spill] sm:$0xff] }
 0x44b   : > { %v5069_v6 = vmul.f32 %v4969_v24, %v11144_v8  ;;  %v3961_v4 = vmul.f32 %v5883_v46, %v3960_v59  ;;  %vm3964_vm2 = vweird.f32 %v5883_v46  ;;  %v3970_v58 = vor.u32 1.1754944e-38, %v3969_v37 }
 0x44c   : > { %v5885_v32 = vpop.eup %5884  ;;  %v5694_v45 = vclamps-f32 %v3932_v20, 1.0  ;;  %v4009_v25 = vand.u32 2147483648, %v9928_v28  ;;  %v4074_v2 = vmul.f32 %v4073_v60, %v11132_v21  ;;  %v4111_v16 = vadd.f32 0.014752088, %v4110_v56  ;;  %vm3965_vm4 = vmor %vm3963_vm0, %vm3964_vm2  ;;  %v5465_v60 = vpop.f32.mrf.mxu3 }
 0x44d   : > { %5417 = vmatmul.f32.gmra.mxu2 %v5069_v6  ;;  %v3962_v48 = vadd.f32 %v5883_v46, %v3961_v4  ;;  %v3999_v23 = vmul.f32 %v5885_v32, %v9928_v28  ;;  %vm9962_vm3 = vcmp.eq.f32.partialorder %v4007_v19, 8.507059e+37  ;;  %v4047_v39 = vand.u32 2147483647, %v9945_v14 }
 0x44e   : > { %v4970_v44 = vadd.f32 1.0, %v5694_v45  ;;  %v4075_v0 = vadd.f32 0.4994258, %v4074_v2  ;;  %v5374_v62 = vadd.f32 %v5373_v35, %v9916_v22  ;;  %v4148_v12 = vmul.f32 3.8918573e-05, %v11147_v30  ;;  %v11149_v22 = vld [vmem:[#allocation39_spill] sm:$0xff] }
 0x44f   : > { %v3966_v34 = vsel %vm3965_vm4, %v5883_v46, %v3962_v48  ;;  %v4000_v37 = vsub.f32 1.0, %v3999_v23  ;;  %v4049_v63 = vand.u32 2147483648, %v9945_v14  ;;  %v4112_v56 = vmul.f32 %v4111_v16, %v11135_v1 }
 0x450   : > { %v5887_v24 = vpop.eup %5886  ;;  %v5070_v59 = vmul.f32 %v4970_v44, %v11148_v61  ;;  %v3971_v53 = vsel %vm9953_vm1, %v3970_v58, %v3966_v34  ;;  %v4076_v19 = vmul.f32 %v4075_v0, %v11132_v21  ;;  %v5466_v15 = vadd.f32 %v5465_v60, %v5374_v62  ;;  %v11150_v21 = vld [vmem:[#allocation14_spill] sm:$0xff]  ;;  %v11153_v34 = vld [vmem:[#allocation37_spill] sm:$0xff] }
 0x451   : > { %v3972_v20 = vmul.f32 %v3971_v53, %v11149_v22  ;;  %v4001_v8 = vmul.f32 %v5885_v32, %v4000_v37  ;;  %vm4004_vm5 = vweird.f32 %v5885_v32  ;;  %v4039_v46 = vmul.f32 %v5887_v24, %v9945_v14  ;;  %v11154_v60 = vld [vmem:[#allocation17_spill] sm:$0xff]  ;;  %v11155_v53 = vld [vmem:[#allocation22_spill] sm:$0xff] }
 0x452   : > { %5509 = vmatmul.f32.gmra.mxu3 %v5070_v59  ;;  %vm4003_vm6 = vweird.f32 %v9928_v28  ;;  %v9980_v6 = vadd.f32 1.0, %v4076_v19  ;;  %5534 = vst [vmem:[%s9681_s22 + $0x18] sm:$0xff] %v5466_v15  ;;  %v4113_v4 = vadd.f32 0.112945676, %v4112_v56  ;;  %v4149_v45 = vadd.f32 0.001143296, %v4148_v12 }
 0x453   : > { %v5695_v2 = vclamps-f32 %v3972_v20, 1.0  ;;  %v4002_v41 = vadd.f32 %v5885_v32, %v4001_v8  ;;  %v4010_v58 = vor.u32 1.1754944e-38, %v4009_v25  ;;  %v4040_v16 = vsub.f32 1.0, %v4039_v46  ;;  %vm4005_vm7 = vmor %vm4003_vm6, %vm4004_vm5  ;;  %v11156_v20 = vld [vmem:[#allocation36_spill] sm:$0xff] }
 0x454   : > { %vm4043_vm8 = vweird.f32 %v9945_v14  ;;  %vm4044_vm9 = vweird.f32 %v5887_v24  ;;  %5888 = vrcp.f32 %v9980_v6  ;;  %v4188_v48 = vmul.f32 3.8918573e-05, %v11150_v21 }
 0x455   : > { %v4971_v23 = vadd.f32 1.0, %v5695_v2  ;;  %v4006_v35 = vsel %vm4005_vm7, %v5885_v32, %v4002_v41  ;;  %v4041_v28 = vmul.f32 %v5887_v24, %v4040_v16  ;;  %v4114_v44 = vmul.f32 %v4113_v4, %v11135_v1  ;;  %vm4045_vm11 = vmor %vm4043_vm8, %vm4044_vm9 }
 0x456   : > { %v4011_v0 = vsel %vm9962_vm3, %v4010_v58, %v4006_v35  ;;  %vm9989_vm10 = vcmp.eq.f32.partialorder %v4047_v39, 8.507059e+37  ;;  %v4050_v25 = vor.u32 1.1754944e-38, %v4049_v63  ;;  %v4150_v12 = vmul.f32 %v4149_v45, %v11147_v30  ;;  %v11157_v58 = vld [vmem:[#allocation21_spill] sm:$0xff] }
 0x457   : > { %v5071_v37 = vmul.f32 %v4971_v23, %v11153_v34  ;;  %v4012_v56 = vmul.f32 %v4011_v0, %v11154_v60  ;;  %v4042_v61 = vadd.f32 %v5887_v24, %v4041_v28  ;;  %v4115_v59 = vadd.f32 0.4994258, %v4114_v44  ;;  %v11158_v28 = vld [vmem:[#allocation16_spill] sm:$0xff] }
 0x458   : > { %v4859_v32 = vmul.f32 %v9875_v3, %v9696_v7  ;;  %v4151_v36 = vadd.f32 0.014752088, %v4150_v12  ;;  %v4189_v39 = vadd.f32 0.001143296, %v4188_v48  ;;  %v4228_v19 = vmul.f32 3.8918573e-05, %v11155_v53 }
 0x459   : > { %5236 = vmatmul.f32.gmra.mxu0 %v5071_v37  ;;  %v5696_v63 = vclamps-f32 %v4012_v56, 1.0  ;;  %v4046_v15 = vsel %vm4045_vm11, %v5887_v24, %v4042_v61  ;;  %v4116_v22 = vmul.f32 %v4115_v59, %v11135_v1  ;;  %v4268_v8 = vmul.f32 3.8918573e-05, %v11156_v20  ;;  %v10027_v59 = vld [vmem:[%s10475_s4] ss:$0 sm:$0xff] }
 0x45a   : > { %v5889_v46 = vpop.eup %5888  ;;  %v4051_v4 = vsel %vm9989_vm10, %v4050_v25, %v4046_v15  ;;  %v4152_v3 = vmul.f32 %v4151_v36, %v11147_v30  ;;  %v4190_v14 = vmul.f32 %v4189_v39, %v11150_v21  ;;  %v4229_v45 = vadd.f32 0.001143296, %v4228_v19  ;;  %v5192_v25 = vpop.f32.mrf.mxu0 }
 0x45b   : > { %v10010_v2 = vmul.f32 %v9872_v55, %v9644_v11  ;;  %v4972_v41 = vadd.f32 1.0, %v5696_v63  ;;  %v4052_v24 = vmul.f32 %v4051_v4, %v11157_v58  ;;  %v4079_v1 = vmul.f32 %v5889_v46, %v9980_v6  ;;  %v11159_v63 = vld [vmem:[#allocation15_spill] sm:$0xff] }
 0x45c   : > { %v10014_v16 = vadd.f32 1.0, %v4116_v22  ;;  %v4153_v48 = vadd.f32 0.112945676, %v4152_v3  ;;  %v4191_v23 = vadd.f32 0.014752088, %v4190_v14  ;;  %v4230_v35 = vmul.f32 %v4229_v45, %v11155_v53 }
 0x45d   : > { %v5072_v44 = vmul.f32 %v4972_v41, %v11158_v28  ;;  %v5697_v0 = vclamps-f32 %v4052_v24, 1.0  ;;  %v4080_v62 = vsub.f32 1.0, %v4079_v1  ;;  %v4269_v12 = vadd.f32 0.001143296, %v4268_v8  ;;  %v11160_v28 = vld [vmem:[#allocation20_spill] sm:$0xff] }
 0x45e   : > { %vm4084_vm12 = vweird.f32 %v5889_v46  ;;  %v4087_v55 = vand.u32 2147483647, %v9980_v6  ;;  %v4089_v34 = vand.u32 2147483648, %v9980_v6  ;;  %5890 = vrcp.f32 %v10014_v16 }
 0x45f   : > { %5328 = vmatmul.f32.gmra.mxu1 %v5072_v44  ;;  %v4973_v37 = vadd.f32 1.0, %v5697_v0  ;;  %v4081_v60 = vmul.f32 %v5889_v46, %v4080_v62  ;;  %v4154_v56 = vmul.f32 %v4153_v48, %v11147_v30  ;;  %v4192_v61 = vmul.f32 %v4191_v23, %v11150_v21  ;;  %v5284_v23 = vpop.f32.mrf.mxu1  ;;  %v11161_v0 = vld [vmem:[#allocation30_spill] sm:$0xff] }
 0x460   : > { %vm4083_vm13 = vweird.f32 %v9980_v6  ;;  %v5193_v36 = vadd.f32 %v10027_v59, %v5192_v25  ;;  %v4231_v39 = vadd.f32 0.014752088, %v4230_v35  ;;  %v4270_v19 = vmul.f32 %v4269_v12, %v11156_v20 }
 0x461   : > { %v5073_v15 = vmul.f32 %v4973_v37, %v11159_v63  ;;  %v4082_v22 = vadd.f32 %v5889_v46, %v4081_v60  ;;  %v4155_v8 = vadd.f32 0.4994258, %v4154_v56  ;;  %v4193_v4 = vadd.f32 0.112945676, %v4192_v61  ;;  %vm4085_vm14 = vmor %vm4083_vm13, %vm4084_vm12 }
 0x462   : > { %v10032_v3 = vadd.f32 0.0036580483, %v4859_v32  ;;  %v4090_v6 = vor.u32 1.1754944e-38, %v4089_v34  ;;  %v4232_v14 = vmul.f32 %v4231_v39, %v11155_v53  ;;  %v4271_v45 = vadd.f32 0.014752088, %v4270_v19  ;;  %v5376_v19 = vpop.f32.mrf.mxu2 }
 0x463   : > { %5420 = vmatmul.f32.gmra.mxu2 %v5073_v15  ;;  %v4086_v41 = vsel %vm4085_vm14, %v5889_v46, %v4082_v22  ;;  %vm4088_vm15 = vcmp.eq.f32.partialorder %v4087_v55, 8.507059e+37  ;;  %v4156_v58 = vmul.f32 %v4155_v8, %v11147_v30  ;;  %v4194_v24 = vmul.f32 %v4193_v4, %v11150_v21 }
 0x464   : > { %v5891_v1 = vpop.eup %5890  ;;  %v4091_v48 = vsel %vm4088_vm15, %v4090_v6, %v4086_v41  ;;  %v4233_v35 = vadd.f32 0.112945676, %v4232_v14  ;;  %v4272_v32 = vmul.f32 %v4271_v45, %v11156_v20  ;;  %v4308_v44 = vmul.f32 3.8918573e-05, %v11160_v28  ;;  %v11164_v41 = vld [vmem:[#allocation25_spill] sm:$0xff] }
 0x465   : > { %v4092_v62 = vmul.f32 %v4091_v48, %v11161_v0  ;;  %v5285_v25 = vadd.f32 %v5284_v23, %v5193_v36  ;;  %v4119_v12 = vmul.f32 %v5891_v1, %v10014_v16  ;;  %v10042_v34 = vadd.f32 1.0, %v4156_v58 }
 0x466   : > { %v4127_v46 = vand.u32 2147483647, %v10014_v16  ;;  %v4195_v30 = vadd.f32 0.4994258, %v4194_v24  ;;  %v4234_v55 = vmul.f32 %v4233_v35, %v11155_v53  ;;  %v4273_v37 = vadd.f32 0.112945676, %v4272_v32 }
 0x467   : > { %v5698_v60 = vclamps-f32 %v4092_v62, 1.0  ;;  %v4120_v56 = vsub.f32 1.0, %v4119_v12  ;;  %v4129_v61 = vand.u32 2147483648, %v10014_v16  ;;  %5892 = vrcp.f32 %v10042_v34  ;;  %v11165_v32 = vld [vmem:[#allocation43_spill] sm:$0xff] }
 0x468   : > { %vm4124_vm0 = vweird.f32 %v5891_v1  ;;  %v4196_v39 = vmul.f32 %v4195_v30, %v11150_v21  ;;  %v4235_v36 = vadd.f32 0.4994258, %v4234_v55  ;;  %v4309_v63 = vadd.f32 0.001143296, %v4308_v44  ;;  %v5468_v21 = vpop.f32.mrf.mxu3 }
 0x469   : > { %v4974_v15 = vadd.f32 1.0, %v5698_v60  ;;  %v4121_v22 = vmul.f32 %v5891_v1, %v4120_v56  ;;  %v5377_v8 = vadd.f32 %v5376_v19, %v5285_v25  ;;  %v4274_v4 = vmul.f32 %v4273_v37, %v11156_v20  ;;  %v11166_v37 = vld [vmem:[#allocation45_spill] sm:$0xff] }
 0x46a   : > { %vm4123_vm1 = vweird.f32 %v10014_v16  ;;  %vm10051_vm2 = vcmp.eq.f32.partialorder %v4127_v46, 8.507059e+37  ;;  %v10055_v14 = vadd.f32 1.0, %v4196_v39  ;;  %v4236_v45 = vmul.f32 %v4235_v36, %v11155_v53 }
 0x46b   : > { %v5074_v58 = vmul.f32 %v4974_v15, %v11164_v41  ;;  %v4122_v24 = vadd.f32 %v5891_v1, %v4121_v22  ;;  %v4130_v48 = vor.u32 1.1754944e-38, %v4129_v61  ;;  %v5469_v23 = vadd.f32 %v5468_v21, %v5377_v8  ;;  %vm4125_vm3 = vmor %vm4123_vm1, %vm4124_vm0 }
 0x46c   : > { %v4167_v35 = vand.u32 2147483647, %v10042_v34  ;;  %v4169_v16 = vand.u32 2147483648, %v10042_v34  ;;  %5894 = vrcp.f32 %v10055_v14  ;;  %v4348_v44 = vmul.f32 3.8918573e-05, %v11165_v32 }
 0x46d   : > { %v5893_v0 = vpop.eup %5892  ;;  %5512 = vmatmul.f32.gmra.mxu3 %v5074_v58  ;;  %v4126_v62 = vsel %vm4125_vm3, %v5891_v1, %v4122_v24  ;;  %v10064_v53 = vadd.f32 1.0, %v4236_v45  ;;  %5535 = vst [vmem:[%s9681_s22 + $0x20] sm:$0xff] %v5469_v23  ;;  %v4275_v25 = vadd.f32 0.4994258, %v4274_v4  ;;  %v4310_v12 = vmul.f32 %v4309_v63, %v11160_v28 }
 0x46e   : > { %v4131_v46 = vsel %vm10051_vm2, %v4130_v48, %v4126_v62  ;;  %v4159_v30 = vmul.f32 %v5893_v0, %v10042_v34  ;;  %vm4163_vm4 = vweird.f32 %v10042_v34  ;;  %v4388_v55 = vmul.f32 3.8918573e-05, %v9151_v47 }
 0x46f   : > { %v4132_v60 = vmul.f32 %v4131_v46, %v11166_v37  ;;  %v4207_v56 = vand.u32 2147483647, %v10055_v14  ;;  %v4209_v1 = vand.u32 2147483648, %v10055_v14  ;;  %5896 = vrcp.f32 %v10064_v53 }
 0x470   : > { %v4160_v61 = vsub.f32 1.0, %v4159_v30  ;;  %vm10077_vm5 = vcmp.eq.f32.partialorder %v4167_v35, 8.507059e+37  ;;  %v4170_v36 = vor.u32 1.1754944e-38, %v4169_v16  ;;  %v4276_v19 = vmul.f32 %v4275_v25, %v11156_v20  ;;  %v11171_v16 = vld [vmem:[#allocation18_spill] sm:$0xff] }
 0x471   : > { %v5699_v63 = vclamps-f32 %v4132_v60, 1.0  ;;  %vm4203_vm6 = vweird.f32 %v10055_v14  ;;  %v4249_v15 = vand.u32 2147483648, %v10064_v53  ;;  %v4311_v22 = vadd.f32 0.014752088, %v4310_v12 }
 0x472   : > { %v5895_v8 = vpop.eup %5894  ;;  %v4161_v4 = vmul.f32 %v5893_v0, %v4160_v61  ;;  %vm4164_vm7 = vweird.f32 %v5893_v0  ;;  %v4247_v6 = vand.u32 2147483647, %v10064_v53  ;;  %v10085_v45 = vadd.f32 1.0, %v4276_v19  ;;  %v11174_v19 = vld [vmem:[#allocation52_spill] sm:$0xff] }
 0x473   : > { %v4975_v21 = vadd.f32 1.0, %v5699_v63  ;;  %v4199_v41 = vmul.f32 %v5895_v8, %v10055_v14  ;;  %vm10088_vm8 = vcmp.eq.f32.partialorder %v4207_v56, 8.507059e+37  ;;  %v4210_v20 = vor.u32 1.1754944e-38, %v4209_v1  ;;  %vm4165_vm10 = vmor %vm4163_vm4, %vm4164_vm7 }
 0x474   : > { %v4312_v24 = vmul.f32 %v4311_v22, %v11160_v28  ;;  %v4162_v48 = vadd.f32 %v5893_v0, %v4161_v4  ;;  %vm4243_vm9 = vweird.f32 %v10064_v53  ;;  %5898 = vrcp.f32 %v10085_v45 }
 0x475   : > { %v4349_v23 = vadd.f32 0.001143296, %v4348_v44  ;;  %v5897_v35 = vpop.eup %5896  ;;  %v5075_v62 = vmul.f32 %v4975_v21, %v11171_v16  ;;  %v4200_v25 = vsub.f32 1.0, %v4199_v41  ;;  %v4250_v12 = vor.u32 1.1754944e-38, %v4249_v15 }
 0x476   : > { %v4313_v46 = vadd.f32 0.112945676, %v4312_v24  ;;  %v4166_v30 = vsel %vm4165_vm10, %v5893_v0, %v4162_v48  ;;  %vm4204_vm11 = vweird.f32 %v5895_v8  ;;  %v4239_v37 = vmul.f32 %v5897_v35, %v10064_v53  ;;  %v11177_v53 = vld [vmem:[#allocation31_spill] sm:$0xff] }
 0x477   : > { %vm10099_vm12 = vcmp.eq.f32.partialorder %v4247_v6, 8.507059e+37  ;;  %v4287_v56 = vand.u32 2147483647, %v10085_v45  ;;  %5239 = vmatmul.f32.gmra.mxu0 %v5075_v62  ;;  %v4171_v44 = vsel %vm10077_vm5, %v4170_v36, %v4166_v30  ;;  %v4201_v1 = vmul.f32 %v5895_v8, %v4200_v25  ;;  %vm4205_vm14 = vmor %vm4203_vm6, %vm4204_vm11 }
 0x478   : > { %v4289_v34 = vand.u32 2147483648, %v10085_v45  ;;  %v4314_v61 = vmul.f32 %v4313_v46, %v11160_v28  ;;  %v4172_v0 = vmul.f32 %v4171_v44, %v11174_v19  ;;  %v4240_v63 = vsub.f32 1.0, %v4239_v37  ;;  %v11175_v37 = vld [vmem:[#allocation32_spill] sm:$0xff]  ;;  %v5195_v44 = vpop.f32.mrf.mxu0  ;;  %v11176_v19 = vld [vmem:[#allocation47_spill] sm:$0xff] }
 0x479   : > { %v4350_v15 = vmul.f32 %v4349_v23, %v11165_v32  ;;  %v4389_v22 = vadd.f32 0.001143296, %v4388_v55  ;;  %v4202_v4 = vadd.f32 %v5895_v8, %v4201_v1  ;;  %vm4244_vm13 = vweird.f32 %v5897_v35 }
 0x47a   : > { %v4315_v6 = vadd.f32 0.4994258, %v4314_v61  ;;  %v4428_v21 = vmul.f32 3.8918573e-05, %v9169_v18  ;;  %v5899_v41 = vpop.eup %5898  ;;  %v5700_v24 = vclamps-f32 %v4172_v0, 1.0  ;;  %v4241_v39 = vmul.f32 %v5897_v35, %v4240_v63  ;;  %vm4245_vm0 = vmor %vm4243_vm9, %vm4244_vm13 }
 0x47b   : > { %v4351_v36 = vadd.f32 0.014752088, %v4350_v15  ;;  %v4390_v48 = vmul.f32 %v4389_v22, %v9151_v47  ;;  %v4206_v16 = vsel %vm4205_vm14, %v5895_v8, %v4202_v4  ;;  %v4279_v62 = vmul.f32 %v5899_v41, %v10085_v45 }
 0x47c   : > { %vm4284_vm15 = vweird.f32 %v5899_v41  ;;  %v4316_v55 = vmul.f32 %v4315_v6, %v11160_v28  ;;  %v4976_v23 = vadd.f32 1.0, %v5700_v24  ;;  %v4211_v25 = vsel %vm10088_vm8, %v4210_v20, %v4206_v16  ;;  %v11178_v16 = vld [vmem:[#allocation29_spill] sm:$0xff] }
 0x47d   : > { %v4242_v46 = vadd.f32 %v5897_v35, %v4241_v39  ;;  %v4352_v30 = vmul.f32 %v4351_v36, %v11165_v32  ;;  %v4212_v14 = vmul.f32 %v4211_v25, %v11175_v37  ;;  %v4280_v8 = vsub.f32 1.0, %v4279_v62 }
 0x47e   : > { %v10124_v1 = vadd.f32 1.0, %v4316_v55  ;;  %v4391_v61 = vadd.f32 0.014752088, %v4390_v48  ;;  %v5076_v28 = vmul.f32 %v4976_v23, %v11176_v19  ;;  %v4429_v58 = vadd.f32 0.001143296, %v4428_v21 }
 0x47f   : > { %v4246_v0 = vsel %vm4245_vm0, %v5897_v35, %v4242_v46  ;;  %v4353_v63 = vadd.f32 0.112945676, %v4352_v30  ;;  %v5701_v20 = vclamps-f32 %v4212_v14, 1.0  ;;  %v4281_v22 = vmul.f32 %v5899_v41, %v4280_v8  ;;  %v11179_v8 = vld [vmem:[#allocation28_spill] sm:$0xff] }
 0x480   : > { %v4251_v15 = vsel %vm10099_vm12, %v4250_v12, %v4246_v0  ;;  %5900 = vrcp.f32 %v10124_v1  ;;  %5331 = vmatmul.f32.gmra.mxu1 %v5076_v28  ;;  %v5196_v6 = vadd.f32 %v10027_v59, %v5195_v44  ;;  %vm4283_vm1 = vweird.f32 %v10085_v45  ;;  %v5287_v44 = vpop.f32.mrf.mxu1  ;;  %v11180_v28 = vld [vmem:[#allocation54_spill] sm:$0xff] }
 0x481   : > { %v4252_v4 = vmul.f32 %v4251_v15, %v11177_v53  ;;  %v4468_v24 = vmul.f32 3.8918573e-05, %v9189_v51  ;;  %v4977_v39 = vadd.f32 1.0, %v5701_v20  ;;  %v4282_v35 = vadd.f32 %v5899_v41, %v4281_v22  ;;  %vm4285_vm2 = vmor %vm4283_vm1, %vm4284_vm15 }
 0x482   : > { %v4354_v21 = vmul.f32 %v4353_v63, %v11165_v32  ;;  %v4392_v36 = vmul.f32 %v4391_v61, %v9151_v47  ;;  %vm4288_vm3 = vcmp.eq.f32.partialorder %v4287_v56, 8.507059e+37  ;;  %v4290_v12 = vor.u32 1.1754944e-38, %v4289_v34 }
 0x483   : > { %v5702_v60 = vclamps-f32 %v4252_v4, 1.0  ;;  %v4430_v48 = vmul.f32 %v4429_v58, %v9169_v18  ;;  %v5077_v62 = vmul.f32 %v4977_v39, %v11178_v16  ;;  %v4286_v55 = vsel %vm4285_vm2, %v5899_v41, %v4282_v35  ;;  %v5379_v4 = vpop.f32.mrf.mxu2 }
 0x484   : > { %v4355_v23 = vadd.f32 0.4994258, %v4354_v21  ;;  %v4393_v45 = vadd.f32 0.112945676, %v4392_v36  ;;  %v4291_v46 = vsel %vm4288_vm3, %v4290_v12, %v4286_v55  ;;  %v4469_v37 = vadd.f32 0.001143296, %v4468_v24  ;;  %v5471_v36 = vpop.f32.mrf.mxu3 }
 0x485   : > { %v4978_v25 = vadd.f32 1.0, %v5702_v60  ;;  %v4431_v30 = vadd.f32 0.014752088, %v4430_v48  ;;  %5423 = vmatmul.f32.gmra.mxu2 %v5077_v62  ;;  %v4292_v61 = vmul.f32 %v4291_v46, %v11179_v8  ;;  %v4508_v34 = vmul.f32 3.8918573e-05, %v9308_v31  ;;  %v11181_v55 = vld [vmem:[#allocation26_spill] sm:$0xff] }
 0x486   : > { %v5901_v14 = vpop.eup %5900  ;;  %v4356_v19 = vmul.f32 %v4355_v23, %v11165_v32  ;;  %v4394_v56 = vmul.f32 %v4393_v45, %v9151_v47  ;;  %v5288_v41 = vadd.f32 %v5287_v44, %v5196_v6  ;;  %v4327_v15 = vand.u32 2147483647, %v10124_v1 }
 0x487   : > { %v5078_v0 = vmul.f32 %v4978_v25, %v11180_v28  ;;  %v4319_v63 = vmul.f32 %v5901_v14, %v10124_v1  ;;  %v4432_v58 = vmul.f32 %v4431_v30, %v9169_v18  ;;  %v5703_v20 = vclamps-f32 %v4292_v61, 1.0  ;;  %v5198_v61 = vpop.f32.mrf.mxu0 }
 0x488   : > { %v10147_v22 = vadd.f32 1.0, %v4356_v19  ;;  %v4395_v53 = vadd.f32 0.4994258, %v4394_v56  ;;  %v5380_v24 = vadd.f32 %v5379_v4, %v5288_v41  ;;  %v4470_v35 = vmul.f32 %v4469_v37, %v9189_v51  ;;  %v11182_v41 = vld [vmem:[#allocation34_spill] sm:$0xff] }
 0x489   : > { %5515 = vmatmul.f32.gmra.mxu3 %v5078_v0  ;;  %v4320_v32 = vsub.f32 1.0, %v4319_v63  ;;  %v4433_v39 = vadd.f32 0.112945676, %v4432_v58  ;;  %v4979_v21 = vadd.f32 1.0, %v5703_v20  ;;  %v4329_v6 = vand.u32 2147483648, %v10124_v1 }
 0x48a   : > { %5902 = vrcp.f32 %v10147_v22  ;;  %v4509_v60 = vadd.f32 0.001143296, %v4508_v34  ;;  %vm4324_vm4 = vweird.f32 %v5901_v14  ;;  %v4396_v48 = vmul.f32 %v4395_v53, %v9151_v47 }
 0x48b   : > { %v4321_v12 = vmul.f32 %v5901_v14, %v4320_v32  ;;  %v5472_v16 = vadd.f32 %v5471_v36, %v5380_v24  ;;  %v10154_v62 = vadd.f32 0.05243302, %v10010_v2  ;;  %v5079_v23 = vmul.f32 %v4979_v21, %v11181_v55 }
 0x48c   : > { %vm4323_vm5 = vweird.f32 %v10124_v1  ;;  %v4434_v45 = vmul.f32 %v4433_v39, %v9169_v18  ;;  %v4367_v46 = vand.u32 2147483647, %v10147_v22  ;;  %v10160_v30 = vadd.f32 1.0, %v4396_v48  ;;  %v5290_v48 = vpop.f32.mrf.mxu1 }
 0x48d   : > { %v4322_v25 = vadd.f32 %v5901_v14, %v4321_v12  ;;  %5536 = vst [vmem:[%s9681_s22 + $0x28] sm:$0xff] %v5472_v16  ;;  %v4471_v37 = vadd.f32 0.014752088, %v4470_v35  ;;  %5242 = vmatmul.f32.gmra.mxu0 %v5079_v23  ;;  %vm4325_vm6 = vmor %vm4323_vm5, %vm4324_vm4  ;;  %vm4328_vm7 = vcmp.eq.f32.partialorder %v4327_v15, 8.507059e+37  ;;  %v4330_v47 = vor.u32 1.1754944e-38, %v4329_v6 }
 0x48e   : > { %v4435_v44 = vadd.f32 0.4994258, %v4434_v45  ;;  %v4510_v2 = vmul.f32 %v4509_v60, %v9308_v31  ;;  %vm4363_vm8 = vweird.f32 %v10147_v22  ;;  %v4369_v1 = vand.u32 2147483648, %v10147_v22 }
 0x48f   : > { %v4326_v8 = vsel %vm4325_vm6, %v5901_v14, %v4322_v25  ;;  %5904 = vrcp.f32 %v10160_v30  ;;  %v4472_v28 = vmul.f32 %v4471_v37, %v9189_v51  ;;  %v4548_v0 = vmul.f32 3.8918573e-05, %v9313_v5 }
 0x490   : > { %v5903_v19 = vpop.eup %5902  ;;  %v4331_v56 = vsel %vm4328_vm7, %v4330_v47, %v4326_v8  ;;  %v4436_v34 = vmul.f32 %v4435_v44, %v9169_v18  ;;  %vm10172_vm9 = vcmp.eq.f32.partialorder %v4367_v46, 8.507059e+37  ;;  %v4407_v20 = vand.u32 2147483647, %v10160_v30  ;;  %v11187_v46 = vld [vmem:[#allocation19_spill] sm:$0xff] }
 0x491   : > { %v4332_v63 = vmul.f32 %v4331_v56, %v11182_v41  ;;  %v4359_v58 = vmul.f32 %v5903_v19, %v10147_v22  ;;  %v5199_v15 = vadd.f32 %v10027_v59, %v5198_v61  ;;  %v4473_v4 = vadd.f32 0.112945676, %v4472_v28 }
 0x492   : > { %v10178_v53 = vadd.f32 1.0, %v4436_v34  ;;  %v4511_v18 = vadd.f32 0.014752088, %v4510_v2  ;;  %v4370_v39 = vor.u32 1.1754944e-38, %v4369_v1  ;;  %v4409_v35 = vand.u32 2147483648, %v10160_v30 }
 0x493   : > { %v5704_v32 = vclamps-f32 %v4332_v63, 1.0  ;;  %v4360_v24 = vsub.f32 1.0, %v4359_v58  ;;  %vm4364_vm10 = vweird.f32 %v5903_v19  ;;  %v4549_v21 = vadd.f32 0.001143296, %v4548_v0 }
 0x494   : > { %5906 = vrcp.f32 %v10178_v53  ;;  %v4588_v6 = vmul.f32 3.8918573e-05, %v9328_v43  ;;  %v4474_v16 = vmul.f32 %v4473_v4, %v9189_v51  ;;  %v4512_v55 = vmul.f32 %v4511_v18, %v9308_v31  ;;  %vm4365_vm13 = vmor %vm4363_vm8, %vm4364_vm10 }
 0x495   : > { %v5905_v36 = vpop.eup %5904  ;;  %v4980_v60 = vadd.f32 1.0, %v5704_v32  ;;  %v4361_v12 = vmul.f32 %v5903_v19, %v4360_v24  ;;  %vm4403_vm11 = vweird.f32 %v10160_v30  ;;  %vm10187_vm12 = vcmp.eq.f32.partialorder %v4407_v20, 8.507059e+37 }
 0x496   : > { %v4399_v23 = vmul.f32 %v5905_v36, %v10160_v30  ;;  %v5291_v25 = vadd.f32 %v5290_v48, %v5199_v15  ;;  %v4475_v44 = vadd.f32 0.4994258, %v4474_v16  ;;  %v4513_v2 = vadd.f32 0.112945676, %v4512_v55 }
 0x497   : > { %v5080_v37 = vmul.f32 %v4980_v60, %v11187_v46  ;;  %v4362_v47 = vadd.f32 %v5903_v19, %v4361_v12  ;;  %v4410_v1 = vor.u32 1.1754944e-38, %v4409_v35  ;;  %v4550_v61 = vmul.f32 %v4549_v21, %v9313_v5 }
 0x498   : > { %v4400_v8 = vsub.f32 1.0, %v4399_v23  ;;  %v4589_v56 = vadd.f32 0.001143296, %v4588_v6  ;;  %vm4404_vm14 = vweird.f32 %v5905_v36  ;;  %v4476_v28 = vmul.f32 %v4475_v44, %v9189_v51 }
 0x499   : > { %5334 = vmatmul.f32.gmra.mxu1 %v5080_v37  ;;  %v4366_v34 = vsel %vm4365_vm13, %v5903_v19, %v4362_v47  ;;  %v4514_v0 = vmul.f32 %v4513_v2, %v9308_v31  ;;  %v4551_v20 = vadd.f32 0.014752088, %v4550_v61  ;;  %v4447_v18 = vand.u32 2147483647, %v10178_v53  ;;  %vm4405_vm15 = vmor %vm4403_vm11, %vm4404_vm14 }
 0x49a   : > { %v5907_v41 = vpop.eup %5906  ;;  %v4371_v63 = vsel %vm10172_vm9, %v4370_v39, %v4366_v34  ;;  %v4401_v58 = vmul.f32 %v5905_v36, %v4400_v8  ;;  %v4590_v22 = vmul.f32 %v4589_v56, %v9328_v43  ;;  %v10204_v19 = vadd.f32 1.0, %v4476_v28 }
 0x49b   : > { %v4372_v15 = vmul.f32 %v4371_v63, %v9395_v49  ;;  %v4439_v4 = vmul.f32 %v5907_v41, %v10178_v53  ;;  %v4449_v51 = vand.u32 2147483648, %v10178_v53  ;;  %v4515_v24 = vadd.f32 0.4994258, %v4514_v0 }
 0x49c   : > { %v4402_v32 = vadd.f32 %v5905_v36, %v4401_v58  ;;  %v4552_v35 = vmul.f32 %v4551_v20, %v9313_v5  ;;  %vm4443_vm0 = vweird.f32 %v10178_v53  ;;  %5908 = vrcp.f32 %v10204_v19  ;;  %v5474_v58 = vpop.f32.mrf.mxu3 }
 0x49d   : > { %v5705_v14 = vclamps-f32 %v4372_v15, 1.0  ;;  %v4440_v39 = vsub.f32 1.0, %v4439_v4  ;;  %vm4444_vm1 = vweird.f32 %v5907_v41  ;;  %v4516_v21 = vmul.f32 %v4515_v24, %v9308_v31 }
 0x49e   : > { %v4406_v49 = vsel %vm4405_vm15, %v5905_v36, %v4402_v32  ;;  %v4591_v6 = vadd.f32 0.014752088, %v4590_v22  ;;  %v4553_v16 = vadd.f32 0.112945676, %v4552_v35  ;;  %vm10217_vm2 = vcmp.eq.f32.partialorder %v4447_v18, 8.507059e+37  ;;  %vm4445_vm3 = vmor %vm4443_vm0, %vm4444_vm1 }
 0x49f   : > { %v4981_v60 = vadd.f32 1.0, %v5705_v14  ;;  %v4411_v12 = vsel %vm10187_vm12, %v4410_v1, %v4406_v49  ;;  %v4441_v48 = vmul.f32 %v5907_v41, %v4440_v39  ;;  %v4450_v23 = vor.u32 1.1754944e-38, %v4449_v51 }
 0x4a0   : > { %v4412_v55 = vmul.f32 %v4411_v12, %v9398_v33  ;;  %v10221_v46 = vadd.f32 1.0, %v4516_v21  ;;  %v4487_v31 = vand.u32 2147483647, %v10204_v19  ;;  %v4554_v47 = vmul.f32 %v4553_v16, %v9313_v5  ;;  %v5382_v33 = vpop.f32.mrf.mxu2  ;;  %v11194_v12 = vld [vmem:[#allocation35_spill] sm:$0xff] }
 0x4a1   : > { %v5081_v36 = vmul.f32 %v4981_v60, %v9354_v10  ;;  %v4442_v37 = vadd.f32 %v5907_v41, %v4441_v48  ;;  %v4628_v44 = vmul.f32 3.8918573e-05, %v9333_v9  ;;  %v4668_v2 = vmul.f32 3.8918573e-05, %v9449_v13 }
 0x4a2   : > { %v5706_v45 = vclamps-f32 %v4412_v55, 1.0  ;;  %5910 = vrcp.f32 %v10221_v46  ;;  %v5909_v8 = vpop.eup %5908  ;;  %v4555_v1 = vadd.f32 0.4994258, %v4554_v47  ;;  %v5383_v61 = vadd.f32 %v5382_v33, %v5291_v25  ;;  %v5201_v55 = vpop.f32.mrf.mxu0 }
 0x4a3   : > { %5426 = vmatmul.f32.gmra.mxu2 %v5081_v36  ;;  %v4446_v10 = vsel %vm4445_vm3, %v5907_v41, %v4442_v37  ;;  %v4592_v56 = vmul.f32 %v4591_v6, %v9328_v43  ;;  %v4479_v53 = vmul.f32 %v5909_v8, %v10204_v19  ;;  %vm4483_vm4 = vweird.f32 %v10204_v19 }
 0x4a4   : > { %v4982_v34 = vadd.f32 1.0, %v5706_v45  ;;  %v4451_v28 = vsel %vm10217_vm2, %v4450_v23, %v4446_v10  ;;  %vm10238_vm5 = vcmp.eq.f32.partialorder %v4487_v31, 8.507059e+37  ;;  %v4489_v41 = vand.u32 2147483648, %v10204_v19  ;;  %v11195_v19 = vld [vmem:[#allocation40_spill] sm:$0xff] }
 0x4a5   : > { %v4452_v0 = vmul.f32 %v4451_v28, %v9401_v54  ;;  %v4556_v25 = vmul.f32 %v4555_v1, %v9313_v5  ;;  %v4480_v22 = vsub.f32 1.0, %v4479_v53  ;;  %v4527_v15 = vand.u32 2147483647, %v10221_v46 }
 0x4a6   : > { %v5082_v20 = vmul.f32 %v4982_v34, %v9359_v27  ;;  %v5475_v4 = vadd.f32 %v5474_v58, %v5383_v61  ;;  %v4593_v54 = vadd.f32 0.112945676, %v4592_v56  ;;  %v4629_v51 = vadd.f32 0.001143296, %v4628_v44 }
 0x4a7   : > { %v5707_v18 = vclamps-f32 %v4452_v0, 1.0  ;;  %v10246_v32 = vadd.f32 1.0, %v4556_v25  ;;  %v4481_v35 = vmul.f32 %v5909_v8, %v4480_v22  ;;  %vm4484_vm6 = vweird.f32 %v5909_v8 }
 0x4a8   : > { %v5911_v24 = vpop.eup %5910  ;;  %5518 = vmatmul.f32.gmra.mxu3 %v5082_v20  ;;  %v4529_v14 = vand.u32 2147483648, %v10221_v46  ;;  %5537 = vst [vmem:[%s9681_s22 + $0x30] sm:$0xff] %v5475_v4  ;;  %v4669_v5 = vadd.f32 0.001143296, %v4668_v2  ;;  %v4490_v49 = vor.u32 1.1754944e-38, %v4489_v41  ;;  %vm4523_vm7 = vweird.f32 %v10221_v46  ;;  %vm4485_vm9 = vmor %vm4483_vm4, %vm4484_vm6 }
 0x4a9   : > { %v4983_v39 = vadd.f32 1.0, %v5707_v18  ;;  %v4519_v27 = vmul.f32 %v5911_v24, %v10221_v46  ;;  %5912 = vrcp.f32 %v10246_v32  ;;  %v4482_v21 = vadd.f32 %v5909_v8, %v4481_v35 }
 0x4aa   : > { %vm10253_vm8 = vcmp.eq.f32.partialorder %v4527_v15, 8.507059e+37  ;;  %v4708_v60 = vmul.f32 3.8918573e-05, %v9452_v38  ;;  %v4594_v30 = vmul.f32 %v4593_v54, %v9328_v43  ;;  %v4630_v23 = vmul.f32 %v4629_v51, %v9333_v9 }
 0x4ab   : > { %v5083_v48 = vmul.f32 %v4983_v39, %v11194_v12  ;;  %v4520_v16 = vsub.f32 1.0, %v4519_v27  ;;  %v4486_v36 = vsel %vm4485_vm9, %v5909_v8, %v4482_v21  ;;  %vm4524_vm10 = vweird.f32 %v5911_v24 }
 0x4ac   : > { %v4530_v37 = vor.u32 1.1754944e-38, %v4529_v14  ;;  %v4670_v31 = vmul.f32 %v4669_v5, %v9449_v13  ;;  %v4491_v47 = vsel %vm10238_vm5, %v4490_v49, %v4486_v36  ;;  %v4595_v33 = vadd.f32 0.4994258, %v4594_v30  ;;  %vm4525_vm11 = vmor %vm4523_vm7, %vm4524_vm10 }
 0x4ad   : > { %5245 = vmatmul.f32.gmra.mxu0 %v5083_v48  ;;  %v4521_v45 = vmul.f32 %v5911_v24, %v4520_v16  ;;  %v4631_v44 = vadd.f32 0.014752088, %v4630_v23  ;;  %v4492_v2 = vmul.f32 %v4491_v47, %v11195_v19  ;;  %v10268_v10 = vadd.f32 %v10027_v59, %v5201_v55 }
 0x4ae   : > { %v4671_v1 = vadd.f32 0.014752088, %v4670_v31  ;;  %v4709_v61 = vadd.f32 0.001143296, %v4708_v60  ;;  %v4567_v34 = vand.u32 2147483647, %v10246_v32  ;;  %v4596_v28 = vmul.f32 %v4595_v33, %v9328_v43 }
 0x4af   : > { %v5913_v56 = vpop.eup %5912  ;;  %v4522_v8 = vadd.f32 %v5911_v24, %v4521_v45  ;;  %v4632_v53 = vmul.f32 %v4631_v44, %v9333_v9  ;;  %v5708_v0 = vclamps-f32 %v4492_v2, 1.0  ;;  %v4748_v41 = vmul.f32 3.8918573e-05, %v9463_v50 }
 0x4b0   : > { %v4559_v63 = vmul.f32 %v5913_v56, %v10246_v32  ;;  %v4672_v59 = vmul.f32 %v4671_v1, %v9449_v13  ;;  %v10279_v58 = vadd.f32 1.0, %v4596_v28  ;;  %v4710_v22 = vmul.f32 %v4709_v61, %v9452_v38 }
 0x4b1   : > { %v4526_v25 = vsel %vm4525_vm11, %v5911_v24, %v4522_v8  ;;  %v4633_v20 = vadd.f32 0.112945676, %v4632_v53  ;;  %v4984_v43 = vadd.f32 1.0, %v5708_v0  ;;  %v4569_v54 = vand.u32 2147483648, %v10246_v32  ;;  %v11196_v24 = vld [vmem:[#allocation41_spill] sm:$0xff]  ;;  %v5385_v53 = vpop.f32.mrf.mxu2 }
 0x4b2   : > { %v4531_v15 = vsel %vm10253_vm8, %v4530_v37, %v4526_v25  ;;  %v4560_v4 = vsub.f32 1.0, %v4559_v63  ;;  %v4673_v18 = vadd.f32 0.112945676, %v4672_v59  ;;  %5914 = vrcp.f32 %v10279_v58 }
 0x4b3   : > { %v4532_v46 = vmul.f32 %v4531_v15, %v9526_v42  ;;  %v4788_v51 = vmul.f32 3.8918573e-05, %v9506_v26  ;;  %v5084_v35 = vmul.f32 %v4984_v43, %v11196_v24  ;;  %vm4564_vm12 = vweird.f32 %v5913_v56 }
 0x4b4   : > { %v4561_v14 = vmul.f32 %v5913_v56, %v4560_v4  ;;  %v4634_v5 = vmul.f32 %v4633_v20, %v9333_v9  ;;  %vm4563_vm13 = vweird.f32 %v10246_v32  ;;  %v4674_v49 = vmul.f32 %v4673_v18, %v9449_v13  ;;  %v5477_v4 = vpop.f32.mrf.mxu3 }
 0x4b5   : > { %v5709_v39 = vclamps-f32 %v4532_v46, 1.0  ;;  %v4711_v27 = vadd.f32 0.014752088, %v4710_v22  ;;  %5337 = vmatmul.f32.gmra.mxu1 %v5084_v35  ;;  %vm4568_vm14 = vcmp.eq.f32.partialorder %v4567_v34, 8.507059e+37  ;;  %v4749_v6 = vadd.f32 0.001143296, %v4748_v41  ;;  %vm4565_vm15 = vmor %vm4563_vm13, %vm4564_vm12 }
 0x4b6   : > { %v4562_v42 = vadd.f32 %v5913_v56, %v4561_v14  ;;  %v4635_v21 = vadd.f32 0.4994258, %v4634_v5  ;;  %v4570_v12 = vor.u32 1.1754944e-38, %v4569_v54  ;;  %v4675_v48 = vadd.f32 0.4994258, %v4674_v49 }
 0x4b7   : > { %v4985_v60 = vadd.f32 1.0, %v5709_v39  ;;  %v4712_v16 = vmul.f32 %v4711_v27, %v9452_v38  ;;  %v4607_v30 = vand.u32 2147483647, %v10279_v58  ;;  %v4789_v32 = vadd.f32 0.001143296, %v4788_v51 }
 0x4b8   : > { %v4566_v55 = vsel %vm4565_vm15, %v5913_v56, %v4562_v42  ;;  %v4636_v23 = vmul.f32 %v4635_v21, %v9333_v9  ;;  %v5915_v36 = vpop.eup %5914  ;;  %v4676_v47 = vmul.f32 %v4675_v48, %v9449_v13  ;;  %v4750_v2 = vmul.f32 %v4749_v6, %v9463_v50  ;;  %v5293_v9 = vpop.f32.mrf.mxu1 }
 0x4b9   : > { %v5085_v37 = vmul.f32 %v4985_v60, %v9494_v52  ;;  %v4571_v31 = vsel %vm4568_vm14, %v4570_v12, %v4566_v55  ;;  %v4713_v45 = vadd.f32 0.112945676, %v4712_v16  ;;  %v4599_v44 = vmul.f32 %v5915_v36, %v10279_v58 }
 0x4ba   : > { %v4572_v33 = vmul.f32 %v4571_v31, %v9573_v40  ;;  %v10299_v19 = vadd.f32 1.0, %v4636_v23  ;;  %v10304_v1 = vmul.f32 %v10032_v3, %v9696_v7  ;;  %v4609_v52 = vand.u32 2147483648, %v10279_v58 }
 0x4bb   : > { %5429 = vmatmul.f32.gmra.mxu2 %v5085_v37  ;;  %v10307_v61 = vadd.f32 1.0, %v4676_v47  ;;  %v4714_v13 = vmul.f32 %v4713_v45, %v9452_v38  ;;  %v5294_v40 = vadd.f32 %v5293_v9, %v10268_v10  ;;  %v4600_v8 = vsub.f32 1.0, %v4599_v44  ;;  %v11203_v9 = vld [vmem:[#allocation49_spill] sm:$0xff] }
 0x4bc   : > { %v5710_v56 = vclamps-f32 %v4572_v33, 1.0  ;;  %5916 = vrcp.f32 %v10299_v19  ;;  %vm4603_vm0 = vweird.f32 %v10279_v58  ;;  %vm4604_vm1 = vweird.f32 %v5915_v36 }
 0x4bd   : > { %vm10313_vm2 = vcmp.eq.f32.partialorder %v4607_v30, 8.507059e+37  ;;  %5918 = vrcp.f32 %v10307_v61  ;;  %v4601_v28 = vmul.f32 %v5915_v36, %v4600_v8  ;;  %v4751_v0 = vadd.f32 0.014752088, %v4750_v2  ;;  %vm4605_vm3 = vmor %vm4603_vm0, %vm4604_vm1 }
 0x4be   : > { %v4986_v34 = vadd.f32 1.0, %v5710_v56  ;;  %v4790_v63 = vmul.f32 %v4789_v32, %v9506_v26  ;;  %v4610_v59 = vor.u32 1.1754944e-38, %v4609_v52  ;;  %v4715_v10 = vadd.f32 0.4994258, %v4714_v13 }
 0x4bf   : > { %v5386_v41 = vadd.f32 %v5385_v53, %v5294_v40  ;;  %v4828_v25 = vmul.f32 3.8918573e-05, %v9644_v11  ;;  %v4602_v22 = vadd.f32 %v5915_v36, %v4601_v28  ;;  %v4647_v43 = vand.u32 2147483647, %v10299_v19 }
 0x4c0   : > { %v5086_v20 = vmul.f32 %v4986_v34, %v9503_v57  ;;  %v4649_v15 = vand.u32 2147483648, %v10299_v19  ;;  %vm4643_vm4 = vweird.f32 %v10299_v19  ;;  %v4687_v18 = vand.u32 2147483647, %v10307_v61 }
 0x4c1   : > { %v4716_v46 = vmul.f32 %v4715_v10, %v9452_v38  ;;  %v5478_v54 = vadd.f32 %v5477_v4, %v5386_v41  ;;  %v4606_v57 = vsel %vm4605_vm3, %v5915_v36, %v4602_v22  ;;  %vm4683_vm5 = vweird.f32 %v10307_v61  ;;  %v11204_v10 = vld [vmem:[#allocation42_spill] sm:$0xff]  ;;  %v11205_v22 = vld [vmem:[#allocation53_spill] sm:$0xff] }
 0x4c2   : > { %v5917_v51 = vpop.eup %5916  ;;  %5521 = vmatmul.f32.gmra.mxu3 %v5086_v20  ;;  %v4689_v24 = vand.u32 2147483648, %v10307_v61  ;;  %v4752_v35 = vmul.f32 %v4751_v0, %v9463_v50  ;;  %v4791_v14 = vadd.f32 0.014752088, %v4790_v63  ;;  %v4611_v5 = vsel %vm10313_vm2, %v4610_v59, %v4606_v57 }
 0x4c3   : > { %v5919_v58 = vpop.eup %5918  ;;  %v4639_v39 = vmul.f32 %v5917_v51, %v10299_v19  ;;  %v10335_v49 = vadd.f32 1.0, %v4716_v46  ;;  %5538 = vst [vmem:[%s9681_s22 + $0x38] sm:$0xff] %v5478_v54  ;;  %v4829_v38 = vadd.f32 0.001143296, %v4828_v25  ;;  %v4612_v27 = vmul.f32 %v4611_v5, %v9577_v29 }
 0x4c4   : > { %vm10339_vm6 = vcmp.eq.f32.partialorder %v4647_v43, 8.507059e+37  ;;  %v4650_v21 = vor.u32 1.1754944e-38, %v4649_v15  ;;  %v4679_v6 = vmul.f32 %v5919_v58, %v10307_v61  ;;  %vm10344_vm7 = vcmp.eq.f32.partialorder %v4687_v18, 8.507059e+37 }
 0x4c5   : > { %v4640_v60 = vsub.f32 1.0, %v4639_v39  ;;  %5920 = vrcp.f32 %v10335_v49  ;;  %v4868_v48 = vmul.f32 3.8918573e-05, %v9696_v7  ;;  %v5711_v16 = vclamps-f32 %v4612_v27, 1.0 }
 0x4c6   : > { %v4680_v55 = vsub.f32 1.0, %v4679_v6  ;;  %v4690_v30 = vor.u32 1.1754944e-38, %v4689_v24  ;;  %v4753_v29 = vadd.f32 0.112945676, %v4752_v35  ;;  %vm4644_vm8 = vweird.f32 %v5917_v51  ;;  %v5204_v35 = vpop.f32.mrf.mxu0 }
 0x4c7   : > { %v4641_v23 = vmul.f32 %v5917_v51, %v4640_v60  ;;  %v4792_v32 = vmul.f32 %v4791_v14, %v9506_v26  ;;  %v4830_v36 = vmul.f32 %v4829_v38, %v9644_v11  ;;  %v4987_v37 = vadd.f32 1.0, %v5711_v16  ;;  %vm4645_vm10 = vmor %vm4643_vm4, %vm4644_vm8  ;;  %v5296_v14 = vpop.f32.mrf.mxu1  ;;  %v11207_v16 = vld [vmem:[#allocation23_spill] sm:$0xff] }
 0x4c8   : > { %v4681_v31 = vmul.f32 %v5919_v58, %v4680_v55  ;;  %vm4684_vm9 = vweird.f32 %v5919_v58  ;;  %v4754_v47 = vmul.f32 %v4753_v29, %v9463_v50  ;;  %v4869_v2 = vadd.f32 0.001143296, %v4868_v48 }
 0x4c9   : > { %v4642_v45 = vadd.f32 %v5917_v51, %v4641_v23  ;;  %v4793_v33 = vadd.f32 0.112945676, %v4792_v32  ;;  %v4831_v44 = vadd.f32 0.014752088, %v4830_v36  ;;  %v5087_v52 = vmul.f32 %v4987_v37, %v11203_v9  ;;  %vm4685_vm11 = vmor %vm4683_vm5, %vm4684_vm9  ;;  %v11208_v23 = vld [vmem:[#allocation85_spill] sm:$0xff] }
 0x4ca   : > { %v4682_v13 = vadd.f32 %v5919_v58, %v4681_v31  ;;  %v4727_v56 = vand.u32 2147483647, %v10335_v49  ;;  %v4755_v40 = vadd.f32 0.4994258, %v4754_v47  ;;  %v4870_v53 = vmul.f32 %v4869_v2, %v9696_v7  ;;  %v10393_v36 = vld [vmem:[%s10475_s4] ss:$0 sm:$0xff] }
 0x4cb   : > { %v5921_v8 = vpop.eup %5920  ;;  %v4646_v3 = vsel %vm4645_vm10, %v5917_v51, %v4642_v45  ;;  %v4794_v34 = vmul.f32 %v4793_v33, %v9506_v26  ;;  %v4832_v28 = vmul.f32 %v4831_v44, %v9644_v11  ;;  %5248 = vmatmul.f32.gmra.mxu0 %v5087_v52  ;;  %v4729_v59 = vand.u32 2147483648, %v10335_v49  ;;  %v11209_v45 = vld [vmem:[#allocation56_spill] sm:$0xff]  ;;  %v11210_v44 = vld [vmem:[#allocation67_spill] sm:$0xff] }
 0x4cc   : > { %v4651_v19 = vsel %vm10339_vm6, %v4650_v21, %v4646_v3  ;;  %v4686_v0 = vsel %vm4685_vm11, %v5919_v58, %v4682_v13  ;;  %v4719_v63 = vmul.f32 %v5921_v8, %v10335_v49  ;;  %v4756_v25 = vmul.f32 %v4755_v40, %v9463_v50  ;;  %v11206_v21 = vld [vmem:[#allocation66_spill] sm:$0xff]  ;;  %v11211_v2 = vld [vmem:[#allocation48_spill] sm:$0xff] }
 0x4cd   : > { %v4652_v41 = vmul.f32 %v4651_v19, %v11204_v10  ;;  %v4691_v61 = vsel %vm10344_vm7, %v4690_v30, %v4686_v0  ;;  %v4795_v20 = vadd.f32 0.4994258, %v4794_v34  ;;  %v4833_v4 = vadd.f32 0.112945676, %v4832_v28  ;;  %v11212_v40 = vld [vmem:[#allocation50_spill] sm:$0xff]  ;;  %v5480_v19 = vpop.f32.mrf.mxu3 }
 0x4ce   : > { %v4692_v43 = vmul.f32 %v4691_v61, %v11205_v22  ;;  %v4720_v15 = vsub.f32 1.0, %v4719_v63  ;;  %v4871_v18 = vadd.f32 0.014752088, %v4870_v53  ;;  %vm4724_vm12 = vweird.f32 %v5921_v8  ;;  %v5388_v53 = vpop.f32.mrf.mxu2 }
 0x4cf   : > { %v5712_v46 = vclamps-f32 %v4652_v41, 1.0  ;;  %v10371_v54 = vadd.f32 1.0, %v4756_v25  ;;  %v4796_v51 = vmul.f32 %v4795_v20, %v9506_v26  ;;  %v4834_v58 = vmul.f32 %v4833_v4, %v9644_v11  ;;  %v5207_v41 = vpop.f32.mrf.mxu0  ;;  %v5299_v61 = vpop.f32.mrf.mxu1 }
 0x4d0   : > { %v5713_v57 = vclamps-f32 %v4692_v43, 1.0  ;;  %v4721_v24 = vmul.f32 %v5921_v8, %v4720_v15  ;;  %v4872_v50 = vmul.f32 %v4871_v18, %v9696_v7  ;;  %v4823_v5 = vmul.f32 %v10154_v62, %v9644_v11 }
 0x4d1   : > { %v4862_v39 = vadd.f32 0.05243302, %v10304_v1  ;;  %v4988_v38 = vadd.f32 1.0, %v5712_v46  ;;  %5922 = vrcp.f32 %v10371_v54  ;;  %vm4723_vm13 = vweird.f32 %v10335_v49 }
 0x4d2   : > { %v4989_v27 = vadd.f32 1.0, %v5713_v57  ;;  %v4722_v42 = vadd.f32 %v5921_v8, %v4721_v24  ;;  %v10381_v26 = vadd.f32 1.0, %v4796_v51  ;;  %vm4725_vm14 = vmor %vm4723_vm13, %vm4724_vm12  ;;  %v4730_v60 = vor.u32 1.1754944e-38, %v4729_v59 }
 0x4d3   : > { %v5088_v6 = vmul.f32 %v4988_v38, %v11206_v21  ;;  %v4835_v12 = vadd.f32 0.4994258, %v4834_v58  ;;  %v4873_v48 = vadd.f32 0.112945676, %v4872_v50  ;;  %vm4728_vm15 = vcmp.eq.f32.partialorder %v4727_v56, 8.507059e+37 }
 0x4d4   : > { %v5089_v62 = vmul.f32 %v4989_v27, %v11207_v16  ;;  %v4726_v55 = vsel %vm4725_vm14, %v5921_v8, %v4722_v42  ;;  %5924 = vrcp.f32 %v10381_v26  ;;  %v4786_v1 = vadd.f32 1.1283791, %v9867_v17 }
 0x4d5   : > { %v4824_v30 = vadd.f32 0.18741608, %v4823_v5  ;;  %v4863_v49 = vmul.f32 %v4862_v39, %v9696_v7  ;;  %5340 = vmatmul.f32.gmra.mxu1 %v5088_v6  ;;  %v4731_v29 = vsel %vm4728_vm15, %v4730_v60, %v4726_v55  ;;  %v5205_v37 = vadd.f32 %v10393_v36, %v5204_v35  ;;  %v5483_v60 = vpop.f32.mrf.mxu3 }
 0x4d6   : > { %5432 = vmatmul.f32.gmra.mxu2 %v5089_v62  ;;  %v4732_v32 = vmul.f32 %v4731_v29, %v11208_v23  ;;  %v4836_v31 = vmul.f32 %v4835_v12, %v9644_v11  ;;  %v4874_v47 = vmul.f32 %v4873_v48, %v9696_v7  ;;  %v790_v33 = vmul.f32 0.5, %v11209_v45  ;;  %v5391_v6 = vpop.f32.mrf.mxu2  ;;  %v11213_v45 = vld [vmem:[#allocation44_spill] sm:$0xff] }
 0x4d7   : > { %v5923_v17 = vpop.eup %5922  ;;  %v4747_v9 = vmul.f32 %v11211_v2, %v11210_v44  ;;  %v4787_v8 = vmul.f32 %v4786_v1, %v11212_v40  ;;  %v4825_v3 = vmul.f32 %v4824_v30, %v9644_v11  ;;  %v4864_v34 = vadd.f32 0.18741608, %v4863_v49  ;;  %v5210_v55 = vpop.f32.mrf.mxu0  ;;  %v11214_v44 = vld [vmem:[#allocation38_spill] sm:$0xff] }
 0x4d8   : > { %v5714_v52 = vclamps-f32 %v4732_v32, 1.0  ;;  %v4759_v13 = vmul.f32 %v5923_v17, %v10371_v54  ;;  %v10402_v56 = vadd.f32 1.0, %v4836_v31  ;;  %v4875_v28 = vadd.f32 0.4994258, %v4874_v47  ;;  %v5302_v1 = vpop.f32.mrf.mxu1 }
 0x4d9   : > { %v5297_v59 = vadd.f32 %v5296_v14, %v5205_v37  ;;  %vm4764_vm0 = vweird.f32 %v5923_v17  ;;  %v4767_v25 = vand.u32 2147483647, %v10371_v54  ;;  %v4769_v20 = vand.u32 2147483648, %v10371_v54 }
 0x4da   : > { %v5925_v0 = vpop.eup %5924  ;;  %v4990_v63 = vadd.f32 1.0, %v5714_v52  ;;  %v4760_v10 = vsub.f32 1.0, %v4759_v13  ;;  %5926 = vrcp.f32 %v10402_v56  ;;  %v4876_v15 = vmul.f32 %v4875_v28, %v9696_v7 }
 0x4db   : > { %v4799_v22 = vmul.f32 %v5925_v0, %v10381_v26  ;;  %v5389_v4 = vadd.f32 %v5388_v53, %v5297_v59  ;;  %v4826_v18 = vadd.f32 1.1283791, %v4825_v3  ;;  %vm4763_vm1 = vweird.f32 %v10371_v54 }
 0x4dc   : > { %v5090_v11 = vmul.f32 %v4990_v63, %v790_v33  ;;  %v4761_v43 = vmul.f32 %v5923_v17, %v4760_v10  ;;  %v5208_v51 = vadd.f32 %v10393_v36, %v5207_v41  ;;  %v4809_v24 = vand.u32 2147483648, %v10381_v26  ;;  %vm4765_vm2 = vmor %vm4763_vm1, %vm4764_vm0 }
 0x4dd   : > { %v4800_v46 = vsub.f32 1.0, %v4799_v22  ;;  %v10414_v35 = vadd.f32 1.0, %v4876_v15  ;;  %v5481_v14 = vadd.f32 %v5480_v19, %v5389_v4  ;;  %v4770_v58 = vor.u32 1.1754944e-38, %v4769_v20  ;;  %v5486_v41 = vpop.f32.mrf.mxu3 }
 0x4de   : > { %5524 = vmatmul.f32.gmra.mxu3 %v5090_v11  ;;  %v4762_v57 = vadd.f32 %v5923_v17, %v4761_v43  ;;  %vm4804_vm3 = vweird.f32 %v5925_v0  ;;  %v4807_v5 = vand.u32 2147483647, %v10381_v26  ;;  %vm4768_vm4 = vcmp.eq.f32.partialorder %v4767_v25, 8.507059e+37  ;;  %v5394_v10 = vpop.f32.mrf.mxu2 }
 0x4df   : > { %v4801_v50 = vmul.f32 %v5925_v0, %v4800_v46  ;;  %5928 = vrcp.f32 %v10414_v35  ;;  %5539 = vst [vmem:[%s9681_s22 + $0x40] sm:$0xff] %v5481_v14  ;;  %v5300_v38 = vadd.f32 %v5299_v61, %v5208_v51  ;;  %vm4803_vm5 = vweird.f32 %v10381_v26  ;;  %v5213_v22 = vpop.f32.mrf.mxu0 }
 0x4e0   : > { %v5927_v39 = vpop.eup %5926  ;;  %v4766_v54 = vsel %vm4765_vm2, %v5923_v17, %v4762_v57  ;;  %v4865_v12 = vmul.f32 %v4864_v34, %v9696_v7  ;;  %vm4805_vm6 = vmor %vm4803_vm5, %vm4804_vm3  ;;  %v4810_v16 = vor.u32 1.1754944e-38, %v4809_v24  ;;  %vm4808_vm7 = vcmp.eq.f32.partialorder %v4807_v5, 8.507059e+37  ;;  %v5305_v11 = vpop.f32.mrf.mxu1  ;;  %v11216_v24 = vld [vmem:[#allocation55_spill] sm:$0xff] }
 0x4e1   : > { %v4771_v27 = vsel %vm4768_vm4, %v4770_v58, %v4766_v54  ;;  %v4802_v42 = vadd.f32 %v5925_v0, %v4801_v50  ;;  %v4839_v21 = vmul.f32 %v5927_v39, %v10402_v56  ;;  %v5392_v62 = vadd.f32 %v5391_v6, %v5300_v38  ;;  %v11217_v50 = vld [vmem:[#allocation57_spill] sm:$0xff] }
 0x4e2   : > { %v4772_v48 = vmul.f32 %v4771_v27, %v4747_v9  ;;  %v4849_v29 = vand.u32 2147483648, %v10402_v56  ;;  %v5211_v37 = vadd.f32 %v10393_v36, %v5210_v55  ;;  %vm4844_vm8 = vweird.f32 %v5927_v39  ;;  %v11215_v9 = vld [vmem:[#allocation46_spill] sm:$0xff] }
 0x4e3   : > { %v4806_v30 = vsel %vm4805_vm6, %v5925_v0, %v4802_v42  ;;  %v4840_v49 = vsub.f32 1.0, %v4839_v21  ;;  %v5484_v32 = vadd.f32 %v5483_v60, %v5392_v62  ;;  %v4847_v47 = vand.u32 2147483647, %v10402_v56 }
 0x4e4   : > { %v5715_v26 = vclamps-f32 %v4772_v48, 1.0  ;;  %v4811_v23 = vsel %vm4808_vm7, %v4810_v16, %v4806_v30  ;;  %v791_v33 = vmul.f32 0.5, %v11213_v45  ;;  %v792_v2 = vmul.f32 0.5, %v11214_v44 }
 0x4e5   : > { %v4812_v31 = vmul.f32 %v4811_v23, %v4787_v8  ;;  %v4841_v7 = vmul.f32 %v5927_v39, %v4840_v49  ;;  %v5929_v17 = vpop.eup %5928  ;;  %v4827_v52 = vmul.f32 %v4826_v18, %v11215_v9  ;;  %5540 = vst [vmem:[%s9681_s22 + $0x48] sm:$0xff] %v5484_v32  ;;  %vm4843_vm9 = vweird.f32 %v10402_v56  ;;  %v5489_v60 = vpop.f32.mrf.mxu3 }
 0x4e6   : > { %v4991_v13 = vadd.f32 1.0, %v5715_v26  ;;  %v4879_v34 = vmul.f32 %v5929_v17, %v10414_v35  ;;  %v4866_v8 = vadd.f32 1.1283791, %v4865_v12  ;;  %vm4845_vm10 = vmor %vm4843_vm9, %vm4844_vm8  ;;  %v4850_v53 = vor.u32 1.1754944e-38, %v4849_v29  ;;  %v5397_v6 = vpop.f32.mrf.mxu2 }
 0x4e7   : > { %v5716_v40 = vclamps-f32 %v4812_v31, 1.0  ;;  %v4842_v3 = vadd.f32 %v5927_v39, %v4841_v7  ;;  %v5303_v19 = vadd.f32 %v5302_v1, %v5211_v37  ;;  %vm4848_vm11 = vcmp.eq.f32.partialorder %v4847_v47, 8.507059e+37  ;;  %v5216_v48 = vpop.f32.mrf.mxu0  ;;  %v11218_v1 = vld [vmem:[#allocation51_spill] sm:$0xff] }
 0x4e8   : > { %v5091_v28 = vmul.f32 %v4991_v13, %v791_v33  ;;  %v4880_v59 = vsub.f32 1.0, %v4879_v34  ;;  %v4887_v25 = vand.u32 2147483647, %v10414_v35  ;;  %v4889_v20 = vand.u32 2147483648, %v10414_v35 }
 0x4e9   : > { %v4992_v0 = vadd.f32 1.0, %v5716_v40  ;;  %v4846_v63 = vsel %vm4845_vm10, %v5927_v39, %v4842_v3  ;;  %v5395_v56 = vadd.f32 %v5394_v10, %v5303_v19  ;;  %vm4884_vm12 = vweird.f32 %v5929_v17 }
 0x4ea   : > { %5251 = vmatmul.f32.gmra.mxu0 %v5091_v28  ;;  %v4851_v61 = vsel %vm4848_vm11, %v4850_v53, %v4846_v63  ;;  %v4881_v4 = vmul.f32 %v5929_v17, %v4880_v59  ;;  %v5214_v46 = vadd.f32 %v10393_v36, %v5213_v22  ;;  %vm4883_vm13 = vweird.f32 %v10414_v35  ;;  %v5308_v35 = vpop.f32.mrf.mxu1 }
 0x4eb   : > { %v5092_v43 = vmul.f32 %v4992_v0, %v792_v2  ;;  %v4852_v15 = vmul.f32 %v4851_v61, %v4827_v52  ;;  %v5487_v18 = vadd.f32 %v5486_v41, %v5395_v56  ;;  %v793_v14 = vmul.f32 0.5, %v11216_v24  ;;  %vm4885_vm14 = vmor %vm4883_vm13, %vm4884_vm12 }
 0x4ec   : > { %v4882_v57 = vadd.f32 %v5929_v17, %v4881_v4  ;;  %v4890_v58 = vor.u32 1.1754944e-38, %v4889_v20  ;;  %v4867_v5 = vmul.f32 %v4866_v8, %v11217_v50  ;;  %vm4888_vm15 = vcmp.eq.f32.partialorder %v4887_v25, 8.507059e+37 }
 0x4ed   : > { %5343 = vmatmul.f32.gmra.mxu1 %v5092_v43  ;;  %v5717_v51 = vclamps-f32 %v4852_v15, 1.0  ;;  %5541 = vst [vmem:[%s9681_s22 + $0x50] sm:$0xff] %v5487_v18  ;;  %v5306_v27 = vadd.f32 %v5305_v11, %v5214_v46  ;;  %v5217_v55 = vadd.f32 %v10393_v36, %v5216_v48  ;;  %v794_v30 = vmul.f32 0.5, %v11218_v1  ;;  %v5492_v32 = vpop.f32.mrf.mxu3 }
 0x4ee   : > { %v4886_v54 = vsel %vm4885_vm14, %v5929_v17, %v4882_v57  ;;  %v5400_v23 = vpop.f32.mrf.mxu2 }
 0x4ef   : > { %v4993_v39 = vadd.f32 1.0, %v5717_v51  ;;  %v4891_v38 = vsel %vm4888_vm15, %v4890_v58, %v4886_v54  ;;  %v5398_v12 = vadd.f32 %v5397_v6, %v5306_v27  ;;  %v5309_v26 = vadd.f32 %v5308_v35, %v5217_v55  ;;  %v5219_v31 = vpop.f32.mrf.mxu0 }
 0x4f0   : > { %v4892_v21 = vmul.f32 %v4891_v38, %v4867_v5  ;;  %v5220_v17 = vadd.f32 %v10393_v36, %v5219_v31 }
 0x4f1   : > { %v5093_v42 = vmul.f32 %v4993_v39, %v793_v14  ;;  %v5490_v62 = vadd.f32 %v5489_v60, %v5398_v12  ;;  %v5401_v37 = vadd.f32 %v5400_v23, %v5309_v26 }
 0x4f2   : > { %v5718_v16 = vclamps-f32 %v4892_v21, 1.0  ;;  %v5311_v7 = vpop.f32.mrf.mxu1 }
 0x4f3   : > { %5435 = vmatmul.f32.gmra.mxu2 %v5093_v42  ;;  %5542 = vst [vmem:[%s9681_s22 + $0x58] sm:$0xff] %v5490_v62  ;;  %v5493_v47 = vadd.f32 %v5492_v32, %v5401_v37  ;;  %v5312_v45 = vadd.f32 %v5311_v7, %v5220_v17 }
 0x4f4   : > { %v4994_v49 = vadd.f32 1.0, %v5718_v16 }
 0x4f5   : > { %5543 = vst [vmem:[%s9681_s22 + $0x60] sm:$0xff] %v5493_v47  ;;  %v5495_v44 = vpop.f32.mrf.mxu3 }
 0x4f6   : > { %v5094_v29 = vmul.f32 %v4994_v49, %v794_v30  ;;  %v5403_v33 = vpop.f32.mrf.mxu2 }
 0x4f7   : > { %v5404_v2 = vadd.f32 %v5403_v33, %v5312_v45  ;;  %v5222_v9 = vpop.f32.mrf.mxu0 }
 0x4f8   : > { %5527 = vmatmul.f32.gmra.mxu3 %v5094_v29  ;;  %v5223_v40 = vadd.f32 %v10393_v36, %v5222_v9 }
 0x4f9   : > { %v5496_v13 = vadd.f32 %v5495_v44, %v5404_v2 }
 0x4fa   : > { %v5314_v52 = vpop.f32.mrf.mxu1 }
 0x4fb   : > { %5544 = vst [vmem:[%s9681_s22 + $0x68] sm:$0xff] %v5496_v13  ;;  %v5315_v3 = vadd.f32 %v5314_v52, %v5223_v40 }
 0x4fd   : > { %v5498_v8 = vpop.f32.mrf.mxu3 }
 0x4fe   : > { %v5406_v34 = vpop.f32.mrf.mxu2 }
 0x4ff   : > { %v5407_v28 = vadd.f32 %v5406_v34, %v5315_v3  ;;  %v5225_v53 = vpop.f32.mrf.mxu0 }
 0x500   : > { %v5226_v63 = vadd.f32 %v10393_v36, %v5225_v53 }
 0x501   : > { %v5499_v0 = vadd.f32 %v5498_v8, %v5407_v28 }
 0x502   : > { %v5317_v19 = vpop.f32.mrf.mxu1 }
 0x503   : > { %5545 = vst [vmem:[%s9681_s22 + $0x70] sm:$0xff] %v5499_v0  ;;  %v5318_v59 = vadd.f32 %v5317_v19, %v5226_v63 }
 0x505   : > { %v5501_v41 = vpop.f32.mrf.mxu3 }
 0x506   : > { %v5409_v10 = vpop.f32.mrf.mxu2 }
 0x507   : > { %v5410_v61 = vadd.f32 %v5409_v10, %v5318_v59  ;;  %v5228_v25 = vpop.f32.mrf.mxu0 }
 0x508   : > { %v5229_v22 = vadd.f32 %v10393_v36, %v5228_v25 }
 0x509   : > { %v5502_v56 = vadd.f32 %v5501_v41, %v5410_v61 }
 0x50a   : > { %v5320_v20 = vpop.f32.mrf.mxu1 }
 0x50b   : > { %5546 = vst [vmem:[%s9681_s22 + $0x78] sm:$0xff] %v5502_v56  ;;  %v5321_v11 = vadd.f32 %v5320_v20, %v5229_v22 }
 0x50d   : > { %v5504_v15 = vpop.f32.mrf.mxu3 }
 0x50e   : > { %v5412_v43 = vpop.f32.mrf.mxu2 }
 0x50f   : > { %v5413_v4 = vadd.f32 %v5412_v43, %v5321_v11  ;;  %v5231_v18 = vpop.f32.mrf.mxu0 }
 0x510   : > { %v5232_v57 = vadd.f32 %v10393_v36, %v5231_v18 }
 0x511   : > { %v5505_v51 = vadd.f32 %v5504_v15, %v5413_v4 }
 0x512   : > { %v5323_v46 = vpop.f32.mrf.mxu1 }
 0x513   : > { %5547 = vst [vmem:[%s9681_s22 + $0x80] sm:$0xff] %v5505_v51  ;;  %v5324_v24 = vadd.f32 %v5323_v46, %v5232_v57 }
 0x515   : > { %v5507_v58 = vpop.f32.mrf.mxu3 }
 0x516   : > { %v5415_v14 = vpop.f32.mrf.mxu2 }
 0x517   : > { %v5416_v50 = vadd.f32 %v5415_v14, %v5324_v24  ;;  %v5234_v5 = vpop.f32.mrf.mxu0 }
 0x518   : > { %v5235_v38 = vadd.f32 %v10393_v36, %v5234_v5 }
 0x519   : > { %v5508_v54 = vadd.f32 %v5507_v58, %v5416_v50 }
 0x51a   : > { %v5326_v39 = vpop.f32.mrf.mxu1 }
 0x51b   : > { %5548 = vst [vmem:[%s9681_s22 + $0x88] sm:$0xff] %v5508_v54  ;;  %v5327_v27 = vadd.f32 %v5326_v39, %v5235_v38 }
 0x51d   : > { %v5510_v21 = vpop.f32.mrf.mxu3 }
 0x51e   : > { %v5418_v42 = vpop.f32.mrf.mxu2 }
 0x51f   : > { %v5419_v6 = vadd.f32 %v5418_v42, %v5327_v27  ;;  %v5237_v60 = vpop.f32.mrf.mxu0 }
 0x520   : > { %v5238_v35 = vadd.f32 %v10393_v36, %v5237_v60 }
 0x521   : > { %v5511_v48 = vadd.f32 %v5510_v21, %v5419_v6 }
 0x522   : > { %v5329_v12 = vpop.f32.mrf.mxu1 }
 0x523   : > { %5549 = vst [vmem:[%s9681_s22 + $0x90] sm:$0xff] %v5511_v48  ;;  %v5330_v16 = vadd.f32 %v5329_v12, %v5238_v35 }
 0x525   : > { %v5513_v55 = vpop.f32.mrf.mxu3 }
 0x526   : > { %v5421_v62 = vpop.f32.mrf.mxu2 }
 0x527   : > { %v5422_v1 = vadd.f32 %v5421_v62, %v5330_v16  ;;  %v5240_v30 = vpop.f32.mrf.mxu0 }
 0x528   : > { %v5241_v26 = vadd.f32 %v10393_v36, %v5240_v30 }
 0x529   : > { %v5514_v29 = vadd.f32 %v5513_v55, %v5422_v1 }
 0x52a   : > { %v5332_v49 = vpop.f32.mrf.mxu1 }
 0x52b   : > { %5550 = vst [vmem:[%s9681_s22 + $0x98] sm:$0xff] %v5514_v29  ;;  %v5333_v23 = vadd.f32 %v5332_v49, %v5241_v26 }
 0x52d   : > { %v5516_v37 = vpop.f32.mrf.mxu3 }
 0x52e   : > { %v5424_v32 = vpop.f32.mrf.mxu2 }
 0x52f   : > { %v5425_v31 = vadd.f32 %v5424_v32, %v5333_v23  ;;  %v5243_v7 = vpop.f32.mrf.mxu0 }
 0x530   : > { %v5244_v17 = vadd.f32 %v10393_v36, %v5243_v7 }
 0x531   : > { %v5517_v47 = vadd.f32 %v5516_v37, %v5425_v31 }
 0x532   : > { %v5335_v45 = vpop.f32.mrf.mxu1 }
 0x533   : > { %5551 = vst [vmem:[%s9681_s22 + $0xa0] sm:$0xff] %v5517_v47  ;;  %v5336_v33 = vadd.f32 %v5335_v45, %v5244_v17 }
 0x535   : > { %v5519_v2 = vpop.f32.mrf.mxu3 }
 0x536   : > { %v5427_v44 = vpop.f32.mrf.mxu2 }
 0x537   : > { %v5428_v9 = vadd.f32 %v5427_v44, %v5336_v33  ;;  %v5246_v52 = vpop.f32.mrf.mxu0 }
 0x538   : > { %v5247_v40 = vadd.f32 %v10393_v36, %v5246_v52 }
 0x539   : > { %v5520_v13 = vadd.f32 %v5519_v2, %v5428_v9 }
 0x53a   : > { %v5338_v3 = vpop.f32.mrf.mxu1 }
 0x53b   : > { %5552 = vst [vmem:[%s9681_s22 + $0xa8] sm:$0xff] %v5520_v13  ;;  %v5339_v34 = vadd.f32 %v5338_v3, %v5247_v40 }
 0x53e   : > { %v5430_v8 = vpop.f32.mrf.mxu2 }
 0x53f   : > { %v5431_v28 = vadd.f32 %v5430_v8, %v5339_v34 }
 0x545   : > { %v5522_v53 = vpop.f32.mrf.mxu3 }
 0x546   : > { %v5523_v19 = vadd.f32 %v5522_v53, %v5431_v28 }
 0x548   : > { %5553 = vst [vmem:[%s9681_s22 + $0xb0] sm:$0xff] %v5523_v19  ;;  %v5249_v0 = vpop.f32.mrf.mxu0 }
 0x549   : > { %v5250_v63 = vadd.f32 %v10393_v36, %v5249_v0 }
 0x552   : > { %v5341_v59 = vpop.f32.mrf.mxu1 }
 0x553   : > { %v5342_v41 = vadd.f32 %v5341_v59, %v5250_v63 }
 0x559   : > { %v5433_v10 = vpop.f32.mrf.mxu2 }
 0x55a   : > { %v5434_v61 = vadd.f32 %v5433_v10, %v5342_v41 }
 0x561   : > { %v5525_v25 = vpop.f32.mrf.mxu3 }
 0x562   : > { %v5526_v20 = vadd.f32 %v5525_v25, %v5434_v61 }
 0x564   : > { %5554 = vst [vmem:[%s9681_s22 + $0xb8] sm:$0xff] %v5526_v20 }
 0x567   : > { %v5252_v56 = vpop.f32.mrf.mxu0 }
 0x568   : > { %v5253_v22 = vadd.f32 %v10393_v36, %v5252_v56 }
 0x56a   : > { %v5344_v11 = vpop.f32.mrf.mxu1 }
 0x56b   : > { %v5345_v15 = vadd.f32 %v5344_v11, %v5253_v22 }
 0x576   : > { %v5436_v43 = vpop.f32.mrf.mxu2 }
 0x577   : > { %v5437_v4 = vadd.f32 %v5436_v43, %v5345_v15 }
 0x57b   : > { %v5528_v18 = vpop.f32.mrf.mxu3 }
 0x57c   : > { %v5529_v46 = vadd.f32 %v5528_v18, %v5437_v4 }
 0x57e   : > { %5555 = vst [vmem:[%s9681_s22 + $0xc0] sm:$0xff] %v5529_v46 }
 0x57f PF: > { %s15_s18 = sadd.s32 1, %s5938_s18  }
 0x580   : > { %p12_p4 = scmp.ge.s32.totalorder %s15_s18, 4  }
 0x582   :  { %14 = sbr.rel (!%p12_p4) target bundleno = 1 (0x1), region = 70 }

</bundles_post_ra>
